<compile_context>
chip_gen: v6e
topology: v6e:2x2x1
jax: 0.10.0
libtpu: 0.0.40
codegen_flags: <defaults>
</compile_context>

<pallas_src>
import functools

import jax
import jax.numpy as jnp
import numpy as np
from jax.experimental import pallas as pl
from jax.experimental.pallas import tpu as pltpu

_LANE = 128


def _round_up(v, m):
    return (v + m - 1) // m * m


def _vmem_limit_bytes():
    """Explicit scoped-VMEM limit: 0.75 * physical, capped at 100 MiB."""
    try:
        cap = pltpu.get_tpu_info().vmem_capacity_bytes
    except Exception:  # pragma: no cover - fallback if info query unavailable
        cap = 64 << 20
    return min(int(cap) * 3 // 4, 100 << 20)


def _conv_kh(band_bf16, w_ref, out_rows, out_cols):
    """band: (out_rows+2, out_cols, 3*Cin) bf16, w_ref: (3, 3*Cin, Cout) bf16.

    Returns (out_rows*out_cols, Cout) f32: one MXU matmul per kh tap, kw folded
    into the contraction dimension.  out_cols is a multiple of 8, so the
    flatten below is a relayout-free view.
    """
    m = out_rows * out_cols
    acc = None
    for kh in range(3):
        blk = band_bf16[kh:kh + out_rows].reshape(m, band_bf16.shape[-1])
        p = jnp.dot(blk, w_ref[kh], preferred_element_type=jnp.float32)
        acc = p if acc is None else acc + p
    return acc


def _resnet_block_kernel(x_ref, w0_ref, b0_ref, w1_ref, b1_ref, *rest,
                         H, W, TH, Wb, Wo, learned_shortcut):
    """One (batch, H-tile) per grid step.

    x_ref : (TH+4, Wb+2, Cin_p)  bf16 halo window of the zero-padded input
    w0_ref: (3, 3*Cin_p, Chid_p) bf16 (kw folded into K)
    b0_ref: (1, Chid_p)          f32
    w1_ref: (3, 3*Chid_p, Cout_p) bf16
    b1_ref: (1, Cout_p)          f32
    ws_ref: (Cin_p, Cout_p)      bf16 (only when learned_shortcut)
    o_ref : (TH, Wo, Cout_p)     f32
    """
    if learned_shortcut:
        ws_ref, o_ref = rest
    else:
        (o_ref,) = rest

    r0 = pl.program_id(1) * TH            # first output row of this tile (global)

    xw = x_ref[...]                       # (TH+4, Wb+2, Cin_p) bf16, raw padded x

    # ---------------- conv_0 : TH+2 hidden rows (2-row recompute halo) ---------
    a = jnp.maximum(xw, xw * 0.2)         # leaky_relu(., 0.2) in bf16 (1 VPU op)
    band0 = jnp.concatenate(              # kw folded into K: (TH+4, Wb, 3*Cin_p)
        [a[:, 0:Wb, :], a[:, 1:Wb + 1, :], a[:, 2:Wb + 2, :]], axis=-1)
    acc0 = _conv_kh(band0, w0_ref, TH + 2, Wb) + b0_ref[...]      # f32
    dh = jnp.maximum(acc0, 0.2 * acc0)                            # leaky_relu, f32
    d3 = dh.reshape(TH + 2, Wb, dh.shape[-1]).astype(jnp.bfloat16)

    # conv_1 sees a *zero padded* hidden activation: zero every hidden row / col
    # that falls outside the H x W image.  Single merged mask, single select.
    row = jax.lax.broadcasted_iota(jnp.int32, (TH + 2, 1, 1), 0) + (r0 - 1)
    col = jax.lax.broadcasted_iota(jnp.int32, (1, Wb, 1), 1)
    inside = (row >= 0) & (row < H) & (col >= 1) & (col <= W)
    d3 = jnp.where(inside, d3, jnp.zeros((), jnp.bfloat16))

    # ---------------- conv_1 : the TH x Wo output rows -------------------------
    band1 = jnp.concatenate(
        [d3[:, 0:Wo, :], d3[:, 1:Wo + 1, :], d3[:, 2:Wo + 2, :]], axis=-1)
    acc1 = _conv_kh(band1, w1_ref, TH, Wo) + b1_ref[...]          # (TH*Wo, Cout_p)

    # ---------------- shortcut --------------------------------------------------
    x_in = xw[2:2 + TH, 2:2 + Wo, :].reshape(TH * Wo, xw.shape[-1])
    if learned_shortcut:
        x_s = jnp.dot(x_in, ws_ref[...], preferred_element_type=jnp.float32)
    else:
        # NOTE: identity residual passes through one bf16 round-trip (within the
        # 2e-2 tolerance); feed an f32 copy if tighter accuracy is ever required.
        x_s = x_in.astype(jnp.float32)    # Cin_p == Cout_p in this case

    out = x_s + 0.1 * acc1                # (TH*Wo, Cout_p) f32
    o_ref[...] = out.reshape(TH, Wo, out.shape[-1]).astype(o_ref.dtype)


def resnet_block_pallas(x_nchw, params, *, tile_h=32):
    """x_nchw: (N, Cin, H, W) f32 -> (N, Cout, H, W) f32."""
    w0, b0, w1, b1 = params["w0"], params["b0"], params["w1"], params["b1"]
    ws = params.get("ws", None)
    learned = ws is not None

    N, Cin, H, W = x_nchw.shape
    Chid, Cout = w0.shape[-1], w1.shape[-1]
    Cin_p = _round_up(Cin, _LANE)
    Chid_p = _round_up(Chid, _LANE)
    Cout_p = _round_up(Cout, _LANE)
    if not learned:
        assert Cin == Cout, "identity shortcut requires fin == fout"

    # Tile height: largest count of ~tile_h rows that covers H; H padded to nH*TH
    # (never a silent TH = H fallback).  Sweep tile_h per generation.
    nH = -(-H // tile_h)
    TH = -(-H // nH)
    Hp = nH * TH

    Wo = _round_up(W, 8)       # conv_1 output columns (flatten stays a view)
    Wb = Wo + 8                # conv_0 / hidden band columns, multiple of 8
    Wp = Wb + 2                # staged input columns (includes 2-px left halo)

    # --- glue: NCHW->NHWC, zero pad (halo / width / height / channel), bf16
    # cast, then one XLA gather staging per-tile (TH+4)-row halo windows.
    x = jnp.transpose(x_nchw, (0, 2, 3, 1))
    x = jnp.pad(x, ((0, 0), (2, Hp - H + 2), (2, Wp - 2 - W), (0, Cin_p - Cin)))
    x = x.astype(jnp.bfloat16)
    x_staged = jnp.stack([x[:, i * TH:i * TH + TH + 4] for i in range(nH)],
                         axis=1)                       # (N, nH, TH+4, Wp, Cin_p)

    # Weights: HWIO, channel padded, kw folded into the contraction dim, bf16.
    w0p = jnp.pad(w0, ((0, 0), (0, 0), (0, Cin_p - Cin), (0, Chid_p - Chid)))
    w0p = w0p.reshape(3, 3 * Cin_p, Chid_p).astype(jnp.bfloat16)
    w1p = jnp.pad(w1, ((0, 0), (0, 0), (0, Chid_p - Chid), (0, Cout_p - Cout)))
    w1p = w1p.reshape(3, 3 * Chid_p, Cout_p).astype(jnp.bfloat16)
    b0p = jnp.pad(b0, ((0, 0), (0, Chid_p - Chid))).astype(jnp.float32)
    b1p = jnp.pad(b1, ((0, 0), (0, Cout_p - Cout))).astype(jnp.float32)

    inputs = [x_staged, w0p, b0p, w1p, b1p]
    in_specs = [
        # Per-tile halo window only: VMEM footprint is O(tile), not O(image).
        pl.BlockSpec((None, None, TH + 4, Wp, Cin_p), lambda n, h: (n, h, 0, 0, 0)),
        pl.BlockSpec((3, 3 * Cin_p, Chid_p), lambda n, h: (0, 0, 0)),
        pl.BlockSpec((1, Chid_p), lambda n, h: (0, 0)),
        pl.BlockSpec((3, 3 * Chid_p, Cout_p), lambda n, h: (0, 0, 0)),
        pl.BlockSpec((1, Cout_p), lambda n, h: (0, 0)),
    ]
    if learned:
        wsp = jnp.pad(ws, ((0, Cin_p - Cin), (0, Cout_p - Cout))).astype(jnp.bfloat16)
        inputs.append(wsp)
        in_specs.append(pl.BlockSpec((Cin_p, Cout_p), lambda n, h: (0, 0)))

    kernel = functools.partial(_resnet_block_kernel, H=H, W=W, TH=TH, Wb=Wb,
                               Wo=Wo, learned_shortcut=learned)

    # Advisory cost estimate (conv FLOPs + HBM bytes) for the XLA scheduler.
    flops = 2 * N * Hp * Wo * 9 * (Cin_p * Chid_p + Chid_p * Cout_p)
    if learned:
        flops += 2 * N * Hp * Wo * Cin_p * Cout_p
    bytes_accessed = (x_staged.size * 2 + w0p.size * 2 + w1p.size * 2
                      + b0p.size * 4 + b1p.size * 4
                      + N * Hp * Wo * Cout_p * 4)

    out = pl.pallas_call(
        kernel,
        out_shape=jax.ShapeDtypeStruct((N, Hp, Wo, Cout_p), jnp.float32),
        grid_spec=pltpu.PrefetchScalarGridSpec(
            num_scalar_prefetch=0,
            grid=(N, nH),
            in_specs=in_specs,
            # lane-dense output block: last dim is a multiple of 128 -> plain vst.
            out_specs=pl.BlockSpec((None, TH, Wo, Cout_p), lambda n, h: (n, h, 0, 0)),
        ),
        compiler_params=pltpu.CompilerParams(
            dimension_semantics=("parallel", "parallel"),
            vmem_limit_bytes=_vmem_limit_bytes()),
        cost_estimate=pl.CostEstimate(flops=flops, transcendentals=0,
                                      bytes_accessed=bytes_accessed),
    )(*inputs)

    out = out[:, :H, :W, :Cout]                   # drop row / col / channel padding
    return jnp.transpose(out, (0, 3, 1, 2))       # back to NCHW


def make_params(key, fin, fout, fhidden=None, is_bias=True):
    """Deterministic synthetic parameters (shapes per nn.Conv2d in __init__)."""
    if fhidden is None:
        fhidden = min(fin, fout)
    k0, k1, k2, k3, k4 = jax.random.split(key, 5)
    return {
        "w0": 0.1 * jax.random.normal(k0, (3, 3, fin, fhidden), jnp.float32),   # HWIO
        "b0": 0.1 * jax.random.normal(k1, (1, fhidden), jnp.float32),
        "w1": 0.1 * jax.random.normal(k2, (3, 3, fhidden, fout), jnp.float32),
        "b1": (0.1 * jax.random.normal(k3, (1, fout), jnp.float32)
               if is_bias else jnp.zeros((1, fout), jnp.float32)),
        "ws": (0.1 * jax.random.normal(k4, (fin, fout), jnp.float32)
               if fin != fout else None),                                        # 1x1, no bias
    }


def resnet_block_ref(x_nchw, params):
    """Pure-JAX f32 reference mirroring the PyTorch forward."""
    def lrelu(v):
        return jnp.where(v > 0, v, 0.2 * v)

    def conv(v, w):
        return jax.lax.conv_general_dilated(
            v, w, window_strides=(1, 1), padding=[(1, 1), (1, 1)],
            dimension_numbers=("NHWC", "HWIO", "NHWC"))

    x = jnp.transpose(x_nchw, (0, 2, 3, 1))
    dx = conv(lrelu(x), params["w0"]) + params["b0"][0]
    dx = conv(lrelu(dx), params["w1"]) + params["b1"][0]
    x_s = (jnp.einsum("nhwc,cd->nhwd", x, params["ws"])
           if params["ws"] is not None else x)
    out = x_s + 0.1 * dx
    return jnp.transpose(out, (0, 3, 1, 2))


if __name__ == "__main__":
    key = jax.random.PRNGKey(0)
    kx1, kp1, kx2, kp2, kx3, kp3 = jax.random.split(key, 6)

    # Learned-shortcut config (fin != fout).
    x1 = jax.random.normal(kx1, (2, 4, 16, 16), jnp.float32)
    p1 = make_params(kp1, fin=4, fout=8)
    out1 = jax.block_until_ready(resnet_block_pallas(x1, p1))
    ref1 = jax.block_until_ready(resnet_block_ref(x1, p1))
    np.testing.assert_allclose(np.asarray(out1), np.asarray(ref1),
                               atol=2e-2, rtol=2e-2)

    # Identity-shortcut config (fin == fout) exercises the specialized path.
    x2 = jax.random.normal(kx2, (2, 8, 16, 16), jnp.float32)
    p2 = make_params(kp2, fin=8, fout=8)
    out2 = jax.block_until_ready(resnet_block_pallas(x2, p2))
    ref2 = jax.block_until_ready(resnet_block_ref(x2, p2))
    np.testing.assert_allclose(np.asarray(out2), np.asarray(ref2),
                               atol=2e-2, rtol=2e-2)

    # Odd spatial shape exercises the H/W rounding + mask path.
    x3 = jax.random.normal(kx3, (1, 4, 13, 11), jnp.float32)
    p3 = make_params(kp3, fin=4, fout=8)
    out3 = jax.block_until_ready(resnet_block_pallas(x3, p3))
    ref3 = jax.block_until_ready(resnet_block_ref(x3, p3))
    np.testing.assert_allclose(np.asarray(out3), np.asarray(ref3),
                               atol=2e-2, rtol=2e-2)

    print("KERNEL_OK")
</pallas_src>

<mosaic_0001>
module attributes {stable_mosaic.version = 11 : i64} {
  func.func @_resnet_block_kernel(%arg0: i32, %arg1: i32, %arg2: memref<1x1x20x26x128xbf16, #tpu.memory_space<vmem>>, %arg3: memref<3x384x128xbf16, #tpu.memory_space<vmem>>, %arg4: memref<1x128xf32, #tpu.memory_space<vmem>>, %arg5: memref<3x384x128xbf16, #tpu.memory_space<vmem>>, %arg6: memref<1x128xf32, #tpu.memory_space<vmem>>, %arg7: memref<128x128xbf16, #tpu.memory_space<vmem>>, %arg8: memref<1x16x16x128xf32, #tpu.memory_space<vmem>>) attributes {dimension_semantics = [#tpu.dimension_semantics<parallel>, #tpu.dimension_semantics<parallel>], iteration_bounds = array<i64: 2, 1>, scalar_prefetch = 0 : i64, scratch_operands = 0 : i64, tpu.core_type = #tpu.core_type<tc>, window_params = [{transform_indices = @transform_0, window_bounds = array<i64: 1, 1, 20, 26, 128>}, {pipeline_mode = #tpu.pipeline_mode<synchronous>, transform_indices = @transform_1, window_bounds = array<i64: 3, 384, 128>}, {pipeline_mode = #tpu.pipeline_mode<synchronous>, transform_indices = @transform_2, window_bounds = array<i64: 1, 128>}, {pipeline_mode = #tpu.pipeline_mode<synchronous>, transform_indices = @transform_3, window_bounds = array<i64: 3, 384, 128>}, {pipeline_mode = #tpu.pipeline_mode<synchronous>, transform_indices = @transform_4, window_bounds = array<i64: 1, 128>}, {pipeline_mode = #tpu.pipeline_mode<synchronous>, transform_indices = @transform_5, window_bounds = array<i64: 128, 128>}, {transform_indices = @transform_6, window_bounds = array<i64: 1, 16, 16, 128>}]} {
    %c16_i32 = arith.constant 16 : i32
    %0 = arith.muli %arg1, %c16_i32 : i32
    %c0 = arith.constant 0 : index
    %c0_0 = arith.constant 0 : index
    %c0_1 = arith.constant 0 : index
    %c0_2 = arith.constant 0 : index
    %c0_3 = arith.constant 0 : index
    %1 = vector.load %arg2[%c0, %c0_0, %c0_1, %c0_2, %c0_3] : memref<1x1x20x26x128xbf16, #tpu.memory_space<vmem>>, vector<1x1x20x26x128xbf16>
    %2 = vector.shape_cast %1 : vector<1x1x20x26x128xbf16> to vector<20x26x128xbf16>
    %cst = arith.constant 2.001950e-01 : bf16
    %3 = vector.broadcast %cst : bf16 to vector<20x26x128xbf16>
    %4 = arith.mulf %2, %3 : vector<20x26x128xbf16>
    %5 = arith.maximumf %2, %4 : vector<20x26x128xbf16>
    %6 = vector.extract_strided_slice %5 {offsets = [0, 0, 0], sizes = [20, 24, 128], strides = [1, 1, 1]} : vector<20x26x128xbf16> to vector<20x24x128xbf16>
    %7 = vector.extract_strided_slice %5 {offsets = [0, 1, 0], sizes = [20, 24, 128], strides = [1, 1, 1]} : vector<20x26x128xbf16> to vector<20x24x128xbf16>
    %8 = vector.extract_strided_slice %5 {offsets = [0, 2, 0], sizes = [20, 24, 128], strides = [1, 1, 1]} : vector<20x26x128xbf16> to vector<20x24x128xbf16>
    %9 = tpu.concatenate %6, %7, %8 in 2 : vector<20x24x128xbf16>, vector<20x24x128xbf16>, vector<20x24x128xbf16> -> vector<20x24x384xbf16>
    %10 = vector.extract_strided_slice %9 {offsets = [0, 0, 0], sizes = [18, 24, 384], strides = [1, 1, 1]} : vector<20x24x384xbf16> to vector<18x24x384xbf16>
    %11 = vector.shape_cast %10 : vector<18x24x384xbf16> to vector<432x384xbf16>
    %c0_4 = arith.constant 0 : index
    %c0_5 = arith.constant 0 : index
    %c0_6 = arith.constant 0 : index
    %12 = vector.load %arg3[%c0_4, %c0_5, %c0_6] : memref<3x384x128xbf16, #tpu.memory_space<vmem>>, vector<1x384x128xbf16>
    %13 = vector.shape_cast %12 : vector<1x384x128xbf16> to vector<384x128xbf16>
    %cst_7 = arith.constant dense<0.000000e+00> : vector<432x128xf32>
    %14 = tpu.matmul %11, %13, %cst_7 {dimension_numbers = #tpu.dot_dimension_numbers<[1], [0], [0], [1], [0, 0, 1, 1], [], []>} : vector<432x384xbf16>, vector<384x128xbf16>, vector<432x128xf32> -> vector<432x128xf32>
    %15 = vector.extract_strided_slice %9 {offsets = [1, 0, 0], sizes = [18, 24, 384], strides = [1, 1, 1]} : vector<20x24x384xbf16> to vector<18x24x384xbf16>
    %16 = vector.shape_cast %15 : vector<18x24x384xbf16> to vector<432x384xbf16>
    %c1 = arith.constant 1 : index
    %c0_8 = arith.constant 0 : index
    %c0_9 = arith.constant 0 : index
    %17 = vector.load %arg3[%c1, %c0_8, %c0_9] : memref<3x384x128xbf16, #tpu.memory_space<vmem>>, vector<1x384x128xbf16>
    %18 = vector.shape_cast %17 : vector<1x384x128xbf16> to vector<384x128xbf16>
    %cst_10 = arith.constant dense<0.000000e+00> : vector<432x128xf32>
    %19 = tpu.matmul %16, %18, %cst_10 {dimension_numbers = #tpu.dot_dimension_numbers<[1], [0], [0], [1], [0, 0, 1, 1], [], []>} : vector<432x384xbf16>, vector<384x128xbf16>, vector<432x128xf32> -> vector<432x128xf32>
    %20 = arith.addf %14, %19 : vector<432x128xf32>
    %21 = vector.extract_strided_slice %9 {offsets = [2, 0, 0], sizes = [18, 24, 384], strides = [1, 1, 1]} : vector<20x24x384xbf16> to vector<18x24x384xbf16>
    %22 = vector.shape_cast %21 : vector<18x24x384xbf16> to vector<432x384xbf16>
    %c2 = arith.constant 2 : index
    %c0_11 = arith.constant 0 : index
    %c0_12 = arith.constant 0 : index
    %23 = vector.load %arg3[%c2, %c0_11, %c0_12] : memref<3x384x128xbf16, #tpu.memory_space<vmem>>, vector<1x384x128xbf16>
    %24 = vector.shape_cast %23 : vector<1x384x128xbf16> to vector<384x128xbf16>
    %cst_13 = arith.constant dense<0.000000e+00> : vector<432x128xf32>
    %25 = tpu.matmul %22, %24, %cst_13 {dimension_numbers = #tpu.dot_dimension_numbers<[1], [0], [0], [1], [0, 0, 1, 1], [], []>} : vector<432x384xbf16>, vector<384x128xbf16>, vector<432x128xf32> -> vector<432x128xf32>
    %26 = arith.addf %20, %25 : vector<432x128xf32>
    %c0_14 = arith.constant 0 : index
    %c0_15 = arith.constant 0 : index
    %27 = vector.load %arg4[%c0_14, %c0_15] : memref<1x128xf32, #tpu.memory_space<vmem>>, vector<1x128xf32>
    %28 = vector.broadcast %27 : vector<1x128xf32> to vector<432x128xf32>
    %29 = arith.addf %26, %28 : vector<432x128xf32>
    %cst_16 = arith.constant 2.000000e-01 : f32
    %30 = vector.broadcast %cst_16 : f32 to vector<432x128xf32>
    %31 = arith.mulf %30, %29 : vector<432x128xf32>
    %32 = arith.maximumf %29, %31 : vector<432x128xf32>
    %33 = vector.shape_cast %32 : vector<432x128xf32> to vector<18x24x128xf32>
    %34 = arith.truncf %33 : vector<18x24x128xf32> to vector<18x24x128xbf16>
    %35 = tpu.iota {dimensions = array<i32: 0>} : vector<18x1x1xi32>
    %c1_i32 = arith.constant 1 : i32
    %36 = arith.subi %0, %c1_i32 : i32
    %37 = vector.broadcast %36 : i32 to vector<18x1x1xi32>
    %38 = arith.addi %35, %37 : vector<18x1x1xi32>
    %39 = tpu.iota {dimensions = array<i32: 1>} : vector<1x24x1xi32>
    %c0_i32 = arith.constant 0 : i32
    %40 = vector.broadcast %c0_i32 : i32 to vector<18x1x1xi32>
    %41 = arith.cmpi sge, %38, %40 : vector<18x1x1xi32>
    %c16_i32_17 = arith.constant 16 : i32
    %42 = vector.broadcast %c16_i32_17 : i32 to vector<18x1x1xi32>
    %43 = arith.cmpi slt, %38, %42 : vector<18x1x1xi32>
    %44 = arith.andi %41, %43 : vector<18x1x1xi1>
    %c1_i32_18 = arith.constant 1 : i32
    %45 = vector.broadcast %c1_i32_18 : i32 to vector<1x24x1xi32>
    %46 = arith.cmpi sge, %39, %45 : vector<1x24x1xi32>
    %47 = vector.broadcast %44 : vector<18x1x1xi1> to vector<18x24x1xi1>
    %48 = vector.broadcast %46 : vector<1x24x1xi1> to vector<18x24x1xi1>
    %49 = arith.andi %47, %48 : vector<18x24x1xi1>
    %c16_i32_19 = arith.constant 16 : i32
    %50 = vector.broadcast %c16_i32_19 : i32 to vector<1x24x1xi32>
    %51 = arith.cmpi sle, %39, %50 : vector<1x24x1xi32>
    %52 = vector.broadcast %51 : vector<1x24x1xi1> to vector<18x24x1xi1>
    %53 = arith.andi %49, %52 : vector<18x24x1xi1>
    %cst_20 = arith.constant 0.000000e+00 : bf16
    %54 = vector.shape_cast %53 : vector<18x24x1xi1> to vector<18x24x1xi1>
    %55 = vector.broadcast %54 : vector<18x24x1xi1> to vector<18x24x128xi1>
    %56 = vector.broadcast %cst_20 : bf16 to vector<18x24x128xbf16>
    %57 = arith.select %55, %34, %56 : vector<18x24x128xi1>, vector<18x24x128xbf16>
    %58 = vector.extract_strided_slice %57 {offsets = [0, 0, 0], sizes = [18, 16, 128], strides = [1, 1, 1]} : vector<18x24x128xbf16> to vector<18x16x128xbf16>
    %59 = vector.extract_strided_slice %57 {offsets = [0, 1, 0], sizes = [18, 16, 128], strides = [1, 1, 1]} : vector<18x24x128xbf16> to vector<18x16x128xbf16>
    %60 = vector.extract_strided_slice %57 {offsets = [0, 2, 0], sizes = [18, 16, 128], strides = [1, 1, 1]} : vector<18x24x128xbf16> to vector<18x16x128xbf16>
    %61 = tpu.concatenate %58, %59, %60 in 2 : vector<18x16x128xbf16>, vector<18x16x128xbf16>, vector<18x16x128xbf16> -> vector<18x16x384xbf16>
    %62 = vector.extract_strided_slice %61 {offsets = [0, 0, 0], sizes = [16, 16, 384], strides = [1, 1, 1]} : vector<18x16x384xbf16> to vector<16x16x384xbf16>
    %63 = vector.shape_cast %62 : vector<16x16x384xbf16> to vector<256x384xbf16>
    %c0_21 = arith.constant 0 : index
    %c0_22 = arith.constant 0 : index
    %c0_23 = arith.constant 0 : index
    %64 = vector.load %arg5[%c0_21, %c0_22, %c0_23] : memref<3x384x128xbf16, #tpu.memory_space<vmem>>, vector<1x384x128xbf16>
    %65 = vector.shape_cast %64 : vector<1x384x128xbf16> to vector<384x128xbf16>
    %cst_24 = arith.constant dense<0.000000e+00> : vector<256x128xf32>
    %66 = tpu.matmul %63, %65, %cst_24 {dimension_numbers = #tpu.dot_dimension_numbers<[1], [0], [0], [1], [0, 0, 1, 1], [], []>} : vector<256x384xbf16>, vector<384x128xbf16>, vector<256x128xf32> -> vector<256x128xf32>
    %67 = vector.extract_strided_slice %61 {offsets = [1, 0, 0], sizes = [16, 16, 384], strides = [1, 1, 1]} : vector<18x16x384xbf16> to vector<16x16x384xbf16>
    %68 = vector.shape_cast %67 : vector<16x16x384xbf16> to vector<256x384xbf16>
    %c1_25 = arith.constant 1 : index
    %c0_26 = arith.constant 0 : index
    %c0_27 = arith.constant 0 : index
    %69 = vector.load %arg5[%c1_25, %c0_26, %c0_27] : memref<3x384x128xbf16, #tpu.memory_space<vmem>>, vector<1x384x128xbf16>
    %70 = vector.shape_cast %69 : vector<1x384x128xbf16> to vector<384x128xbf16>
    %cst_28 = arith.constant dense<0.000000e+00> : vector<256x128xf32>
    %71 = tpu.matmul %68, %70, %cst_28 {dimension_numbers = #tpu.dot_dimension_numbers<[1], [0], [0], [1], [0, 0, 1, 1], [], []>} : vector<256x384xbf16>, vector<384x128xbf16>, vector<256x128xf32> -> vector<256x128xf32>
    %72 = arith.addf %66, %71 : vector<256x128xf32>
    %73 = vector.extract_strided_slice %61 {offsets = [2, 0, 0], sizes = [16, 16, 384], strides = [1, 1, 1]} : vector<18x16x384xbf16> to vector<16x16x384xbf16>
    %74 = vector.shape_cast %73 : vector<16x16x384xbf16> to vector<256x384xbf16>
    %c2_29 = arith.constant 2 : index
    %c0_30 = arith.constant 0 : index
    %c0_31 = arith.constant 0 : index
    %75 = vector.load %arg5[%c2_29, %c0_30, %c0_31] : memref<3x384x128xbf16, #tpu.memory_space<vmem>>, vector<1x384x128xbf16>
    %76 = vector.shape_cast %75 : vector<1x384x128xbf16> to vector<384x128xbf16>
    %cst_32 = arith.constant dense<0.000000e+00> : vector<256x128xf32>
    %77 = tpu.matmul %74, %76, %cst_32 {dimension_numbers = #tpu.dot_dimension_numbers<[1], [0], [0], [1], [0, 0, 1, 1], [], []>} : vector<256x384xbf16>, vector<384x128xbf16>, vector<256x128xf32> -> vector<256x128xf32>
    %78 = arith.addf %72, %77 : vector<256x128xf32>
    %c0_33 = arith.constant 0 : index
    %c0_34 = arith.constant 0 : index
    %79 = vector.load %arg6[%c0_33, %c0_34] : memref<1x128xf32, #tpu.memory_space<vmem>>, vector<1x128xf32>
    %80 = vector.broadcast %79 : vector<1x128xf32> to vector<256x128xf32>
    %81 = arith.addf %78, %80 : vector<256x128xf32>
    %82 = vector.extract_strided_slice %2 {offsets = [2, 2, 0], sizes = [16, 16, 128], strides = [1, 1, 1]} : vector<20x26x128xbf16> to vector<16x16x128xbf16>
    %83 = vector.shape_cast %82 : vector<16x16x128xbf16> to vector<256x128xbf16>
    %c0_35 = arith.constant 0 : index
    %c0_36 = arith.constant 0 : index
    %84 = vector.load %arg7[%c0_35, %c0_36] : memref<128x128xbf16, #tpu.memory_space<vmem>>, vector<128x128xbf16>
    %cst_37 = arith.constant dense<0.000000e+00> : vector<256x128xf32>
    %85 = tpu.matmul %83, %84, %cst_37 {dimension_numbers = #tpu.dot_dimension_numbers<[1], [0], [0], [1], [0, 0, 1, 1], [], []>} : vector<256x128xbf16>, vector<128x128xbf16>, vector<256x128xf32> -> vector<256x128xf32>
    %cst_38 = arith.constant 1.000000e-01 : f32
    %86 = vector.broadcast %cst_38 : f32 to vector<256x128xf32>
    %87 = arith.mulf %86, %81 : vector<256x128xf32>
    %88 = arith.addf %85, %87 : vector<256x128xf32>
    %89 = vector.shape_cast %88 : vector<256x128xf32> to vector<16x16x128xf32>
    %c0_39 = arith.constant 0 : index
    %c0_40 = arith.constant 0 : index
    %c0_41 = arith.constant 0 : index
    %c0_42 = arith.constant 0 : index
    %90 = vector.load %arg8[%c0_39, %c0_40, %c0_41, %c0_42] : memref<1x16x16x128xf32, #tpu.memory_space<vmem>>, vector<1x16x16x128xf32>
    %91 = vector.shape_cast %90 : vector<1x16x16x128xf32> to vector<16x16x128xf32>
    %92 = vector.shape_cast %89 : vector<16x16x128xf32> to vector<1x16x16x128xf32>
    tpu.vector_store %arg8[%c0_39, %c0_40, %c0_41, %c0_42], %92 {strides = array<i32>} : memref<1x16x16x128xf32, #tpu.memory_space<vmem>>, vector<1x16x16x128xf32>,
    return
  }
  func.func @transform_0(%arg0: i32, %arg1: i32) -> (i32, i32, i32, i32, i32) {
    %c0_i32 = arith.constant 0 : i32
    %c0_i32_0 = arith.constant 0 : i32
    %c0_i32_1 = arith.constant 0 : i32
    %c0_i32_2 = arith.constant 0 : i32
    return %arg0, %arg1, %c0_i32, %c0_i32_0, %c0_i32_1 : i32, i32, i32, i32, i32
  }
  func.func @transform_1(%arg0: i32, %arg1: i32) -> (i32, i32, i32) {
    %c0_i32 = arith.constant 0 : i32
    %c0_i32_0 = arith.constant 0 : i32
    %c0_i32_1 = arith.constant 0 : i32
    %c0_i32_2 = arith.constant 0 : i32
    return %c0_i32, %c0_i32_0, %c0_i32_1 : i32, i32, i32
  }
  func.func @transform_2(%arg0: i32, %arg1: i32) -> (i32, i32) {
    %c0_i32 = arith.constant 0 : i32
    %c0_i32_0 = arith.constant 0 : i32
    %c0_i32_1 = arith.constant 0 : i32
    return %c0_i32, %c0_i32_0 : i32, i32
  }
  func.func @transform_3(%arg0: i32, %arg1: i32) -> (i32, i32, i32) {
    %c0_i32 = arith.constant 0 : i32
    %c0_i32_0 = arith.constant 0 : i32
    %c0_i32_1 = arith.constant 0 : i32
    %c0_i32_2 = arith.constant 0 : i32
    return %c0_i32, %c0_i32_0, %c0_i32_1 : i32, i32, i32
  }
  func.func @transform_4(%arg0: i32, %arg1: i32) -> (i32, i32) {
    %c0_i32 = arith.constant 0 : i32
    %c0_i32_0 = arith.constant 0 : i32
    %c0_i32_1 = arith.constant 0 : i32
    return %c0_i32, %c0_i32_0 : i32, i32
  }
  func.func @transform_5(%arg0: i32, %arg1: i32) -> (i32, i32) {
    %c0_i32 = arith.constant 0 : i32
    %c0_i32_0 = arith.constant 0 : i32
    %c0_i32_1 = arith.constant 0 : i32
    return %c0_i32, %c0_i32_0 : i32, i32
  }
  func.func @transform_6(%arg0: i32, %arg1: i32) -> (i32, i32, i32, i32) {
    %c0_i32 = arith.constant 0 : i32
    %c0_i32_0 = arith.constant 0 : i32
    %c0_i32_1 = arith.constant 0 : i32
    return %arg0, %arg1, %c0_i32, %c0_i32_0 : i32, i32, i32, i32
  }
}

</mosaic_0001>

<bundles_post_ra>
// kernel: tpu_custom_call.1
= control target key start
LH: loop header
LB: loop body
LE: loop exit
PB: predicated region body
PF: predicated region fallthrough
CT: control target
= control target key end

     0   :  { %11 = vsyncpa [#allocation3], 0  ;;  %s13313_s0 = inlined_call_operand.vmem [shape: bf16[2,1,20,26,128], index: 0, kind: input, shape index: {}]   ;;  %s13314_s1 = inlined_call_operand.vmem [shape: bf16[3,384,128], index: 1, kind: input, shape index: {}]   ;;  %s13315_s2 = inlined_call_operand.vmem [shape: f32[1,128], index: 2, kind: input, shape index: {}]   ;;  %s13316_s3 = inlined_call_operand.vmem [shape: bf16[3,384,128], index: 3, kind: input, shape index: {}]   ;;  %s13317_s4 = inlined_call_operand.vmem [shape: f32[1,128], index: 4, kind: input, shape index: {}]   ;;  %s13318_s5 = inlined_call_operand.hbm [shape: bf16[128,128], index: 5, kind: input, shape index: {}]   ;;  %s13319_s6 = inlined_call_operand.hbm [shape: f32[2,16,16,128], index: 6, kind: output, shape index: {}]  }
   0x1   :  { %12 = vsyncpa [#allocation4], 0 }
   0x2   :  { %14 = vsyncpa [#allocation4 + $0x1], 0  ;;  %s9216_s21 = smov 0   ;;  %s9218_s22 = smov 0  }
   0x3   :  { %s9220_s23 = smov 0   ;;  %s9222_s24 = smov 0  }
   0x4   :  { %s9224_s25 = smov 0   ;;  %s9226_s26 = smov 0  }
   0x5 LB: > { %s7076_s27 = sadd.s32 4294967295, %s9169_s26   ;;  %s7077_s28 = sadd.s32 4294967294, %s9169_s26   ;;  %s9169_s26 = sphi %s9226_s26, %s20_s26   ;;  %s9165_s25 = sphi %s9224_s25, %s13981_s25   ;;  %s9161_s24 = sphi %s9222_s24, %s13980_s24   ;;  %s9157_s23 = sphi %s9220_s23, %s13979_s23   ;;  %s9153_s22 = sphi %s9218_s22, %s13978_s22   ;;  %s9149_s21 = sphi %s9216_s21, %s13977_s21  }
   0x6   : > { %s32_s29 = sadd.s32 1, %s9165_s25  ;;  %s174_s30 = sadd.s32 1, %s9157_s23 }
   0x7   : > { %p34_p0 = scmp.ge.s32.totalorder %s32_s29, 2  ;;  %p184_p1 = scmp.ne.s32.totalorder %s9157_s23, %s9153_s22 }
   0x8   : > { %p185_p2 = scmp.eq.s32.totalorder %s7076_s27, 1  ;;  %p190_p3 = scmp.ne.s32.totalorder %s9153_s22, %s9149_s21 }
   0x9   : > { %s13983_s29 = smov (%p34_p0, %s32_s29), 0  ;;  %p191_p5 = scmp.eq.s32.totalorder %s7077_s28, 1 }
   0xa   : > { %p9256_p4 = por %p185_p2, %p184_p1  ;;  %s169_s8 = ssub.s32 %s9165_s25, %s13983_s29 }
   0xb   : > { %p7078_p6 = scmp.ge.s32.totalorder %s9169_s26, 1  ;;  %p172_p7 = scmp.eq.s32.totalorder %s169_s8, 0 }
   0xc   : > { %p9263_p8 = por %p191_p5, %p190_p3  ;;  %p198_p9 = scmp.lt.s32.totalorder %s9169_s26, 3 }
   0xd   : > { %s9269_s10 = scalar_select %p172_p7, %s9157_s23, %s174_s30  }
   0xe   : > { %p9271_p10 = pnand %p7078_p6, %p198_p9  ;;  %p9275_p11 = scmp.eq.s32.totalorder %s7076_s27, 0 }
   0xf   : > { %s9171_s13 = smov [#allocation2]  }
  0x10   : > { %p8793_p12 = pneg %p9271_p10  ;;  %s222_s14 = sshll.u32 %s9171_s13, 4  ;;  %s223_s14 = int_to_ptr.vmem [resolvable:$true] %s222_s14 }
  0x11   : > { %s9074_s15 = scalar_lea.vmem %s223_s14, 1024  ;;  %p9082_p5 = scmp.lt.s32.totalorder %s223_s14, %s223_s14 }
  0x12   : > { %p8794_p13 = pnand %p9275_p11, %p8793_p12  ;;  %p9075_p1 = scmp.ne.s32.totalorder %s223_s14, %s9074_s15 }
  0x13   : > { %p9083_p6 = scmp.lt.s32.totalorder %s9074_s15, %s9074_s15 }
  0x14   : > { %p9065_p0 = pneg %p8794_p13 }
  0x15   : > { %p9084_p7 = por %p9083_p6, %p9082_p5 }
  0x16   : > { %p9077_p2 = pnand %p9075_p1, %p9065_p0 }
  0x18   : > { %p9078_p3 = pneg %p9077_p2 }
  0x1a   : > { %p9085_p9 = pnand %p9084_p7, %p9078_p3 }
  0x1c   : > { %9088 = shalt.err (!%p9085_p9)
}
  0x1d   : > { %s9172_s16 = smov 64   ;;  %s9173_s17 = smov 4  }
  0x1e   : > { %8796 = dma.hbm_to_vmem [thread:$0]  (!%p8794_p13), %s13318_s5, 1024, %s223_s14, [#allocation3], %s9172_s16, %s9172_s16, %s9173_s17  }
  0x1f   : > { %250 = sbr.rel (%p9271_p10) target bundleno = 1398 (0x576), region = 44 }
  0x24   : > { %9140 = dma.done.wait (%p9275_p11), [#allocation3], 1024  }
  0x25   : > { %9142 = vsyncadd (%p9275_p11), [#allocation3], 4294966272  ;;  %v13320_v0 = vmov 0   ;;  %v13329_v1 = vmov 0.0   ;;  %vm9176_vm0 = vmmov 0   ;;  %v8861_v2 = vld [vmem:[%s13314_s1 + $0xf8] sm:$0xff]  }
  0x26   : > { %1609 = vmatprep.subr.bf16.mxu0 %v13320_v0  ;;  %8206 = vmatprep.subr.bf16.mxu1 %v13329_v1  ;;  %v8862_v3 = vld [vmem:[%s13314_s1 + $0x178] sm:$0xff]   ;;  %p284_p10 = scmp.lt.s32.totalorder %s9161_s24, 1  ;;  %v8863_v4 = vld [vmem:[%s13314_s1 + $0xf0] sm:$0xff]   ;;  %v8865_v6 = vld [vmem:[%s13314_s1 + $0xe8] sm:$0xff]   ;;  %vm1040_vm1 = vcmask 1046528   ;;  %vm9177_vm6 = vmmov 1  }
  0x27   : > { %8222 = vmatprep.mubr.msk.bf16.mxu1 %vm9176_vm0, %v13329_v1  ;;  %1610 = vmatpush1.bf16.msra.mxu0 %v8861_v2  ;;  %v8864_v5 = vld [vmem:[%s13314_s1 + $0x170] sm:$0xff]   ;;  %v8866_v7 = vld [vmem:[%s13314_s1 + $0x168] sm:$0xff]   ;;  %v8867_v8 = vld [vmem:[%s13314_s1 + $0xe0] sm:$0xff]   ;;  %vm739_vm2 = vsmask.f32 7424  ;;  %vm6497_vm13 = vcmask 1042432  }
  0x28   : > { %8207 = vmatpush3.bf16.msra.mxu1 %v8862_v3  ;;  %1611 = vmatprep.subr.bf16.mxu0 %v13320_v0  ;;  %s285_s14 = scalar_select %p284_p10, %s9161_s24, 1  ;;  %v8868_v9 = vld [vmem:[%s13314_s1 + $0x160] sm:$0xff]   ;;  %v8869_v10 = vld [vmem:[%s13314_s1 + $0xd8] sm:$0xff]   ;;  %v8871_v16 = vld [vmem:[%s13314_s1 + $0xd0] sm:$0xff]   ;;  %vm6498_vm14 = vcmask 1046532  }
  0x29   : > { %8208 = vmatprep.subr.bf16.mxu1 %v13329_v1  ;;  %v8870_v11 = vld [vmem:[%s13314_s1 + $0x158] sm:$0xff]   ;;  %v8872_v17 = vld [vmem:[%s13314_s1 + $0x150] sm:$0xff]   ;;  %v8873_v22 = vld [vmem:[%s13314_s1 + $0xc8] sm:$0xff]   ;;  %s7668_s28 = sshll.u32 %s9161_s24, 12  ;;  %s9178_s15 = smov [#allocation5]  }
  0x2a   : > { %s8786_s19 = smul.u32 320, %s285_s14  ;;  %v8874_v24 = vld [vmem:[%s13314_s1 + $0x148] sm:$0xff]   ;;  %v8875_v42 = vld [vmem:[%s13314_s1 + $0xc0] sm:$0xff]   ;;  %v8877_v50 = vld [vmem:[%s13314_s1 + $0x138] sm:$0xff]   ;;  %s13260_s13 = scalar_lea.hbm %s13319_s6, %s7668_s28 }
  0x2b   : > { %1612 = vmatpush1.bf16.msra.mxu0 %v8863_v4  ;;  %v8876_v45 = vld [vmem:[%s13314_s1 + $0x140] sm:$0xff]   ;;  %vm4222_vm3 = vmpackc.low %vm9176_vm0, %vm9176_vm0  ;;  %s9093_s16 = sshll.u32 %s9178_s15, 4  ;;  %s9094_s16 = int_to_ptr.vmem [resolvable:$false] %s9093_s16 }
  0x2c   : > { %8209 = vmatpush3.bf16.msra.mxu1 %v8864_v5  ;;  %1613 = vmatprep.subr.bf16.mxu0 %v13320_v0  ;;  %s9331_s12 = scalar_lea.vmem %s13313_s0, %s8786_s19  ;;  %vm4226_vm7 = vmpackc.low %vm9177_vm6, %vm9177_vm6  ;;  %s281_s19 = sand.u32 1, %s9153_s22  }
  0x2d   : > { %8210 = vmatprep.subr.bf16.mxu1 %v13329_v1  ;;  %v303_v12 = vld [vmem:[%s9331_s12 + $0x10] sm:$0xf]  ;;  %v304_v13 = vld [vmem:[%s9331_s12 + $0x14] sm:$0xf]  ;;  %v305_v14 = vld [vmem:[%s9331_s12 + $0x18] sm:$0xf] }
  0x2e   : > { %v306_v15 = vld [vmem:[%s9331_s12 + $0x1c] sm:$0x1]  ;;  %v383_v18 = vmul.bf16 1045249613, %v303_v12  ;;  %v384_v19 = vmul.bf16 1045249613, %v304_v13  ;;  %vm12420_vm15 = vmor %vm6497_vm13, %vm6498_vm14 }
  0x2f   : > { %1614 = vmatpush1.bf16.msra.mxu0 %v8865_v6  ;;  %v385_v20 = vmul.bf16 1045249613, %v305_v14  ;;  %v386_v21 = vmul.bf16 1045249613, %v306_v15  ;;  %v307_v28 = vld [vmem:[%s9331_s12 + $0x20] sm:$0xf] }
  0x30   : > { %8211 = vmatpush3.bf16.msra.mxu1 %v8866_v7  ;;  %1615 = vmatprep.subr.bf16.mxu0 %v13320_v0  ;;  %v9356_v23 = vmax.bf16 %v383_v18, %v303_v12  ;;  %v9361_v25 = vmax.bf16 %v384_v19, %v304_v13  ;;  %v308_v29 = vld [vmem:[%s9331_s12 + $0x24] sm:$0xf]  ;;  %v309_v30 = vld [vmem:[%s9331_s12 + $0x28] sm:$0xf]  ;;  %v310_v33 = vld [vmem:[%s9331_s12 + $0x2c] sm:$0x1] }
  0x31   : > { %8212 = vmatprep.subr.bf16.mxu1 %v13329_v1  ;;  %v9363_v26 = vmax.bf16 %v385_v20, %v305_v14  ;;  %v466_v27 = vmax.bf16 %v386_v21, %v306_v15  ;;  %v387_v34 = vmul.bf16 1045249613, %v307_v28  ;;  %v388_v35 = vmul.bf16 1045249613, %v308_v29  ;;  %v311_v52 = vld [vmem:[%s9331_s12 + $0x30] sm:$0xf] }
  0x32   : > { %13491 = vst [vmem:[#allocation8_spill] sm:$0xff] %v9361_v25  ;;  %v9371_v31 = vcombine.low %v9356_v23, %v9361_v25  ;;  %v389_v36 = vmul.bf16 1045249613, %v309_v30  ;;  %v390_v37 = vmul.bf16 1045249613, %v310_v33  ;;  %v8878_v6 = vld [vmem:[%s13314_s1 + $0x130] sm:$0xff]  }
  0x33   : > { %1616 = vmatpush1.bf16.msra.mxu0 %v8867_v8  ;;  %13492 = vst [vmem:[#allocation9_spill] sm:$0xff] %v9363_v26  ;;  %v9374_v32 = vcombine.low %v9363_v26, %v466_v27  ;;  %v9382_v40 = vmax.bf16 %v387_v34, %v307_v28  ;;  %v9384_v41 = vmax.bf16 %v388_v35, %v308_v29  ;;  %v312_v53 = vld [vmem:[%s9331_s12 + $0x34] sm:$0xf]  ;;  %v313_v59 = vld [vmem:[%s9331_s12 + $0x38] sm:$0xf]  ;;  %v8879_v28 = vld [vmem:[%s13314_s1 + $0x128] sm:$0xff]  }
  0x34   : > { %8213 = vmatpush3.bf16.msra.mxu1 %v8868_v9  ;;  %1617 = vmatprep.subr.bf16.mxu0 %v13320_v0  ;;  %v1044_v38 = vrot.slane %v9371_v31, 1  ;;  %v9389_v43 = vmax.bf16 %v389_v36, %v309_v30  ;;  %v470_v44 = vmax.bf16 %v390_v37, %v310_v33  ;;  %v758_v54 = vshll.u32 %v9371_v31, 16  ;;  %v314_v60 = vld [vmem:[%s9331_s12 + $0x3c] sm:$0x1]  ;;  %v315_v9 = vld [vmem:[%s9331_s12 + $0x40] sm:$0xf] }
  0x35   : > { %8214 = vmatprep.subr.bf16.mxu1 %v13329_v1  ;;  %v9380_v39 = vrot.slane %v9374_v32, 1  ;;  %v9402_v48 = vcombine.low %v9382_v40, %v9384_v41  ;;  %v763_v55 = vshll.u32 %v9374_v32, 16  ;;  %v391_v61 = vmul.bf16 1045249613, %v311_v52  ;;  %v317_v15 = vld [vmem:[%s9331_s12 + $0x48] sm:$0xf] }
  0x36   : > { %13493 = vst [vmem:[#allocation10_spill] sm:$0xff] %v9389_v43  ;;  %v9410_v51 = vcombine.low %v9389_v43, %v470_v44  ;;  %v392_v62 = vmul.bf16 1045249613, %v312_v53  ;;  %v393_v63 = vmul.bf16 1045249613, %v313_v59  ;;  %v756_v3 = vshrl.u32 %v9371_v31, 16 }
  0x37   : > { %1618 = vmatpush1.bf16.msra.mxu0 %v8869_v10  ;;  %v9397_v46 = vsel %vm1040_vm1, %v1044_v38, %v9380_v39  ;;  %v1112_v47 = vunpack.c.l.b16 %v9380_v39  ;;  %13495 = vst [vmem:[#allocation12_spill] sm:$0xff] %v9402_v48  ;;  %v1047_v57 = vrot.slane %v9402_v48, 1  ;;  %v394_v2 = vmul.bf16 1045249613, %v314_v60  ;;  %v316_v10 = vld [vmem:[%s9331_s12 + $0x44] sm:$0xf] }
  0x38   : > { %8215 = vmatpush3.bf16.msra.mxu1 %v8870_v11  ;;  %1619 = vmatprep.subr.bf16.mxu0 %v13320_v0  ;;  %13494 = vst [vmem:[#allocation11_spill] sm:$0xff] %v9397_v46  ;;  %v1110_v49 = vunpack.c.h.b16 %v9397_v46  ;;  %v9420_v58 = vrot.slane %v9410_v51, 1  ;;  %v9427_v4 = vmax.bf16 %v391_v61, %v311_v52  ;;  %v9429_v5 = vmax.bf16 %v392_v62, %v312_v53  ;;  %v8887_v36 = vld [vmem:[%s13314_s1 + $0x30] sm:$0xff]   ;;  %v321_v44 = vld [vmem:[%s9331_s12 + $0x58] sm:$0xf]  ;;  %s7083_s20 = sshll.u32 %s281_s19, 8 }
  0x39   : > { %8216 = vmatprep.subr.bf16.mxu1 %v13329_v1  ;;  %v9435_v7 = vmax.bf16 %v393_v63, %v313_v59  ;;  %v474_v8 = vmax.bf16 %v394_v2, %v314_v60  ;;  %v760_v13 = vrot.slane %v758_v54, 1  ;;  %v9450_v14 = vrot.slane %v763_v55, 1  ;;  %v319_v37 = vld [vmem:[%s9331_s12 + $0x50] sm:$0xf]  ;;  %v8881_v63 = vld [vmem:[%s13314_s1 + $0x118] sm:$0xff]   ;;  %s13093_s27 = scalar_lea.vmem [#allocation5], %s7083_s20 }
  0x3a   : > { %v9416_v56 = vpack.c.b16 %v1112_v47, %v1110_v49  ;;  %13497 = vst [vmem:[#allocation14_spill] sm:$0xff] %v9427_v4  ;;  %13498 = vst [vmem:[#allocation15_spill] sm:$0xff] %v9429_v5  ;;  %v9444_v11 = vsel %vm1040_vm1, %v1047_v57, %v9420_v58  ;;  %v9448_v12 = vcombine.low %v9427_v4, %v9429_v5  ;;  %v395_v18 = vmul.bf16 1045249613, %v315_v9  ;;  %v8880_v47 = vld [vmem:[%s13314_s1 + $0x120] sm:$0xff]   ;;  %s6982_s30 = sshll.u32 %s13093_s27, 4  ;;  %s13262_s30 = int_to_ptr.vmem [resolvable:$true] %s6982_s30 }
  0x3b   : > { %1620 = vmatpush1.bf16.msra.mxu0 %v8871_v16  ;;  %13499 = vst [vmem:[#allocation16_spill] sm:$0xff] %v9435_v7  ;;  %13500 = vst [vmem:[#allocation17_spill] sm:$0xff] %v9444_v11  ;;  %v9454_v16 = vcombine.low %v9435_v7, %v474_v8  ;;  %v396_v19 = vmul.bf16 1045249613, %v316_v10  ;;  %v761_v21 = vor.u32 %v760_v13, %v756_v3  ;;  %v1116_v49 = vunpack.c.h.b16 %v9444_v11  ;;  %s13268_s24 = scalar_lea.sflag [#allocation4], %s281_s19  ;;  %s9089_s14 = scalar_lea.vmem %s13262_s30, 4096 }
  0x3c   : > { %8217 = vmatpush3.bf16.msra.mxu1 %v8872_v17  ;;  %1621 = vmatprep.subr.bf16.mxu0 %v13320_v0  ;;  %13496 = vst [vmem:[#allocation13_spill] sm:$0xff] %v9416_v56  ;;  %v318_v17 = vld [vmem:[%s9331_s12 + $0x4c] sm:$0x1]  ;;  %v1050_v20 = vrot.slane %v9448_v12, 1  ;;  %v7175_v27 = vcombine.low %v9380_v39, %v9444_v11  ;;  %v9498_v52 = vmax.bf16 %v395_v18, %v315_v9  ;;  %v399_v55 = vmul.bf16 1045249613, %v319_v37  ;;  %p9090_p11 = scmp.ne.s32.totalorder %s13262_s30, %s9089_s14  ;;  %p9096_p0 = scmp.lt.s32.totalorder %s13262_s30, %s9094_s16 }
  0x3d   : > { %8218 = vmatprep.subr.bf16.mxu1 %v13329_v1  ;;  %v9467_v29 = vrot.slane %v9454_v16, 1  ;;  %v9472_v30 = vsel %vm739_vm2, %v761_v21, %v9450_v14  ;;  %v398_v33 = vmul.bf16 1045249613, %v318_v17  ;;  %v9505_v54 = vmax.bf16 %v396_v19, %v316_v10  ;;  %v8890_v19 = vld [vmem:[%s13314_s1 + $0x20] sm:$0xff]   ;;  %s9095_s17 = scalar_lea.vmem %s9094_s16, 8192 }
  0x3e   : > { %1641 = vmatprep.mubr.bf16.mxu0 %v9472_v30  ;;  %v401_v61 = vmul.bf16 1045249613, %v321_v44  ;;  %v9515_v2 = vmax.bf16 %v399_v55, %v319_v37  ;;  %v778_v18 = vshll.u32 %v9410_v51, 16  ;;  %p9091_p12 = pnand %p9090_p11, %p9256_p4  ;;  %p9097_p1 = scmp.lt.s32.totalorder %s9095_s17, %s9089_s14 }
  0x3f   : > { %1622 = vmatpush1.bf16.msra.mxu0 %v8873_v22  ;;  %v397_v22 = vmul.bf16 1045249613, %v317_v15  ;;  %v9476_v34 = vsel %vm1040_vm1, %v1050_v20, %v9467_v29  ;;  %v1124_v35 = vunpack.c.l.b16 %v9467_v29  ;;  %v478_v60 = vmax.bf16 %v398_v33, %v318_v17 }
  0x40   : > { %8219 = vmatpush3.bf16.msra.mxu1 %v8874_v24  ;;  %1623 = vmatprep.subr.bf16.mxu0 %v13320_v0  ;;  %v8885_v24 = vld [vmem:[%s13314_s1 + $0x38] sm:$0xff]   ;;  %v1122_v38 = vunpack.c.h.b16 %v9476_v34  ;;  %v9488_v39 = vcombine.low %v9420_v58, %v9476_v34  ;;  %13504 = vst [vmem:[#allocation21_spill] sm:$0xff] %v9515_v2  ;;  %v9523_v8 = vcombine.low %v9498_v52, %v9505_v54  ;;  %v773_v17 = vshll.u32 %v9402_v48, 16  ;;  %p9092_p13 = pneg %p9091_p12  ;;  %p9098_p2 = por %p9097_p1, %p9096_p0 }
  0x41   : > { %8220 = vmatprep.subr.bf16.mxu1 %v13329_v1  ;;  %v9507_v59 = vmax.bf16 %v397_v22, %v317_v15  ;;  %v9525_v9 = vmax.bf16 %v401_v61, %v321_v44  ;;  %v8882_v22 = vld [vmem:[%s13314_s1 + $0x110] sm:$0xff]   ;;  %v782_v33 = vshrl.u32 %v9410_v51, 16 }
  0x42   : > { %13501 = vst [vmem:[#allocation18_spill] sm:$0xff] %v9488_v39  ;;  %v9503_v53 = vpack.c.b16 %v1124_v35, %v1122_v38  ;;  %13506 = vst [vmem:[#allocation23_spill] sm:$0xff] %v9523_v8  ;;  %v775_v37 = vrot.slane %v773_v17, 1  ;;  %v780_v38 = vrot.slane %v778_v18, 1  ;;  %v330_v17 = vld [vmem:[%s9331_s12 + $0x7c] sm:$0x1]  ;;  %p9099_p3 = pnand %p9098_p2, %p9092_p13 }
  0x43   : > { %1624 = vmatpush1.bf16.msra.mxu0 %v8875_v42  ;;  %v320_v42 = vld [vmem:[%s9331_s12 + $0x54] sm:$0xf]  ;;  %13503 = vst [vmem:[#allocation20_spill] sm:$0xff] %v9507_v59  ;;  %13507 = vst [vmem:[#allocation24_spill] sm:$0xff] %v9525_v9  ;;  %v9532_v15 = vcombine.low %v9507_v59, %v478_v60  ;;  %v329_v60 = vld [vmem:[%s9331_s12 + $0x78] sm:$0xf] }
  0x44   : > { %8221 = vmatpush3.bf16.msra.mxu1 %v8876_v45  ;;  %1625 = vmatprep.subr.bf16.mxu0 %v13320_v0  ;;  %v322_v45 = vld [vmem:[%s9331_s12 + $0x5c] sm:$0x1]  ;;  %13502 = vst [vmem:[#allocation19_spill] sm:$0xff] %v9503_v53  ;;  %v400_v57 = vmul.bf16 1045249613, %v320_v42  ;;  %v13517_v53 = vmov 0  }
  0x45   : > { %2404 = vmatprep.subr.bf16.mxu1 %v13320_v0  ;;  %v402_v62 = vmul.bf16 1045249613, %v322_v45  ;;  %v13519_v39 = vmov 0.0  }
  0x46   : > { %v9517_v3 = vmax.bf16 %v400_v57, %v320_v42  ;;  %v8891_v42 = vld [vmem:[%s13314_s1 + $0x18] sm:$0xff]   ;;  %v328_v57 = vld [vmem:[%s9331_s12 + $0x74] sm:$0xf] }
  0x47   : > { %8223 = vmatmul.mubr.bf16.vlgmr.msra.gmra.mxu1 %v9397_v46  ;;  %1626 = vmatpush2.bf16.msra.mxu0 %v8877_v50  ;;  %v1118_v50 = vunpack.c.l.b16 %v9420_v58  ;;  %v8888_v58 = vld [vmem:[%s13314_s1 + $0x28] sm:$0xff]   ;;  %v482_v10 = vmax.bf16 %v402_v62, %v322_v45 }
  0x48   : > { %1627 = vmatprep.subr.bf16.mxu0 %v13320_v0  ;;  %8226 = vmatprep.mubr.msk.bf16.mxu1 %vm9176_vm0, %v13329_v1  ;;  %13505 = vst [vmem:[#allocation22_spill] sm:$0xff] %v9517_v3  ;;  %v9529_v13 = vcombine.low %v9515_v2, %v9517_v3  ;;  %v325_v45 = vld [vmem:[%s9331_s12 + $0x68] sm:$0xf] }
  0x49   : > { %2405 = vmatpush1.bf16.msra.mxu1 %v8885_v24  ;;  %v9540_v20 = vcombine.low %v9525_v9, %v482_v10  ;;  %v767_v24 = vshrl.u32 %v9374_v32, 16  ;;  %v8883_v32 = vld [vmem:[%s13314_s1 + $0x108] sm:$0xff]   ;;  %v8884_v10 = vld [vmem:[%s13314_s1 + $0x100] sm:$0xff]  }
  0x4a   : > { %2406 = vmatprep.subr.bf16.mxu1 %v13320_v0  ;;  %v1056_v21 = vrot.slane %v9529_v13, 1 }
  0x4b   : > { %1628 = vmatpush2.bf16.msra.mxu0 %v8878_v6  ;;  %v1319_v6 = vpack.c.b16 %v1118_v50, %v1116_v49  ;;  %v9555_v35 = vrot.slane %v9540_v20, 1  ;;  %v327_v49 = vld [vmem:[%s9331_s12 + $0x70] sm:$0xf] }
  0x4c   : > { %1629 = vmatprep.subr.bf16.mxu0 %v13320_v0  ;;  %v407_v18 = vmul.bf16 1045249613, %v327_v49 }
  0x4d   : > { %2407 = vmatpush1.bf16.msra.mxu1 %v8887_v36  ;;  %v9561_v36 = vrot.slane %v9532_v15, 1  ;;  %v9568_v51 = vsel %vm1040_vm1, %v1056_v21, %v9555_v35  ;;  %v1136_v44 = vunpack.c.l.b16 %v9555_v35  ;;  %v9602_v21 = vor.u32 %v767_v24, %v9450_v14  ;;  %v8886_v14 = vld [vmem:[%s13314_s1 + $0xb8] sm:$0xff]  }
  0x4e   : > { %2408 = vmatprep.subr.bf16.mxu1 %v13320_v0  ;;  %v1134_v50 = vunpack.c.h.b16 %v9568_v51  ;;  %v410_v24 = vmul.bf16 1045249613, %v330_v17 }
  0x4f   : > { %8227 = vmatmul.mubr.bf16.gmra.mxu1 %v7175_v27  ;;  %1630 = vmatpush2.bf16.msra.mxu0 %v8879_v28  ;;  %v1053_v27 = vrot.slane %v9523_v8, 1  ;;  %v771_v28 = vshrl.u32 %v9402_v48, 16  ;;  %v9578_v55 = vcombine.low %v9561_v36, %v9568_v51 }
  0x50   : > { %1631 = vmatprep.subr.bf16.mxu0 %v13320_v0  ;;  %8230 = vmatprep.mubr.msk.bf16.mxu1 %vm9176_vm0, %v13329_v1  ;;  %v9583_v62 = vpack.c.b16 %v1136_v44, %v1134_v50  ;;  %v9617_v44 = vmax.bf16 %v407_v18, %v327_v49  ;;  %v324_v49 = vld [vmem:[%s9331_s12 + $0x64] sm:$0xf] }
  0x51   : > { %2409 = vmatpush1.bf16.msra.mxu1 %v8888_v58  ;;  %13508 = vst [vmem:[#allocation25_spill] sm:$0xff] %v9578_v55  ;;  %v776_v61 = vor.u32 %v775_v37, %v771_v28  ;;  %v405_v58 = vmul.bf16 1045249613, %v325_v45  ;;  %v409_v28 = vmul.bf16 1045249613, %v329_v60 }
  0x52   : > { %2410 = vmatprep.subr.bf16.mxu1 %v13320_v0  ;;  %13509 = vst [vmem:[#allocation26_spill] sm:$0xff] %v9583_v62  ;;  %13514 = vst [vmem:[#allocation31_spill] sm:$0xff] %v9617_v44  ;;  %v334_v62 = vld [vmem:[%s9331_s12 + $0x8c] sm:$0x1]  ;;  %v335_v55 = vld [vmem:[%s9331_s12 + $0x90] sm:$0xf] }
  0x53   : > { %1632 = vmatpush2.bf16.msra.mxu0 %v8880_v47  ;;  %v326_v47 = vld [vmem:[%s9331_s12 + $0x6c] sm:$0x1]  ;;  %v9609_v37 = vmax.bf16 %v405_v58, %v325_v45  ;;  %v323_v45 = vld [vmem:[%s9331_s12 + $0x60] sm:$0xf]  ;;  %v490_v58 = vmax.bf16 %v410_v24, %v330_v17  ;;  %v415_v11 = vmul.bf16 1045249613, %v335_v55 }
  0x54   : > { %1633 = vmatprep.subr.bf16.mxu0 %v13320_v0  ;;  %v403_v17 = vmul.bf16 1045249613, %v323_v45 }
  0x55   : > { %2411 = vmatpush1.bf16.msra.mxu1 %v8890_v19  ;;  %v9599_v19 = vsel %vm1040_vm1, %v1053_v27, %v9561_v36  ;;  %13513 = vst [vmem:[#allocation30_spill] sm:$0xff] %v9609_v37  ;;  %v8894_v27 = vld [vmem:[%s13314_s1 + $0x8] sm:$0xff]  }
  0x56   : > { %2412 = vmatprep.subr.bf16.mxu1 %v13320_v0  ;;  %13510 = vst [vmem:[#allocation27_spill] sm:$0xff] %v9599_v19 }
  0x57   : > { %8231 = vmatmul.mubr.bf16.gmra.mxu1 %v1319_v6  ;;  %1634 = vmatpush2.bf16.msra.mxu0 %v8881_v63  ;;  %v406_v63 = vmul.bf16 1045249613, %v326_v47  ;;  %v8893_v6 = vld [vmem:[%s13314_s1 + $0x10] sm:$0xff]  }
  0x58   : > { %1635 = vmatprep.subr.bf16.mxu0 %v13320_v0  ;;  %8234 = vmatprep.mubr.msk.bf16.mxu1 %vm9176_vm0, %v13329_v1 }
  0x59   : > { %2413 = vmatpush1.bf16.msra.mxu1 %v8891_v42  ;;  %v486_v42 = vmax.bf16 %v406_v63, %v326_v47  ;;  %v1130_v63 = vunpack.c.l.b16 %v9561_v36  ;;  %v8896_v36 = vld [vmem:[%s13314_s1] sm:$0xff]  }
  0x5a   : > { %2414 = vmatprep.subr.bf16.mxu1 %v13320_v0 }
  0x5b   : > { %1636 = vmatpush2.bf16.msra.mxu0 %v8882_v22  ;;  %v408_v22 = vmul.bf16 1045249613, %v328_v57 }
  0x5c   : > { %1637 = vmatprep.subr.bf16.mxu0 %v13320_v0 }
  0x5d   : > { %2415 = vmatpush1.bf16.msra.mxu1 %v8893_v6  ;;  %v9619_v50 = vmax.bf16 %v408_v22, %v328_v57  ;;  %v9640_v6 = vcombine.low %v9609_v37, %v486_v42  ;;  %v786_v42 = vshrl.u32 %v9448_v12, 16 }
  0x5e   : > { %2416 = vmatprep.subr.bf16.mxu1 %v13320_v0 }
  0x5f   : > { %8235 = vmatmul.mubr.bf16.gmra.mxu1 %v9476_v34  ;;  %1638 = vmatpush2.bf16.msra.mxu0 %v8883_v32  ;;  %v9605_v34 = vsel %vm739_vm2, %v776_v61, %v780_v38  ;;  %v9607_v32 = vor.u32 %v782_v33, %v780_v38  ;;  %13515 = vst [vmem:[#allocation32_spill] sm:$0xff] %v9619_v50  ;;  %v788_v61 = vshll.u32 %v9448_v12, 16 }
  0x60   : > { %1639 = vmatprep.subr.bf16.mxu0 %v13320_v0  ;;  %8238 = vmatprep.mubr.msk.bf16.mxu1 %vm9176_vm0, %v13329_v1  ;;  %13511 = vst [vmem:[#allocation28_spill] sm:$0xff] %v9605_v34  ;;  %v9621_v33 = vmax.bf16 %v409_v28, %v329_v60  ;;  %v7179_v38 = vcombine.low %v9467_v29, %v9599_v19  ;;  %v1128_v60 = vunpack.c.h.b16 %v9599_v19  ;;  %v8889_v28 = vld [vmem:[%s13314_s1 + $0xb0] sm:$0xff]  }
  0x61   : > { %13512 = vst [vmem:[#allocation29_spill] sm:$0xff] %v9607_v32  ;;  %v7174_v47 = vcombine.low %v9602_v21, %v9605_v34  ;;  %v9634_v57 = vcombine.low %v9617_v44, %v9619_v50  ;;  %v1117_v29 = vunpack.c.l.b16 %v9607_v32  ;;  %2417 = vmatpush1.bf16.msra.mxu1 %v8894_v27  ;;  %v790_v27 = vrot.slane %v788_v61, 1  ;;  %v337_v44 = vld [vmem:[%s9331_s12 + $0x98] sm:$0xf] }
  0x62   : > { %13516 = vst [vmem:[#allocation33_spill] sm:$0xff] %v9621_v33  ;;  %v9645_v18 = vcombine.low %v9621_v33, %v490_v58  ;;  %2418 = vmatprep.subr.bf16.mxu1 %v13320_v0  ;;  %v1327_v58 = vpack.c.b16 %v1130_v63, %v1128_v60  ;;  %v793_v0 = vshll.u32 %v9454_v16, 16  ;;  %v9671_v50 = vmax.bf16 %v403_v17, %v323_v45  ;;  %v8892_v60 = vld [vmem:[%s13314_s1 + $0xa8] sm:$0xff]   ;;  %v336_v63 = vld [vmem:[%s9331_s12 + $0x94] sm:$0xf]  ;;  %v8897_v17 = vld [vmem:[%s13314_s1 + $0x78] sm:$0xff]  }
  0x63   : > { %1640 = vmatpush2.bf16.msra.mxu0 %v8884_v10  ;;  %v1115_v10 = vunpack.c.h.b16 %v9605_v34  ;;  %v1062_v22 = vrot.slane %v9634_v57, 1  ;;  %v803_v45 = vshll.u32 %v9523_v8, 16 }
  0x64   : > { %8330 = vmatprep.subr.bf16.mxu0 %v13329_v1  ;;  %v9659_v24 = vrot.slane %v9645_v18, 1 }
  0x65   : > { %2419 = vmatpush1.bf16.msra.mxu1 %v8896_v36  ;;  %v1318_v61 = vpack.c.b16 %v1117_v29, %v1115_v10  ;;  %v414_v36 = vmul.bf16 1045249613, %v334_v62 }
  0x66   : > { %1642 = vmatmul.mubr.bf16.vlgmr.msra.gmra.mxu0 %v9371_v31  ;;  %v404_v31 = vmul.bf16 1045249613, %v324_v49  ;;  %v9675_v19 = vsel %vm1040_vm1, %v1062_v22, %v9659_v24  ;;  %2420 = vmatprep.subr.bf16.mxu1 %v13517_v53 }
  0x67   : > { %8239 = vmatmul.mubr.bf16.gmra.mxu1 %v7179_v38  ;;  %8331 = vmatpush3.bf16.msra.mxu0 %v8886_v14  ;;  %v333_v38 = vld [vmem:[%s9331_s12 + $0x88] sm:$0xf]  ;;  %v7173_v14 = vcombine.low %v9363_v26, %v9382_v40  ;;  %v1148_v40 = vunpack.c.l.b16 %v9659_v24  ;;  %v1146_v29 = vunpack.c.h.b16 %v9675_v19 }
  0x68   : > { %1649 = vmatprep.mubr.bf16.mxu0 %v7174_v47  ;;  %8242 = vmatprep.mubr.msk.bf16.mxu1 %vm9176_vm0, %v13329_v1  ;;  %v9666_v47 = vrot.slane %v9640_v6, 1  ;;  %v413_v22 = vmul.bf16 1045249613, %v333_v38 }
  0x69   : > { %8332 = vmatprep.subr.bf16.mxu0 %v13329_v1  ;;  %v9684_v1 = vmax.bf16 %v404_v31, %v324_v49  ;;  %v9696_v3 = vpack.c.b16 %v1148_v40, %v1146_v29  ;;  %2421 = vmatpush2.bf16.msra.mxu1 %v8897_v17  ;;  %v791_v49 = vor.u32 %v790_v27, %v786_v42  ;;  %v795_v31 = vrot.slane %v793_v0, 1 }
  0x6a   : > { %v9690_v10 = vcombine.low %v9666_v47, %v9675_v19  ;;  %2422 = vmatprep.subr.bf16.mxu1 %v13517_v53  ;;  %v801_v40 = vshrl.u32 %v9523_v8, 16  ;;  %v416_v29 = vmul.bf16 1045249613, %v336_v63  ;;  %v805_v0 = vrot.slane %v803_v45, 1 }
  0x6b   : > { %8333 = vmatpush3.bf16.msra.mxu0 %v8889_v28  ;;  %13520 = vst [vmem:[#allocation35_spill] sm:$0xff] %v9696_v3  ;;  %v338_v28 = vld [vmem:[%s9331_s12 + $0x9c] sm:$0x1]  ;;  %v9705_v2 = vcombine.low %v9671_v50, %v9684_v1  ;;  %v808_v42 = vshll.u32 %v9532_v15, 16  ;;  %v9711_v27 = vmax.bf16 %v413_v22, %v333_v38  ;;  %v494_v17 = vmax.bf16 %v414_v36, %v334_v62 }
  0x6c   : > { %13518 = vst [vmem:[#allocation34_spill] sm:$0xff] %v9690_v10  ;;  %8334 = vmatprep.subr.bf16.mxu0 %v13519_v39  ;;  %v8899_v10 = vld [vmem:[%s13314_s1 + $0x70] sm:$0xff]   ;;  %v9716_v3 = vmax.bf16 %v415_v11, %v335_v55  ;;  %v7176_v8 = vcombine.low %v9384_v41, %v9389_v43  ;;  %v9722_v45 = vsel %vm739_vm2, %v791_v49, %v795_v31  ;;  %v797_v11 = vshrl.u32 %v9454_v16, 16  ;;  %v8900_v41 = vld [vmem:[%s13314_s1 + $0x68] sm:$0xff]   ;;  %v8898_v16 = vld [vmem:[%s13314_s1 + $0x98] sm:$0xff]  }
  0x6d   : > { %13521 = vst [vmem:[#allocation36_spill] sm:$0xff] %v9705_v2  ;;  %13522 = vst [vmem:[#allocation37_spill] sm:$0xff] %v9711_v27  ;;  %2423 = vmatpush2.bf16.msra.mxu1 %v8899_v10  ;;  %v9724_v38 = vmax.bf16 %v416_v29, %v336_v63  ;;  %v812_v55 = vshrl.u32 %v9532_v15, 16  ;;  %v806_v22 = vor.u32 %v805_v0, %v801_v40  ;;  %v810_v36 = vrot.slane %v808_v42, 1  ;;  %v341_v49 = vld [vmem:[%s9331_s12 + $0xa8] sm:$0xf] }
  0x6e   : > { %1650 = vmatmul.mubr.bf16.gmra.mxu0 %v7173_v14  ;;  %v417_v14 = vmul.bf16 1045249613, %v337_v44  ;;  %13523 = vst [vmem:[#allocation38_spill] sm:$0xff] %v9716_v3  ;;  %13524 = vst [vmem:[#allocation39_spill] sm:$0xff] %v9722_v45  ;;  %2424 = vmatprep.subr.bf16.mxu1 %v13517_v53  ;;  %v9736_v63 = vcombine.low %v9711_v27, %v494_v17  ;;  %v342_v40 = vld [vmem:[%s9331_s12 + $0xac] sm:$0x1]  ;;  %v9755_v29 = vor.u32 %v797_v11, %v795_v31 }
  0x6f   : > { %8243 = vmatmul.mubr.bf16.gmra.mxu1 %v1327_v58  ;;  %1657 = vmatprep.mubr.bf16.mxu0 %v1318_v61  ;;  %v8895_v58 = vld [vmem:[%s13314_s1 + $0xa0] sm:$0xff]   ;;  %v418_v61 = vmul.bf16 1045249613, %v338_v28  ;;  %13525 = vst [vmem:[#allocation40_spill] sm:$0xff] %v9724_v38  ;;  %v9767_v0 = vsel %vm739_vm2, %v806_v22, %v810_v36  ;;  %v9769_v42 = vor.u32 %v812_v55, %v810_v36  ;;  %v343_v31 = vld [vmem:[%s9331_s12 + $0xb0] sm:$0xf]  ;;  %v1142_v5 = vunpack.c.l.b16 %v9666_v47 }
  0x70   : > { %8246 = vmatprep.mubr.msk.bf16.mxu1 %vm9176_vm0, %v13519_v39  ;;  %8335 = vmatpush3.bf16.msra.mxu0 %v8892_v60  ;;  %v9726_v62 = vmax.bf16 %v417_v14, %v337_v44  ;;  %v1059_v60 = vrot.slane %v9705_v2, 1  ;;  %v9740_v44 = vcombine.low %v9716_v3, %v9724_v38  ;;  %13526 = vst [vmem:[#allocation41_spill] sm:$0xff] %v9755_v29  ;;  %13528 = vst [vmem:[#allocation43_spill] sm:$0xff] %v9767_v0  ;;  %v344_v17 = vld [vmem:[%s9331_s12 + $0xb4] sm:$0xf]  ;;  %v8902_v36 = vld [vmem:[%s13314_s1 + $0x60] sm:$0xff]  }
  0x71   : > { %8336 = vmatprep.subr.bf16.mxu0 %v13519_v39  ;;  %v498_v10 = vmax.bf16 %v418_v61, %v338_v28  ;;  %2425 = vmatpush2.bf16.msra.mxu1 %v8900_v41  ;;  %13529 = vst [vmem:[#allocation44_spill] sm:$0xff] %v9769_v42  ;;  %v421_v11 = vmul.bf16 1045249613, %v341_v49  ;;  %v422_v55 = vmul.bf16 1045249613, %v342_v40  ;;  %v1129_v46 = vunpack.c.l.b16 %v9769_v42 }
  0x72   : > { %v1068_v28 = vrot.slane %v9740_v44, 1  ;;  %2426 = vmatprep.subr.bf16.mxu1 %v13517_v53  ;;  %v345_v38 = vld [vmem:[%s9331_s12 + $0xb8] sm:$0xf]  ;;  %v346_v3 = vld [vmem:[%s9331_s12 + $0xbc] sm:$0x1]  ;;  %v1127_v4 = vunpack.c.h.b16 %v9767_v0 }
  0x73   : > { %v9746_v15 = vcombine.low %v9726_v62, %v498_v10  ;;  %v331_v10 = vld [vmem:[%s9331_s12 + $0x80] sm:$0xf]  ;;  %v332_v43 = vld [vmem:[%s9331_s12 + $0x84] sm:$0xf]  ;;  %v423_v48 = vmul.bf16 1045249613, %v343_v31 }
  0x74   : > { %8337 = vmatpush3.bf16.msra.mxu0 %v8895_v58  ;;  %v8901_v58 = vld [vmem:[%s13314_s1 + $0x90] sm:$0xff]   ;;  %v424_v32 = vmul.bf16 1045249613, %v344_v17  ;;  %v425_v42 = vmul.bf16 1045249613, %v345_v38 }
  0x75   : > { %8338 = vmatprep.subr.bf16.mxu0 %v13519_v39  ;;  %v9758_v14 = vrot.slane %v9746_v15, 1  ;;  %2427 = vmatpush2.bf16.msra.mxu1 %v8902_v36  ;;  %v411_v36 = vmul.bf16 1045249613, %v331_v10 }
  0x76   : > { %1658 = vmatmul.mubr.bf16.gmra.mxu0 %v7176_v8  ;;  %v9764_v8 = vsel %vm1040_vm1, %v1059_v60, %v9666_v47  ;;  %2428 = vmatprep.subr.bf16.mxu1 %v13517_v53  ;;  %v9811_v47 = vmax.bf16 %v421_v11, %v341_v49 }
  0x77   : > { %8247 = vmatmul.mubr.bf16.gmra.mxu1 %v9568_v51  ;;  %1665 = vmatprep.mubr.bf16.mxu0 %v9722_v45  ;;  %13527 = vst [vmem:[#allocation42_spill] sm:$0xff] %v9764_v8  ;;  %v9772_v51 = vrot.slane %v9736_v63, 1  ;;  %v9781_v61 = vsel %vm1040_vm1, %v1068_v28, %v9758_v14  ;;  %v1160_v60 = vunpack.c.l.b16 %v9758_v14  ;;  %v7178_v28 = vcombine.low %v9755_v29, %v9767_v0 }
  0x78   : > { %8250 = vmatprep.mubr.msk.bf16.mxu1 %vm9176_vm0, %v13519_v39  ;;  %8339 = vmatpush3.bf16.msra.mxu0 %v8898_v16  ;;  %v1158_v41 = vunpack.c.h.b16 %v9781_v61  ;;  %v7183_v16 = vcombine.low %v9555_v35, %v9764_v8  ;;  %v1140_v56 = vunpack.c.h.b16 %v9764_v8  ;;  %v816_v35 = vshrl.u32 %v9529_v13, 16 }
  0x79   : > { %8340 = vmatprep.subr.bf16.mxu0 %v13519_v39  ;;  %v9789_v22 = vcombine.low %v9772_v51, %v9781_v61  ;;  %v502_v8 = vmax.bf16 %v422_v55, %v342_v40  ;;  %v9817_v0 = vmax.bf16 %v423_v48, %v343_v31  ;;  %v9819_v29 = vmax.bf16 %v424_v32, %v344_v17 }
  0x7a   : > { %v1335_v49 = vpack.c.b16 %v1142_v5, %v1140_v56  ;;  %v9823_v40 = vmax.bf16 %v425_v42, %v345_v38  ;;  %v1326_v55 = vpack.c.b16 %v1129_v46, %v1127_v4  ;;  %v9833_v31 = vmax.bf16 %v411_v36, %v331_v10  ;;  %v349_v38 = vld [vmem:[%s9331_s12 + $0xc8] sm:$0xf]  ;;  %v352_v36 = vld [vmem:[%s9331_s12 + $0xd4] sm:$0xf] }
  0x7b   : > { %13530 = vst [vmem:[#allocation45_spill] sm:$0xff] %v9789_v22  ;;  %v9804_v22 = vpack.c.b16 %v1160_v60, %v1158_v41  ;;  %v426_v60 = vmul.bf16 1045249613, %v346_v3  ;;  %v823_v41 = vshll.u32 %v9540_v20, 16  ;;  %13532 = vst [vmem:[#allocation47_spill] sm:$0xff] %v9817_v0  ;;  %v9831_v48 = vcombine.low %v9817_v0, %v9819_v29 }
  0x7c   : > { %8341 = vmatpush3.bf16.msra.mxu0 %v8901_v58  ;;  %v818_v58 = vshll.u32 %v9529_v13, 16  ;;  %13533 = vst [vmem:[#allocation48_spill] sm:$0xff] %v9819_v29  ;;  %v827_v4 = vshrl.u32 %v9540_v20, 16  ;;  %v831_v42 = vshrl.u32 %v9705_v2, 16  ;;  %v838_v17 = vshll.u32 %v9640_v6, 16 }
  0x7d   : > { %13531 = vst [vmem:[#allocation46_spill] sm:$0xff] %v9804_v22  ;;  %8342 = vmatprep.subr.bf16.mxu0 %v13519_v39  ;;  %v412_v22 = vmul.bf16 1045249613, %v332_v43  ;;  %v506_v11 = vmax.bf16 %v426_v60, %v346_v3  ;;  %v825_v5 = vrot.slane %v823_v41, 1  ;;  %v1074_v46 = vrot.slane %v9831_v48, 1 }
  0x7e   : > { %1666 = vmatmul.mubr.bf16.gmra.mxu0 %v9448_v12  ;;  %v7177_v12 = vcombine.low %v9435_v7, %v9498_v52  ;;  %v820_v32 = vrot.slane %v818_v58, 1  ;;  %v840_v34 = vrot.slane %v838_v17, 1  ;;  %v432_v25 = vmul.bf16 1045249613, %v352_v36 }
  0x7f   : > { %8251 = vmatmul.mubr.bf16.gmra.mxu1 %v7183_v16  ;;  %1673 = vmatprep.mubr.bf16.mxu0 %v7178_v28  ;;  %v833_v16 = vshll.u32 %v9705_v2, 16  ;;  %v9827_v28 = vcombine.low %v9811_v47, %v502_v8  ;;  %v9835_v52 = vmax.bf16 %v412_v22, %v332_v43  ;;  %v9838_v56 = vcombine.low %v9823_v40, %v506_v11  ;;  %v350_v8 = vld [vmem:[%s9331_s12 + $0xcc] sm:$0x1]  ;;  %v351_v22 = vld [vmem:[%s9331_s12 + $0xd0] sm:$0xf] }
  0x80   : > { %8254 = vmatprep.mubr.msk.bf16.mxu1 %vm9176_vm0, %v13519_v39  ;;  %v821_v20 = vor.u32 %v820_v32, %v816_v35  ;;  %v8904_v32 = vld [vmem:[%s13314_s1 + $0x88] sm:$0xff]   ;;  %v430_v0 = vmul.bf16 1045249613, %v350_v8  ;;  %v431_v7 = vmul.bf16 1045249613, %v351_v22  ;;  %v9901_v17 = vmax.bf16 %v432_v25, %v352_v36 }
  0x81   : > { %v9843_v3 = vrot.slane %v9838_v56, 1  ;;  %v835_v43 = vrot.slane %v833_v16, 1  ;;  %v9850_v10 = vrot.slane %v9827_v28, 1  ;;  %v9855_v60 = vcombine.low %v9833_v31, %v9835_v52  ;;  %v8903_v16 = vld [vmem:[%s13314_s1 + $0x58] sm:$0xff]   ;;  %8343 = vmatpush3.bf16.msra.mxu0 %v8904_v32  ;;  %v340_v36 = vld [vmem:[%s9331_s12 + $0xa4] sm:$0xf] }
  0x82   : > { %v9883_v2 = vsel %vm739_vm2, %v821_v20, %v825_v5  ;;  %2429 = vmatpush2.bf16.msra.mxu1 %v8903_v16  ;;  %8344 = vmatprep.subr.bf16.mxu0 %v13519_v39  ;;  %13540 = vst [vmem:[#allocation55_spill] sm:$0xff] %v9901_v17  ;;  %v8906_v16 = vld [vmem:[%s13314_s1 + $0x48] sm:$0xff]  }
  0x83   : > { %13534 = vst [vmem:[#allocation49_spill] sm:$0xff] %v9855_v60  ;;  %v9859_v58 = vsel %vm1040_vm1, %v1074_v46, %v9843_v3  ;;  %v1172_v41 = vunpack.c.l.b16 %v9843_v3  ;;  %v7180_v46 = vcombine.low %v9505_v54, %v9507_v59  ;;  %v836_v45 = vor.u32 %v835_v43, %v831_v42  ;;  %2430 = vmatprep.subr.bf16.mxu1 %v13517_v53  ;;  %v10088_v59 = vld [vmem:[%s9331_s12 + $0x104] sm:$0xf] }
  0x84   : > { %v1170_v11 = vunpack.c.h.b16 %v9859_v58  ;;  %v9869_v35 = vcombine.low %v9850_v10, %v9859_v58  ;;  %v842_v43 = vshrl.u32 %v9640_v6, 16 }
  0x86   : > { %1674 = vmatmul.mubr.bf16.gmra.mxu0 %v7177_v12  ;;  %v353_v12 = vld [vmem:[%s9331_s12 + $0xd8] sm:$0xf]  ;;  %13535 = vst [vmem:[#allocation50_spill] sm:$0xff] %v9869_v35  ;;  %v9880_v29 = vpack.c.b16 %v1172_v41, %v1170_v11  ;;  %v1065_v35 = vrot.slane %v9855_v60, 1  ;;  %v9888_v41 = vor.u32 %v827_v4, %v825_v5  ;;  %v510_v11 = vmax.bf16 %v430_v0, %v350_v8 }
  0x87   : > { %8255 = vmatmul.mubr.bf16.gmra.mxu1 %v1335_v49  ;;  %1681 = vmatprep.mubr.bf16.mxu0 %v1326_v55  ;;  %v354_v49 = vld [vmem:[%s9331_s12 + $0xdc] sm:$0x1]  ;;  %v429_v55 = vmul.bf16 1045249613, %v349_v38  ;;  %v433_v26 = vmul.bf16 1045249613, %v353_v12  ;;  %v9922_v6 = vor.u32 %v842_v43, %v840_v34 }
  0x88   : > { %8258 = vmatprep.mubr.msk.bf16.mxu1 %vm9176_vm0, %v13519_v39  ;;  %13536 = vst [vmem:[#allocation51_spill] sm:$0xff] %v9880_v29  ;;  %v434_v54 = vmul.bf16 1045249613, %v354_v49  ;;  %13537 = vst [vmem:[#allocation52_spill] sm:$0xff] %v9888_v41  ;;  %v9892_v29 = vmax.bf16 %v431_v7, %v351_v22  ;;  %v9898_v42 = vsel %vm1040_vm1, %v1065_v35, %v9772_v51  ;;  %v8905_v22 = vld [vmem:[%s13314_s1 + $0x50] sm:$0xff]   ;;  %v1154_v35 = vunpack.c.l.b16 %v9772_v51 }
  0x89   : > { %v9890_v20 = vmax.bf16 %v429_v55, %v349_v38  ;;  %13539 = vst [vmem:[#allocation54_spill] sm:$0xff] %v9898_v42  ;;  %v9903_v5 = vmax.bf16 %v433_v26, %v353_v12  ;;  %v9908_v7 = vsel %vm739_vm2, %v836_v45, %v840_v34  ;;  %v7187_v4 = vcombine.low %v9659_v24, %v9898_v42  ;;  %v339_v38 = vld [vmem:[%s9331_s12 + $0xa0] sm:$0xf] }
  0x8a   : > { %13538 = vst [vmem:[#allocation53_spill] sm:$0xff] %v9892_v29  ;;  %13541 = vst [vmem:[#allocation56_spill] sm:$0xff] %v9908_v7  ;;  %v9912_v0 = vcombine.low %v9892_v29, %v9901_v17  ;;  %v7182_v26 = vcombine.low %v9888_v41, %v9908_v7  ;;  %v419_v24 = vmul.bf16 1045249613, %v339_v38  ;;  %2431 = vmatpush2.bf16.msra.mxu1 %v8905_v22  ;;  %v1152_v34 = vunpack.c.h.b16 %v9898_v42  ;;  %v8907_v22 = vld [vmem:[%s13314_s1 + $0x40] sm:$0xff]  }
  0x8b   : > { %v9918_v25 = vcombine.low %v9890_v20, %v510_v11  ;;  %13542 = vst [vmem:[#allocation57_spill] sm:$0xff] %v9922_v6  ;;  %2432 = vmatprep.subr.bf16.mxu1 %v13517_v53  ;;  %v1141_v32 = vunpack.c.l.b16 %v9922_v6  ;;  %v853_v29 = vshll.u32 %v9645_v18, 16  ;;  %v360_v6 = vld [vmem:[%s9331_s12 + $0xf4] sm:$0xf] }
  0x8c   : > { %v1080_v8 = vrot.slane %v9912_v0, 1  ;;  %v9970_v42 = vmax.bf16 %v419_v24, %v339_v38  ;;  %v868_v38 = vshll.u32 %v9736_v63, 16 }
  0x8d   : > { %v9940_v55 = vrot.slane %v9918_v25, 1  ;;  %v855_v24 = vrot.slane %v853_v29, 1  ;;  %v872_v29 = vshrl.u32 %v9736_v63, 16 }
  0x8e   : > { %1682 = vmatmul.mubr.bf16.gmra.mxu0 %v7180_v46  ;;  %2433 = vmatpush2.bf16.msra.mxu1 %v8906_v16 }
  0x8f   : > { %8259 = vmatmul.mubr.bf16.gmra.mxu1 %v9675_v19  ;;  %1689 = vmatprep.mubr.bf16.mxu0 %v9883_v2  ;;  %v514_v19 = vmax.bf16 %v434_v54, %v354_v49  ;;  %v1139_v49 = vunpack.c.h.b16 %v9908_v7  ;;  %v848_v54 = vshll.u32 %v9634_v57, 16  ;;  %v913_v7 = vshll.u32 %v9838_v56, 16 }
  0x90   : > { %8262 = vmatprep.mubr.msk.bf16.mxu1 %vm9176_vm0, %v13519_v39  ;;  %2434 = vmatprep.subr.bf16.mxu1 %v13517_v53 }
  0x91   : > { %v9925_v45 = vcombine.low %v9903_v5, %v514_v19  ;;  %v7181_v19 = vcombine.low %v9525_v9, %v9671_v50  ;;  %v1334_v17 = vpack.c.b16 %v1141_v32, %v1139_v49  ;;  %v850_v50 = vrot.slane %v848_v54, 1 }
  0x92   : > { %2435 = vmatpush2.bf16.msra.mxu1 %v8907_v22  ;;  %v861_v49 = vshrl.u32 %v9855_v60, 16  ;;  %v7184_v54 = vcombine.low %v9684_v1, %v9609_v37 }
  0x93   : > { %v9933_v12 = vrot.slane %v9925_v45, 1  ;;  %3118 = vmatprep.subr.bf16.mxu1 %v13517_v53 }
  0x95   : > { %v9949_v46 = vsel %vm1040_vm1, %v1080_v8, %v9933_v12  ;;  %v1184_v51 = vunpack.c.l.b16 %v9933_v12 }
  0x96   : > { %1690 = vmatmul.mubr.bf16.gmra.mxu0 %v9529_v13  ;;  %v420_v13 = vmul.bf16 1045249613, %v340_v36  ;;  %v1182_v11 = vunpack.c.h.b16 %v9949_v46  ;;  %v9958_v43 = vcombine.low %v9940_v55, %v9949_v46 }
  0x97   : > { %8263 = vmatmul.mubr.bf16.gmra.mxu1 %v7187_v4  ;;  %1697 = vmatprep.mubr.bf16.mxu0 %v7182_v26  ;;  %v1343_v4 = vpack.c.b16 %v1154_v35, %v1152_v34  ;;  %v846_v26 = vshrl.u32 %v9634_v57, 16  ;;  %v863_v34 = vshll.u32 %v9855_v60, 16 }
  0x98   : > { %8266 = vmatprep.mubr.msk.bf16.mxu1 %vm9176_vm0, %v13519_v39  ;;  %13543 = vst [vmem:[#allocation58_spill] sm:$0xff] %v9958_v43  ;;  %v9963_v8 = vpack.c.b16 %v1184_v51, %v1182_v11  ;;  %v9972_v16 = vmax.bf16 %v420_v13, %v340_v36  ;;  %v347_v13 = vld [vmem:[%s9331_s12 + $0xc0] sm:$0xf]  ;;  %v348_v51 = vld [vmem:[%s9331_s12 + $0xc4] sm:$0xf] }
  0x99   : > { %v851_v36 = vor.u32 %v850_v50, %v846_v26  ;;  %v865_v32 = vrot.slane %v863_v34, 1  ;;  %v428_v26 = vmul.bf16 1045249613, %v348_v51  ;;  %v8908_v50 = vld [vmem:[%s13314_s1 + $0x80] sm:$0xff]  }
  0x9a   : > { %13544 = vst [vmem:[#allocation59_spill] sm:$0xff] %v9963_v8  ;;  %v9978_v35 = vcombine.low %v9970_v42, %v9972_v16  ;;  %v427_v8 = vmul.bf16 1045249613, %v347_v13  ;;  %8345 = vmatpush3.bf16.msra.mxu0 %v8908_v50 }
  0x9b   : > { %v866_v22 = vor.u32 %v865_v32, %v861_v49  ;;  %8454 = vmatprep.subr.bf16.mxu0 %v13519_v39 }
  0x9c   : > { %13545 = vst [vmem:[#allocation60_spill] sm:$0xff] %v9978_v35  ;;  %v1071_v11 = vrot.slane %v9978_v35, 1  ;;  %v10010_v34 = vmax.bf16 %v427_v8, %v347_v13  ;;  %v893_v13 = vshll.u32 %v9978_v35, 16  ;;  %v891_v60 = vshrl.u32 %v9978_v35, 16  ;;  %v359_v35 = vld [vmem:[%s9331_s12 + $0xf0] sm:$0xf] }
  0x9e   : > { %1698 = vmatmul.mubr.bf16.gmra.mxu0 %v7181_v19  ;;  %v870_v19 = vrot.slane %v868_v38, 1  ;;  %v10001_v1 = vsel %vm1040_vm1, %v1071_v11, %v9850_v10  ;;  %v357_v11 = vld [vmem:[%s9331_s12 + $0xe8] sm:$0xf] }
  0x9f   : > { %8267 = vmatmul.mubr.bf16.gmra.mxu1 %v1343_v4  ;;  %1705 = vmatprep.mubr.bf16.mxu0 %v1334_v17  ;;  %v857_v17 = vshrl.u32 %v9645_v18, 16  ;;  %v9991_v4 = vsel %vm739_vm2, %v851_v36, %v855_v24  ;;  %13547 = vst [vmem:[#allocation62_spill] sm:$0xff] %v10001_v1  ;;  %v878_v36 = vshll.u32 %v9740_v44, 16  ;;  %v7191_v49 = vcombine.low %v9758_v14, %v10001_v1 }
  0xa0   : > { %8270 = vmatprep.mubr.msk.bf16.mxu1 %vm9176_vm0, %v13519_v39  ;;  %13546 = vst [vmem:[#allocation61_spill] sm:$0xff] %v9991_v4  ;;  %v10008_v63 = vsel %vm739_vm2, %v866_v22, %v870_v19  ;;  %v10015_v38 = vor.u32 %v872_v29, %v870_v19  ;;  %v1164_v19 = vunpack.c.h.b16 %v10001_v1  ;;  %v358_v29 = vld [vmem:[%s9331_s12 + $0xec] sm:$0x1]  ;;  %v895_v1 = vrot.slane %v893_v13, 1 }
  0xa1   : > { %v10003_v18 = vor.u32 %v857_v17, %v855_v24  ;;  %13549 = vst [vmem:[#allocation64_spill] sm:$0xff] %v10008_v63  ;;  %v883_v24 = vshll.u32 %v9746_v15, 16  ;;  %v1166_v17 = vunpack.c.l.b16 %v9850_v10  ;;  %v1151_v14 = vunpack.c.h.b16 %v10008_v63 }
  0xa2   : > { %13550 = vst [vmem:[#allocation65_spill] sm:$0xff] %v10015_v38  ;;  %v1153_v22 = vunpack.c.l.b16 %v10015_v38  ;;  %v880_v50 = vrot.slane %v878_v36, 1  ;;  %v887_v10 = vshrl.u32 %v9746_v15, 16  ;;  %v898_v38 = vshll.u32 %v9827_v28, 16 }
  0xa3   : > { %13548 = vst [vmem:[#allocation63_spill] sm:$0xff] %v10003_v18  ;;  %v7186_v32 = vcombine.low %v10003_v18, %v10008_v63  ;;  %v885_v43 = vrot.slane %v883_v24, 1  ;;  %v7185_v36 = vcombine.low %v9621_v33, %v9833_v31  ;;  %v437_v24 = vmul.bf16 1045249613, %v357_v11 }
  0xa4   : > { %v1351_v37 = vpack.c.b16 %v1166_v17, %v1164_v19  ;;  %v1342_v15 = vpack.c.b16 %v1153_v22, %v1151_v14  ;;  %v438_v18 = vmul.bf16 1045249613, %v358_v29  ;;  %v908_v13 = vshll.u32 %v9831_v48, 16 }
  0xa5   : > { %v10055_v31 = vmax.bf16 %v437_v24, %v357_v11  ;;  %v928_v14 = vshll.u32 %v9918_v25, 16  ;;  %v439_v22 = vmul.bf16 1045249613, %v359_v35  ;;  %v915_v24 = vrot.slane %v913_v7, 1  ;;  %v10093_v7 = vld [vmem:[%s9331_s12 + $0x108] sm:$0xf] }
  0xa6   : > { %1706 = vmatmul.mubr.bf16.gmra.mxu0 %v7184_v54  ;;  %v356_v54 = vld [vmem:[%s9331_s12 + $0xe4] sm:$0xf]  ;;  %v518_v17 = vmax.bf16 %v438_v18, %v358_v29  ;;  %v362_v18 = vld [vmem:[%s9331_s12 + $0xfc] sm:$0x1]  ;;  %v900_v29 = vrot.slane %v898_v38, 1 }
  0xa7   : > { %8271 = vmatmul.mubr.bf16.gmra.mxu1 %v9781_v61  ;;  %1713 = vmatprep.mubr.bf16.mxu0 %v9991_v4  ;;  %v10012_v61 = vmax.bf16 %v428_v26, %v348_v51  ;;  %v355_v51 = vld [vmem:[%s9331_s12 + $0xe0] sm:$0xf]  ;;  %v876_v26 = vshrl.u32 %v9740_v44, 16 }
  0xa8   : > { %8274 = vmatprep.mubr.msk.bf16.mxu1 %vm9176_vm0, %v13519_v39 }
  0xa9   : > { %v10025_v8 = vcombine.low %v10010_v34, %v10012_v61  ;;  %v881_v4 = vor.u32 %v880_v50, %v876_v26  ;;  %v440_v26 = vmul.bf16 1045249613, %v360_v6  ;;  %v906_v50 = vshrl.u32 %v9831_v48, 16 }
  0xab   : > { %13551 = vst [vmem:[#allocation66_spill] sm:$0xff] %v10025_v8  ;;  %v923_v19 = vshll.u32 %v10025_v8, 16  ;;  %v10070_v11 = vsel %vm739_vm2, %v881_v4, %v885_v43  ;;  %v921_v33 = vshrl.u32 %v10025_v8, 16  ;;  %v10083_v4 = vmax.bf16 %v439_v22, %v359_v35 }
  0xac   : > { %13553 = vst [vmem:[#allocation68_spill] sm:$0xff] %v10070_v11  ;;  %v10085_v38 = vmax.bf16 %v440_v26, %v360_v6  ;;  %v442_v35 = vmul.bf16 1045249613, %v362_v18  ;;  %v444_v26 = vmul.bf16 1045249613, %v10088_v59 }
  0xad   : > { %13555 = vst [vmem:[#allocation70_spill] sm:$0xff] %v10083_v4 }
  0xae   : > { %1714 = vmatmul.mubr.bf16.gmra.mxu0 %v9634_v57  ;;  %v1077_v57 = vrot.slane %v10025_v8, 1  ;;  %13556 = vst [vmem:[#allocation71_spill] sm:$0xff] %v10085_v38  ;;  %v445_v8 = vmul.bf16 1045249613, %v10093_v7 }
  0xaf   : > { %8275 = vmatmul.mubr.bf16.gmra.mxu1 %v7191_v49  ;;  %1721 = vmatprep.mubr.bf16.mxu0 %v7186_v32  ;;  %v435_v49 = vmul.bf16 1045249613, %v355_v51  ;;  %v436_v32 = vmul.bf16 1045249613, %v356_v54 }
  0xb0   : > { %8278 = vmatprep.mubr.msk.bf16.mxu1 %vm9176_vm0, %v13519_v39 }
  0xb1   : > { %v10051_v63 = vmax.bf16 %v435_v49, %v355_v51  ;;  %v10053_v9 = vmax.bf16 %v436_v32, %v356_v54  ;;  %v7188_v51 = vcombine.low %v9835_v52, %v9711_v27  ;;  %v361_v54 = vld [vmem:[%s9331_s12 + $0xf8] sm:$0xf]  ;;  %v10074_v49 = vcombine.low %v10055_v31, %v518_v17 }
  0xb2   : > { %v10076_v32 = vor.u32 %v887_v10, %v885_v43  ;;  %v896_v52 = vor.u32 %v895_v1, %v891_v60  ;;  %v917_v27 = vshrl.u32 %v9838_v56, 16  ;;  %v925_v43 = vrot.slane %v923_v19, 1 }
  0xb3   : > { %v930_v10 = vrot.slane %v928_v14, 1  ;;  %v932_v60 = vshrl.u32 %v9918_v25, 16  ;;  %v10098_v56 = vrot.slane %v10074_v49, 1  ;;  %v441_v6 = vmul.bf16 1045249613, %v361_v54 }
  0xb4   : > { %13554 = vst [vmem:[#allocation69_spill] sm:$0xff] %v10076_v32  ;;  %v10108_v25 = vsel %vm739_vm2, %v896_v52, %v900_v29  ;;  %v943_v19 = vshll.u32 %v9925_v45, 16  ;;  %v10114_v14 = vcombine.low %v10083_v4, %v10085_v38  ;;  %v13560_v52 = vshrl.u32 %v9827_v28, 16  ;;  %v366_v28 = vld [vmem:[%s9331_s12 + $0x10c] sm:$0x1] }
  0xb5   : > { %13557 = vst [vmem:[#allocation72_spill] sm:$0xff] %v10098_v56  ;;  %13559 = vst [vmem:[#allocation74_spill] sm:$0xff] %v10108_v25  ;;  %v1163_v41 = vunpack.c.h.b16 %v10108_v25  ;;  %v10142_v38 = vmax.bf16 %v441_v6, %v361_v54  ;;  %v10167_v54 = vor.u32 %v932_v60, %v930_v10  ;;  %v10187_v6 = vmax.bf16 %v444_v26, %v10088_v59 }
  0xb6   : > { %1722 = vmatmul.mubr.bf16.gmra.mxu0 %v7185_v36  ;;  %v910_v36 = vrot.slane %v908_v13, 1  ;;  %v10105_v13 = vsel %vm1040_vm1, %v1077_v57, %v9940_v55  ;;  %v10124_v1 = vor.u32 %v13560_v52, %v900_v29  ;;  %v7189_v29 = vcombine.low %v9726_v62, %v9970_v42 }
  0xb7   : > { %8279 = vmatmul.mubr.bf16.gmra.mxu1 %v1351_v37  ;;  %1729 = vmatprep.mubr.bf16.mxu0 %v1342_v15  ;;  %v10065_v37 = vcombine.low %v10051_v63, %v10053_v9  ;;  %v10079_v15 = vld [vmem:[%s9331_s12 + $0x100] sm:$0xf]  ;;  %13558 = vst [vmem:[#allocation73_spill] sm:$0xff] %v10105_v13  ;;  %v7195_v57 = vcombine.low %v9843_v3, %v10105_v13  ;;  %v1178_v3 = vunpack.c.l.b16 %v9940_v55 }
  0xb8   : > { %8282 = vmatprep.mubr.msk.bf16.mxu1 %vm9176_vm0, %v13519_v39  ;;  %v443_v22 = vmul.bf16 1045249613, %v10079_v15  ;;  %13561 = vst [vmem:[#allocation75_spill] sm:$0xff] %v10124_v1  ;;  %v911_v55 = vor.u32 %v910_v36, %v906_v50 }
  0xb9   : > { %13552 = vst [vmem:[#allocation67_spill] sm:$0xff] %v10065_v37  ;;  %v1083_v17 = vrot.slane %v10065_v37, 1  ;;  %v951_v50 = vshrl.u32 %v10065_v37, 16 }
  0xbb   : > { %v10153_v42 = vsel %vm1040_vm1, %v1083_v17, %v10098_v56  ;;  %v1177_v17 = vunpack.c.l.b16 %v10167_v54 }
  0xbc   : > { %13562 = vst [vmem:[#allocation76_spill] sm:$0xff] %v10153_v42  ;;  %v1188_v36 = vunpack.c.h.b16 %v10153_v42 }
  0xbe   : > { %1730 = vmatmul.mubr.bf16.gmra.mxu0 %v7188_v51  ;;  %v7190_v51 = vcombine.low %v10076_v32, %v10108_v25  ;;  %v1165_v32 = vunpack.c.l.b16 %v10124_v1  ;;  %v10145_v1 = vsel %vm739_vm2, %v911_v55, %v915_v24 }
  0xbf   : > { %8283 = vmatmul.mubr.bf16.gmra.mxu1 %v9859_v58  ;;  %1737 = vmatprep.mubr.bf16.mxu0 %v10070_v11  ;;  %v938_v58 = vshll.u32 %v9912_v0, 16  ;;  %v1176_v11 = vunpack.c.h.b16 %v10105_v13  ;;  %v522_v13 = vmax.bf16 %v442_v35, %v362_v18  ;;  %v10190_v35 = vmax.bf16 %v445_v8, %v10093_v7 }
  0xc0   : > { %8286 = vmatprep.mubr.msk.bf16.mxu1 %vm9176_vm0, %v13519_v39  ;;  %v1350_v52 = vpack.c.b16 %v1165_v32, %v1163_v41  ;;  %v10147_v41 = vor.u32 %v917_v27, %v915_v24  ;;  %v7199_v27 = vcombine.low %v9933_v12, %v10153_v42  ;;  %v953_v32 = vshll.u32 %v10065_v37, 16 }
  0xc1   : > { %v940_v4 = vrot.slane %v938_v58, 1  ;;  %v1359_v58 = vpack.c.b16 %v1178_v3, %v1176_v11  ;;  %v945_v11 = vrot.slane %v943_v19, 1  ;;  %v1190_v12 = vunpack.c.l.b16 %v10098_v56  ;;  %v302_v56 = vld [vmem:[%s9331_s12 + $0xc] sm:$0x1] }
  0xc2   : > { %v13565_v19 = vshrl.u32 %v9912_v0, 16  ;;  %v955_v8 = vrot.slane %v953_v32, 1  ;;  %v7196_v7 = vcombine.low %v10012_v61, %v9890_v20  ;;  %v962_v61 = vshrl.u32 %v10074_v49, 16 }
  0xc4   : > { %v941_v3 = vor.u32 %v940_v4, %v13565_v19  ;;  %v13567_v4 = vrot.slane %v10114_v14, 1 }
  0xc6   : > { %1738 = vmatmul.mubr.bf16.gmra.mxu0 %v9740_v44  ;;  %v446_v44 = vmul.bf16 1045249613, %v366_v28  ;;  %v10213_v26 = vsel %vm739_vm2, %v941_v3, %v945_v11  ;;  %v373_v3 = vld [vmem:[%s9331_s12 + $0x128] sm:$0xf] }
  0xc7   : > { %8287 = vmatmul.mubr.bf16.gmra.mxu1 %v7195_v57  ;;  %1745 = vmatprep.mubr.bf16.mxu0 %v7190_v51  ;;  %v7192_v57 = vcombine.low %v9972_v16, %v9811_v47  ;;  %v926_v51 = vor.u32 %v925_v43, %v921_v33  ;;  %v10159_v33 = vcombine.low %v10142_v38, %v522_v13 }
  0xc8   : > { %8290 = vmatprep.mubr.msk.bf16.mxu1 %vm9176_vm0, %v13519_v39  ;;  %v7193_v43 = vcombine.low %v9823_v40, %v10010_v34  ;;  %v526_v13 = vmax.bf16 %v446_v44, %v366_v28  ;;  %v947_v28 = vshrl.u32 %v9925_v45, 16  ;;  %v367_v45 = vld [vmem:[%s9331_s12 + $0x110] sm:$0xf] }
  0xc9   : > { %v10156_v16 = vsel %vm739_vm2, %v926_v51, %v930_v10  ;;  %v10170_v18 = vrot.slane %v10159_v33, 1  ;;  %v1367_v10 = vpack.c.b16 %v1190_v12, %v1188_v36  ;;  %v369_v51 = vld [vmem:[%s9331_s12 + $0x118] sm:$0xf] }
  0xca   : > { %13563 = vst [vmem:[#allocation77_spill] sm:$0xff] %v10156_v16  ;;  %v1175_v24 = vunpack.c.h.b16 %v10156_v16  ;;  %v10201_v59 = vcombine.low %v10190_v35, %v526_v13  ;;  %v10223_v55 = vor.u32 %v947_v28, %v945_v11  ;;  %v447_v11 = vmul.bf16 1045249613, %v367_v45 }
  0xcb   : > { %13564 = vst [vmem:[#allocation78_spill] sm:$0xff] %v10170_v18  ;;  %v449_v36 = vmul.bf16 1045249613, %v369_v51 }
  0xcc   : > { %v1358_v60 = vpack.c.b16 %v1177_v17, %v1175_v24 }
  0xcd   : > { %v10257_v28 = vmax.bf16 %v449_v36, %v369_v51  ;;  %v299_v36 = vld [vmem:[%s9331_s12] sm:$0xf] }
  0xce   : > { %1746 = vmatmul.mubr.bf16.gmra.mxu0 %v7189_v29 }
  0xcf   : > { %8291 = vmatmul.mubr.bf16.gmra.mxu1 %v1359_v58  ;;  %1753 = vmatprep.mubr.bf16.mxu0 %v1350_v52  ;;  %v10218_v58 = vrot.slane %v10201_v59, 1  ;;  %v956_v52 = vor.u32 %v955_v8, %v951_v50  ;;  %v374_v8 = vld [vmem:[%s9331_s12 + $0x12c] sm:$0x1] }
  0xd0   : > { %8294 = vmatprep.mubr.msk.bf16.mxu1 %vm9176_vm0, %v13519_v39 }
  0xd1   : > { %13569 = vst [vmem:[#allocation81_spill] sm:$0xff] %v10218_v58  ;;  %v1202_v13 = vunpack.c.l.b16 %v10218_v58 }
  0xd6   : > { %1754 = vmatmul.mubr.bf16.gmra.mxu0 %v7192_v57  ;;  %v368_v57 = vld [vmem:[%s9331_s12 + $0x114] sm:$0xf] }
  0xd7   : > { %8295 = vmatmul.mubr.bf16.gmra.mxu1 %v9949_v46  ;;  %1761 = vmatprep.mubr.bf16.mxu0 %v10145_v1  ;;  %v7194_v46 = vcombine.low %v10147_v41, %v10156_v16  ;;  %v448_v32 = vmul.bf16 1045249613, %v368_v57 }
  0xd8   : > { %8298 = vmatprep.mubr.msk.bf16.mxu1 %vm9176_vm0, %v13519_v39 }
  0xde   : > { %1762 = vmatmul.mubr.bf16.gmra.mxu0 %v9831_v48  ;;  %v10184_v48 = vmax.bf16 %v443_v22, %v10079_v15  ;;  %v958_v15 = vshll.u32 %v10074_v49, 16  ;;  %v10210_v22 = vsel %vm1040_vm1, %v13567_v4, %v10170_v18  ;;  %v10255_v4 = vmax.bf16 %v448_v32, %v368_v57 }
  0xdf   : > { %8299 = vmatmul.mubr.bf16.gmra.mxu1 %v7199_v27  ;;  %1769 = vmatprep.mubr.bf16.mxu0 %v7194_v46  ;;  %13568 = vst [vmem:[#allocation80_spill] sm:$0xff] %v10210_v22  ;;  %v370_v46 = vld [vmem:[%s9331_s12 + $0x11c] sm:$0x1]  ;;  %v973_v32 = vshll.u32 %v10159_v33, 16 }
  0xe0   : > { %8302 = vmatprep.mubr.msk.bf16.mxu1 %vm9176_vm0, %v13519_v39  ;;  %v10198_v34 = vcombine.low %v10184_v48, %v10187_v6  ;;  %v960_v44 = vrot.slane %v958_v15, 1  ;;  %v450_v17 = vmul.bf16 1045249613, %v370_v46  ;;  %13573 = vst [vmem:[#allocation85_spill] sm:$0xff] %v10255_v4 }
  0xe2   : > { %13566 = vst [vmem:[#allocation79_spill] sm:$0xff] %v10198_v34  ;;  %v1089_v29 = vrot.slane %v10198_v34, 1  ;;  %v10235_v49 = vsel %vm739_vm2, %v956_v52, %v960_v44  ;;  %v10238_v50 = vor.u32 %v962_v61, %v960_v44  ;;  %v968_v52 = vshll.u32 %v10114_v14, 16 }
  0xe3   : > { %13571 = vst [vmem:[#allocation83_spill] sm:$0xff] %v10235_v49  ;;  %v7198_v24 = vcombine.low %v10223_v55, %v10235_v49  ;;  %v1187_v19 = vunpack.c.h.b16 %v10235_v49 }
  0xe4   : > { %v10232_v27 = vsel %vm1040_vm1, %v1089_v29, %v10218_v58  ;;  %v1189_v15 = vunpack.c.l.b16 %v10238_v50  ;;  %v530_v29 = vmax.bf16 %v450_v17, %v370_v46  ;;  %v454_v58 = vmul.bf16 1045249613, %v374_v8 }
  0xe5   : > { %13570 = vst [vmem:[#allocation82_spill] sm:$0xff] %v10232_v27  ;;  %v7203_v12 = vcombine.low %v10170_v18, %v10232_v27  ;;  %v966_v46 = vshrl.u32 %v10114_v14, 16  ;;  %v970_v17 = vrot.slane %v968_v52, 1 }
  0xe6   : > { %1770 = vmatmul.mubr.bf16.gmra.mxu0 %v7193_v43  ;;  %v371_v43 = vld [vmem:[%s9331_s12 + $0x120] sm:$0xf]  ;;  %v1366_v51 = vpack.c.b16 %v1189_v15, %v1187_v19  ;;  %v983_v19 = vshll.u32 %v10198_v34, 16  ;;  %v379_v15 = vmul.bf16 1045249613, %v299_v36 }
  0xe7   : > { %8303 = vmatmul.mubr.bf16.gmra.mxu1 %v1367_v10  ;;  %1777 = vmatprep.mubr.bf16.mxu0 %v1358_v60  ;;  %v372_v10 = vld [vmem:[%s9331_s12 + $0x124] sm:$0xf]  ;;  %v1200_v60 = vunpack.c.h.b16 %v10232_v27  ;;  %v451_v44 = vmul.bf16 1045249613, %v371_v43 }
  0xe8   : > { %8306 = vmatprep.mubr.msk.bf16.mxu1 %vm9176_vm0, %v13519_v39  ;;  %v452_v61 = vmul.bf16 1045249613, %v372_v10  ;;  %v985_v52 = vrot.slane %v983_v19, 1 }
  0xe9   : > { %v1375_v57 = vpack.c.b16 %v1202_v13, %v1200_v60  ;;  %v10275_v27 = vmax.bf16 %v451_v44, %v371_v43  ;;  %v534_v13 = vmax.bf16 %v454_v58, %v374_v8  ;;  %v981_v8 = vshrl.u32 %v10198_v34, 16 }
  0xea   : > { %v988_v44 = vshll.u32 %v10201_v59, 16 }
  0xeb   : > { %v986_v42 = vor.u32 %v985_v52, %v981_v8 }
  0xee   : > { %1778 = vmatmul.mubr.bf16.gmra.mxu0 %v7196_v7  ;;  %v10253_v7 = vmax.bf16 %v447_v11, %v367_v45  ;;  %v7197_v45 = vcombine.low %v9903_v5, %v10051_v63  ;;  %v10277_v63 = vmax.bf16 %v452_v61, %v372_v10  ;;  %v971_v10 = vor.u32 %v970_v17, %v966_v46 }
  0xef   : > { %8307 = vmatmul.mubr.bf16.gmra.mxu1 %v10210_v22  ;;  %1785 = vmatprep.mubr.bf16.mxu0 %v10213_v26  ;;  %v975_v22 = vrot.slane %v973_v32, 1  ;;  %v977_v17 = vshrl.u32 %v10159_v33, 16 }
  0xf0   : > { %8310 = vmatprep.mubr.msk.bf16.mxu1 %vm9176_vm0, %v13519_v39  ;;  %13572 = vst [vmem:[#allocation84_spill] sm:$0xff] %v10253_v7  ;;  %v10266_v11 = vcombine.low %v10253_v7, %v10255_v4  ;;  %v301_v4 = vld [vmem:[%s9331_s12 + $0x8] sm:$0xf] }
  0xf1   : > { %v381_v61 = vmul.bf16 1045249613, %v301_v4  ;;  %v10306_v32 = vsel %vm739_vm2, %v971_v10, %v975_v22  ;;  %v10321_v33 = vor.u32 %v977_v17, %v975_v22 }
  0xf6   : > { %1786 = vmatmul.mubr.bf16.gmra.mxu0 %v9912_v0  ;;  %v453_v0 = vmul.bf16 1045249613, %v373_v3 }
  0xf7   : > { %8311 = vmatmul.mubr.bf16.gmra.mxu1 %v7203_v12  ;;  %1793 = vmatprep.mubr.bf16.mxu0 %v7198_v24  ;;  %v300_v12 = vld [vmem:[%s9331_s12 + $0x4] sm:$0xf]  ;;  %v10273_v24 = vcombine.low %v10257_v28, %v530_v29  ;;  %v1092_v29 = vrot.slane %v10266_v11, 1 }
  0xf8   : > { %8314 = vmatprep.mubr.msk.bf16.mxu1 %vm9176_vm0, %v13519_v39  ;;  %v10279_v60 = vmax.bf16 %v453_v0, %v373_v3  ;;  %v380_v18 = vmul.bf16 1045249613, %v300_v12  ;;  %v10290_v3 = vcombine.low %v10275_v27, %v10277_v63  ;;  %v382_v0 = vmul.bf16 1045249613, %v302_v56 }
  0xf9   : > { %v10286_v43 = vrot.slane %v10273_v24, 1 }
  0xfa   : > { %13574 = vst [vmem:[#allocation86_spill] sm:$0xff] %v10279_v60  ;;  %13576 = vst [vmem:[#allocation88_spill] sm:$0xff] %v10290_v3  ;;  %v10295_v58 = vcombine.low %v10279_v60, %v534_v13  ;;  %v1095_v13 = vrot.slane %v10290_v3, 1  ;;  %v1013_v34 = vshll.u32 %v10290_v3, 16 }
  0xfb   : > { %13575 = vst [vmem:[#allocation87_spill] sm:$0xff] %v10286_v43  ;;  %v10303_v46 = vsel %vm1040_vm1, %v1092_v29, %v10286_v43  ;;  %v992_v29 = vshrl.u32 %v10201_v59, 16 }
  0xfc   : > { %13577 = vst [vmem:[#allocation89_spill] sm:$0xff] %v10303_v46  ;;  %v10311_v19 = vrot.slane %v10295_v58, 1 }
  0xfe   : > { %1794 = vmatmul.mubr.bf16.gmra.mxu0 %v7197_v45  ;;  %v459_v45 = vmax.bf16 %v379_v15, %v299_v36  ;;  %13578 = vst [vmem:[#allocation90_spill] sm:$0xff] %v10311_v19  ;;  %v990_v36 = vrot.slane %v988_v44, 1 }
  0xff   : > { %8315 = vmatmul.mubr.bf16.gmra.mxu1 %v1375_v57  ;;  %1801 = vmatprep.mubr.bf16.mxu0 %v1366_v51  ;;  %v460_v57 = vmax.bf16 %v380_v18, %v300_v12  ;;  %v7200_v51 = vcombine.low %v10053_v9, %v10055_v31  ;;  %v10313_v18 = vmax.bf16 %v381_v61, %v301_v4 }
 0x100   : > { %8318 = vmatprep.mubr.msk.bf16.mxu1 %vm9176_vm0, %v13519_v39  ;;  %v462_v12 = vmax.bf16 %v382_v0, %v302_v56  ;;  %v10328_v4 = vsel %vm1040_vm1, %v1095_v13, %v10311_v19  ;;  %v10331_v56 = vsel %vm739_vm2, %v986_v42, %v990_v36  ;;  %v10343_v61 = vor.u32 %v992_v29, %v990_v36 }
 0x101   : > { %v10315_v9 = vcombine.low %v459_v45, %v460_v57  ;;  %13579 = vst [vmem:[#allocation91_spill] sm:$0xff] %v10328_v4  ;;  %13580 = vst [vmem:[#allocation92_spill] sm:$0xff] %v10331_v56  ;;  %v7207_v59 = vcombine.low %v10286_v43, %v10328_v4  ;;  %v7202_v44 = vcombine.low %v10321_v33, %v10331_v56  ;;  %v1260_v17 = vunpack.c.h.b16 %v10328_v4 }
 0x102   : > { %v10334_v10 = vcombine.low %v10313_v18, %v462_v12  ;;  %13581 = vst [vmem:[#allocation93_spill] sm:$0xff] %v10343_v61  ;;  %v1262_v13 = vunpack.c.l.b16 %v10311_v19  ;;  %v1199_v12 = vunpack.c.h.b16 %v10331_v56  ;;  %v1201_v36 = vunpack.c.l.b16 %v10343_v61 }
 0x103   : > { %v743_v52 = vshll.u32 %v10315_v9, 16  ;;  %v741_v42 = vshrl.u32 %v10315_v9, 16  ;;  %v998_v29 = vshll.u32 %v10266_v11, 16  ;;  %v1003_v19 = vshll.u32 %v10273_v24, 16 }
 0x104   : > { %v748_v57 = vshll.u32 %v10334_v10, 16  ;;  %v1374_v4 = vpack.c.b16 %v1201_v36, %v1199_v12  ;;  %v996_v43 = vshrl.u32 %v10266_v11, 16  ;;  %v752_v7 = vshrl.u32 %v10334_v10, 16 }
 0x105   : > { %v745_v45 = vrot.slane %v743_v52, 1  ;;  %v1015_v12 = vrot.slane %v1013_v34, 1  ;;  %v1018_v36 = vshll.u32 %v10295_v58, 16  ;;  %v8909_v34 = vld [vmem:[%s13314_s1 + $0x1b8] sm:$0xff]  }
 0x106   : > { %1802 = vmatmul.mubr.bf16.gmra.mxu0 %v7200_v51 }
 0x107   : > { %v10317_v15 = vpop.f32.mrf.mxu1  ;;  %8319 = vmatmul.mubr.bf16.gmra.mxu1 %v10303_v46  ;;  %1809 = vmatprep.mubr.bf16.mxu0 %v10306_v32  ;;  %v746_v52 = vor.u32 %v745_v45, %v741_v42  ;;  %v1000_v46 = vrot.slane %v998_v29, 1 }
 0x108   : > { %8322 = vmatprep.mubr.msk.bf16.mxu1 %vm9176_vm0, %v13519_v39 }
 0x109   : > { %v8224_v8 = vpop.f32.mrf.mxu1 }
 0x10b   : > { %v10337_v22 = vpop.f32.mrf.mxu1 }
 0x10d   : > { %v8225_v0 = vpop.f32.mrf.mxu1 }
 0x10e   : > { %1810 = vmatmul.mubr.bf16.gmra.mxu0 %v10114_v14  ;;  %v750_v14 = vrot.slane %v748_v57, 1  ;;  %v1383_v0 = vpack.c.b16 %v1262_v13, %v1260_v17  ;;  %v1011_v57 = vshrl.u32 %v10290_v3, 16  ;;  %v1001_v17 = vor.u32 %v1000_v46, %v996_v43  ;;  %v13601_v3 = vld [vmem:[#allocation13_spill] sm:$0xff] }
 0x10f   : > { %v10348_v51 = vpop.f32.mrf.mxu1  ;;  %8323 = vmatmul.mubr.bf16.gmra.mxu1 %v7207_v59  ;;  %1817 = vmatprep.mubr.bf16.mxu0 %v7202_v44  ;;  %v7201_v59 = vcombine.low %v10142_v38, %v10184_v48  ;;  %v1005_v48 = vrot.slane %v1003_v19, 1  ;;  %v1109_v46 = vunpack.c.h.b16 %v9472_v30 }
 0x110   : > { %8326 = vmatprep.mubr.msk.bf16.mxu1 %vm9176_vm0, %v13519_v39  ;;  %v751_v42 = vsel %vm739_vm2, %v746_v52, %v750_v14  ;;  %v754_v13 = vor.u32 %v752_v7, %v750_v14  ;;  %v1007_v52 = vshrl.u32 %v10273_v24, 16  ;;  %v1022_v24 = vshrl.u32 %v10295_v58, 16 }
 0x111   : > { %v8228_v8 = vpop.f32.mrf.mxu1  ;;  %v7233_v58 = vcombine.low %v10313_v18, %v9356_v23 }
 0x112   : > { %v7234_v19 = vcombine.low %v754_v13, %v9472_v30 }
 0x113   : > { %v10359_v44 = vpop.f32.mrf.mxu1 }
 0x115   : > { %v8229_v61 = vpop.f32.mrf.mxu1 }
 0x116   : > { %1818 = vmatmul.mubr.bf16.gmra.mxu0 %v7201_v59  ;;  %v7204_v61 = vcombine.low %v10187_v6, %v10190_v35  ;;  %v10376_v59 = vsel %vm739_vm2, %v1001_v17, %v1005_v48  ;;  %v10386_v6 = vor.u32 %v1007_v52, %v1005_v48 }
 0x117   : > { %v10366_v45 = vpop.f32.mrf.mxu1  ;;  %8327 = vmatmul.mubr.bf16.gmra.mxu1 %v1383_v0  ;;  %1825 = vmatprep.mubr.bf16.mxu0 %v1374_v4  ;;  %v1016_v4 = vor.u32 %v1015_v12, %v1011_v57  ;;  %v1020_v0 = vrot.slane %v1018_v36, 1  ;;  %v8911_v57 = vld [vmem:[%s13314_s1 + $0x1b0] sm:$0xff]  }
 0x118   : > { %2436 = vmatprep.mubr.bf16.mxu1 %v751_v42  ;;  %v1111_v42 = vunpack.c.l.b16 %v9602_v21  ;;  %v8912_v21 = vld [vmem:[%s13314_s1 + $0x1a8] sm:$0xff]  }
 0x119   : > { %v8232_v29 = vpop.f32.mrf.mxu1  ;;  %v10391_v14 = vsel %vm739_vm2, %v1016_v4, %v1020_v0  ;;  %v10404_v13 = vor.u32 %v1022_v24, %v1020_v0  ;;  %v8914_v4 = vld [vmem:[%s13314_s1 + $0x1a0] sm:$0xff]   ;;  %v13584_v24 = vld [vmem:[#allocation9_spill] sm:$0xff] }
 0x11a   : > { %13582 = vst [vmem:[#allocation94_spill] sm:$0xff] %v10391_v14  ;;  %v7206_v30 = vcombine.low %v10386_v6, %v10391_v14  ;;  %v2113_v12 = vpack.c.b16 %v1111_v42, %v1109_v46  ;;  %v1259_v18 = vunpack.c.h.b16 %v10391_v14  ;;  %v13585_v46 = vld [vmem:[#allocation8_spill] sm:$0xff] }
 0x11b   : > { %v10372_v8 = vpop.f32.mrf.mxu1  ;;  %13583 = vst [vmem:[#allocation95_spill] sm:$0xff] %v10404_v13  ;;  %v1261_v52 = vunpack.c.l.b16 %v10404_v13  ;;  %v7236_v42 = vcombine.low %v13585_v46, %v13584_v24  ;;  %v8918_v46 = vld [vmem:[%s13314_s1 + $0x188] sm:$0xff]  }
 0x11d   : > { %v8233_v7 = vpop.f32.mrf.mxu1 }
 0x11e   : > { %1826 = vmatmul.mubr.bf16.gmra.mxu0 %v7204_v61 }
 0x11f   : > { %v10382_v43 = vpop.f32.mrf.mxu1  ;;  %2437 = vmatmul.mubr.bf16.vlgmr.msra.gmra.mxu1 %v10315_v9  ;;  %1833 = vmatprep.mubr.bf16.mxu0 %v10376_v59 }
 0x120   : > { %2444 = vmatprep.mubr.bf16.mxu1 %v7234_v19  ;;  %3119 = vmatpush1.bf16.msra.mxu1 %v8909_v34 }
 0x121   : > { %v8236_v17 = vpop.f32.mrf.mxu1  ;;  %3120 = vmatprep.subr.bf16.mxu1 %v13517_v53 }
 0x123   : > { %v10398_v48 = vpop.f32.mrf.mxu1 }
 0x124   : > { %3121 = vmatpush1.bf16.msra.mxu1 %v8911_v57  ;;  %v1382_v57 = vpack.c.b16 %v1261_v52, %v1259_v18 }
 0x125   : > { %v8237_v36 = vpop.f32.mrf.mxu1  ;;  %3122 = vmatprep.subr.bf16.mxu1 %v13517_v53 }
 0x126   : > { %v1643_v29 = vpop.f32.mrf.mxu0  ;;  %1834 = vmatmul.mubr.bf16.gmra.mxu0 %v10266_v11  ;;  %v13586_v36 = vld [vmem:[#allocation28_spill] sm:$0xff] }
 0x127   : > { %v10412_v61 = vadd.f32 %v10317_v15, %v1643_v29  ;;  %v10414_v23 = vpop.f32.mrf.mxu1  ;;  %2445 = vmatmul.mubr.bf16.gmra.mxu1 %v7233_v58  ;;  %1841 = vmatprep.mubr.bf16.mxu0 %v7206_v30  ;;  %v7205_v15 = vcombine.low %v10257_v28, %v10275_v27  ;;  %v8915_v58 = vld [vmem:[%s13314_s1 + $0x198] sm:$0xff]   ;;  %v8917_v29 = vld [vmem:[%s13314_s1 + $0x190] sm:$0xff]  }
 0x128   : > { %v1645_v19 = vpop.f32.mrf.mxu0  ;;  %2452 = vmatprep.mubr.bf16.mxu1 %v2113_v12  ;;  %3123 = vmatpush1.bf16.msra.mxu1 %v8912_v21 }
 0x129   : > { %v8240_v0 = vpop.f32.mrf.mxu1  ;;  %3124 = vmatprep.subr.bf16.mxu1 %v13517_v53 }
 0x12a   : > { %v1646_v11 = vpop.f32.mrf.mxu0 }
 0x12b   : > { %v10425_v34 = vadd.f32 %v10337_v22, %v1646_v11  ;;  %v10427_v7 = vpop.f32.mrf.mxu1  ;;  %v13587_v11 = vld [vmem:[#allocation39_spill] sm:$0xff] }
 0x12c   : > { %v1648_v17 = vpop.f32.mrf.mxu0  ;;  %3125 = vmatpush1.bf16.msra.mxu1 %v8914_v4 }
 0x12d   : > { %v8241_v30 = vpop.f32.mrf.mxu1  ;;  %3126 = vmatprep.subr.bf16.mxu1 %v13517_v53 }
 0x12e   : > { %v1651_v12 = vpop.f32.mrf.mxu0  ;;  %1842 = vmatmul.mubr.bf16.gmra.mxu0 %v7205_v15  ;;  %v13588_v15 = vld [vmem:[#allocation29_spill] sm:$0xff]  ;;  %v1041_v30 = vrot.slane %v10315_v9, 1 }
 0x12f   : > { %v10436_v27 = vadd.f32 %v10348_v51, %v1651_v12  ;;  %v10438_v22 = vpop.f32.mrf.mxu1  ;;  %2453 = vmatmul.mubr.bf16.gmra.mxu1 %v7236_v42  ;;  %1849 = vmatprep.mubr.bf16.mxu0 %v1382_v57  ;;  %v7208_v51 = vcombine.low %v10277_v63, %v10279_v60  ;;  %v10454_v24 = vcombine.low %v13588_v15, %v13587_v11  ;;  %v1042_v63 = vrot.slane %v10334_v10, 1  ;;  %v8920_v10 = vld [vmem:[%s13314_s1 + $0x180] sm:$0xff]  }
 0x130   : > { %v1653_v21 = vpop.f32.mrf.mxu0  ;;  %2460 = vmatprep.mubr.bf16.mxu1 %v13586_v36  ;;  %3127 = vmatpush1.bf16.msra.mxu1 %v8915_v58  ;;  %v13589_v58 = vld [vmem:[#allocation12_spill] sm:$0xff]  ;;  %v1121_v12 = vunpack.c.h.b16 %v13587_v11  ;;  %v13592_v11 = vld [vmem:[#allocation10_spill] sm:$0xff] }
 0x131   : > { %v8244_v18 = vpop.f32.mrf.mxu1  ;;  %3128 = vmatprep.subr.bf16.mxu1 %v13517_v53 }
 0x132   : > { %v1654_v52 = vpop.f32.mrf.mxu0 }
 0x133   : > { %v10448_v19 = vadd.f32 %v10359_v44, %v1654_v52  ;;  %v10450_v4 = vpop.f32.mrf.mxu1 }
 0x134   : > { %v1656_v0 = vpop.f32.mrf.mxu0  ;;  %3129 = vmatpush1.bf16.msra.mxu1 %v8917_v29  ;;  %v13590_v29 = vld [vmem:[#allocation41_spill] sm:$0xff] }
 0x135   : > { %v8245_v42 = vpop.f32.mrf.mxu1  ;;  %3130 = vmatprep.subr.bf16.mxu1 %v13517_v53  ;;  %v1123_v18 = vunpack.c.l.b16 %v13590_v29  ;;  %v13591_v0 = vld [vmem:[#allocation14_spill] sm:$0xff] }
 0x136   : > { %v1659_v57 = vpop.f32.mrf.mxu0  ;;  %1850 = vmatmul.mubr.bf16.gmra.mxu0 %v7208_v51  ;;  %v10484_v15 = vcombine.low %v13592_v11, %v13591_v0  ;;  %v1043_v42 = vsel %vm1040_vm1, %v1041_v30, %v1042_v63  ;;  %v13593_v0 = vld [vmem:[#allocation11_spill] sm:$0xff] }
 0x137   : > { %v10462_v44 = vadd.f32 %v10366_v45, %v1659_v57  ;;  %v10464_v17 = vpop.f32.mrf.mxu1  ;;  %2461 = vmatmul.mubr.bf16.gmra.mxu1 %v13589_v58  ;;  %8346 = vmatprep.mubr.msk.bf16.mxu0 %vm9176_vm0, %v13519_v39  ;;  %v7235_v11 = vcombine.low %v1042_v63, %v13593_v0  ;;  %v8916_v63 = vld [vmem:[%s13314_s1 + $0x228] sm:$0xff]  }
 0x138   : > { %v1661_v21 = vpop.f32.mrf.mxu0  ;;  %2468 = vmatprep.mubr.bf16.mxu1 %v10454_v24  ;;  %3131 = vmatpush1.bf16.msra.mxu1 %v8918_v46  ;;  %v8910_v46 = vld [vmem:[%s13314_s1 + $0x238] sm:$0xff]  }
 0x139   : > { %v8248_v45 = vpop.f32.mrf.mxu1  ;;  %3132 = vmatprep.subr.bf16.mxu1 %v13517_v53  ;;  %v10490_v21 = vpack.c.b16 %v1123_v18, %v1121_v12  ;;  %v8913_v12 = vld [vmem:[%s13314_s1 + $0x230] sm:$0xff]  }
 0x13a   : > { %v1662_v52 = vpop.f32.mrf.mxu0 }
 0x13b   : > { %v10478_v51 = vadd.f32 %v10372_v8, %v1662_v52  ;;  %v10480_v9 = vpop.f32.mrf.mxu1  ;;  %v8921_v8 = vld [vmem:[%s13314_s1 + $0x1f8] sm:$0xff]  }
 0x13c   : > { %v1664_v57 = vpop.f32.mrf.mxu0  ;;  %3133 = vmatpush1.bf16.msra.mxu1 %v8920_v10 }
 0x13d   : > { %v8249_v29 = vpop.f32.mrf.mxu1  ;;  %3134 = vmatprep.subr.bf16.mxu1 %v13517_v53 }
 0x13e   : > { %v1667_v45 = vpop.f32.mrf.mxu0  ;;  %8347 = vmatmul.mubr.bf16.vlgmr.msra.gmra.mxu0 %v1043_v42  ;;  %v13594_v29 = vld [vmem:[#allocation16_spill] sm:$0xff] }
 0x13f   : > { %v10497_v52 = vadd.f32 %v10382_v43, %v1667_v45  ;;  %v10499_v30 = vpop.f32.mrf.mxu1  ;;  %2469 = vmatmul.mubr.bf16.gmra.mxu1 %v10484_v15  ;;  %8455 = vmatpush3.bf16.msra.mxu0 %v8910_v46  ;;  %v8923_v43 = vld [vmem:[%s13314_s1 + $0x1f0] sm:$0xff]   ;;  %v13595_v45 = vld [vmem:[#allocation15_spill] sm:$0xff] }
 0x140   : > { %v1669_v18 = vpop.f32.mrf.mxu0  ;;  %2476 = vmatprep.mubr.bf16.mxu1 %v10490_v21  ;;  %8350 = vmatprep.mubr.msk.bf16.mxu0 %vm9176_vm0, %v13519_v39 }
 0x141   : > { %v8252_v10 = vpop.f32.mrf.mxu1  ;;  %8456 = vmatprep.subr.bf16.mxu0 %v13519_v39  ;;  %3135 = vmatpush2.bf16.msra.mxu1 %v8921_v8  ;;  %v10521_v18 = vcombine.low %v13595_v45, %v13594_v29 }
 0x142   : > { %v1670_v42 = vpop.f32.mrf.mxu0  ;;  %3136 = vmatprep.subr.bf16.mxu1 %v13517_v53 }
 0x143   : > { %v10515_v46 = vadd.f32 %v10398_v48, %v1670_v42  ;;  %v10517_v57 = vpop.f32.mrf.mxu1  ;;  %13596 = vst [vmem:[#allocation9_spill] sm:$0xff] %v10521_v18  ;;  %8457 = vmatpush3.bf16.msra.mxu0 %v8913_v12  ;;  %v8924_v12 = vld [vmem:[%s13314_s1 + $0x1e8] sm:$0xff]  }
 0x144   : > { %v1672_v8 = vpop.f32.mrf.mxu0  ;;  %8458 = vmatprep.subr.bf16.mxu0 %v13519_v39 }
 0x145   : > { %v8253_v10 = vpop.f32.mrf.mxu1  ;;  %3137 = vmatpush2.bf16.msra.mxu1 %v8923_v43  ;;  %v13597_v43 = vld [vmem:[#allocation43_spill] sm:$0xff] }
 0x146   : > { %v1675_v0 = vpop.f32.mrf.mxu0  ;;  %8351 = vmatmul.mubr.bf16.gmra.mxu0 %v7235_v11  ;;  %3138 = vmatprep.subr.bf16.mxu1 %v13517_v53 }
 0x147   : > { %v10529_v48 = vadd.f32 %v10414_v23, %v1675_v0  ;;  %v10531_v42 = vpop.f32.mrf.mxu1  ;;  %2477 = vmatmul.mubr.bf16.gmra.mxu1 %v10521_v18  ;;  %8354 = vmatprep.mubr.msk.bf16.mxu0 %vm9176_vm0, %v13519_v39  ;;  %v8919_v23 = vld [vmem:[%s13314_s1 + $0x220] sm:$0xff]  }
 0x148   : > { %v1677_v29 = vpop.f32.mrf.mxu0  ;;  %2484 = vmatprep.mubr.bf16.mxu1 %v13597_v43  ;;  %8459 = vmatpush3.bf16.msra.mxu0 %v8916_v63 }
 0x149   : > { %v8256_v11 = vpop.f32.mrf.mxu1  ;;  %8460 = vmatprep.subr.bf16.mxu0 %v13519_v39  ;;  %3139 = vmatpush2.bf16.msra.mxu1 %v8924_v12  ;;  %v13599_v29 = vld [vmem:[#allocation44_spill] sm:$0xff] }
 0x14a   : > { %v1678_v45 = vpop.f32.mrf.mxu0  ;;  %3140 = vmatprep.subr.bf16.mxu1 %v13517_v53  ;;  %v10552_v63 = vcombine.low %v13599_v29, %v9883_v2  ;;  %v8922_v11 = vld [vmem:[%s13314_s1 + $0x218] sm:$0xff]  }
 0x14b   : > { %v10546_v8 = vadd.f32 %v10427_v7, %v1678_v45  ;;  %v10548_v10 = vpop.f32.mrf.mxu1 }
 0x14c   : > { %v1680_v0 = vpop.f32.mrf.mxu0  ;;  %13600 = vst [vmem:[#allocation28_spill] sm:$0xff] %v10552_v63  ;;  %8461 = vmatpush3.bf16.msra.mxu0 %v8919_v23  ;;  %v1133_v23 = vunpack.c.h.b16 %v9883_v2  ;;  %v13606_v2 = vld [vmem:[#allocation21_spill] sm:$0xff] }
 0x14d   : > { %13598 = vst [vmem:[#allocation8_spill] sm:$0xff] %v10546_v8  ;;  %v8257_v60 = vpop.f32.mrf.mxu1  ;;  %8462 = vmatprep.subr.bf16.mxu0 %v13519_v39  ;;  %v13603_v0 = vld [vmem:[#allocation23_spill] sm:$0xff] }
 0x14e   : > { %v1683_v12 = vpop.f32.mrf.mxu0  ;;  %8355 = vmatmul.mubr.bf16.gmra.mxu0 %v13601_v3  ;;  %v13604_v60 = vld [vmem:[#allocation52_spill] sm:$0xff]  ;;  %v8925_v3 = vld [vmem:[%s13314_s1 + $0x210] sm:$0xff]   ;;  %v13631_v8 = vld [vmem:[#allocation27_spill] sm:$0xff] }
 0x14f   : > { %v10560_v7 = vadd.f32 %v10438_v22, %v1683_v12  ;;  %v10562_v45 = vpop.f32.mrf.mxu1  ;;  %2485 = vmatmul.mubr.bf16.gmra.mxu1 %v13603_v0  ;;  %8358 = vmatprep.mubr.msk.bf16.mxu0 %vm9176_vm0, %v13519_v39  ;;  %v1135_v13 = vunpack.c.l.b16 %v13604_v60 }
 0x150   : > { %v1685_v29 = vpop.f32.mrf.mxu0  ;;  %2492 = vmatprep.mubr.bf16.mxu1 %v10552_v63  ;;  %8463 = vmatpush3.bf16.msra.mxu0 %v8922_v11 }
 0x151   : > { %13602 = vst [vmem:[#allocation39_spill] sm:$0xff] %v10560_v7  ;;  %v8260_v22 = vpop.f32.mrf.mxu1  ;;  %8464 = vmatprep.subr.bf16.mxu0 %v13519_v39  ;;  %v13607_v29 = vld [vmem:[#allocation20_spill] sm:$0xff]  ;;  %v10583_v60 = vpack.c.b16 %v1135_v13, %v1133_v23 }
 0x152   : > { %v1686_v12 = vpop.f32.mrf.mxu0  ;;  %v10581_v43 = vcombine.low %v13607_v29, %v13606_v2  ;;  %v8926_v22 = vld [vmem:[%s13314_s1 + $0x1e0] sm:$0xff]   ;;  %v13614_v2 = vld [vmem:[#allocation22_spill] sm:$0xff] }
 0x153   : > { %v10575_v14 = vadd.f32 %v10450_v4, %v1686_v12  ;;  %v10577_v0 = vpop.f32.mrf.mxu1  ;;  %13609 = vst [vmem:[#allocation41_spill] sm:$0xff] %v10583_v60  ;;  %v13610_v4 = vld [vmem:[#allocation17_spill] sm:$0xff]  ;;  %3141 = vmatpush2.bf16.msra.mxu1 %v8926_v22 }
 0x154   : > { %13608 = vst [vmem:[#allocation12_spill] sm:$0xff] %v10581_v43  ;;  %v1688_v63 = vpop.f32.mrf.mxu0  ;;  %8465 = vmatpush3.bf16.msra.mxu0 %v8925_v3  ;;  %3142 = vmatprep.subr.bf16.mxu1 %v13517_v53 }
 0x155   : > { %13605 = vst [vmem:[#allocation29_spill] sm:$0xff] %v10575_v14  ;;  %v8261_v11 = vpop.f32.mrf.mxu1  ;;  %8466 = vmatprep.subr.bf16.mxu0 %v13519_v39 }
 0x156   : > { %v1691_v7 = vpop.f32.mrf.mxu0  ;;  %8359 = vmatmul.mubr.bf16.gmra.mxu0 %v13610_v4 }
 0x157   : > { %v10591_v12 = vadd.f32 %v10464_v17, %v1691_v7  ;;  %v10593_v14 = vpop.f32.mrf.mxu1  ;;  %2493 = vmatmul.mubr.bf16.gmra.mxu1 %v10581_v43  ;;  %8362 = vmatprep.mubr.msk.bf16.mxu0 %vm9176_vm0, %v13519_v39  ;;  %v13613_v7 = vld [vmem:[#allocation24_spill] sm:$0xff] }
 0x158   : > { %v1693_v13 = vpop.f32.mrf.mxu0  ;;  %2500 = vmatprep.mubr.bf16.mxu1 %v10583_v60  ;;  %v10607_v29 = vcombine.low %v13614_v2, %v13613_v7 }
 0x159   : > { %13611 = vst [vmem:[#allocation14_spill] sm:$0xff] %v10591_v12  ;;  %v8264_v63 = vpop.f32.mrf.mxu1  ;;  %v13616_v13 = vld [vmem:[#allocation18_spill] sm:$0xff] }
 0x15a   : > { %v1694_v23 = vpop.f32.mrf.mxu0  ;;  %13615 = vst [vmem:[#allocation11_spill] sm:$0xff] %v10607_v29 }
 0x15b   : > { %v10601_v3 = vadd.f32 %v10480_v9, %v1694_v23  ;;  %v10603_v17 = vpop.f32.mrf.mxu1  ;;  %v13618_v23 = vld [vmem:[#allocation56_spill] sm:$0xff] }
 0x15c   : > { %v1696_v11 = vpop.f32.mrf.mxu0 }
 0x15d   : > { %13612 = vst [vmem:[#allocation10_spill] sm:$0xff] %v10601_v3  ;;  %v8265_v43 = vpop.f32.mrf.mxu1 }
 0x15e   : > { %v1699_v4 = vpop.f32.mrf.mxu0  ;;  %8363 = vmatmul.mubr.bf16.gmra.mxu0 %v13616_v13  ;;  %v8927_v43 = vld [vmem:[%s13314_s1 + $0x1d8] sm:$0xff]  }
 0x15f   : > { %v10611_v22 = vadd.f32 %v10499_v30, %v1699_v4  ;;  %v10613_v63 = vpop.f32.mrf.mxu1  ;;  %2501 = vmatmul.mubr.bf16.gmra.mxu1 %v10607_v29  ;;  %8366 = vmatprep.mubr.msk.bf16.mxu0 %vm9176_vm0, %v13519_v39  ;;  %v8928_v30 = vld [vmem:[%s13314_s1 + $0x208] sm:$0xff]  }
 0x160   : > { %v1701_v9 = vpop.f32.mrf.mxu0  ;;  %2508 = vmatprep.mubr.bf16.mxu1 %v13618_v23  ;;  %3143 = vmatpush2.bf16.msra.mxu1 %v8927_v43  ;;  %v13620_v29 = vld [vmem:[#allocation61_spill] sm:$0xff]  ;;  %v13625_v43 = vld [vmem:[#allocation36_spill] sm:$0xff] }
 0x161   : > { %13617 = vst [vmem:[#allocation16_spill] sm:$0xff] %v10611_v22  ;;  %v8268_v7 = vpop.f32.mrf.mxu1  ;;  %8467 = vmatpush3.bf16.msra.mxu0 %v8928_v30  ;;  %v13621_v23 = vld [vmem:[#allocation57_spill] sm:$0xff]  ;;  %3144 = vmatprep.subr.bf16.mxu1 %v13517_v53  ;;  %v13623_v22 = vld [vmem:[#allocation19_spill] sm:$0xff] }
 0x162   : > { %v1702_v4 = vpop.f32.mrf.mxu0  ;;  %v10632_v7 = vcombine.low %v13621_v23, %v13620_v29  ;;  %8468 = vmatprep.subr.bf16.mxu0 %v13519_v39  ;;  %v1145_v23 = vunpack.c.h.b16 %v13620_v29 }
 0x163   : > { %v10626_v2 = vadd.f32 %v10517_v57, %v1702_v4  ;;  %v10628_v11 = vpop.f32.mrf.mxu1 }
 0x164   : > { %v1704_v9 = vpop.f32.mrf.mxu0  ;;  %13622 = vst [vmem:[#allocation44_spill] sm:$0xff] %v10632_v7 }
 0x165   : > { %13619 = vst [vmem:[#allocation15_spill] sm:$0xff] %v10626_v2  ;;  %v8269_v13 = vpop.f32.mrf.mxu1  ;;  %v13626_v9 = vld [vmem:[#allocation63_spill] sm:$0xff] }
 0x166   : > { %v1707_v60 = vpop.f32.mrf.mxu0  ;;  %8367 = vmatmul.mubr.bf16.gmra.mxu0 %v13623_v22  ;;  %v1147_v13 = vunpack.c.l.b16 %v13626_v9 }
 0x167   : > { %v10638_v57 = vadd.f32 %v10531_v42, %v1707_v60  ;;  %v10640_v4 = vpop.f32.mrf.mxu1  ;;  %2509 = vmatmul.mubr.bf16.gmra.mxu1 %v13625_v43  ;;  %8370 = vmatprep.mubr.msk.bf16.mxu0 %vm9176_vm0, %v13519_v39  ;;  %v13627_v60 = vld [vmem:[#allocation31_spill] sm:$0xff] }
 0x168   : > { %v1709_v30 = vpop.f32.mrf.mxu0  ;;  %2516 = vmatprep.mubr.bf16.mxu1 %v10632_v7  ;;  %v10657_v18 = vpack.c.b16 %v1147_v13, %v1145_v23  ;;  %v13634_v13 = vld [vmem:[#allocation33_spill] sm:$0xff] }
 0x169   : > { %13624 = vst [vmem:[#allocation13_spill] sm:$0xff] %v10638_v57  ;;  %v8272_v2 = vpop.f32.mrf.mxu1  ;;  %v13628_v57 = vld [vmem:[#allocation30_spill] sm:$0xff] }
 0x16a   : > { %v1710_v3 = vpop.f32.mrf.mxu0  ;;  %v10655_v43 = vcombine.low %v13628_v57, %v13627_v60  ;;  %13630 = vst [vmem:[#allocation21_spill] sm:$0xff] %v10657_v18  ;;  %v13635_v60 = vld [vmem:[#allocation32_spill] sm:$0xff] }
 0x16b   : > { %v10649_v22 = vadd.f32 %v10548_v10, %v1710_v3  ;;  %v10651_v42 = vpop.f32.mrf.mxu1 }
 0x16c   : > { %13629 = vst [vmem:[#allocation52_spill] sm:$0xff] %v10655_v43  ;;  %v1712_v12 = vpop.f32.mrf.mxu0 }
 0x16d   : > { %v8273_v29 = vpop.f32.mrf.mxu1  ;;  %v8929_v12 = vld [vmem:[%s13314_s1 + $0x1d0] sm:$0xff]  }
 0x16e   : > { %v1715_v30 = vpop.f32.mrf.mxu0  ;;  %8371 = vmatmul.mubr.bf16.gmra.mxu0 %v13631_v8  ;;  %3145 = vmatpush2.bf16.msra.mxu1 %v8929_v12  ;;  %v10679_v29 = vcombine.low %v13635_v60, %v13634_v13 }
 0x16f   : > { %v10661_v9 = vadd.f32 %v10562_v45, %v1715_v30  ;;  %v10663_v2 = vpop.f32.mrf.mxu1  ;;  %2517 = vmatmul.mubr.bf16.gmra.mxu1 %v10655_v43  ;;  %8374 = vmatprep.mubr.msk.bf16.mxu0 %vm9176_vm0, %v13519_v39  ;;  %v13637_v43 = vld [vmem:[#allocation25_spill] sm:$0xff] }
 0x170   : > { %v1717_v10 = vpop.f32.mrf.mxu0  ;;  %2524 = vmatprep.mubr.bf16.mxu1 %v10657_v18  ;;  %13636 = vst [vmem:[#allocation22_spill] sm:$0xff] %v10679_v29  ;;  %3146 = vmatprep.subr.bf16.mxu1 %v13517_v53 }
 0x171   : > { %13632 = vst [vmem:[#allocation20_spill] sm:$0xff] %v10661_v9  ;;  %v8276_v3 = vpop.f32.mrf.mxu1 }
 0x172   : > { %v1718_v57 = vpop.f32.mrf.mxu0 }
 0x173   : > { %v10673_v45 = vadd.f32 %v10577_v0, %v1718_v57  ;;  %v10675_v23 = vpop.f32.mrf.mxu1  ;;  %v13639_v57 = vld [vmem:[#allocation64_spill] sm:$0xff] }
 0x174   : > { %v1720_v30 = vpop.f32.mrf.mxu0 }
 0x175   : > { %13633 = vst [vmem:[#allocation24_spill] sm:$0xff] %v10673_v45  ;;  %v8277_v10 = vpop.f32.mrf.mxu1 }
 0x176   : > { %v1723_v18 = vpop.f32.mrf.mxu0  ;;  %8375 = vmatmul.mubr.bf16.gmra.mxu0 %v13637_v43 }
 0x177   : > { %v10684_v3 = vadd.f32 %v10593_v14, %v1723_v18  ;;  %v10686_v12 = vpop.f32.mrf.mxu1  ;;  %2525 = vmatmul.mubr.bf16.gmra.mxu1 %v10679_v29  ;;  %8378 = vmatprep.mubr.msk.bf16.mxu0 %vm9176_vm0, %v13519_v39  ;;  %v13641_v14 = vld [vmem:[#allocation68_spill] sm:$0xff]  ;;  %v13642_v18 = vld [vmem:[#allocation65_spill] sm:$0xff] }
 0x178   : > { %v1725_v0 = vpop.f32.mrf.mxu0  ;;  %2532 = vmatprep.mubr.bf16.mxu1 %v13639_v57  ;;  %v8930_v29 = vld [vmem:[%s13314_s1 + $0x1c8] sm:$0xff]   ;;  %v13644_v57 = vld [vmem:[#allocation26_spill] sm:$0xff] }
 0x179   : > { %13638 = vst [vmem:[#allocation61_spill] sm:$0xff] %v10684_v3  ;;  %v8280_v13 = vpop.f32.mrf.mxu1  ;;  %v10699_v3 = vcombine.low %v13642_v18, %v13641_v14  ;;  %v8931_v0 = vld [vmem:[%s13314_s1 + $0x200] sm:$0xff]   ;;  %3147 = vmatpush2.bf16.msra.mxu1 %v8930_v29  ;;  %v13651_v29 = vld [vmem:[#allocation42_spill] sm:$0xff] }
 0x17a   : > { %v1726_v60 = vpop.f32.mrf.mxu0  ;;  %8469 = vmatpush3.bf16.msra.mxu0 %v8931_v0  ;;  %3148 = vmatprep.subr.bf16.mxu1 %v13517_v53  ;;  %v13654_v53 = vld [vmem:[#allocation34_spill] sm:$0xff] }
 0x17b   : > { %v10693_v30 = vadd.f32 %v10603_v17, %v1726_v60  ;;  %v10695_v10 = vpop.f32.mrf.mxu1  ;;  %13643 = vst [vmem:[#allocation63_spill] sm:$0xff] %v10699_v3  ;;  %v13646_v60 = vld [vmem:[#allocation49_spill] sm:$0xff] }
 0x17c   : > { %v1728_v43 = vpop.f32.mrf.mxu0 }
 0x17d   : > { %13640 = vst [vmem:[#allocation57_spill] sm:$0xff] %v10693_v30  ;;  %v8281_v8 = vpop.f32.mrf.mxu1  ;;  %v13647_v30 = vld [vmem:[#allocation69_spill] sm:$0xff] }
 0x17e   : > { %v1731_v13 = vpop.f32.mrf.mxu0  ;;  %8379 = vmatmul.mubr.bf16.gmra.mxu0 %v13644_v57  ;;  %v1157_v8 = vunpack.c.h.b16 %v13641_v14  ;;  %v1159_v45 = vunpack.c.l.b16 %v13647_v30  ;;  %v13648_v57 = vld [vmem:[#allocation38_spill] sm:$0xff] }
 0x17f   : > { %v10709_v17 = vadd.f32 %v10613_v63, %v1731_v13  ;;  %v10711_v43 = vpop.f32.mrf.mxu1  ;;  %2533 = vmatmul.mubr.bf16.gmra.mxu1 %v13646_v60  ;;  %8382 = vmatprep.mubr.msk.bf16.mxu0 %vm9176_vm0, %v13519_v39 }
 0x180   : > { %v1733_v18 = vpop.f32.mrf.mxu0  ;;  %2540 = vmatprep.mubr.bf16.mxu1 %v10699_v3 }
 0x181   : > { %13645 = vst [vmem:[#allocation31_spill] sm:$0xff] %v10709_v17  ;;  %v8284_v7 = vpop.f32.mrf.mxu1  ;;  %v13649_v17 = vld [vmem:[#allocation37_spill] sm:$0xff]  ;;  %v10729_v18 = vpack.c.b16 %v1159_v45, %v1157_v8 }
 0x182   : > { %v1734_v63 = vpop.f32.mrf.mxu0  ;;  %v10727_v9 = vcombine.low %v13649_v17, %v13648_v57 }
 0x183   : > { %v10721_v13 = vadd.f32 %v10628_v11, %v1734_v63  ;;  %v10723_v60 = vpop.f32.mrf.mxu1  ;;  %13650 = vst [vmem:[#allocation30_spill] sm:$0xff] %v10729_v18 }
 0x184   : > { %v1736_v14 = vpop.f32.mrf.mxu0 }
 0x185   : > { %v8285_v3 = vpop.f32.mrf.mxu1  ;;  %v8932_v14 = vld [vmem:[%s13314_s1 + $0x1c0] sm:$0xff]  }
 0x186   : > { %v1739_v30 = vpop.f32.mrf.mxu0  ;;  %8383 = vmatmul.mubr.bf16.gmra.mxu0 %v13651_v29  ;;  %3149 = vmatpush2.bf16.msra.mxu1 %v8932_v14 }
 0x187   : > { %v10733_v7 = vadd.f32 %v10640_v4, %v1739_v30  ;;  %v10735_v0 = vpop.f32.mrf.mxu1  ;;  %2541 = vmatmul.mubr.bf16.gmra.mxu1 %v10727_v9  ;;  %8386 = vmatprep.mubr.msk.bf16.mxu0 %vm9176_vm0, %v13519_v39  ;;  %v13652_v4 = vld [vmem:[#allocation40_spill] sm:$0xff] }
 0x188   : > { %v1741_v11 = vpop.f32.mrf.mxu0  ;;  %2548 = vmatprep.mubr.bf16.mxu1 %v10729_v18  ;;  %v10748_v8 = vcombine.low %v13652_v4, %v9726_v62  ;;  %v13658_v18 = vld [vmem:[#allocation35_spill] sm:$0xff] }
 0x189   : > { %v8288_v57 = vpop.f32.mrf.mxu1 }
 0x18a   : > { %v1742_v45 = vpop.f32.mrf.mxu0  ;;  %13653 = vst [vmem:[#allocation33_spill] sm:$0xff] %v10748_v8 }
 0x18b   : > { %v10742_v3 = vadd.f32 %v10651_v42, %v1742_v45  ;;  %v10744_v17 = vpop.f32.mrf.mxu1 }
 0x18c   : > { %v1744_v63 = vpop.f32.mrf.mxu0 }
 0x18d   : > { %v8289_v30 = vpop.f32.mrf.mxu1 }
 0x18e   : > { %v1747_v11 = vpop.f32.mrf.mxu0  ;;  %8387 = vmatmul.mubr.bf16.gmra.mxu0 %v13654_v53 }
 0x18f   : > { %v10755_v57 = vadd.f32 %v10663_v2, %v1747_v11  ;;  %v2028_v42 = vpop.f32.mrf.mxu1  ;;  %2549 = vmatmul.mubr.bf16.gmra.mxu1 %v10748_v8  ;;  %8390 = vmatprep.mubr.msk.bf16.mxu0 %vm9176_vm0, %v13519_v39  ;;  %v13657_v2 = vld [vmem:[#allocation75_spill] sm:$0xff] }
 0x190   : > { %v1749_v62 = vpop.f32.mrf.mxu0  ;;  %2556 = vmatprep.mubr.bf16.mxu1 %v10108_v25  ;;  %v10768_v11 = vcombine.low %v13657_v2, %v10145_v1 }
 0x191   : > { %13655 = vst [vmem:[#allocation32_spill] sm:$0xff] %v10755_v57  ;;  %v8292_v45 = vpop.f32.mrf.mxu1  ;;  %v13663_v57 = vld [vmem:[#allocation54_spill] sm:$0xff] }
 0x192   : > { %v1750_v4 = vpop.f32.mrf.mxu0  ;;  %v13660_v45 = vld [vmem:[#allocation60_spill] sm:$0xff] }
 0x193   : > { %v10762_v63 = vadd.f32 %v10675_v23, %v1750_v4  ;;  %v10764_v30 = vpop.f32.mrf.mxu1  ;;  %v1169_v23 = vunpack.c.h.b16 %v10145_v1 }
 0x194   : > { %v1752_v14 = vpop.f32.mrf.mxu0 }
 0x195   : > { %13656 = vst [vmem:[#allocation68_spill] sm:$0xff] %v10762_v63  ;;  %v8293_v53 = vpop.f32.mrf.mxu1 }
 0x196   : > { %v1755_v8 = vpop.f32.mrf.mxu0  ;;  %8391 = vmatmul.mubr.bf16.gmra.mxu0 %v13658_v18  ;;  %v1171_v53 = vunpack.c.l.b16 %v10147_v41 }
 0x197   : > { %v10772_v62 = vadd.f32 %v10686_v12, %v1755_v8  ;;  %v10774_v25 = vpop.f32.mrf.mxu1  ;;  %2557 = vmatmul.mubr.bf16.gmra.mxu1 %v13660_v45  ;;  %8394 = vmatprep.mubr.msk.bf16.mxu0 %vm9176_vm0, %v13519_v39  ;;  %v13661_v8 = vld [vmem:[#allocation47_spill] sm:$0xff] }
 0x198   : > { %v1757_v4 = vpop.f32.mrf.mxu0  ;;  %2564 = vmatprep.mubr.bf16.mxu1 %v10768_v11  ;;  %v10789_v45 = vcombine.low %v9811_v47, %v13661_v8  ;;  %v10791_v63 = vpack.c.b16 %v1171_v53, %v1169_v23 }
 0x199   : > { %13659 = vst [vmem:[#allocation65_spill] sm:$0xff] %v10772_v62  ;;  %v8296_v14 = vpop.f32.mrf.mxu1 }
 0x19a   : > { %v1758_v2 = vpop.f32.mrf.mxu0  ;;  %13662 = vst [vmem:[#allocation69_spill] sm:$0xff] %v10789_v45 }
 0x19b   : > { %v10783_v18 = vadd.f32 %v10695_v10, %v1758_v2  ;;  %v10785_v12 = vpop.f32.mrf.mxu1  ;;  %v13664_v2 = vld [vmem:[#allocation48_spill] sm:$0xff] }
 0x19c   : > { %v1760_v62 = vpop.f32.mrf.mxu0  ;;  %v10806_v8 = vcombine.low %v13664_v2, %v9823_v40 }
 0x19d   : > { %v8297_v1 = vpop.f32.mrf.mxu1 }
 0x19e   : > { %v1763_v4 = vpop.f32.mrf.mxu0  ;;  %8395 = vmatmul.mubr.bf16.gmra.mxu0 %v13663_v57  ;;  %13665 = vst [vmem:[#allocation38_spill] sm:$0xff] %v10806_v8 }
 0x19f   : > { %v10795_v41 = vadd.f32 %v10711_v43, %v1763_v4  ;;  %v2044_v14 = vpop.f32.mrf.mxu1  ;;  %2565 = vmatmul.mubr.bf16.gmra.mxu1 %v10789_v45  ;;  %8398 = vmatprep.mubr.msk.bf16.mxu0 %vm9176_vm0, %v13519_v39  ;;  %v13666_v45 = vld [vmem:[#allocation45_spill] sm:$0xff] }
 0x1a0   : > { %v1765_v10 = vpop.f32.mrf.mxu0  ;;  %2572 = vmatprep.mubr.bf16.mxu1 %v10791_v63 }
 0x1a1   : > { %v8300_v47 = vpop.f32.mrf.mxu1 }
 0x1a2   : > { %v1766_v62 = vpop.f32.mrf.mxu0 }
 0x1a3   : > { %v10802_v23 = vadd.f32 %v10723_v60, %v1766_v62  ;;  %v2047_v53 = vpop.f32.mrf.mxu1 }
 0x1a4   : > { %v1768_v43 = vpop.f32.mrf.mxu0 }
 0x1a5   : > { %v8301_v1 = vpop.f32.mrf.mxu1 }
 0x1a6   : > { %v1771_v4 = vpop.f32.mrf.mxu0  ;;  %8399 = vmatmul.mubr.bf16.gmra.mxu0 %v13666_v45 }
 0x1a7   : > { %v10810_v57 = vadd.f32 %v10735_v0, %v1771_v4  ;;  %v2052_v10 = vpop.f32.mrf.mxu1  ;;  %2573 = vmatmul.mubr.bf16.gmra.mxu1 %v10806_v8  ;;  %8402 = vmatprep.mubr.msk.bf16.mxu0 %vm9176_vm0, %v13519_v39  ;;  %v10823_v0 = vcombine.low %v10167_v54, %v10213_v26  ;;  %v13668_v8 = vld [vmem:[#allocation46_spill] sm:$0xff]  ;;  %v1183_v54 = vunpack.c.l.b16 %v10223_v55 }
 0x1a8   : > { %v1773_v60 = vpop.f32.mrf.mxu0  ;;  %2580 = vmatprep.mubr.bf16.mxu1 %v10156_v16 }
 0x1a9   : > { %v8304_v47 = vpop.f32.mrf.mxu1 }
 0x1aa   : > { %v1774_v40 = vpop.f32.mrf.mxu0  ;;  %v13670_v47 = vld [vmem:[#allocation66_spill] sm:$0xff] }
 0x1ab   : > { %v10817_v62 = vadd.f32 %v10744_v17, %v1774_v40  ;;  %v10819_v2 = vpop.f32.mrf.mxu1  ;;  %v1181_v17 = vunpack.c.h.b16 %v10213_v26 }
 0x1ac   : > { %v1776_v43 = vpop.f32.mrf.mxu0 }
 0x1ad   : > { %13667 = vst [vmem:[#allocation37_spill] sm:$0xff] %v10817_v62  ;;  %v8305_v1 = vpop.f32.mrf.mxu1  ;;  %v13673_v62 = vld [vmem:[#allocation62_spill] sm:$0xff] }
 0x1ae   : > { %v1779_v4 = vpop.f32.mrf.mxu0  ;;  %8403 = vmatmul.mubr.bf16.gmra.mxu0 %v13668_v8 }
 0x1af   : > { %v10826_v45 = vadd.f32 %v2028_v42, %v1779_v4  ;;  %v10828_v60 = vpop.f32.mrf.mxu1  ;;  %2581 = vmatmul.mubr.bf16.gmra.mxu1 %v13670_v47  ;;  %8406 = vmatprep.mubr.msk.bf16.mxu0 %vm9176_vm0, %v13519_v39  ;;  %v13671_v4 = vld [vmem:[#allocation53_spill] sm:$0xff] }
 0x1b0   : > { %v1781_v40 = vpop.f32.mrf.mxu0  ;;  %2588 = vmatprep.mubr.bf16.mxu1 %v10823_v0  ;;  %v10843_v47 = vcombine.low %v9890_v20, %v13671_v4 }
 0x1b1   : > { %13669 = vst [vmem:[#allocation42_spill] sm:$0xff] %v10826_v45  ;;  %v8308_v43 = vpop.f32.mrf.mxu1  ;;  %v10845_v45 = vpack.c.b16 %v1183_v54, %v1181_v17 }
 0x1b2   : > { %v1782_v1 = vpop.f32.mrf.mxu0  ;;  %13672 = vst [vmem:[#allocation40_spill] sm:$0xff] %v10843_v47 }
 0x1b3   : > { %v10837_v8 = vadd.f32 %v10764_v30, %v1782_v1  ;;  %v10839_v42 = vpop.f32.mrf.mxu1  ;;  %v13674_v1 = vld [vmem:[#allocation55_spill] sm:$0xff] }
 0x1b4   : > { %v1784_v16 = vpop.f32.mrf.mxu0  ;;  %v10860_v4 = vcombine.low %v13674_v1, %v9903_v5 }
 0x1b5   : > { %v8309_v26 = vpop.f32.mrf.mxu1 }
 0x1b6   : > { %v1787_v40 = vpop.f32.mrf.mxu0  ;;  %8407 = vmatmul.mubr.bf16.gmra.mxu0 %v13673_v62  ;;  %13675 = vst [vmem:[#allocation75_spill] sm:$0xff] %v10860_v4 }
 0x1b7   : > { %v10849_v55 = vadd.f32 %v10774_v25, %v1787_v40  ;;  %v2068_v43 = vpop.f32.mrf.mxu1  ;;  %2589 = vmatmul.mubr.bf16.gmra.mxu1 %v10843_v47  ;;  %8410 = vmatprep.mubr.msk.bf16.mxu0 %vm9176_vm0, %v13519_v39  ;;  %v13676_v47 = vld [vmem:[#allocation50_spill] sm:$0xff] }
 0x1b8   : > { %v1789_v30 = vpop.f32.mrf.mxu0  ;;  %2596 = vmatprep.mubr.bf16.mxu1 %v10845_v45 }
 0x1b9   : > { %v8312_v20 = vpop.f32.mrf.mxu1 }
 0x1ba   : > { %v1790_v16 = vpop.f32.mrf.mxu0 }
 0x1bb   : > { %v10856_v17 = vadd.f32 %v10785_v12, %v1790_v16  ;;  %v2071_v54 = vpop.f32.mrf.mxu1 }
 0x1bc   : > { %v1792_v25 = vpop.f32.mrf.mxu0 }
 0x1bd   : > { %v8313_v26 = vpop.f32.mrf.mxu1 }
 0x1be   : > { %v1795_v40 = vpop.f32.mrf.mxu0  ;;  %8411 = vmatmul.mubr.bf16.gmra.mxu0 %v13676_v47 }
 0x1bf   : > { %v10863_v62 = vadd.f32 %v2044_v14, %v1795_v40  ;;  %v2076_v30 = vpop.f32.mrf.mxu1  ;;  %2597 = vmatmul.mubr.bf16.gmra.mxu1 %v10860_v4  ;;  %8414 = vmatprep.mubr.msk.bf16.mxu0 %vm9176_vm0, %v13519_v39  ;;  %v10875_v14 = vcombine.low %v10238_v50, %v10306_v32  ;;  %v13677_v4 = vld [vmem:[#allocation51_spill] sm:$0xff]  ;;  %v1195_v50 = vunpack.c.l.b16 %v10321_v33 }
 0x1c0   : > { %v1797_v12 = vpop.f32.mrf.mxu0  ;;  %2604 = vmatprep.mubr.bf16.mxu1 %v10235_v49 }
 0x1c1   : > { %v8316_v20 = vpop.f32.mrf.mxu1 }
 0x1c2   : > { %v1798_v16 = vpop.f32.mrf.mxu0 }
 0x1c3   : > { %v10869_v5 = vadd.f32 %v2047_v53, %v1798_v16  ;;  %v10871_v1 = vpop.f32.mrf.mxu1  ;;  %v1193_v53 = vunpack.c.h.b16 %v10306_v32 }
 0x1c4   : > { %v1800_v25 = vpop.f32.mrf.mxu0 }
 0x1c5   : > { %v8317_v26 = vpop.f32.mrf.mxu1  ;;  %v10897_v49 = vpack.c.b16 %v1195_v50, %v1193_v53 }
 0x1c6   : > { %v1803_v40 = vpop.f32.mrf.mxu0  ;;  %8415 = vmatmul.mubr.bf16.gmra.mxu0 %v13677_v4 }
 0x1c7   : > { %v10878_v47 = vadd.f32 %v2052_v10, %v1803_v40  ;;  %v10880_v12 = vpop.f32.mrf.mxu1  ;;  %2605 = vmatmul.mubr.bf16.gmra.mxu1 %v10065_v37  ;;  %8418 = vmatprep.mubr.msk.bf16.mxu0 %vm9176_vm0, %v13519_v39  ;;  %v13679_v40 = vld [vmem:[#allocation70_spill] sm:$0xff]  ;;  %13681 = vst [vmem:[#allocation53_spill] sm:$0xff] %v10897_v49 }
 0x1c8   : > { %v1805_v20 = vpop.f32.mrf.mxu0  ;;  %2612 = vmatprep.mubr.bf16.mxu1 %v10875_v14  ;;  %v10895_v37 = vcombine.low %v10055_v31, %v13679_v40 }
 0x1c9   : > { %13678 = vst [vmem:[#allocation47_spill] sm:$0xff] %v10878_v47  ;;  %v8320_v16 = vpop.f32.mrf.mxu1  ;;  %v13682_v47 = vld [vmem:[#allocation73_spill] sm:$0xff] }
 0x1ca   : > { %v1806_v25 = vpop.f32.mrf.mxu0  ;;  %13680 = vst [vmem:[#allocation48_spill] sm:$0xff] %v10895_v37 }
 0x1cb   : > { %v10889_v26 = vadd.f32 %v10819_v2, %v1806_v25  ;;  %v10891_v10 = vpop.f32.mrf.mxu1 }
 0x1cc   : > { %v1808_v4 = vpop.f32.mrf.mxu0 }
 0x1cd   : > { %v8321_v32 = vpop.f32.mrf.mxu1 }
 0x1ce   : > { %v1811_v20 = vpop.f32.mrf.mxu0  ;;  %8419 = vmatmul.mubr.bf16.gmra.mxu0 %v13682_v47 }
 0x1cf   : > { %v10901_v33 = vadd.f32 %v10828_v60, %v1811_v20  ;;  %v10903_v16 = vpop.f32.mrf.mxu1  ;;  %2613 = vmatmul.mubr.bf16.gmra.mxu1 %v10895_v37  ;;  %8422 = vmatprep.mubr.msk.bf16.mxu0 %vm9176_vm0, %v13519_v39  ;;  %v13683_v60 = vld [vmem:[#allocation71_spill] sm:$0xff]  ;;  %v13685_v37 = vld [vmem:[#allocation58_spill] sm:$0xff] }
 0x1d0   : > { %v1813_v2 = vpop.f32.mrf.mxu0  ;;  %2620 = vmatprep.mubr.bf16.mxu1 %v10897_v49  ;;  %v10916_v25 = vcombine.low %v13683_v60, %v10142_v38 }
 0x1d1   : > { %v8324_v31 = vpop.f32.mrf.mxu1 }
 0x1d2   : > { %v1814_v4 = vpop.f32.mrf.mxu0  ;;  %13684 = vst [vmem:[#allocation55_spill] sm:$0xff] %v10916_v25 }
 0x1d3   : > { %v10910_v53 = vadd.f32 %v10839_v42, %v1814_v4  ;;  %v10912_v50 = vpop.f32.mrf.mxu1 }
 0x1d4   : > { %v1816_v40 = vpop.f32.mrf.mxu0 }
 0x1d5   : > { %v8325_v32 = vpop.f32.mrf.mxu1 }
 0x1d6   : > { %v1819_v20 = vpop.f32.mrf.mxu0  ;;  %8423 = vmatmul.mubr.bf16.gmra.mxu0 %v13685_v37 }
 0x1d7   : > { %v10919_v47 = vadd.f32 %v2068_v43, %v1819_v20  ;;  %v10921_v2 = vpop.f32.mrf.mxu1  ;;  %2621 = vmatmul.mubr.bf16.gmra.mxu1 %v10916_v25  ;;  %8426 = vmatprep.mubr.msk.bf16.mxu0 %vm9176_vm0, %v13519_v39  ;;  %v13687_v43 = vld [vmem:[#allocation93_spill] sm:$0xff]  ;;  %v13689_v25 = vld [vmem:[#allocation59_spill] sm:$0xff] }
 0x1d8   : > { %v1821_v42 = vpop.f32.mrf.mxu0  ;;  %2628 = vmatprep.mubr.bf16.mxu1 %v10331_v56  ;;  %v10933_v32 = vcombine.low %v13687_v43, %v10376_v59  ;;  %v13693_v56 = vld [vmem:[#allocation76_spill] sm:$0xff] }
 0x1d9   : > { %13686 = vst [vmem:[#allocation70_spill] sm:$0xff] %v10919_v47  ;;  %v8328_v31 = vpop.f32.mrf.mxu1  ;;  %v13690_v47 = vld [vmem:[#allocation79_spill] sm:$0xff] }
 0x1da   : > { %v1822_v38 = vpop.f32.mrf.mxu0  ;;  %13688 = vst [vmem:[#allocation71_spill] sm:$0xff] %v10933_v32 }
 0x1db   : > { %v10927_v4 = vadd.f32 %v2071_v54, %v1822_v38  ;;  %v10929_v60 = vpop.f32.mrf.mxu1  ;;  %v1205_v54 = vunpack.c.h.b16 %v10376_v59 }
 0x1dc   : > { %v1824_v40 = vpop.f32.mrf.mxu0 }
 0x1dd   : > { %v8329_v20 = vpop.f32.mrf.mxu1  ;;  %v1207_v40 = vunpack.c.l.b16 %v10386_v6 }
 0x1de   : > { %v1827_v37 = vpop.f32.mrf.mxu0  ;;  %8427 = vmatmul.mubr.bf16.gmra.mxu0 %v13689_v25 }
 0x1df   : > { %v10936_v49 = vadd.f32 %v2076_v30, %v1827_v37  ;;  %v2438_v42 = vpop.f32.mrf.mxu1  ;;  %2629 = vmatmul.mubr.bf16.gmra.mxu1 %v13690_v47  ;;  %8430 = vmatprep.mubr.msk.bf16.mxu0 %vm9176_vm0, %v13519_v39  ;;  %v13691_v47 = vld [vmem:[#allocation84_spill] sm:$0xff] }
 0x1e0   : > { %v10943_v31 = vadd.f32 %v2438_v42, %v10412_v61  ;;  %v1829_v38 = vpop.f32.mrf.mxu0  ;;  %2636 = vmatprep.mubr.bf16.mxu1 %v10933_v32  ;;  %v10952_v25 = vcombine.low %v10190_v35, %v13691_v47  ;;  %v10957_v42 = vpack.c.b16 %v1207_v40, %v1205_v54  ;;  %v13694_v54 = vld [vmem:[#allocation80_spill] sm:$0xff] }
 0x1e1   : > { %v2440_v43 = vpop.f32.mrf.mxu1  ;;  %v13695_v40 = vld [vmem:[#allocation72_spill] sm:$0xff] }
 0x1e2   : > { %v1830_v20 = vpop.f32.mrf.mxu0  ;;  %13692 = vst [vmem:[#allocation93_spill] sm:$0xff] %v10957_v42  ;;  %v10972_v43 = vcombine.low %v13695_v40, %v13694_v54 }
 0x1e3   : > { %v10948_v37 = vadd.f32 %v10871_v1, %v1830_v20  ;;  %v2441_v30 = vpop.f32.mrf.mxu1 }
 0x1e4   : > { %v10955_v59 = vadd.f32 %v2441_v30, %v10425_v34  ;;  %v1832_v61 = vpop.f32.mrf.mxu0  ;;  %v13696_v30 = vld [vmem:[#allocation85_spill] sm:$0xff] }
 0x1e5   : > { %v2443_v38 = vpop.f32.mrf.mxu1  ;;  %v10979_v61 = vcombine.low %v13696_v30, %v10257_v28 }
 0x1e6   : > { %v1835_v32 = vpop.f32.mrf.mxu0  ;;  %8431 = vmatmul.mubr.bf16.gmra.mxu0 %v13693_v56 }
 0x1e7   : > { %v10961_v6 = vadd.f32 %v10880_v12, %v1835_v32  ;;  %v2446_v1 = vpop.f32.mrf.mxu1  ;;  %2637 = vmatmul.mubr.bf16.gmra.mxu1 %v10952_v25  ;;  %8434 = vmatprep.mubr.msk.bf16.mxu0 %vm9176_vm0, %v13519_v39  ;;  %13697 = vst [vmem:[#allocation84_spill] sm:$0xff] %v10979_v61 }
 0x1e8   : > { %v10967_v35 = vadd.f32 %v2446_v1, %v10436_v27  ;;  %v1837_v34 = vpop.f32.mrf.mxu0  ;;  %2644 = vmatprep.mubr.bf16.mxu1 %v10957_v42 }
 0x1e9   : > { %v2448_v47 = vpop.f32.mrf.mxu1  ;;  %v1194_v34 = vunpack.c.h.b16 %v13694_v54 }
 0x1ea   : > { %v1838_v20 = vpop.f32.mrf.mxu0  ;;  %v13698_v47 = vld [vmem:[#allocation78_spill] sm:$0xff] }
 0x1eb   : > { %v10975_v12 = vadd.f32 %v10891_v10, %v1838_v20  ;;  %v2449_v32 = vpop.f32.mrf.mxu1  ;;  %v1196_v42 = vunpack.c.l.b16 %v13698_v47 }
 0x1ec   : > { %v10982_v27 = vadd.f32 %v2449_v32, %v10448_v19  ;;  %v1840_v38 = vpop.f32.mrf.mxu0 }
 0x1ed   : > { %v2451_v1 = vpop.f32.mrf.mxu1  ;;  %v10997_v32 = vpack.c.b16 %v1196_v42, %v1194_v34 }
 0x1ee   : > { %v1843_v40 = vpop.f32.mrf.mxu0  ;;  %8435 = vmatmul.mubr.bf16.gmra.mxu0 %v10972_v43 }
 0x1ef   : > { %v10988_v10 = vadd.f32 %v10903_v16, %v1843_v40  ;;  %v2454_v20 = vpop.f32.mrf.mxu1  ;;  %2645 = vmatmul.mubr.bf16.gmra.mxu1 %v10979_v61  ;;  %8438 = vmatprep.mubr.msk.bf16.mxu0 %vm9176_vm0, %v13519_v39 }
 0x1f0   : > { %v10994_v28 = vadd.f32 %v2454_v20, %v10462_v44  ;;  %v1845_v19 = vpop.f32.mrf.mxu0  ;;  %3150 = vmatprep.mubr.bf16.mxu1 %v13586_v36 }
 0x1f1   : > { %v2456_v54 = vpop.f32.mrf.mxu1 }
 0x1f2   : > { %v1846_v30 = vpop.f32.mrf.mxu0 }
 0x1f3   : > { %v11000_v38 = vadd.f32 %v10912_v50, %v1846_v30  ;;  %v2457_v16 = vpop.f32.mrf.mxu1  ;;  %v13699_v30 = vld [vmem:[#allocation82_spill] sm:$0xff] }
 0x1f4   : > { %v11003_v1 = vadd.f32 %v2457_v16, %v10478_v51  ;;  %v1848_v47 = vpop.f32.mrf.mxu0  ;;  %v8933_v51 = vld [vmem:[%s13316_s3 + $0x138] sm:$0xff]  }
 0x1f5   : > { %v2459_v40 = vpop.f32.mrf.mxu1  ;;  %7774 = vmatprep.subr.bf16.mxu1 %v8933_v51 }
 0x1f6   : > { %v1851_v61 = vpop.f32.mrf.mxu0  ;;  %8439 = vmatmul.mubr.bf16.gmra.mxu0 %v10997_v32 }
 0x1f7   : > { %v11007_v44 = vadd.f32 %v10921_v2, %v1851_v61  ;;  %v2462_v36 = vpop.f32.mrf.mxu1  ;;  %8442 = vmatprep.mubr.msk.bf16.mxu0 %vm9176_vm0, %v13519_v39  ;;  %3151 = vmatmul.mubr.bf16.vlgmr.msra.gmra.mxu1 %v13589_v58  ;;  %v8934_v2 = vld [vmem:[%s13316_s3 + $0xf8] sm:$0xff]  }
 0x1f8   : > { %v11013_v50 = vadd.f32 %v2462_v36, %v10497_v52  ;;  %v1853_v42 = vpop.f32.mrf.mxu0  ;;  %3158 = vmatprep.mubr.bf16.mxu1 %v10454_v24  ;;  %7775 = vmatpush3.bf16.msra.mxu1 %v8934_v2  ;;  %v13700_v36 = vld [vmem:[#allocation89_spill] sm:$0xff] }
 0x1f9   : > { %v2464_v34 = vpop.f32.mrf.mxu1  ;;  %v13701_v42 = vld [vmem:[#allocation81_spill] sm:$0xff] }
 0x1fa   : > { %v1854_v61 = vpop.f32.mrf.mxu0  ;;  %v11041_v51 = vcombine.low %v13701_v42, %v13700_v36 }
 0x1fb   : > { %v11023_v20 = vadd.f32 %v10929_v60, %v1854_v61  ;;  %v2465_v58 = vpop.f32.mrf.mxu1  ;;  %v13703_v61 = vld [vmem:[#allocation8_spill] sm:$0xff] }
 0x1fc   : > { %v11026_v52 = vadd.f32 %v2465_v58, %v10515_v46  ;;  %v1856_v24 = vpop.f32.mrf.mxu0 }
 0x1fd   : > { %v2467_v19 = vpop.f32.mrf.mxu1 }
 0x1fe   : > { %v2687_v54 = vpop.f32.mrf.mxu0  ;;  %8443 = vmatmul.mubr.bf16.gmra.mxu0 %v13699_v30  ;;  %v13704_v19 = vld [vmem:[#allocation87_spill] sm:$0xff] }
 0x1ff   : > { %v2470_v16 = vpop.f32.mrf.mxu1  ;;  %v11030_v47 = vadd.f32 %v2687_v54, %v10943_v31  ;;  %8446 = vmatprep.mubr.msk.bf16.mxu0 %vm9176_vm0, %v13519_v39  ;;  %3159 = vmatmul.mubr.bf16.gmra.mxu1 %v10484_v15  ;;  %v1208_v54 = vunpack.c.l.b16 %v13704_v19 }
 0x200   : > { %v11036_v60 = vadd.f32 %v2470_v16, %v10529_v48  ;;  %v8348_v40 = vpop.f32.mrf.mxu0  ;;  %3166 = vmatprep.mubr.bf16.mxu1 %v10490_v21  ;;  %v1206_v48 = vunpack.c.h.b16 %v13700_v36 }
 0x201   : > { %v2472_v46 = vpop.f32.mrf.mxu1 }
 0x202   : > { %v2690_v34 = vpop.f32.mrf.mxu0  ;;  %v13707_v46 = vld [vmem:[#allocation39_spill] sm:$0xff] }
 0x203   : > { %v2473_v2 = vpop.f32.mrf.mxu1  ;;  %v11044_v31 = vadd.f32 %v2690_v34, %v10955_v59  ;;  %v13706_v59 = vld [vmem:[#allocation9_spill] sm:$0xff] }
 0x204   : > { %v11047_v58 = vadd.f32 %v2473_v2, %v13703_v61  ;;  %v8349_v15 = vpop.f32.mrf.mxu0  ;;  %v13708_v2 = vld [vmem:[#allocation43_spill] sm:$0xff]  ;;  %v11062_v61 = vpack.c.b16 %v1208_v54, %v1206_v48  ;;  %v13713_v54 = vld [vmem:[#allocation14_spill] sm:$0xff] }
 0x205   : > { %13702 = vst [vmem:[#allocation76_spill] sm:$0xff] %v11044_v31  ;;  %v2475_v24 = vpop.f32.mrf.mxu1  ;;  %v13712_v48 = vld [vmem:[#allocation23_spill] sm:$0xff] }
 0x206   : > { %v2695_v21 = vpop.f32.mrf.mxu0  ;;  %8447 = vmatmul.mubr.bf16.gmra.mxu0 %v11041_v51 }
 0x207   : > { %v2478_v16 = vpop.f32.mrf.mxu1  ;;  %v11053_v40 = vadd.f32 %v2695_v21, %v10967_v35  ;;  %8450 = vmatprep.mubr.msk.bf16.mxu0 %vm9176_vm0, %v13519_v39  ;;  %3167 = vmatmul.mubr.bf16.gmra.mxu1 %v13706_v59  ;;  %v13710_v35 = vld [vmem:[#allocation29_spill] sm:$0xff] }
 0x208   : > { %v11059_v42 = vadd.f32 %v2478_v16, %v13707_v46  ;;  %v8352_v34 = vpop.f32.mrf.mxu0  ;;  %3174 = vmatprep.mubr.bf16.mxu1 %v13708_v2  ;;  %v13714_v2 = vld [vmem:[#allocation28_spill] sm:$0xff] }
 0x209   : > { %13705 = vst [vmem:[#allocation80_spill] sm:$0xff] %v11053_v40  ;;  %v2480_v36 = vpop.f32.mrf.mxu1 }
 0x20a   : > { %v2698_v15 = vpop.f32.mrf.mxu0 }
 0x20b   : > { %v2481_v24 = vpop.f32.mrf.mxu1  ;;  %v11065_v19 = vadd.f32 %v2698_v15, %v10982_v27 }
 0x20c   : > { %v11068_v21 = vadd.f32 %v2481_v24, %v13710_v35  ;;  %v8353_v40 = vpop.f32.mrf.mxu0  ;;  %v13716_v24 = vld [vmem:[#allocation10_spill] sm:$0xff] }
 0x20d   : > { %13709 = vst [vmem:[#allocation72_spill] sm:$0xff] %v11065_v19  ;;  %v2483_v31 = vpop.f32.mrf.mxu1 }
 0x20e   : > { %v2703_v59 = vpop.f32.mrf.mxu0  ;;  %8451 = vmatmul.mubr.bf16.gmra.mxu0 %v11062_v61 }
 0x20f   : > { %v2486_v16 = vpop.f32.mrf.mxu1  ;;  %v11072_v46 = vadd.f32 %v2703_v59, %v10994_v28  ;;  %8470 = vmatprep.mubr.msk.bf16.mxu0 %vm9176_vm0, %v13519_v39  ;;  %3175 = vmatmul.mubr.bf16.gmra.mxu1 %v13712_v48  ;;  %v8935_v59 = vld [vmem:[%s13316_s3 + $0x130] sm:$0xff]  }
 0x210   : > { %v11078_v27 = vadd.f32 %v2486_v16, %v13713_v54  ;;  %v8356_v34 = vpop.f32.mrf.mxu0  ;;  %3182 = vmatprep.mubr.bf16.mxu1 %v13714_v2  ;;  %v8936_v16 = vld [vmem:[%s13316_s3 + $0xf0] sm:$0xff]   ;;  %7776 = vmatprep.subr.bf16.mxu1 %v8935_v59 }
 0x211   : > { %13711 = vst [vmem:[#allocation85_spill] sm:$0xff] %v11072_v46  ;;  %v2488_v40 = vpop.f32.mrf.mxu1  ;;  %v13717_v34 = vld [vmem:[#allocation17_spill] sm:$0xff]  ;;  %7777 = vmatpush3.bf16.msra.mxu1 %v8936_v16  ;;  %v13724_v16 = vld [vmem:[#allocation11_spill] sm:$0xff] }
 0x212   : > { %v2706_v31 = vpop.f32.mrf.mxu0  ;;  %v13719_v40 = vld [vmem:[#allocation12_spill] sm:$0xff] }
 0x213   : > { %v2489_v36 = vpop.f32.mrf.mxu1  ;;  %v11082_v15 = vadd.f32 %v2706_v31, %v11003_v1  ;;  %v13720_v31 = vld [vmem:[#allocation16_spill] sm:$0xff] }
 0x214   : > { %v11085_v28 = vadd.f32 %v2489_v36, %v13716_v24  ;;  %v8357_v35 = vpop.f32.mrf.mxu0 }
 0x215   : > { %13715 = vst [vmem:[#allocation78_spill] sm:$0xff] %v11082_v15  ;;  %v2491_v48 = vpop.f32.mrf.mxu1  ;;  %v13721_v35 = vld [vmem:[#allocation41_spill] sm:$0xff] }
 0x216   : > { %v2711_v54 = vpop.f32.mrf.mxu0  ;;  %8471 = vmatmul.mubr.bf16.vlgmr.msra.gmra.mxu0 %v13717_v34 }
 0x217   : > { %v2494_v2 = vpop.f32.mrf.mxu1  ;;  %v11095_v1 = vadd.f32 %v2711_v54, %v11013_v50  ;;  %8474 = vmatprep.mubr.msk.bf16.mxu0 %vm9176_vm0, %v13519_v39  ;;  %3183 = vmatmul.mubr.bf16.gmra.mxu1 %v13719_v40  ;;  %v13722_v50 = vld [vmem:[#allocation15_spill] sm:$0xff]  ;;  %v13723_v40 = vld [vmem:[#allocation18_spill] sm:$0xff] }
 0x218   : > { %v11101_v36 = vadd.f32 %v2494_v2, %v13720_v31  ;;  %v8360_v24 = vpop.f32.mrf.mxu0  ;;  %3190 = vmatprep.mubr.bf16.mxu1 %v13721_v35  ;;  %v13726_v35 = vld [vmem:[#allocation56_spill] sm:$0xff] }
 0x219   : > { %13718 = vst [vmem:[#allocation82_spill] sm:$0xff] %v11095_v1  ;;  %v2496_v48 = vpop.f32.mrf.mxu1  ;;  %v13725_v24 = vld [vmem:[#allocation13_spill] sm:$0xff] }
 0x21a   : > { %v2714_v15 = vpop.f32.mrf.mxu0 }
 0x21b   : > { %v2497_v34 = vpop.f32.mrf.mxu1  ;;  %v11105_v59 = vadd.f32 %v2714_v15, %v11026_v52 }
 0x21c   : > { %v11108_v54 = vadd.f32 %v2497_v34, %v13722_v50  ;;  %v8361_v1 = vpop.f32.mrf.mxu0 }
 0x21d   : > { %v2499_v46 = vpop.f32.mrf.mxu1 }
 0x21e   : > { %v2719_v19 = vpop.f32.mrf.mxu0  ;;  %8475 = vmatmul.mubr.bf16.gmra.mxu0 %v13723_v40  ;;  %v8937_v46 = vld [vmem:[%s13316_s3 + $0x178] sm:$0xff]  }
 0x21f   : > { %v2502_v2 = vpop.f32.mrf.mxu1  ;;  %v11112_v31 = vadd.f32 %v2719_v19, %v11036_v60  ;;  %8478 = vmatprep.mubr.msk.bf16.mxu0 %vm9176_vm0, %v13519_v39  ;;  %3191 = vmatmul.mubr.bf16.gmra.mxu1 %v13724_v16  ;;  %v13727_v16 = vld [vmem:[#allocation19_spill] sm:$0xff] }
 0x220   : > { %v11118_v52 = vadd.f32 %v2502_v2, %v13725_v24  ;;  %v8364_v15 = vpop.f32.mrf.mxu0  ;;  %3198 = vmatprep.mubr.bf16.mxu1 %v13726_v35  ;;  %8578 = vmatprep.subr.bf16.mxu0 %v8937_v46  ;;  %v13729_v35 = vld [vmem:[#allocation36_spill] sm:$0xff] }
 0x221   : > { %v2504_v1 = vpop.f32.mrf.mxu1  ;;  %8579 = vmatpush3.bf16.msra.mxu0 %v8937_v46 }
 0x222   : > { %v2722_v48 = vpop.f32.mrf.mxu0 }
 0x223   : > { %v2505_v60 = vpop.f32.mrf.mxu1  ;;  %v11125_v19 = vadd.f32 %v2722_v48, %v11047_v58  ;;  %v13730_v58 = vld [vmem:[#allocation20_spill] sm:$0xff] }
 0x224   : > { %v11128_v34 = vadd.f32 %v2505_v60, %v10649_v22  ;;  %v8365_v50 = vpop.f32.mrf.mxu0  ;;  %v13731_v22 = vld [vmem:[#allocation44_spill] sm:$0xff] }
 0x225   : > { %v2507_v40 = vpop.f32.mrf.mxu1 }
 0x226   : > { %v2727_v2 = vpop.f32.mrf.mxu0  ;;  %8479 = vmatmul.mubr.bf16.gmra.mxu0 %v13727_v16  ;;  %v13733_v16 = vld [vmem:[#allocation24_spill] sm:$0xff] }
 0x227   : > { %v2510_v24 = vpop.f32.mrf.mxu1  ;;  %v11132_v15 = vadd.f32 %v2727_v2, %v11059_v42  ;;  %8482 = vmatprep.mubr.msk.bf16.mxu0 %vm9176_vm0, %v13519_v39  ;;  %3199 = vmatmul.mubr.bf16.gmra.mxu1 %v13729_v35  ;;  %v8938_v35 = vld [vmem:[%s13316_s3 + $0x128] sm:$0xff]  }
 0x228   : > { %v11138_v1 = vadd.f32 %v2510_v24, %v13730_v58  ;;  %v8368_v46 = vpop.f32.mrf.mxu0  ;;  %3206 = vmatprep.mubr.bf16.mxu1 %v13731_v22  ;;  %v13734_v58 = vld [vmem:[#allocation27_spill] sm:$0xff]  ;;  %7778 = vmatprep.subr.bf16.mxu1 %v8938_v35 }
 0x229   : > { %13728 = vst [vmem:[#allocation89_spill] sm:$0xff] %v11132_v15  ;;  %v2512_v48 = vpop.f32.mrf.mxu1 }
 0x22a   : > { %v2730_v60 = vpop.f32.mrf.mxu0  ;;  %v13737_v48 = vld [vmem:[#allocation61_spill] sm:$0xff] }
 0x22b   : > { %v2513_v50 = vpop.f32.mrf.mxu1  ;;  %v11142_v40 = vadd.f32 %v2730_v60, %v11068_v21  ;;  %v13736_v21 = vld [vmem:[#allocation52_spill] sm:$0xff] }
 0x22c   : > { %v11145_v42 = vadd.f32 %v2513_v50, %v13733_v16  ;;  %v8369_v2 = vpop.f32.mrf.mxu0  ;;  %v13738_v50 = vld [vmem:[#allocation21_spill] sm:$0xff] }
 0x22d   : > { %13732 = vst [vmem:[#allocation81_spill] sm:$0xff] %v11142_v40  ;;  %v2515_v15 = vpop.f32.mrf.mxu1  ;;  %v8939_v16 = vld [vmem:[%s13316_s3 + $0xe8] sm:$0xff]  }
 0x22e   : > { %v2735_v24 = vpop.f32.mrf.mxu0  ;;  %8483 = vmatmul.mubr.bf16.gmra.mxu0 %v13734_v58  ;;  %7779 = vmatpush3.bf16.msra.mxu1 %v8939_v16  ;;  %v13740_v40 = vld [vmem:[#allocation25_spill] sm:$0xff]  ;;  %v13742_v16 = vld [vmem:[#allocation22_spill] sm:$0xff] }
 0x22f   : > { %v2518_v46 = vpop.f32.mrf.mxu1  ;;  %v11152_v22 = vadd.f32 %v2735_v24, %v11078_v27  ;;  %8486 = vmatprep.mubr.msk.bf16.mxu0 %vm9176_vm0, %v13519_v39  ;;  %3207 = vmatmul.mubr.bf16.gmra.mxu1 %v13736_v21 }
 0x230   : > { %v11158_v60 = vadd.f32 %v2518_v46, %v13737_v48  ;;  %v8372_v15 = vpop.f32.mrf.mxu0  ;;  %3214 = vmatprep.mubr.bf16.mxu1 %v13738_v50 }
 0x231   : > { %13735 = vst [vmem:[#allocation8_spill] sm:$0xff] %v11152_v22  ;;  %v2520_v2 = vpop.f32.mrf.mxu1  ;;  %v13739_v22 = vld [vmem:[#allocation57_spill] sm:$0xff] }
 0x232   : > { %v2738_v58 = vpop.f32.mrf.mxu0  ;;  %v13743_v2 = vld [vmem:[#allocation31_spill] sm:$0xff] }
 0x233   : > { %v2521_v27 = vpop.f32.mrf.mxu1  ;;  %v11165_v24 = vadd.f32 %v2738_v58, %v11085_v28 }
 0x234   : > { %v11168_v21 = vadd.f32 %v2521_v27, %v13739_v22  ;;  %v8373_v46 = vpop.f32.mrf.mxu0  ;;  %v13744_v22 = vld [vmem:[#allocation64_spill] sm:$0xff] }
 0x235   : > { %v2523_v48 = vpop.f32.mrf.mxu1 }
 0x236   : > { %v2743_v15 = vpop.f32.mrf.mxu0  ;;  %8487 = vmatmul.mubr.bf16.gmra.mxu0 %v13740_v40 }
 0x237   : > { %v2526_v35 = vpop.f32.mrf.mxu1  ;;  %v11172_v50 = vadd.f32 %v2743_v15, %v11101_v36  ;;  %8490 = vmatprep.mubr.msk.bf16.mxu0 %vm9176_vm0, %v13519_v39  ;;  %3215 = vmatmul.mubr.bf16.gmra.mxu1 %v13742_v16  ;;  %v8940_v36 = vld [vmem:[%s13316_s3 + $0x170] sm:$0xff]  }
 0x238   : > { %v11178_v28 = vadd.f32 %v2526_v35, %v13743_v2  ;;  %v8376_v58 = vpop.f32.mrf.mxu0  ;;  %3222 = vmatprep.mubr.bf16.mxu1 %v13744_v22  ;;  %8580 = vmatprep.subr.bf16.mxu0 %v8940_v36  ;;  %v13746_v2 = vld [vmem:[#allocation26_spill] sm:$0xff] }
 0x239   : > { %13741 = vst [vmem:[#allocation87_spill] sm:$0xff] %v11172_v50  ;;  %v2528_v27 = vpop.f32.mrf.mxu1  ;;  %8581 = vmatpush3.bf16.msra.mxu0 %v8940_v36  ;;  %v13750_v36 = vld [vmem:[#allocation32_spill] sm:$0xff] }
 0x23a   : > { %v2746_v46 = vpop.f32.mrf.mxu0 }
 0x23b   : > { %v2529_v48 = vpop.f32.mrf.mxu1  ;;  %v11182_v40 = vadd.f32 %v2746_v46, %v11108_v54  ;;  %v13748_v54 = vld [vmem:[#allocation49_spill] sm:$0xff]  ;;  %v13749_v46 = vld [vmem:[#allocation63_spill] sm:$0xff] }
 0x23c   : > { %v11188_v15 = vadd.f32 %v2529_v48, %v10721_v13  ;;  %v8377_v16 = vpop.f32.mrf.mxu0 }
 0x23d   : > { %13745 = vst [vmem:[#allocation9_spill] sm:$0xff] %v11182_v40  ;;  %v2531_v50 = vpop.f32.mrf.mxu1 }
 0x23e   : > { %v2751_v35 = vpop.f32.mrf.mxu0  ;;  %8491 = vmatmul.mubr.bf16.gmra.mxu0 %v13746_v2 }
 0x23f   : > { %v2534_v58 = vpop.f32.mrf.mxu1  ;;  %v11192_v22 = vadd.f32 %v2751_v35, %v11118_v52  ;;  %8494 = vmatprep.mubr.msk.bf16.mxu0 %vm9176_vm0, %v13519_v39  ;;  %3223 = vmatmul.mubr.bf16.gmra.mxu1 %v13748_v54 }
 0x240   : > { %v11198_v27 = vadd.f32 %v2534_v58, %v10733_v7  ;;  %v8380_v13 = vpop.f32.mrf.mxu0  ;;  %3230 = vmatprep.mubr.bf16.mxu1 %v13749_v46  ;;  %v13752_v46 = vld [vmem:[#allocation68_spill] sm:$0xff] }
 0x241   : > { %13747 = vst [vmem:[#allocation39_spill] sm:$0xff] %v11192_v22  ;;  %v2536_v50 = vpop.f32.mrf.mxu1 }
 0x242   : > { %v2754_v48 = vpop.f32.mrf.mxu0 }
 0x243   : > { %v2537_v16 = vpop.f32.mrf.mxu1  ;;  %v11202_v2 = vadd.f32 %v2754_v48, %v11128_v34 }
 0x244   : > { %v11205_v52 = vadd.f32 %v2537_v16, %v10742_v3  ;;  %v8381_v35 = vpop.f32.mrf.mxu0  ;;  %v13751_v3 = vld [vmem:[#allocation30_spill] sm:$0xff] }
 0x245   : > { %v2539_v22 = vpop.f32.mrf.mxu1 }
 0x246   : > { %v2759_v40 = vpop.f32.mrf.mxu0  ;;  %8495 = vmatmul.mubr.bf16.gmra.mxu0 %v13651_v29  ;;  %v8941_v22 = vld [vmem:[%s13316_s3 + $0x120] sm:$0xff]  }
 0x247   : > { %v2542_v7 = vpop.f32.mrf.mxu1  ;;  %v11209_v58 = vadd.f32 %v2759_v40, %v11138_v1  ;;  %8498 = vmatprep.mubr.msk.bf16.mxu0 %vm9176_vm0, %v13519_v39  ;;  %3231 = vmatmul.mubr.bf16.gmra.mxu1 %v10727_v9  ;;  %v8942_v29 = vld [vmem:[%s13316_s3 + $0xe0] sm:$0xff]  }
 0x248   : > { %v11215_v34 = vadd.f32 %v2542_v7, %v13750_v36  ;;  %v8384_v54 = vpop.f32.mrf.mxu0  ;;  %3238 = vmatprep.mubr.bf16.mxu1 %v13751_v3  ;;  %7780 = vmatprep.subr.bf16.mxu1 %v8941_v22  ;;  %v13753_v7 = vld [vmem:[#allocation34_spill] sm:$0xff]  ;;  %v13754_v3 = vld [vmem:[#allocation33_spill] sm:$0xff] }
 0x249   : > { %v2544_v1 = vpop.f32.mrf.mxu1  ;;  %7781 = vmatpush3.bf16.msra.mxu1 %v8942_v29 }
 0x24a   : > { %v2762_v40 = vpop.f32.mrf.mxu0  ;;  %v13756_v1 = vld [vmem:[#allocation74_spill] sm:$0xff] }
 0x24b   : > { %v2545_v13 = vpop.f32.mrf.mxu1  ;;  %v11225_v9 = vadd.f32 %v2762_v40, %v11145_v42  ;;  %v13755_v42 = vld [vmem:[#allocation65_spill] sm:$0xff] }
 0x24c   : > { %v11228_v50 = vadd.f32 %v2545_v13, %v13752_v46  ;;  %v8385_v48 = vpop.f32.mrf.mxu0 }
 0x24d   : > { %v2547_v16 = vpop.f32.mrf.mxu1 }
 0x24e   : > { %v2767_v35 = vpop.f32.mrf.mxu0  ;;  %8499 = vmatmul.mubr.bf16.gmra.mxu0 %v13753_v7 }
 0x24f   : > { %v2550_v36 = vpop.f32.mrf.mxu1  ;;  %v11232_v54 = vadd.f32 %v2767_v35, %v11158_v60  ;;  %8502 = vmatprep.mubr.msk.bf16.mxu0 %vm9176_vm0, %v13519_v39  ;;  %3239 = vmatmul.mubr.bf16.gmra.mxu1 %v13754_v3  ;;  %v8943_v35 = vld [vmem:[%s13316_s3 + $0x168] sm:$0xff]   ;;  %v13757_v3 = vld [vmem:[#allocation35_spill] sm:$0xff] }
 0x250   : > { %v11238_v22 = vadd.f32 %v2550_v36, %v13755_v42  ;;  %v8388_v29 = vpop.f32.mrf.mxu0  ;;  %3246 = vmatprep.mubr.bf16.mxu1 %v13756_v1  ;;  %8582 = vmatprep.subr.bf16.mxu0 %v8943_v35 }
 0x251   : > { %v2552_v40 = vpop.f32.mrf.mxu1  ;;  %8583 = vmatpush3.bf16.msra.mxu0 %v8943_v35 }
 0x252   : > { %v2770_v13 = vpop.f32.mrf.mxu0 }
 0x253   : > { %v2553_v46 = vpop.f32.mrf.mxu1  ;;  %v11242_v48 = vadd.f32 %v2770_v13, %v11168_v21  ;;  %v13758_v21 = vld [vmem:[#allocation60_spill] sm:$0xff] }
 0x254   : > { %v11245_v60 = vadd.f32 %v2553_v46, %v10783_v18  ;;  %v8389_v16 = vpop.f32.mrf.mxu0 }
 0x255   : > { %v2555_v7 = vpop.f32.mrf.mxu1 }
 0x256   : > { %v2775_v36 = vpop.f32.mrf.mxu0  ;;  %8503 = vmatmul.mubr.bf16.gmra.mxu0 %v13757_v3 }
 0x257   : > { %v2558_v42 = vpop.f32.mrf.mxu1  ;;  %v11252_v29 = vadd.f32 %v2775_v36, %v11178_v28  ;;  %8506 = vmatprep.mubr.msk.bf16.mxu0 %vm9176_vm0, %v13519_v39  ;;  %3247 = vmatmul.mubr.bf16.gmra.mxu1 %v13758_v21  ;;  %v13759_v21 = vld [vmem:[#allocation54_spill] sm:$0xff] }
 0x258   : > { %v11258_v18 = vadd.f32 %v2558_v42, %v10795_v41  ;;  %v8392_v1 = vpop.f32.mrf.mxu0  ;;  %3254 = vmatprep.mubr.bf16.mxu1 %v10768_v11  ;;  %v13760_v11 = vld [vmem:[#allocation69_spill] sm:$0xff] }
 0x259   : > { %v2560_v40 = vpop.f32.mrf.mxu1 }
 0x25a   : > { %v2778_v13 = vpop.f32.mrf.mxu0 }
 0x25b   : > { %v2561_v46 = vpop.f32.mrf.mxu1  ;;  %v11262_v16 = vadd.f32 %v2778_v13, %v11188_v15 }
 0x25c   : > { %v11265_v28 = vadd.f32 %v2561_v46, %v10802_v23  ;;  %v8393_v7 = vpop.f32.mrf.mxu0  ;;  %v13761_v46 = vld [vmem:[#allocation37_spill] sm:$0xff] }
 0x25d   : > { %v2563_v36 = vpop.f32.mrf.mxu1 }
 0x25e   : > { %v2783_v3 = vpop.f32.mrf.mxu0  ;;  %8507 = vmatmul.mubr.bf16.gmra.mxu0 %v13759_v21  ;;  %v13762_v21 = vld [vmem:[#allocation45_spill] sm:$0xff] }
 0x25f   : > { %v2566_v41 = vpop.f32.mrf.mxu1  ;;  %v11269_v42 = vadd.f32 %v2783_v3, %v11198_v27  ;;  %8510 = vmatprep.mubr.msk.bf16.mxu0 %vm9176_vm0, %v13519_v39  ;;  %3255 = vmatmul.mubr.bf16.gmra.mxu1 %v13760_v11 }
 0x260   : > { %v11275_v15 = vadd.f32 %v2566_v41, %v10810_v57  ;;  %v8396_v35 = vpop.f32.mrf.mxu0  ;;  %3262 = vmatprep.mubr.bf16.mxu1 %v10791_v63  ;;  %v13763_v63 = vld [vmem:[#allocation38_spill] sm:$0xff] }
 0x261   : > { %v2568_v23 = vpop.f32.mrf.mxu1  ;;  %v13764_v41 = vld [vmem:[#allocation42_spill] sm:$0xff] }
 0x262   : > { %v2786_v1 = vpop.f32.mrf.mxu0  ;;  %v13765_v23 = vld [vmem:[#allocation77_spill] sm:$0xff] }
 0x263   : > { %v2569_v40 = vpop.f32.mrf.mxu1  ;;  %v11279_v13 = vadd.f32 %v2786_v1, %v11205_v52 }
 0x264   : > { %v11282_v27 = vadd.f32 %v2569_v40, %v13761_v46  ;;  %v8397_v7 = vpop.f32.mrf.mxu0 }
 0x265   : > { %v2571_v36 = vpop.f32.mrf.mxu1 }
 0x266   : > { %v2791_v3 = vpop.f32.mrf.mxu0  ;;  %8511 = vmatmul.mubr.bf16.gmra.mxu0 %v13762_v21  ;;  %v8945_v36 = vld [vmem:[%s13316_s3 + $0xd8] sm:$0xff]  }
 0x267   : > { %v2574_v11 = vpop.f32.mrf.mxu1  ;;  %v11286_v57 = vadd.f32 %v2791_v3, %v11215_v34  ;;  %8514 = vmatprep.mubr.msk.bf16.mxu0 %vm9176_vm0, %v13519_v39  ;;  %3263 = vmatmul.mubr.bf16.gmra.mxu1 %v13763_v63  ;;  %v8944_v34 = vld [vmem:[%s13316_s3 + $0x118] sm:$0xff]  }
 0x268   : > { %v11292_v52 = vadd.f32 %v2574_v11, %v13764_v41  ;;  %v8400_v35 = vpop.f32.mrf.mxu0  ;;  %3270 = vmatprep.mubr.bf16.mxu1 %v13765_v23  ;;  %7782 = vmatprep.subr.bf16.mxu1 %v8944_v34  ;;  %v13766_v41 = vld [vmem:[#allocation46_spill] sm:$0xff] }
 0x269   : > { %v2576_v1 = vpop.f32.mrf.mxu1  ;;  %7783 = vmatpush3.bf16.msra.mxu1 %v8945_v36  ;;  %v13767_v23 = vld [vmem:[#allocation66_spill] sm:$0xff] }
 0x26a   : > { %v2794_v40 = vpop.f32.mrf.mxu0  ;;  %v8948_v36 = vld [vmem:[%s13316_s3 + $0xd0] sm:$0xff]  }
 0x26b   : > { %v2577_v46 = vpop.f32.mrf.mxu1  ;;  %v11296_v7 = vadd.f32 %v2794_v40, %v11228_v50 }
 0x26c   : > { %v11305_v3 = vadd.f32 %v2577_v46, %v10837_v8  ;;  %v8401_v21 = vpop.f32.mrf.mxu0  ;;  %v8947_v46 = vld [vmem:[%s13316_s3 + $0x110] sm:$0xff]  }
 0x26d   : > { %v2579_v11 = vpop.f32.mrf.mxu1  ;;  %7784 = vmatprep.subr.bf16.mxu1 %v8947_v46  ;;  %v13769_v46 = vld [vmem:[#allocation40_spill] sm:$0xff] }
 0x26e   : > { %v2799_v63 = vpop.f32.mrf.mxu0  ;;  %8515 = vmatmul.mubr.bf16.gmra.mxu0 %v13766_v41  ;;  %7785 = vmatpush3.bf16.msra.mxu1 %v8948_v36  ;;  %v8949_v41 = vld [vmem:[%s13316_s3 + $0x108] sm:$0xff]  }
 0x26f   : > { %v2582_v50 = vpop.f32.mrf.mxu1  ;;  %v11309_v35 = vadd.f32 %v2799_v63, %v11238_v22  ;;  %8518 = vmatprep.mubr.msk.bf16.mxu0 %vm9176_vm0, %v13519_v39  ;;  %3271 = vmatmul.mubr.bf16.gmra.mxu1 %v13767_v23  ;;  %v8946_v22 = vld [vmem:[%s13316_s3 + $0x160] sm:$0xff]   ;;  %v13768_v23 = vld [vmem:[#allocation62_spill] sm:$0xff] }
 0x270   : > { %v11315_v1 = vadd.f32 %v2582_v50, %v10849_v55  ;;  %v8404_v8 = vpop.f32.mrf.mxu0  ;;  %3278 = vmatprep.mubr.bf16.mxu1 %v10823_v0  ;;  %8584 = vmatprep.subr.bf16.mxu0 %v8946_v22 }
 0x271   : > { %v2584_v40 = vpop.f32.mrf.mxu1  ;;  %8585 = vmatpush3.bf16.msra.mxu0 %v8946_v22  ;;  %7786 = vmatprep.subr.bf16.mxu1 %v8949_v41 }
 0x272   : > { %v2802_v34 = vpop.f32.mrf.mxu0 }
 0x273   : > { %v2585_v21 = vpop.f32.mrf.mxu1  ;;  %v11328_v55 = vadd.f32 %v2802_v34, %v11245_v60  ;;  %v8950_v60 = vld [vmem:[%s13316_s3 + $0xc8] sm:$0xff]  }
 0x274   : > { %v11331_v0 = vadd.f32 %v2585_v21, %v10856_v17  ;;  %v8405_v11 = vpop.f32.mrf.mxu0  ;;  %v8951_v17 = vld [vmem:[%s13316_s3 + $0x158] sm:$0xff]   ;;  %7787 = vmatpush3.bf16.msra.mxu1 %v8950_v60 }
 0x275   : > { %v2587_v63 = vpop.f32.mrf.mxu1  ;;  %8586 = vmatprep.subr.bf16.mxu0 %v8951_v17  ;;  %v8953_v11 = vld [vmem:[%s13316_s3 + $0xc0] sm:$0xff]  }
 0x276   : > { %v2807_v50 = vpop.f32.mrf.mxu0  ;;  %8519 = vmatmul.mubr.bf16.gmra.mxu0 %v13768_v23 }
 0x277   : > { %v2590_v8 = vpop.f32.mrf.mxu1  ;;  %v11344_v40 = vadd.f32 %v2807_v50, %v11258_v18  ;;  %8522 = vmatprep.mubr.msk.bf16.mxu0 %vm9176_vm0, %v13519_v39  ;;  %3279 = vmatmul.mubr.bf16.gmra.mxu1 %v13769_v46  ;;  %v8952_v18 = vld [vmem:[%s13316_s3 + $0x100] sm:$0xff]  }
 0x278   : > { %v11350_v34 = vadd.f32 %v2590_v8, %v10863_v62  ;;  %v8408_v22 = vpop.f32.mrf.mxu0  ;;  %3286 = vmatprep.mubr.bf16.mxu1 %v10845_v45  ;;  %8587 = vmatpush3.bf16.msra.mxu0 %v8951_v17  ;;  %v8954_v62 = vld [vmem:[%s13316_s3 + $0x150] sm:$0xff]   ;;  %v8955_v8 = vld [vmem:[%s13316_s3 + $0x148] sm:$0xff]  }
 0x279   : > { %v2592_v36 = vpop.f32.mrf.mxu1  ;;  %7788 = vmatprep.subr.bf16.mxu1 %v8952_v18  ;;  %8588 = vmatprep.subr.bf16.mxu0 %v8954_v62  ;;  %v13770_v17 = vld [vmem:[#allocation50_spill] sm:$0xff] }
 0x27a   : > { %v2810_v21 = vpop.f32.mrf.mxu0  ;;  %7789 = vmatpush3.bf16.msra.mxu1 %v8953_v11 }
 0x27b   : > { %v2593_v63 = vpop.f32.mrf.mxu1  ;;  %v11363_v45 = vadd.f32 %v2810_v21, %v11265_v28  ;;  %v13772_v28 = vld [vmem:[#allocation47_spill] sm:$0xff] }
 0x27c   : > { %v11366_v41 = vadd.f32 %v2593_v63, %v10869_v5  ;;  %v8409_v50 = vpop.f32.mrf.mxu0  ;;  %v13771_v5 = vld [vmem:[#allocation75_spill] sm:$0xff]  ;;  %8589 = vmatpush3.bf16.msra.mxu0 %v8954_v62 }
 0x27d   : > { %v2595_v23 = vpop.f32.mrf.mxu1  ;;  %v13773_v21 = vld [vmem:[#allocation83_spill] sm:$0xff]  ;;  %8590 = vmatprep.subr.bf16.mxu0 %v8955_v8 }
 0x27e   : > { %v2815_v60 = vpop.f32.mrf.mxu0  ;;  %8523 = vmatmul.mubr.bf16.gmra.mxu0 %v13770_v17  ;;  %v13775_v62 = vld [vmem:[#allocation51_spill] sm:$0xff] }
 0x27f   : > { %v2598_v46 = vpop.f32.mrf.mxu1  ;;  %v11373_v22 = vadd.f32 %v2815_v60, %v11275_v15  ;;  %8526 = vmatprep.mubr.msk.bf16.mxu0 %vm9176_vm0, %v13519_v39  ;;  %3287 = vmatmul.mubr.bf16.gmra.mxu1 %v13771_v5  ;;  %v8956_v15 = vld [vmem:[%s13316_s3 + $0x140] sm:$0xff]  }
 0x280   : > { %v11379_v36 = vadd.f32 %v2598_v46, %v13772_v28  ;;  %v8412_v18 = vpop.f32.mrf.mxu0  ;;  %3294 = vmatprep.mubr.bf16.mxu1 %v13773_v21  ;;  %8591 = vmatpush3.bf16.msra.mxu0 %v8955_v8  ;;  %v13777_v21 = vld [vmem:[#allocation67_spill] sm:$0xff] }
 0x281   : > { %v2600_v11 = vpop.f32.mrf.mxu1  ;;  %8592 = vmatprep.subr.bf16.mxu0 %v8956_v15 }
 0x282   : > { %v2818_v63 = vpop.f32.mrf.mxu0 }
 0x283   : > { %v2601_v50 = vpop.f32.mrf.mxu1  ;;  %v11386_v23 = vadd.f32 %v2818_v63, %v11282_v27 }
 0x284   : > { %v11389_v60 = vadd.f32 %v2601_v50, %v10889_v26  ;;  %v8413_v17 = vpop.f32.mrf.mxu0  ;;  %8593 = vmatpush3.bf16.msra.mxu0 %v8956_v15 }
 0x285   : > { %13774 = vst [vmem:[#allocation43_spill] sm:$0xff] %v11386_v23  ;;  %v2603_v46 = vpop.f32.mrf.mxu1 }
 0x286   : > { %v2823_v5 = vpop.f32.mrf.mxu0  ;;  %8527 = vmatmul.mubr.bf16.gmra.mxu0 %v13775_v62  ;;  %v13779_v62 = vld [vmem:[#allocation73_spill] sm:$0xff] }
 0x287   : > { %v2606_v28 = vpop.f32.mrf.mxu1  ;;  %v11393_v18 = vadd.f32 %v2823_v5, %v11292_v52  ;;  %8530 = vmatprep.mubr.msk.bf16.mxu0 %vm9176_vm0, %v13519_v39  ;;  %3295 = vmatmul.mubr.bf16.gmra.mxu1 %v13777_v21  ;;  %v13783_v21 = vld [vmem:[#allocation53_spill] sm:$0xff] }
 0x288   : > { %v11399_v27 = vadd.f32 %v2606_v28, %v10901_v33  ;;  %v8416_v26 = vpop.f32.mrf.mxu0  ;;  %3302 = vmatprep.mubr.bf16.mxu1 %v10875_v14  ;;  %v13781_v14 = vld [vmem:[#allocation48_spill] sm:$0xff] }
 0x289   : > { %13776 = vst [vmem:[#allocation29_spill] sm:$0xff] %v11393_v18  ;;  %v2608_v8 = vpop.f32.mrf.mxu1 }
 0x28a   : > { %v2826_v11 = vpop.f32.mrf.mxu0 }
 0x28b   : > { %v2609_v63 = vpop.f32.mrf.mxu1  ;;  %v11403_v50 = vadd.f32 %v2826_v11, %v11305_v3  ;;  %v13782_v3 = vld [vmem:[#allocation70_spill] sm:$0xff] }
 0x28c   : > { %v11406_v52 = vadd.f32 %v2609_v63, %v10910_v53  ;;  %v8417_v17 = vpop.f32.mrf.mxu0 }
 0x28d   : > { %13778 = vst [vmem:[#allocation23_spill] sm:$0xff] %v11403_v50  ;;  %v2611_v46 = vpop.f32.mrf.mxu1  ;;  %v13789_v50 = vld [vmem:[#allocation59_spill] sm:$0xff] }
 0x28e   : > { %v2831_v5 = vpop.f32.mrf.mxu0  ;;  %8531 = vmatmul.mubr.bf16.gmra.mxu0 %v13779_v62  ;;  %v13785_v62 = vld [vmem:[#allocation58_spill] sm:$0xff] }
 0x28f   : > { %v2614_v33 = vpop.f32.mrf.mxu1  ;;  %v11410_v28 = vadd.f32 %v2831_v5, %v11315_v1  ;;  %8534 = vmatprep.mubr.msk.bf16.mxu0 %vm9176_vm0, %v13519_v39  ;;  %3303 = vmatmul.mubr.bf16.gmra.mxu1 %v13781_v14  ;;  %v376_v14 = vld [vmem:[%s9331_s12 + $0x134] sm:$0xf] }
 0x290   : > { %v11416_v15 = vadd.f32 %v2614_v33, %v13782_v3  ;;  %v8420_v53 = vpop.f32.mrf.mxu0  ;;  %3310 = vmatprep.mubr.bf16.mxu1 %v13783_v21  ;;  %v375_v33 = vld [vmem:[%s9331_s12 + $0x130] sm:$0xf] }
 0x291   : > { %13780 = vst [vmem:[#allocation14_spill] sm:$0xff] %v11410_v28  ;;  %v2616_v26 = vpop.f32.mrf.mxu1 }
 0x292   : > { %v2834_v8 = vpop.f32.mrf.mxu0  ;;  %v13788_v26 = vld [vmem:[#allocation92_spill] sm:$0xff] }
 0x293   : > { %v2617_v11 = vpop.f32.mrf.mxu1  ;;  %v11420_v63 = vadd.f32 %v2834_v8, %v11331_v0  ;;  %v13787_v0 = vld [vmem:[#allocation55_spill] sm:$0xff] }
 0x294   : > { %v11423_v1 = vadd.f32 %v2617_v11, %v10927_v4  ;;  %v8421_v17 = vpop.f32.mrf.mxu0  ;;  %v455_v11 = vmul.bf16 1045249613, %v375_v33 }
 0x295   : > { %13784 = vst [vmem:[#allocation28_spill] sm:$0xff] %v11420_v63  ;;  %v2619_v46 = vpop.f32.mrf.mxu1  ;;  %v456_v17 = vmul.bf16 1045249613, %v376_v14  ;;  %v378_v63 = vld [vmem:[%s9331_s12 + $0x13c] sm:$0x1] }
 0x296   : > { %v2839_v5 = vpop.f32.mrf.mxu0  ;;  %8535 = vmatmul.mubr.bf16.gmra.mxu0 %v13785_v62  ;;  %v377_v62 = vld [vmem:[%s9331_s12 + $0x138] sm:$0xf] }
 0x297   : > { %v2622_v3 = vpop.f32.mrf.mxu1  ;;  %v11429_v53 = vadd.f32 %v2839_v5, %v11350_v34  ;;  %8538 = vmatprep.mubr.msk.bf16.mxu0 %vm9176_vm0, %v13519_v39  ;;  %3311 = vmatmul.mubr.bf16.gmra.mxu1 %v13787_v0 }
 0x298   : > { %v11435_v4 = vadd.f32 %v2622_v3, %v10936_v49  ;;  %v8424_v21 = vpop.f32.mrf.mxu0  ;;  %3318 = vmatprep.mubr.bf16.mxu1 %v13788_v26  ;;  %v457_v49 = vmul.bf16 1045249613, %v377_v62  ;;  %v458_v3 = vmul.bf16 1045249613, %v378_v63  ;;  %v11448_v26 = vmax.bf16 %v456_v17, %v376_v14 }
 0x299   : > { %13786 = vst [vmem:[#allocation10_spill] sm:$0xff] %v11429_v53  ;;  %v2624_v8 = vpop.f32.mrf.mxu1  ;;  %v11446_v21 = vmax.bf16 %v455_v11, %v375_v33  ;;  %v13791_v33 = vld [vmem:[#allocation71_spill] sm:$0xff] }
 0x29a   : > { %v2842_v46 = vpop.f32.mrf.mxu0  ;;  %v538_v11 = vmax.bf16 %v458_v3, %v378_v63 }
 0x29b   : > { %v2625_v28 = vpop.f32.mrf.mxu1  ;;  %v11441_v34 = vadd.f32 %v2842_v46, %v11366_v41 }
 0x29c   : > { %v11444_v5 = vadd.f32 %v2625_v28, %v10948_v37  ;;  %v8425_v0 = vpop.f32.mrf.mxu0  ;;  %v13790_v37 = vld [vmem:[#allocation79_spill] sm:$0xff] }
 0x29d   : > { %v2627_v53 = vpop.f32.mrf.mxu1 }
 0x29e   : > { %v2847_v8 = vpop.f32.mrf.mxu0  ;;  %8539 = vmatmul.mubr.bf16.gmra.mxu0 %v13789_v50  ;;  %v11461_v53 = vmax.bf16 %v457_v49, %v377_v62  ;;  %v11465_v50 = vcombine.low %v11446_v21, %v11448_v26 }
 0x29f   : > { %v2630_v18 = vpop.f32.mrf.mxu1  ;;  %v11452_v23 = vadd.f32 %v2847_v8, %v11379_v36  ;;  %8542 = vmatprep.mubr.msk.bf16.mxu0 %vm9176_vm0, %v13519_v39  ;;  %3319 = vmatmul.mubr.bf16.gmra.mxu1 %v13790_v37  ;;  %v13792_v37 = vld [vmem:[#allocation93_spill] sm:$0xff] }
 0x2a0   : > { %v11458_v41 = vadd.f32 %v2630_v18, %v10961_v6  ;;  %v8428_v28 = vpop.f32.mrf.mxu0  ;;  %3326 = vmatprep.mubr.bf16.mxu1 %v13791_v33  ;;  %v11474_v8 = vcombine.low %v11461_v53, %v538_v11  ;;  %v1028_v62 = vshll.u32 %v11465_v50, 16  ;;  %v1026_v33 = vshrl.u32 %v11465_v50, 16 }
 0x2a1   : > { %v2632_v14 = vpop.f32.mrf.mxu1 }
 0x2a2   : > { %v2850_v36 = vpop.f32.mrf.mxu0  ;;  %v1030_v14 = vrot.slane %v1028_v62, 1 }
 0x2a3   : > { %v2633_v17 = vpop.f32.mrf.mxu1  ;;  %v11468_v46 = vadd.f32 %v2850_v36, %v11389_v60 }
 0x2a4   : > { %v11471_v0 = vadd.f32 %v2633_v17, %v10975_v12  ;;  %v8429_v6 = vpop.f32.mrf.mxu0 }
 0x2a5   : > { %v2635_v18 = vpop.f32.mrf.mxu1  ;;  %v1031_v6 = vor.u32 %v1030_v14, %v1026_v33 }
 0x2a6   : > { %v2855_v63 = vpop.f32.mrf.mxu0  ;;  %8543 = vmatmul.mubr.bf16.gmra.mxu0 %v13693_v56  ;;  %v1033_v56 = vshll.u32 %v11474_v8, 16 }
 0x2a7   : > { %v2638_v49 = vpop.f32.mrf.mxu1  ;;  %v11479_v3 = vadd.f32 %v2855_v63, %v11399_v27  ;;  %8546 = vmatprep.mubr.msk.bf16.mxu0 %vm9176_vm0, %v13519_v39  ;;  %3327 = vmatmul.mubr.bf16.gmra.mxu1 %v10952_v25 }
 0x2a8   : > { %v11485_v12 = vadd.f32 %v2638_v49, %v10988_v10  ;;  %v8432_v60 = vpop.f32.mrf.mxu0  ;;  %3334 = vmatprep.mubr.bf16.mxu1 %v13792_v37  ;;  %v1035_v18 = vrot.slane %v1033_v56, 1  ;;  %v13794_v37 = vld [vmem:[#allocation94_spill] sm:$0xff] }
 0x2a9   : > { %v2640_v28 = vpop.f32.mrf.mxu1  ;;  %v13793_v60 = vld [vmem:[#allocation84_spill] sm:$0xff] }
 0x2aa   : > { %v2858_v11 = vpop.f32.mrf.mxu0  ;;  %v1037_v28 = vshrl.u32 %v11474_v8, 16  ;;  %v1036_v14 = vsel %vm739_vm2, %v1031_v6, %v1035_v18 }
 0x2ab   : > { %v2641_v27 = vpop.f32.mrf.mxu1  ;;  %v11491_v36 = vadd.f32 %v2858_v11, %v11406_v52 }
 0x2ac   : > { %v11494_v17 = vadd.f32 %v2641_v27, %v11000_v38  ;;  %v8433_v25 = vpop.f32.mrf.mxu0 }
 0x2ad   : > { %v2643_v10 = vpop.f32.mrf.mxu1  ;;  %v13795_v25 = vld [vmem:[#allocation95_spill] sm:$0xff] }
 0x2ae   : > { %v2863_v63 = vpop.f32.mrf.mxu0  ;;  %8547 = vmatmul.mubr.bf16.gmra.mxu0 %v10972_v43  ;;  %v7342_v10 = vcombine.low %v13795_v25, %v1036_v14 }
 0x2af   : > { %v2646_v49 = vpop.f32.mrf.mxu1  ;;  %v11498_v62 = vadd.f32 %v2863_v63, %v11416_v15  ;;  %8550 = vmatprep.mubr.msk.bf16.mxu0 %vm9176_vm0, %v13519_v39  ;;  %3335 = vmatmul.mubr.bf16.gmra.mxu1 %v13793_v60  ;;  %v1039_v63 = vor.u32 %v1037_v28, %v1035_v18 }
 0x2b0   : > { %v2647_v52 = vadd.f32 %v2646_v49, %v11007_v44  ;;  %v8436_v38 = vpop.f32.mrf.mxu0  ;;  %3342 = vmatprep.mubr.bf16.mxu1 %v13794_v37 }
 0x2b1   : > { %v2648_v33 = vpop.f32.mrf.mxu1  ;;  %v13797_v38 = vld [vmem:[#allocation88_spill] sm:$0xff]  ;;  %v2906_v37 = vunpack.c.l.b16 %v1039_v63 }
 0x2b2   : > { %v2866_v43 = vpop.f32.mrf.mxu0 }
 0x2b3   : > { %v2649_v56 = vpop.f32.mrf.mxu1  ;;  %v11508_v15 = vadd.f32 %v2866_v43, %v11423_v1 }
 0x2b4   : > { %v2650_v11 = vadd.f32 %v2649_v56, %v11023_v20  ;;  %v8437_v27 = vpop.f32.mrf.mxu0  ;;  %v2904_v20 = vunpack.c.h.b16 %v1036_v14 }
 0x2b5   : > { %v2651_v44 = vpop.f32.mrf.mxu1 }
 0x2b6   : > { %v2871_v49 = vpop.f32.mrf.mxu0  ;;  %8551 = vmatmul.mubr.bf16.gmra.mxu0 %v10997_v32  ;;  %v13799_v32 = vld [vmem:[#allocation86_spill] sm:$0xff]  ;;  %v2963_v27 = vpack.c.b16 %v2906_v37, %v2904_v20 }
 0x2b7   : > { %v11514_v60 = vadd.f32 %v2871_v49, %v11435_v4  ;;  %8554 = vmatprep.mubr.msk.bf16.mxu0 %vm9176_vm0, %v13519_v39  ;;  %v3152_v6 = vpop.f32.mrf.mxu1  ;;  %3343 = vmatmul.mubr.bf16.gmra.mxu1 %v13797_v38  ;;  %v7341_v4 = vcombine.low %v13799_v32, %v11446_v21 }
 0x2b8   : > { %v8440_v1 = vpop.f32.mrf.mxu0  ;;  %3350 = vmatprep.mubr.bf16.mxu1 %v7342_v10 }
 0x2b9   : > { %13796 = vst [vmem:[#allocation17_spill] sm:$0xff] %v11514_v60  ;;  %v3154_v33 = vpop.f32.mrf.mxu1 }
 0x2ba   : > { %v2874_v43 = vpop.f32.mrf.mxu0 }
 0x2bb   : > { %v11520_v18 = vadd.f32 %v2874_v43, %v11444_v5  ;;  %v11522_v28 = vpop.f32.mrf.mxu1 }
 0x2bc   : > { %v8441_v56 = vpop.f32.mrf.mxu0 }
 0x2bd   : > { %13798 = vst [vmem:[#allocation12_spill] sm:$0xff] %v11520_v18  ;;  %v3157_v25 = vpop.f32.mrf.mxu1 }
 0x2be   : > { %v2879_v44 = vpop.f32.mrf.mxu0  ;;  %8555 = vmatmul.mubr.bf16.gmra.mxu0 %v13699_v30  ;;  %v7344_v30 = vcombine.low %v11448_v26, %v11461_v53 }
 0x2bf   : > { %v11528_v10 = vadd.f32 %v2879_v44, %v11458_v41  ;;  %8558 = vmatprep.mubr.msk.bf16.mxu0 %vm9176_vm0, %v13519_v39  ;;  %v11532_v14 = vpop.f32.mrf.mxu1  ;;  %3351 = vmatmul.mubr.bf16.gmra.mxu1 %v7341_v4 }
 0x2c0   : > { %v8444_v5 = vpop.f32.mrf.mxu0  ;;  %3358 = vmatprep.mubr.bf16.mxu1 %v2963_v27 }
 0x2c1   : > { %13800 = vst [vmem:[#allocation16_spill] sm:$0xff] %v11528_v10  ;;  %v3162_v63 = vpop.f32.mrf.mxu1 }
 0x2c2   : > { %v2882_v49 = vpop.f32.mrf.mxu0 }
 0x2c3   : > { %v11535_v21 = vadd.f32 %v2882_v49, %v11471_v0  ;;  %v11537_v38 = vpop.f32.mrf.mxu1  ;;  %v1099_v49 = vrot.slane %v11474_v8, 1  ;;  %v11581_v8 = vld [vmem:[%s13315_s2] ss:$0 sm:$0xff] }
 0x2c4   : > { %v8445_v41 = vpop.f32.mrf.mxu0 }
 0x2c5   : > { %13801 = vst [vmem:[#allocation41_spill] sm:$0xff] %v11535_v21  ;;  %v3165_v1 = vpop.f32.mrf.mxu1 }
 0x2c6   : > { %v2887_v20 = vpop.f32.mrf.mxu0  ;;  %8559 = vmatmul.mubr.bf16.gmra.mxu0 %v11041_v51  ;;  %v13806_v1 = vld [vmem:[#allocation91_spill] sm:$0xff] }
 0x2c7   : > { %v11543_v37 = vadd.f32 %v2887_v20, %v11485_v12  ;;  %8562 = vmatprep.mubr.msk.bf16.mxu0 %vm9176_vm0, %v13519_v39  ;;  %v11547_v33 = vpop.f32.mrf.mxu1  ;;  %3359 = vmatmul.mubr.bf16.gmra.mxu1 %v7344_v30 }
 0x2c8   : > { %v8448_v0 = vpop.f32.mrf.mxu0 }
 0x2c9   : > { %13802 = vst [vmem:[#allocation15_spill] sm:$0xff] %v11543_v37  ;;  %v3170_v43 = vpop.f32.mrf.mxu1 }
 0x2ca   : > { %v2890_v32 = vpop.f32.mrf.mxu0 }
 0x2cb   : > { %v11550_v4 = vadd.f32 %v2890_v32, %v11494_v17  ;;  %v11552_v26 = vpop.f32.mrf.mxu1  ;;  %v1098_v17 = vrot.slane %v11465_v50, 1  ;;  %v11576_v50 = vld [vmem:[%s13316_s3 + $0xb8] sm:$0xff]  }
 0x2cc   : > { %v8449_v53 = vpop.f32.mrf.mxu0  ;;  %8626 = vmatprep.subr.bf16.mxu1 %v11576_v50 }
 0x2cd   : > { %13803 = vst [vmem:[#allocation18_spill] sm:$0xff] %v11550_v4  ;;  %v3173_v56 = vpop.f32.mrf.mxu1  ;;  %v1100_v0 = vsel %vm1040_vm1, %v1098_v17, %v1099_v49 }
 0x2ce   : > { %v2895_v51 = vpop.f32.mrf.mxu0  ;;  %8563 = vmatmul.mubr.bf16.gmra.mxu0 %v11062_v61 }
 0x2cf   : > { %v11555_v12 = vadd.f32 %v2895_v51, %v2647_v52  ;;  %8566 = vmatprep.mubr.msk.bf16.mxu0 %vm9176_vm0, %v13519_v39  ;;  %v11559_v27 = vpop.f32.mrf.mxu1  ;;  %v13807_v51 = vld [vmem:[#allocation90_spill] sm:$0xff] }
 0x2d0   : > { %v8452_v25 = vpop.f32.mrf.mxu0 }
 0x2d1   : > { %13804 = vst [vmem:[#allocation11_spill] sm:$0xff] %v11555_v12  ;;  %v3178_v44 = vpop.f32.mrf.mxu1  ;;  %v7343_v25 = vcombine.low %v13807_v51, %v1100_v0  ;;  %v2907_v51 = vunpack.c.l.b16 %v1099_v49 }
 0x2d2   : > { %v2898_v5 = vpop.f32.mrf.mxu0 }
 0x2d3   : > { %v11561_v63 = vadd.f32 %v2898_v5, %v2650_v11  ;;  %v11565_v30 = vpop.f32.mrf.mxu1  ;;  %v3894_v11 = vlaneseq }
 0x2d4   : > { %v8453_v41 = vpop.f32.mrf.mxu0 }
 0x2d5   : > { %13805 = vst [vmem:[#allocation13_spill] sm:$0xff] %v11561_v63  ;;  %v3181_v61 = vpop.f32.mrf.mxu1  ;;  %v3895_v41 = vshrl.u32 %v3894_v11, 7  ;;  %v2905_v63 = vunpack.c.h.b16 %v1100_v0 }
 0x2d6   : > { %v3401_v52 = vpop.f32.mrf.mxu0  ;;  %8567 = vmatmul.mubr.bf16.gmra.mxu0 %v13806_v1 }
 0x2d7   : > { %v3402_v20 = vadd.f32 %v3401_v52, %v3152_v6  ;;  %8570 = vmatprep.mubr.msk.bf16.mxu0 %vm9176_vm0, %v13519_v39  ;;  %v11571_v43 = vpop.f32.mrf.mxu1  ;;  %v13808_v52 = vld [vmem:[#allocation76_spill] sm:$0xff]  ;;  %vm3952_vm4 = vcmp.ge.s32.totalorder %v3895_v41, 1  ;;  %v2964_v0 = vpack.c.b16 %v2907_v51, %v2905_v63  ;;  %v3897_v49 = vadd.s32 16, %v3895_v41 }
 0x2d8   : > { %v8472_v32 = vpop.f32.mrf.mxu0  ;;  %vm11601_vm5 = vmpackc.low %vm3952_vm4, %vm3952_vm4  ;;  %v13817_v51 = vld [vmem:[#allocation72_spill] sm:$0xff] }
 0x2d9   : > { %v3616_v6 = vadd.f32 %v3402_v20, %v11030_v47  ;;  %v3186_v53 = vpop.f32.mrf.mxu1  ;;  %v13809_v20 = vmov 0   ;;  %vm4053_vm9 = vcmp.le.s32.totalorder %v3897_v49, 16 }
 0x2da   : > { %v3404_v56 = vpop.f32.mrf.mxu0  ;;  %v4276_v32 = vsel %vm4222_vm3, 65537, %v13809_v20  ;;  %vm4227_vm10 = vmpackc.low %vm4053_vm9, %vm4053_vm9 }
 0x2db   : > { %v3677_v44 = vadd.f32 %v11581_v8, %v3616_v6  ;;  %v3405_v5 = vadd.f32 %v3404_v56, %v11522_v28  ;;  %v11590_v17 = vpop.f32.mrf.mxu1  ;;  %v7370_v56 = vcombine.low %v4276_v32, %v4276_v32 }
 0x2dc   : > { %v8473_v61 = vpop.f32.mrf.mxu0 }
 0x2dd   : > { %v3617_v1 = vadd.f32 %v3405_v5, %v13808_v52  ;;  %v3189_v47 = vpop.f32.mrf.mxu1  ;;  %v3731_v12 = vmul.f32 0.2, %v3677_v44  ;;  %v13810_v61 = vld [vmem:[#allocation80_spill] sm:$0xff]  ;;  %vm11609_vm8 = vcmp.ne.s16.totalorder %v7370_v56, 0 }
 0x2de   : > { %v3409_v53 = vpop.f32.mrf.mxu0  ;;  %8571 = vmatmul.mubr.bf16.gmra.mxu0 %v7343_v25 }
 0x2df   : > { %v3678_v4 = vadd.f32 %v11581_v8, %v3617_v1  ;;  %v3410_v6 = vadd.f32 %v3409_v53, %v11532_v14  ;;  %8574 = vmatprep.mubr.msk.bf16.mxu0 %vm9176_vm0, %v13519_v39  ;;  %v11598_v28 = vpop.f32.mrf.mxu1  ;;  %v3785_v14 = vmax.f32 %v3677_v44, %v3731_v12  ;;  %v4280_v44 = vsel %vm4226_vm7, 65537, %v13809_v20 }
 0x2e0   : > { %v8476_v11 = vpop.f32.mrf.mxu0 }
 0x2e1   : > { %v3732_v5 = vmul.f32 0.2, %v3678_v4  ;;  %v3618_v52 = vadd.f32 %v3410_v6, %v13810_v61  ;;  %v3194_v47 = vpop.f32.mrf.mxu1  ;;  %v13813_v6 = vmov 0 }
 0x2e2   : > { %v3412_v25 = vpop.f32.mrf.mxu0  ;;  %v13814_v6 = vsel %vm11609_vm8, 4294967295, %v13813_v6 }
 0x2e3   : > { %v3786_v1 = vmax.f32 %v3678_v4, %v3732_v5  ;;  %v3679_v39 = vadd.f32 %v11581_v8, %v3618_v52  ;;  %v3413_v53 = vadd.f32 %v3412_v25, %v11537_v38  ;;  %v11607_v32 = vpop.f32.mrf.mxu1  ;;  %13815 = vst [vmem:[#allocation56_spill] sm:$0xff] %v13814_v6  ;;  %v4279_v38 = vsel %vm11601_vm5, 65537, %v13809_v20 }
 0x2e4   : > { %v8477_v11 = vpop.f32.mrf.mxu0 }
 0x2e5   : > { %v11613_v63 = vpack.c.bf16 %v3786_v1, %v3785_v14  ;;  %v3733_v41 = vmul.f32 0.2, %v3679_v39  ;;  %v3619_v61 = vadd.f32 %v3413_v53, %v13817_v51  ;;  %v3197_v12 = vpop.f32.mrf.mxu1  ;;  %v13818_v1 = vld [vmem:[#allocation85_spill] sm:$0xff]  ;;  %v7372_v51 = vcombine.low %v4279_v38, %v4280_v44 }
 0x2e6   : > { %v3417_v4 = vpop.f32.mrf.mxu0  ;;  %8575 = vmatmul.mubr.bf16.gmra.mxu0 %v2964_v0  ;;  %v4281_v38 = vsel %vm4227_vm10, 65537, %v13809_v20 }
 0x2e7   : > { %13816 = vst [vmem:[#allocation19_spill] sm:$0xff] %v11613_v63  ;;  %v3787_v5 = vmax.f32 %v3679_v39, %v3733_v41  ;;  %v3680_v56 = vadd.f32 %v11581_v8, %v3619_v61  ;;  %v3418_v52 = vadd.f32 %v3417_v4, %v11547_v33  ;;  %v11622_v47 = vpop.f32.mrf.mxu1  ;;  %v4456_v25 = vsel %vm11609_vm8, %v11613_v63, 0 }
 0x2e8   : > { %v8480_v14 = vpop.f32.mrf.mxu0  ;;  %v4495_v0 = vshll.u32 %v4456_v25, 16  ;;  %v4493_v63 = vshrl.u32 %v4456_v25, 16  ;;  %v4762_v21 = vrot.slane %v4456_v25, 1  ;;  %v7373_v60 = vcombine.low %v4281_v38, %v4281_v38 }
 0x2e9   : > { %v3840_v49 = vpack.c.bf16 %v3787_v5, %v3787_v5  ;;  %v3620_v53 = vadd.f32 %v3418_v52, %v13818_v1  ;;  %v3202_v37 = vpop.f32.mrf.mxu1  ;;  %v3734_v41 = vmul.f32 0.2, %v3680_v56  ;;  %vm11643_vm11 = vcmp.ne.s16.totalorder %v7372_v51, 0 }
 0x2ea   : > { %v3420_v11 = vpop.f32.mrf.mxu0  ;;  %v4497_v39 = vrot.slane %v4495_v0, 1  ;;  %v13819_v37 = vld [vmem:[#allocation78_spill] sm:$0xff]  ;;  %vm11660_vm12 = vcmp.ne.s16.totalorder %v7373_v60, 0 }
 0x2eb   : > { %v3681_v61 = vadd.f32 %v11581_v8, %v3620_v53  ;;  %v3421_v33 = vadd.f32 %v3420_v11, %v11552_v26  ;;  %v11630_v12 = vpop.f32.mrf.mxu1  ;;  %v4457_v4 = vsel %vm11609_vm8, %v3840_v49, 0  ;;  %v3788_v11 = vmax.f32 %v3680_v56, %v3734_v41  ;;  %v13823_v56 = vld [vmem:[#allocation82_spill] sm:$0xff] }
 0x2ec   : > { %v8481_v14 = vpop.f32.mrf.mxu0  ;;  %v4500_v5 = vshll.u32 %v4457_v4, 16  ;;  %v4763_v52 = vrot.slane %v4457_v4, 1  ;;  %v4498_v53 = vor.u32 %v4497_v39, %v4493_v63 }
 0x2ed   : > { %v3735_v1 = vmul.f32 0.2, %v3681_v61  ;;  %v3621_v10 = vadd.f32 %v3421_v33, %v13819_v37  ;;  %v3205_v44 = vpop.f32.mrf.mxu1 }
 0x2ee   : > { %v3425_v0 = vpop.f32.mrf.mxu0  ;;  %v4502_v18 = vrot.slane %v4500_v5, 1  ;;  %v11637_v26 = vsel %vm1040_vm1, %v4762_v21, %v4763_v52 }
 0x2ef   : > { %v3789_v6 = vmax.f32 %v3681_v61, %v3735_v1  ;;  %v3682_v49 = vadd.f32 %v11581_v8, %v3621_v10  ;;  %v3426_v14 = vadd.f32 %v3425_v0, %v11559_v27  ;;  %v11641_v25 = vpop.f32.mrf.mxu1 }
 0x2f0   : > { %v8484_v4 = vpop.f32.mrf.mxu0  ;;  %v11648_v20 = vsel %vm739_vm2, %v4498_v53, %v4502_v18 }
 0x2f1   : > { %v11650_v63 = vpack.c.bf16 %v3789_v6, %v3788_v11  ;;  %v3736_v21 = vmul.f32 0.2, %v3682_v49  ;;  %v3622_v39 = vadd.f32 %v3426_v14, %v13823_v56  ;;  %v3210_v41 = vpop.f32.mrf.mxu1 }
 0x2f2   : > { %v3428_v10 = vpop.f32.mrf.mxu0 }
 0x2f3   : > { %13822 = vst [vmem:[#allocation36_spill] sm:$0xff] %v11650_v63  ;;  %v3790_v61 = vmax.f32 %v3682_v49, %v3736_v21  ;;  %v3683_v27 = vadd.f32 %v11581_v8, %v3622_v39  ;;  %v3429_v5 = vadd.f32 %v3428_v10, %v11565_v30  ;;  %v4458_v51 = vsel %vm11643_vm11, %v11650_v63, 0  ;;  %v11658_v52 = vpop.f32.mrf.mxu1 }
 0x2f4   : > { %v8485_v18 = vpop.f32.mrf.mxu0  ;;  %v4507_v1 = vshll.u32 %v4458_v51, 16  ;;  %v4765_v21 = vrot.slane %v4458_v51, 1  ;;  %v4505_v39 = vshrl.u32 %v4458_v51, 16 }
 0x2f5   : > { %v3842_v37 = vpack.c.bf16 %v3790_v61, %v3790_v61  ;;  %v3623_v38 = vadd.f32 %v3429_v5, %v11105_v59  ;;  %v3213_v44 = vpop.f32.mrf.mxu1  ;;  %v3737_v11 = vmul.f32 0.2, %v3683_v27 }
 0x2f6   : > { %v3433_v0 = vpop.f32.mrf.mxu0  ;;  %v4509_v53 = vrot.slane %v4507_v1, 1 }
 0x2f7   : > { %v3684_v30 = vadd.f32 %v11581_v8, %v3623_v38  ;;  %v3434_v49 = vadd.f32 %v3433_v0, %v11571_v43  ;;  %v4459_v14 = vsel %vm11660_vm12, %v3842_v37, 0  ;;  %v11669_v4 = vpop.f32.mrf.mxu1  ;;  %v3791_v38 = vmax.f32 %v3683_v27, %v3737_v11 }
 0x2f8   : > { %v8488_v60 = vpop.f32.mrf.mxu0  ;;  %v4766_v56 = vrot.slane %v4459_v14, 1  ;;  %v4512_v41 = vshll.u32 %v4459_v14, 16  ;;  %v4510_v1 = vor.u32 %v4509_v53, %v4505_v39 }
 0x2f9   : > { %v3738_v10 = vmul.f32 0.2, %v3684_v30  ;;  %v3624_v59 = vadd.f32 %v3434_v49, %v11112_v31  ;;  %v3218_v61 = vpop.f32.mrf.mxu1  ;;  %v8958_v49 = vld [vmem:[%s13316_s3 + $0xb0] sm:$0xff]  }
 0x2fa   : > { %v3436_v5 = vpop.f32.mrf.mxu0  ;;  %v11673_v18 = vsel %vm1040_vm1, %v4765_v21, %v4766_v56  ;;  %v4514_v43 = vrot.slane %v4512_v41, 1 }
 0x2fb   : > { %v3792_v44 = vmax.f32 %v3684_v30, %v3738_v10  ;;  %v3685_v37 = vadd.f32 %v11581_v8, %v3624_v59  ;;  %v3437_v0 = vadd.f32 %v3436_v5, %v11590_v17  ;;  %8594 = vmatprep.mubr.bf16.mxu0 %v11673_v18  ;;  %v11678_v51 = vpop.f32.mrf.mxu1  ;;  %v8959_v59 = vld [vmem:[%s13316_s3 + $0xa8] sm:$0xff]  }
 0x2fc   : > { %v8489_v14 = vpop.f32.mrf.mxu0  ;;  %v11681_v31 = vsel %vm739_vm2, %v4510_v1, %v4514_v43  ;;  %v13827_v5 = vld [vmem:[#allocation89_spill] sm:$0xff] }
 0x2fd   : > { %v11686_v53 = vpack.c.bf16 %v3792_v44, %v3791_v38  ;;  %v3739_v27 = vmul.f32 0.2, %v3685_v37  ;;  %v3625_v11 = vadd.f32 %v3437_v0, %v11125_v19  ;;  %5107 = vmatprep.mubr.bf16.mxu1 %v11681_v31  ;;  %v3221_v17 = vpop.f32.mrf.mxu1 }
 0x2fe   : > { %v3441_v30 = vpop.f32.mrf.mxu0  ;;  %7478 = vmatmul.mubr.msk.bf16.vlgmr.msra.gmra.mxu1 %vm11643_vm11, %v11650_v63 }
 0x2ff   : > { %13826 = vst [vmem:[#allocation20_spill] sm:$0xff] %v11686_v53  ;;  %v3793_v60 = vmax.f32 %v3685_v37, %v3739_v27  ;;  %v3686_v21 = vadd.f32 %v11581_v8, %v3625_v11  ;;  %v3442_v56 = vadd.f32 %v3441_v30, %v11598_v28  ;;  %v4460_v39 = vsel %vm11643_vm11, %v11686_v53, 0  ;;  %v11698_v41 = vpop.f32.mrf.mxu1  ;;  %8627 = vmatpush3.bf16.msra.mxu1 %v11576_v50  ;;  %v8960_v28 = vld [vmem:[%s13316_s3 + $0x78] sm:$0xff]  }
 0x300   : > { %v8492_v19 = vpop.f32.mrf.mxu0  ;;  %v4519_v10 = vshll.u32 %v4460_v39, 16  ;;  %8628 = vmatprep.subr.bf16.mxu1 %v8958_v49  ;;  %7910 = vmatprep.subr.bf16.mxu0 %v8960_v28  ;;  %v4768_v30 = vrot.slane %v4460_v39, 1 }
 0x301   : > { %v3844_v61 = vpack.c.bf16 %v3793_v60, %v3793_v60  ;;  %v3626_v1 = vadd.f32 %v3442_v56, %v13827_v5  ;;  %v3226_v43 = vpop.f32.mrf.mxu1  ;;  %v3740_v38 = vmul.f32 0.2, %v3686_v21  ;;  %v4517_v60 = vshrl.u32 %v4460_v39, 16  ;;  %v8961_v19 = vld [vmem:[%s13316_s3 + $0x38] sm:$0xff]  }
 0x302   : > { %v3444_v44 = vpop.f32.mrf.mxu0  ;;  %v4521_v37 = vrot.slane %v4519_v10, 1 }
 0x303   : > { %v4461_v50 = vsel %vm11660_vm12, %v3844_v61, 0  ;;  %v3687_v0 = vadd.f32 %v11581_v8, %v3626_v1  ;;  %v3445_v14 = vadd.f32 %v3444_v44, %v11607_v32  ;;  %v11712_v27 = vpop.f32.mrf.mxu1  ;;  %8629 = vmatpush3.bf16.msra.mxu1 %v8958_v49  ;;  %v13828_v61 = vld [vmem:[#allocation81_spill] sm:$0xff]  ;;  %v3794_v43 = vmax.f32 %v3686_v21, %v3740_v38  ;;  %v8962_v21 = vld [vmem:[%s13316_s3 + $0x70] sm:$0xff]   ;;  %v8963_v38 = vld [vmem:[%s13316_s3 + $0xa0] sm:$0xff]  }
 0x304   : > { %v4769_v11 = vrot.slane %v4461_v50, 1  ;;  %v8493_v17 = vpop.f32.mrf.mxu0  ;;  %v4524_v56 = vshll.u32 %v4461_v50, 16  ;;  %8630 = vmatprep.subr.bf16.mxu1 %v8959_v59  ;;  %v4522_v49 = vor.u32 %v4521_v37, %v4517_v60 }
 0x305   : > { %v3741_v10 = vmul.f32 0.2, %v3687_v0  ;;  %v3627_v5 = vadd.f32 %v3445_v14, %v13828_v61  ;;  %v3229_v1 = vpop.f32.mrf.mxu1 }
 0x306   : > { %v3449_v32 = vpop.f32.mrf.mxu0  ;;  %v11719_v44 = vsel %vm1040_vm1, %v4768_v30, %v4769_v11  ;;  %v4526_v28 = vrot.slane %v4524_v56, 1  ;;  %v13831_v11 = vld [vmem:[#allocation8_spill] sm:$0xff] }
 0x307   : > { %v3795_v17 = vmax.f32 %v3687_v0, %v3741_v10  ;;  %v3688_v39 = vadd.f32 %v11581_v8, %v3627_v5  ;;  %v3450_v50 = vadd.f32 %v3449_v32, %v11622_v47  ;;  %8595 = vmatmul.mubr.bf16.vlgmr.msra.gmra.mxu0 %v11719_v44  ;;  %v11724_v63 = vpop.f32.mrf.mxu1  ;;  %8631 = vmatpush3.bf16.msra.mxu1 %v8959_v59  ;;  %v8964_v47 = vld [vmem:[%s13316_s3 + $0x30] sm:$0xff]  }
 0x308   : > { %v8496_v37 = vpop.f32.mrf.mxu0  ;;  %v11733_v0 = vsel %vm739_vm2, %v4522_v49, %v4526_v28  ;;  %7911 = vmatpush3.bf16.msra.mxu0 %v8961_v19  ;;  %8632 = vmatprep.subr.bf16.mxu1 %v8963_v38 }
 0x309   : > { %13829 = vst [vmem:[#allocation44_spill] sm:$0xff] %v11733_v0  ;;  %v11738_v14 = vpack.c.bf16 %v3795_v17, %v3794_v43  ;;  %v3742_v59 = vmul.f32 0.2, %v3688_v39  ;;  %v3628_v30 = vadd.f32 %v3450_v50, %v13831_v11  ;;  %5115 = vmatprep.mubr.bf16.mxu1 %v11733_v0  ;;  %v3234_v60 = vpop.f32.mrf.mxu1  ;;  %7912 = vmatprep.subr.bf16.mxu0 %v8962_v21 }
 0x30a   : > { %v3452_v56 = vpop.f32.mrf.mxu0  ;;  %7479 = vmatmul.mubr.msk.bf16.gmra.mxu1 %vm11643_vm11, %v11686_v53 }
 0x30b   : > { %13830 = vst [vmem:[#allocation24_spill] sm:$0xff] %v11738_v14  ;;  %v3796_v19 = vmax.f32 %v3688_v39, %v3742_v59  ;;  %v3689_v10 = vadd.f32 %v11581_v8, %v3628_v30  ;;  %v3453_v61 = vadd.f32 %v3452_v56, %v11630_v12  ;;  %v4462_v5 = vsel %vm11643_vm11, %v11738_v14, 0  ;;  %v11750_v1 = vpop.f32.mrf.mxu1  ;;  %8633 = vmatpush3.bf16.msra.mxu1 %v8963_v38 }
 0x30c   : > { %v8497_v43 = vpop.f32.mrf.mxu0  ;;  %v4531_v32 = vshll.u32 %v4462_v5, 16  ;;  %7913 = vmatpush3.bf16.msra.mxu0 %v8964_v47  ;;  %v4771_v30 = vrot.slane %v4462_v5, 1  ;;  %v4529_v47 = vshrl.u32 %v4462_v5, 16 }
 0x30d   : > { %v3846_v49 = vpack.c.bf16 %v3796_v19, %v3796_v19  ;;  %v3629_v28 = vadd.f32 %v3453_v61, %v11165_v24  ;;  %v3237_v17 = vpop.f32.mrf.mxu1  ;;  %v3743_v50 = vmul.f32 0.2, %v3689_v10  ;;  %v13832_v24 = vld [vmem:[#allocation87_spill] sm:$0xff] }
 0x30e   : > { %v3457_v39 = vpop.f32.mrf.mxu0  ;;  %v4533_v21 = vrot.slane %v4531_v32, 1  ;;  %v8965_v32 = vld [vmem:[%s13316_s3 + $0x68] sm:$0xff]  }
 0x30f   : > { %v3690_v37 = vadd.f32 %v11581_v8, %v3629_v28  ;;  %v3458_v12 = vadd.f32 %v3457_v39, %v11641_v25  ;;  %v4463_v59 = vsel %vm11660_vm12, %v3846_v49, 0  ;;  %v11757_v11 = vpop.f32.mrf.mxu1  ;;  %v8966_v25 = vld [vmem:[%s13316_s3 + $0x28] sm:$0xff]   ;;  %v3797_v49 = vmax.f32 %v3689_v10, %v3743_v50  ;;  %7914 = vmatprep.subr.bf16.mxu0 %v8965_v32 }
 0x310   : > { %v8500_v38 = vpop.f32.mrf.mxu0  ;;  %v4772_v60 = vrot.slane %v4463_v59, 1  ;;  %v4536_v56 = vshll.u32 %v4463_v59, 16  ;;  %v4534_v39 = vor.u32 %v4533_v21, %v4529_v47  ;;  %7915 = vmatpush3.bf16.msra.mxu0 %v8966_v25  ;;  %v13835_v21 = vld [vmem:[#allocation9_spill] sm:$0xff] }
 0x311   : > { %v3744_v19 = vmul.f32 0.2, %v3690_v37  ;;  %v3630_v61 = vadd.f32 %v3458_v12, %v13832_v24  ;;  %v3242_v43 = vpop.f32.mrf.mxu1 }
 0x312   : > { %v3460_v28 = vpop.f32.mrf.mxu0  ;;  %v11767_v17 = vsel %vm1040_vm1, %v4771_v30, %v4772_v60  ;;  %v4538_v5 = vrot.slane %v4536_v56, 1 }
 0x313   : > { %13833 = vst [vmem:[#allocation27_spill] sm:$0xff] %v11767_v17  ;;  %v3798_v59 = vmax.f32 %v3690_v37, %v3744_v19  ;;  %v3691_v38 = vadd.f32 %v11581_v8, %v3630_v61  ;;  %v3461_v12 = vadd.f32 %v3460_v28, %v11658_v52  ;;  %8598 = vmatprep.mubr.bf16.mxu0 %v11767_v17  ;;  %v11772_v24 = vpop.f32.mrf.mxu1  ;;  %v13836_v28 = vld [vmem:[#allocation39_spill] sm:$0xff] }
 0x314   : > { %v8501_v43 = vpop.f32.mrf.mxu0  ;;  %v11775_v53 = vsel %vm739_vm2, %v4534_v39, %v4538_v5 }
 0x315   : > { %13834 = vst [vmem:[#allocation52_spill] sm:$0xff] %v11775_v53  ;;  %v11777_v10 = vpack.c.bf16 %v3798_v59, %v3797_v49  ;;  %v3745_v50 = vmul.f32 0.2, %v3691_v38  ;;  %v3631_v30 = vadd.f32 %v3461_v12, %v13835_v21  ;;  %5123 = vmatprep.mubr.bf16.mxu1 %v11775_v53  ;;  %v3245_v37 = vpop.f32.mrf.mxu1  ;;  %v8967_v59 = vld [vmem:[%s13316_s3 + $0x60] sm:$0xff]  }
 0x316   : > { %v3465_v60 = vpop.f32.mrf.mxu0  ;;  %7480 = vmatmul.mubr.msk.bf16.gmra.mxu1 %vm11643_vm11, %v11738_v14  ;;  %7916 = vmatprep.subr.bf16.mxu0 %v8967_v59 }
 0x317   : > { %v3799_v52 = vmax.f32 %v3691_v38, %v3745_v50  ;;  %v3692_v47 = vadd.f32 %v11581_v8, %v3631_v30  ;;  %v3466_v56 = vadd.f32 %v3465_v60, %v11669_v4  ;;  %v4464_v19 = vsel %vm11643_vm11, %v11777_v10, 0  ;;  %v11789_v61 = vpop.f32.mrf.mxu1  ;;  %v8968_v4 = vld [vmem:[%s13316_s3 + $0x98] sm:$0xff]   ;;  %v8969_v38 = vld [vmem:[%s13316_s3 + $0x20] sm:$0xff]  }
 0x318   : > { %v8504_v32 = vpop.f32.mrf.mxu0  ;;  %v4543_v25 = vshll.u32 %v4464_v19, 16  ;;  %8634 = vmatprep.subr.bf16.mxu1 %v8968_v4  ;;  %7917 = vmatpush3.bf16.msra.mxu0 %v8969_v38 }
 0x319   : > { %v3848_v49 = vpack.c.bf16 %v3799_v52, %v3799_v52  ;;  %v3632_v39 = vadd.f32 %v3466_v56, %v13836_v28  ;;  %v3250_v5 = vpop.f32.mrf.mxu1  ;;  %v3746_v50 = vmul.f32 0.2, %v3692_v47  ;;  %v4774_v56 = vrot.slane %v4464_v19, 1  ;;  %8635 = vmatpush3.bf16.msra.mxu1 %v8968_v4  ;;  %v8971_v4 = vld [vmem:[%s13316_s3 + $0x18] sm:$0xff]  }
 0x31a   : > { %v3468_v12 = vpop.f32.mrf.mxu0  ;;  %v4545_v43 = vrot.slane %v4543_v25, 1  ;;  %v4541_v28 = vshrl.u32 %v4464_v19, 16 }
 0x31b   : > { %v3693_v21 = vadd.f32 %v11581_v8, %v3632_v39  ;;  %v3469_v30 = vadd.f32 %v3468_v12, %v11678_v51  ;;  %v4465_v37 = vsel %vm11660_vm12, %v3848_v49, 0  ;;  %v11805_v60 = vpop.f32.mrf.mxu1  ;;  %v3800_v17 = vmax.f32 %v3692_v47, %v3746_v50 }
 0x31c   : > { %v8505_v52 = vpop.f32.mrf.mxu0  ;;  %v4775_v32 = vrot.slane %v4465_v37, 1  ;;  %v4548_v5 = vshll.u32 %v4465_v37, 16  ;;  %v4546_v49 = vor.u32 %v4545_v43, %v4541_v28 }
 0x31d   : > { %v3747_v25 = vmul.f32 0.2, %v3693_v21  ;;  %v3633_v14 = vadd.f32 %v3469_v30, %v11202_v2  ;;  %v3253_v39 = vpop.f32.mrf.mxu1  ;;  %v8970_v2 = vld [vmem:[%s13316_s3 + $0x58] sm:$0xff]  }
 0x31e   : > { %v3473_v53 = vpop.f32.mrf.mxu0  ;;  %v11809_v51 = vsel %vm1040_vm1, %v4774_v56, %v4775_v32  ;;  %v4550_v12 = vrot.slane %v4548_v5, 1  ;;  %7918 = vmatprep.subr.bf16.mxu0 %v8970_v2 }
 0x31f   : > { %v3801_v59 = vmax.f32 %v3693_v21, %v3747_v25  ;;  %v3694_v52 = vadd.f32 %v11581_v8, %v3633_v14  ;;  %v3474_v0 = vadd.f32 %v3473_v53, %v11698_v41  ;;  %8599 = vmatmul.mubr.bf16.gmra.mxu0 %v11809_v51  ;;  %v11814_v19 = vpop.f32.mrf.mxu1 }
 0x320   : > { %v8508_v38 = vpop.f32.mrf.mxu0  ;;  %v11823_v47 = vsel %vm739_vm2, %v4546_v49, %v4550_v12  ;;  %7919 = vmatpush3.bf16.msra.mxu0 %v8971_v4 }
 0x321   : > { %v11825_v43 = vpack.c.bf16 %v3801_v59, %v3800_v17  ;;  %v3748_v14 = vmul.f32 0.2, %v3694_v52  ;;  %v3634_v53 = vadd.f32 %v3474_v0, %v11209_v58  ;;  %5131 = vmatprep.mubr.bf16.mxu1 %v11823_v47  ;;  %v3258_v41 = vpop.f32.mrf.mxu1 }
 0x322   : > { %v3476_v50 = vpop.f32.mrf.mxu0  ;;  %7481 = vmatmul.mubr.msk.bf16.gmra.mxu1 %vm11643_vm11, %v11777_v10 }
 0x323   : > { %v3802_v21 = vmax.f32 %v3694_v52, %v3748_v14  ;;  %v3695_v30 = vadd.f32 %v11581_v8, %v3634_v53  ;;  %v3477_v37 = vadd.f32 %v3476_v50, %v11712_v27  ;;  %v4466_v17 = vsel %vm11643_vm11, %v11825_v43, 0  ;;  %v11837_v58 = vpop.f32.mrf.mxu1 }
 0x324   : > { %v8509_v0 = vpop.f32.mrf.mxu0  ;;  %v4555_v56 = vshll.u32 %v4466_v17, 16  ;;  %v4777_v4 = vrot.slane %v4466_v17, 1  ;;  %v4553_v14 = vshrl.u32 %v4466_v17, 16 }
 0x325   : > { %v3850_v32 = vpack.c.bf16 %v3802_v21, %v3802_v21  ;;  %v3635_v28 = vadd.f32 %v3477_v37, %v11225_v9  ;;  %v3261_v5 = vpop.f32.mrf.mxu1  ;;  %v3749_v25 = vmul.f32 0.2, %v3695_v30  ;;  %v8972_v21 = vld [vmem:[%s13316_s3 + $0x50] sm:$0xff]  }
 0x326   : > { %v3481_v39 = vpop.f32.mrf.mxu0  ;;  %v4557_v49 = vrot.slane %v4555_v56, 1  ;;  %v8974_v37 = vld [vmem:[%s13316_s3 + $0x10] sm:$0xff]   ;;  %7920 = vmatprep.subr.bf16.mxu0 %v8972_v21 }
 0x327   : > { %v3696_v12 = vadd.f32 %v11581_v8, %v3635_v28  ;;  %v3482_v59 = vadd.f32 %v3481_v39, %v11724_v63  ;;  %v4467_v27 = vsel %vm11660_vm12, %v3850_v32, 0  ;;  %v11844_v52 = vpop.f32.mrf.mxu1  ;;  %v8973_v63 = vld [vmem:[%s13316_s3 + $0x90] sm:$0xff]   ;;  %v3803_v0 = vmax.f32 %v3695_v30, %v3749_v25  ;;  %7921 = vmatpush3.bf16.msra.mxu0 %v8974_v37 }
 0x328   : > { %v8512_v2 = vpop.f32.mrf.mxu0  ;;  %v4778_v38 = vrot.slane %v4467_v27, 1  ;;  %v4560_v53 = vshll.u32 %v4467_v27, 16  ;;  %v4558_v32 = vor.u32 %v4557_v49, %v4553_v14  ;;  %8636 = vmatprep.subr.bf16.mxu1 %v8973_v63 }
 0x329   : > { %v3750_v41 = vmul.f32 0.2, %v3696_v12  ;;  %v3636_v9 = vadd.f32 %v3482_v59, %v11232_v54  ;;  %v3266_v50 = vpop.f32.mrf.mxu1  ;;  %8637 = vmatpush3.bf16.msra.mxu1 %v8973_v63 }
 0x32a   : > { %v3484_v56 = vpop.f32.mrf.mxu0  ;;  %v11857_v17 = vsel %vm1040_vm1, %v4777_v4, %v4778_v38  ;;  %v4562_v54 = vrot.slane %v4560_v53, 1  ;;  %v8975_v4 = vld [vmem:[%s13316_s3 + $0x48] sm:$0xff]  }
 0x32b   : > { %v3804_v28 = vmax.f32 %v3696_v12, %v3750_v41  ;;  %v3697_v5 = vadd.f32 %v11581_v8, %v3636_v9  ;;  %v3485_v39 = vadd.f32 %v3484_v56, %v11750_v1  ;;  %8602 = vmatprep.mubr.bf16.mxu0 %v11857_v17  ;;  %v11862_v59 = vpop.f32.mrf.mxu1  ;;  %v8976_v9 = vld [vmem:[%s13316_s3 + $0x8] sm:$0xff]   ;;  %7922 = vmatprep.subr.bf16.mxu0 %v8975_v4 }
 0x32c   : > { %v8513_v27 = vpop.f32.mrf.mxu0  ;;  %v11865_v2 = vsel %vm739_vm2, %v4558_v32, %v4562_v54  ;;  %7923 = vmatpush3.bf16.msra.mxu0 %v8976_v9 }
 0x32d   : > { %v11867_v30 = vpack.c.bf16 %v3804_v28, %v3803_v0  ;;  %v3751_v25 = vmul.f32 0.2, %v3697_v5  ;;  %v3637_v49 = vadd.f32 %v3485_v39, %v11242_v48  ;;  %5139 = vmatprep.mubr.bf16.mxu1 %v11865_v2  ;;  %v3269_v12 = vpop.f32.mrf.mxu1  ;;  %v8977_v28 = vld [vmem:[%s13316_s3 + $0x40] sm:$0xff]  }
 0x32e   : > { %v3489_v1 = vpop.f32.mrf.mxu0  ;;  %7482 = vmatmul.mubr.msk.bf16.gmra.mxu1 %vm11643_vm11, %v11825_v43  ;;  %7924 = vmatprep.subr.bf16.mxu0 %v8977_v28 }
 0x32f   : > { %v3805_v38 = vmax.f32 %v3697_v5, %v3751_v25  ;;  %v3698_v14 = vadd.f32 %v11581_v8, %v3637_v49  ;;  %v3490_v53 = vadd.f32 %v3489_v1, %v11757_v11  ;;  %v4468_v48 = vsel %vm11643_vm11, %v11867_v30, 0  ;;  %v11882_v41 = vpop.f32.mrf.mxu1  ;;  %v8978_v11 = vld [vmem:[%s13316_s3 + $0x88] sm:$0xff]   ;;  %v8979_v25 = vld [vmem:[%s13316_s3] sm:$0xff]  }
 0x330   : > { %v8516_v50 = vpop.f32.mrf.mxu0  ;;  %v4567_v21 = vshll.u32 %v4468_v48, 16  ;;  %8638 = vmatprep.subr.bf16.mxu1 %v8978_v11  ;;  %v4780_v12 = vrot.slane %v4468_v48, 1  ;;  %v4565_v4 = vshrl.u32 %v4468_v48, 16  ;;  %7925 = vmatpush3.bf16.msra.mxu0 %v8979_v25 }
 0x331   : > { %v3852_v63 = vpack.c.bf16 %v3805_v38, %v3805_v38  ;;  %v3638_v37 = vadd.f32 %v3490_v53, %v11252_v29  ;;  %v3274_v0 = vpop.f32.mrf.mxu1  ;;  %v3752_v56 = vmul.f32 0.2, %v3698_v14  ;;  %8639 = vmatpush3.bf16.msra.mxu1 %v8978_v11  ;;  %v8980_v50 = vld [vmem:[%s13316_s3 + $0x80] sm:$0xff]  }
 0x332   : > { %v3492_v32 = vpop.f32.mrf.mxu0  ;;  %v4569_v54 = vrot.slane %v4567_v21, 1  ;;  %8640 = vmatprep.subr.bf16.mxu1 %v8980_v50 }
 0x333   : > { %v3699_v5 = vadd.f32 %v11581_v8, %v3638_v37  ;;  %v3493_v39 = vadd.f32 %v3492_v32, %v11772_v24  ;;  %v4469_v29 = vsel %vm11660_vm12, %v3852_v63, 0  ;;  %v11898_v27 = vpop.f32.mrf.mxu1  ;;  %v3806_v21 = vmax.f32 %v3698_v14, %v3752_v56  ;;  %v11918_v14 = vld [vmem:[%s13316_s3 + $0x238] sm:$0xff]  }
 0x334   : > { %v8517_v49 = vpop.f32.mrf.mxu0  ;;  %v4781_v1 = vrot.slane %v4469_v29, 1  ;;  %v4572_v38 = vshll.u32 %v4469_v29, 16  ;;  %v4570_v0 = vor.u32 %v4569_v54, %v4565_v4  ;;  %8674 = vmatprep.subr.bf16.mxu0 %v11918_v14 }
 0x335   : > { %v3753_v53 = vmul.f32 0.2, %v3699_v5  ;;  %v3639_v24 = vadd.f32 %v3493_v39, %v11262_v16  ;;  %v3277_v9 = vpop.f32.mrf.mxu1  ;;  %8641 = vmatpush3.bf16.msra.mxu1 %v8980_v50 }
 0x336   : > { %v3497_v63 = vpop.f32.mrf.mxu0  ;;  %v11908_v37 = vsel %vm1040_vm1, %v4780_v12, %v4781_v1  ;;  %v4574_v32 = vrot.slane %v4572_v38, 1 }
 0x337   : > { %v3807_v48 = vmax.f32 %v3699_v5, %v3753_v53  ;;  %v3700_v28 = vadd.f32 %v11581_v8, %v3639_v24  ;;  %v3498_v11 = vadd.f32 %v3497_v63, %v11789_v61  ;;  %8603 = vmatmul.mubr.bf16.gmra.mxu0 %v11908_v37  ;;  %v11913_v16 = vpop.f32.mrf.mxu1 }
 0x338   : > { %v8520_v56 = vpop.f32.mrf.mxu0  ;;  %v11921_v39 = vsel %vm739_vm2, %v4570_v0, %v4574_v32 }
 0x339   : > { %v11923_v54 = vpack.c.bf16 %v3807_v48, %v3806_v21  ;;  %v3754_v5 = vmul.f32 0.2, %v3700_v28  ;;  %v3640_v61 = vadd.f32 %v3498_v11, %v11269_v42  ;;  %5147 = vmatprep.mubr.bf16.mxu1 %v11921_v39  ;;  %v3282_v29 = vpop.f32.mrf.mxu1 }
 0x33a   : > { %v3500_v25 = vpop.f32.mrf.mxu0  ;;  %7483 = vmatmul.mubr.msk.bf16.gmra.mxu1 %vm11643_vm11, %v11867_v30 }
 0x33b   : > { %v3808_v49 = vmax.f32 %v3700_v28, %v3754_v5  ;;  %v3701_v12 = vadd.f32 %v11581_v8, %v3640_v61  ;;  %v3501_v1 = vadd.f32 %v3500_v25, %v11805_v60  ;;  %v4470_v4 = vsel %vm11643_vm11, %v11923_v54, 0  ;;  %v11936_v42 = vpop.f32.mrf.mxu1 }
 0x33c   : > { %v8521_v38 = vpop.f32.mrf.mxu0  ;;  %v4579_v53 = vshll.u32 %v4470_v4, 16  ;;  %v4783_v56 = vrot.slane %v4470_v4, 1  ;;  %v4577_v61 = vshrl.u32 %v4470_v4, 16 }
 0x33d   : > { %v3854_v24 = vpack.c.bf16 %v3808_v49, %v3808_v49  ;;  %v3641_v9 = vadd.f32 %v3501_v1, %v11279_v13  ;;  %v3285_v50 = vpop.f32.mrf.mxu1  ;;  %v3755_v0 = vmul.f32 0.2, %v3701_v12 }
 0x33e   : > { %v3505_v21 = vpop.f32.mrf.mxu0  ;;  %v4581_v63 = vrot.slane %v4579_v53, 1 }
 0x33f   : > { %v3702_v32 = vadd.f32 %v11581_v8, %v3641_v9  ;;  %v3506_v48 = vadd.f32 %v3505_v21, %v11814_v19  ;;  %v4471_v60 = vsel %vm11660_vm12, %v3854_v24, 0  ;;  %v11943_v28 = vpop.f32.mrf.mxu1  ;;  %v3809_v9 = vmax.f32 %v3701_v12, %v3755_v0 }
 0x340   : > { %v8524_v11 = vpop.f32.mrf.mxu0  ;;  %v4784_v5 = vrot.slane %v4471_v60, 1  ;;  %v4584_v29 = vshll.u32 %v4471_v60, 16  ;;  %v4582_v53 = vor.u32 %v4581_v63, %v4577_v61 }
 0x341   : > { %v3756_v25 = vmul.f32 0.2, %v3702_v32  ;;  %v3642_v13 = vadd.f32 %v3506_v48, %v11286_v57  ;;  %v3290_v49 = vpop.f32.mrf.mxu1 }
 0x342   : > { %v3508_v1 = vpop.f32.mrf.mxu0  ;;  %v11947_v38 = vsel %vm1040_vm1, %v4783_v56, %v4784_v5  ;;  %v4586_v19 = vrot.slane %v4584_v29, 1 }
 0x343   : > { %v3810_v50 = vmax.f32 %v3702_v32, %v3756_v25  ;;  %v3703_v24 = vadd.f32 %v11581_v8, %v3642_v13  ;;  %v3509_v21 = vadd.f32 %v3508_v1, %v11837_v58  ;;  %8606 = vmatprep.mubr.bf16.mxu0 %v11947_v38  ;;  %v11952_v4 = vpop.f32.mrf.mxu1 }
 0x344   : > { %v8525_v60 = vpop.f32.mrf.mxu0  ;;  %v11955_v57 = vsel %vm739_vm2, %v4582_v53, %v4586_v19 }
 0x345   : > { %v11957_v48 = vpack.c.bf16 %v3810_v50, %v3809_v9  ;;  %v3757_v11 = vmul.f32 0.2, %v3703_v24  ;;  %v3643_v63 = vadd.f32 %v3509_v21, %v11296_v7  ;;  %5155 = vmatprep.mubr.bf16.mxu1 %v11955_v57  ;;  %v3293_v12 = vpop.f32.mrf.mxu1 }
 0x346   : > { %v3513_v0 = vpop.f32.mrf.mxu0  ;;  %7484 = vmatmul.mubr.msk.bf16.gmra.mxu1 %vm11643_vm11, %v11923_v54 }
 0x347   : > { %13837 = vst [vmem:[#allocation61_spill] sm:$0xff] %v11957_v48  ;;  %v3811_v58 = vmax.f32 %v3703_v24, %v3757_v11  ;;  %v3704_v32 = vadd.f32 %v11581_v8, %v3643_v63  ;;  %v3514_v56 = vadd.f32 %v3513_v0, %v11844_v52  ;;  %v4472_v5 = vsel %vm11643_vm11, %v11957_v48, 0  ;;  %v11969_v61 = vpop.f32.mrf.mxu1 }
 0x348   : > { %v8528_v7 = vpop.f32.mrf.mxu0  ;;  %v4591_v29 = vshll.u32 %v4472_v5, 16  ;;  %v4786_v60 = vrot.slane %v4472_v5, 1  ;;  %v4589_v63 = vshrl.u32 %v4472_v5, 16 }
 0x349   : > { %v3856_v25 = vpack.c.bf16 %v3811_v58, %v3811_v58  ;;  %v3644_v13 = vadd.f32 %v3514_v56, %v11309_v35  ;;  %v3298_v49 = vpop.f32.mrf.mxu1  ;;  %v3758_v19 = vmul.f32 0.2, %v3704_v32 }
 0x34a   : > { %v3516_v1 = vpop.f32.mrf.mxu0  ;;  %v4593_v53 = vrot.slane %v4591_v29, 1 }
 0x34b   : > { %v3705_v9 = vadd.f32 %v11581_v8, %v3644_v13  ;;  %v3517_v50 = vadd.f32 %v3516_v1, %v11862_v59  ;;  %v4473_v52 = vsel %vm11660_vm12, %v3856_v25, 0  ;;  %v11976_v24 = vpop.f32.mrf.mxu1  ;;  %v3812_v13 = vmax.f32 %v3704_v32, %v3758_v19 }
 0x34c   : > { %v8529_v21 = vpop.f32.mrf.mxu0  ;;  %v4787_v11 = vrot.slane %v4473_v52, 1  ;;  %v4596_v12 = vshll.u32 %v4473_v52, 16  ;;  %v4594_v29 = vor.u32 %v4593_v53, %v4589_v63 }
 0x34d   : > { %v3759_v0 = vmul.f32 0.2, %v3705_v9  ;;  %v3645_v35 = vadd.f32 %v3517_v50, %v11328_v55  ;;  %v3301_v58 = vpop.f32.mrf.mxu1  ;;  %v8983_v55 = vld [vmem:[%s13316_s3 + $0x1f8] sm:$0xff]  }
 0x34e   : > { %v3521_v56 = vpop.f32.mrf.mxu0  ;;  %v11980_v7 = vsel %vm1040_vm1, %v4786_v60, %v4787_v11  ;;  %v4598_v59 = vrot.slane %v4596_v12, 1  ;;  %8046 = vmatprep.subr.bf16.mxu1 %v8983_v55 }
 0x34f   : > { %v3813_v49 = vmax.f32 %v3705_v9, %v3759_v0  ;;  %v3706_v25 = vadd.f32 %v11581_v8, %v3645_v35  ;;  %v3522_v1 = vadd.f32 %v3521_v56, %v11882_v41  ;;  %8607 = vmatmul.mubr.bf16.gmra.mxu0 %v11980_v7  ;;  %v11985_v5 = vpop.f32.mrf.mxu1 }
 0x350   : > { %v8532_v50 = vpop.f32.mrf.mxu0  ;;  %v11991_v52 = vsel %vm739_vm2, %v4594_v29, %v4598_v59 }
 0x351   : > { %v11993_v53 = vpack.c.bf16 %v3813_v49, %v3812_v13  ;;  %v3760_v32 = vmul.f32 0.2, %v3706_v25  ;;  %v3646_v19 = vadd.f32 %v3522_v1, %v11344_v40  ;;  %5163 = vmatprep.mubr.bf16.mxu1 %v11991_v52  ;;  %v3306_v41 = vpop.f32.mrf.mxu1 }
 0x352   : > { %v3524_v9 = vpop.f32.mrf.mxu0  ;;  %7485 = vmatmul.mubr.msk.bf16.gmra.mxu1 %vm11643_vm11, %v11957_v48 }
 0x353   : > { %13838 = vst [vmem:[#allocation21_spill] sm:$0xff] %v11993_v53  ;;  %v3814_v21 = vmax.f32 %v3706_v25, %v3760_v32  ;;  %v3707_v60 = vadd.f32 %v11581_v8, %v3646_v19  ;;  %v3525_v11 = vadd.f32 %v3524_v9, %v11898_v27  ;;  %v4474_v63 = vsel %vm11643_vm11, %v11993_v53, 0  ;;  %v12005_v12 = vpop.f32.mrf.mxu1  ;;  %v12011_v8 = vld [vmem:[%s13315_s2] ss:$0 sm:$0xff] }
 0x354   : > { %v8533_v40 = vpop.f32.mrf.mxu0  ;;  %v4603_v0 = vshll.u32 %v4474_v63, 16  ;;  %v4601_v32 = vshrl.u32 %v4474_v63, 16 }
 0x355   : > { %v3858_v35 = vpack.c.bf16 %v3814_v21, %v3814_v21  ;;  %v3647_v58 = vadd.f32 %v3525_v11, %v11363_v45  ;;  %v3309_v56 = vpop.f32.mrf.mxu1  ;;  %v3761_v13 = vmul.f32 0.2, %v3707_v60  ;;  %v4789_v45 = vrot.slane %v4474_v63, 1 }
 0x356   : > { %v3529_v29 = vpop.f32.mrf.mxu0  ;;  %v4605_v59 = vrot.slane %v4603_v0, 1 }
 0x357   : > { %v3708_v27 = vadd.f32 %v12011_v8, %v3647_v58  ;;  %v3530_v49 = vadd.f32 %v3529_v29, %v11913_v16  ;;  %v4475_v25 = vsel %vm11660_vm12, %v3858_v35, 0  ;;  %v12017_v1 = vpop.f32.mrf.mxu1  ;;  %v3815_v58 = vmax.f32 %v3707_v60, %v3761_v13 }
 0x358   : > { %v8536_v55 = vpop.f32.mrf.mxu0  ;;  %v4790_v50 = vrot.slane %v4475_v25, 1  ;;  %v4608_v19 = vshll.u32 %v4475_v25, 16  ;;  %v4606_v0 = vor.u32 %v4605_v59, %v4601_v32 }
 0x359   : > { %v3762_v41 = vmul.f32 0.2, %v3708_v27  ;;  %v3648_v9 = vadd.f32 %v3530_v49, %v11373_v22  ;;  %v3314_v21 = vpop.f32.mrf.mxu1 }
 0x35a   : > { %v3532_v11 = vpop.f32.mrf.mxu0  ;;  %v12021_v40 = vsel %vm1040_vm1, %v4789_v45, %v4790_v50  ;;  %v4610_v16 = vrot.slane %v4608_v19, 1  ;;  %v13841_v45 = vld [vmem:[#allocation43_spill] sm:$0xff] }
 0x35b   : > { %v3816_v56 = vmax.f32 %v3708_v27, %v3762_v41  ;;  %v3709_v35 = vadd.f32 %v12011_v8, %v3648_v9  ;;  %v3533_v29 = vadd.f32 %v3532_v11, %v11936_v42  ;;  %8610 = vmatprep.mubr.bf16.mxu0 %v12021_v40  ;;  %v12026_v63 = vpop.f32.mrf.mxu1  ;;  %v13842_v11 = vld [vmem:[#allocation29_spill] sm:$0xff] }
 0x35c   : > { %v8537_v25 = vpop.f32.mrf.mxu0  ;;  %v12029_v22 = vsel %vm739_vm2, %v4606_v0, %v4610_v16 }
 0x35d   : > { %13839 = vst [vmem:[#allocation57_spill] sm:$0xff] %v12029_v22  ;;  %v12031_v49 = vpack.c.bf16 %v3816_v56, %v3815_v58  ;;  %v3763_v55 = vmul.f32 0.2, %v3709_v35  ;;  %v3649_v59 = vadd.f32 %v3533_v29, %v13841_v45  ;;  %5171 = vmatprep.mubr.bf16.mxu1 %v12029_v22  ;;  %v3317_v60 = vpop.f32.mrf.mxu1 }
 0x35e   : > { %v3537_v13 = vpop.f32.mrf.mxu0  ;;  %7486 = vmatmul.mubr.msk.bf16.gmra.mxu1 %vm11643_vm11, %v11993_v53 }
 0x35f   : > { %13840 = vst [vmem:[#allocation25_spill] sm:$0xff] %v12031_v49  ;;  %v3817_v42 = vmax.f32 %v3709_v35, %v3763_v55  ;;  %v3710_v27 = vadd.f32 %v12011_v8, %v3649_v59  ;;  %v3538_v50 = vadd.f32 %v3537_v13, %v11943_v28  ;;  %v4476_v32 = vsel %vm11643_vm11, %v12031_v49, 0  ;;  %v12043_v19 = vpop.f32.mrf.mxu1 }
 0x360   : > { %v8540_v41 = vpop.f32.mrf.mxu0  ;;  %v4615_v9 = vshll.u32 %v4476_v32, 16  ;;  %v4792_v59 = vrot.slane %v4476_v32, 1  ;;  %v4613_v13 = vshrl.u32 %v4476_v32, 16 }
 0x361   : > { %v3860_v21 = vpack.c.bf16 %v3817_v42, %v3817_v42  ;;  %v3650_v0 = vadd.f32 %v3538_v50, %v13842_v11  ;;  %v3322_v16 = vpop.f32.mrf.mxu1  ;;  %v3764_v29 = vmul.f32 0.2, %v3710_v27  ;;  %v13843_v50 = vld [vmem:[#allocation23_spill] sm:$0xff] }
 0x362   : > { %v3540_v58 = vpop.f32.mrf.mxu0  ;;  %v4617_v56 = vrot.slane %v4615_v9, 1 }
 0x363   : > { %v3711_v35 = vadd.f32 %v12011_v8, %v3650_v0  ;;  %v3541_v25 = vadd.f32 %v3540_v58, %v11952_v4  ;;  %v4477_v28 = vsel %vm11660_vm12, %v3860_v21, 0  ;;  %v12050_v55 = vpop.f32.mrf.mxu1  ;;  %v3818_v58 = vmax.f32 %v3710_v27, %v3764_v29 }
 0x364   : > { %v8541_v45 = vpop.f32.mrf.mxu0  ;;  %v4793_v60 = vrot.slane %v4477_v28, 1  ;;  %v4620_v42 = vshll.u32 %v4477_v28, 16  ;;  %v4618_v0 = vor.u32 %v4617_v56, %v4613_v13 }
 0x365   : > { %v3765_v41 = vmul.f32 0.2, %v3711_v35  ;;  %v3651_v11 = vadd.f32 %v3541_v25, %v13843_v50  ;;  %v3325_v16 = vpop.f32.mrf.mxu1 }
 0x366   : > { %v3545_v9 = vpop.f32.mrf.mxu0  ;;  %v12054_v53 = vsel %vm1040_vm1, %v4792_v59, %v4793_v60  ;;  %v4622_v4 = vrot.slane %v4620_v42, 1  ;;  %v13845_v60 = vld [vmem:[#allocation14_spill] sm:$0xff] }
 0x367   : > { %v3819_v22 = vmax.f32 %v3711_v35, %v3765_v41  ;;  %v3712_v21 = vadd.f32 %v12011_v8, %v3651_v11  ;;  %v3546_v45 = vadd.f32 %v3545_v9, %v11969_v61  ;;  %8611 = vmatmul.mubr.bf16.gmra.mxu0 %v12054_v53  ;;  %v12059_v32 = vpop.f32.mrf.mxu1  ;;  %v13846_v9 = vld [vmem:[#allocation28_spill] sm:$0xff] }
 0x368   : > { %v8544_v28 = vpop.f32.mrf.mxu0  ;;  %v12062_v25 = vsel %vm739_vm2, %v4618_v0, %v4622_v4 }
 0x369   : > { %13844 = vst [vmem:[#allocation22_spill] sm:$0xff] %v12062_v25  ;;  %v12064_v50 = vpack.c.bf16 %v3819_v22, %v3818_v58  ;;  %v3766_v59 = vmul.f32 0.2, %v3712_v21  ;;  %v3652_v56 = vadd.f32 %v3546_v45, %v13845_v60  ;;  %5179 = vmatprep.mubr.bf16.mxu1 %v12062_v25  ;;  %v3330_v27 = vpop.f32.mrf.mxu1 }
 0x36a   : > { %v3548_v29 = vpop.f32.mrf.mxu0  ;;  %7487 = vmatmul.mubr.msk.bf16.gmra.mxu1 %vm11643_vm11, %v12031_v49 }
 0x36b   : > { %v3820_v61 = vmax.f32 %v3712_v21, %v3766_v59  ;;  %v3713_v35 = vadd.f32 %v12011_v8, %v3652_v56  ;;  %v3549_v13 = vadd.f32 %v3548_v29, %v11976_v24  ;;  %v4478_v22 = vsel %vm11643_vm11, %v12064_v50, 0  ;;  %v12076_v42 = vpop.f32.mrf.mxu1 }
 0x36c   : > { %v8545_v41 = vpop.f32.mrf.mxu0  ;;  %v4627_v11 = vshll.u32 %v4478_v22, 16  ;;  %v4795_v27 = vrot.slane %v4478_v22, 1 }
 0x36d   : > { %v3862_v16 = vpack.c.bf16 %v3820_v61, %v3820_v61  ;;  %v3653_v0 = vadd.f32 %v3549_v13, %v13846_v9  ;;  %v3333_v4 = vpop.f32.mrf.mxu1  ;;  %v3767_v28 = vmul.f32 0.2, %v3713_v35  ;;  %v4625_v41 = vshrl.u32 %v4478_v22, 16  ;;  %v13847_v13 = vld [vmem:[#allocation10_spill] sm:$0xff] }
 0x36e   : > { %v3553_v58 = vpop.f32.mrf.mxu0  ;;  %v4629_v45 = vrot.slane %v4627_v11, 1 }
 0x36f   : > { %v3714_v21 = vadd.f32 %v12011_v8, %v3653_v0  ;;  %v3554_v59 = vadd.f32 %v3553_v58, %v11985_v5  ;;  %v4479_v24 = vsel %vm11660_vm12, %v3862_v16, 0  ;;  %v12083_v60 = vpop.f32.mrf.mxu1  ;;  %v3821_v58 = vmax.f32 %v3713_v35, %v3767_v28 }
 0x370   : > { %v8548_v56 = vpop.f32.mrf.mxu0  ;;  %v4796_v29 = vrot.slane %v4479_v24, 1  ;;  %v4632_v61 = vshll.u32 %v4479_v24, 16  ;;  %v4630_v0 = vor.u32 %v4629_v45, %v4625_v41 }
 0x371   : > { %v3768_v49 = vmul.f32 0.2, %v3714_v21  ;;  %v3654_v9 = vadd.f32 %v3554_v59, %v13847_v13  ;;  %v3338_v4 = vpop.f32.mrf.mxu1 }
 0x372   : > { %v3556_v11 = vpop.f32.mrf.mxu0  ;;  %v12087_v25 = vsel %vm1040_vm1, %v4795_v27, %v4796_v29  ;;  %v4634_v5 = vrot.slane %v4632_v61, 1 }
 0x373   : > { %v3822_v48 = vmax.f32 %v3714_v21, %v3768_v49  ;;  %v3715_v16 = vadd.f32 %v12011_v8, %v3654_v9  ;;  %v3557_v56 = vadd.f32 %v3556_v11, %v12005_v12  ;;  %8614 = vmatprep.mubr.bf16.mxu0 %v12087_v25  ;;  %v12092_v22 = vpop.f32.mrf.mxu1 }
 0x374   : > { %v8549_v24 = vpop.f32.mrf.mxu0  ;;  %v12095_v59 = vsel %vm739_vm2, %v4630_v0, %v4634_v5 }
 0x375   : > { %v12097_v13 = vpack.c.bf16 %v3822_v48, %v3821_v58  ;;  %v3769_v27 = vmul.f32 0.2, %v3715_v16  ;;  %v3655_v45 = vadd.f32 %v3557_v56, %v11441_v34  ;;  %5187 = vmatprep.mubr.bf16.mxu1 %v12095_v59  ;;  %v3341_v49 = vpop.f32.mrf.mxu1 }
 0x376   : > { %v3561_v35 = vpop.f32.mrf.mxu0  ;;  %7488 = vmatmul.mubr.msk.bf16.gmra.mxu1 %vm11643_vm11, %v12064_v50 }
 0x377   : > { %v3823_v12 = vmax.f32 %v3715_v16, %v3769_v27  ;;  %v3716_v28 = vadd.f32 %v12011_v8, %v3655_v45  ;;  %v3562_v21 = vadd.f32 %v3561_v35, %v12017_v1  ;;  %v4480_v48 = vsel %vm11643_vm11, %v12097_v13, 0  ;;  %v12109_v29 = vpop.f32.mrf.mxu1 }
 0x378   : > { %v8552_v34 = vpop.f32.mrf.mxu0  ;;  %v4639_v41 = vshll.u32 %v4480_v48, 16  ;;  %v4798_v27 = vrot.slane %v4480_v48, 1  ;;  %v4637_v49 = vshrl.u32 %v4480_v48, 16 }
 0x379   : > { %v3864_v61 = vpack.c.bf16 %v3823_v12, %v3823_v12  ;;  %v3656_v9 = vadd.f32 %v3562_v21, %v11452_v23  ;;  %v3346_v4 = vpop.f32.mrf.mxu1  ;;  %v3770_v5 = vmul.f32 0.2, %v3716_v28 }
 0x37a   : > { %v3564_v11 = vpop.f32.mrf.mxu0  ;;  %v4641_v0 = vrot.slane %v4639_v41, 1 }
 0x37b   : > { %v3717_v58 = vadd.f32 %v12011_v8, %v3656_v9  ;;  %v3565_v16 = vadd.f32 %v3564_v11, %v12026_v63  ;;  %v4481_v1 = vsel %vm11660_vm12, %v3864_v61, 0  ;;  %v12116_v56 = vpop.f32.mrf.mxu1  ;;  %v3824_v4 = vmax.f32 %v3716_v28, %v3770_v5 }
 0x37c   : > { %v8553_v24 = vpop.f32.mrf.mxu0  ;;  %v4799_v45 = vrot.slane %v4481_v1, 1  ;;  %v4644_v35 = vshll.u32 %v4481_v1, 16  ;;  %v4642_v9 = vor.u32 %v4641_v0, %v4637_v49 }
 0x37d   : > { %v3771_v12 = vmul.f32 0.2, %v3717_v58  ;;  %v3657_v23 = vadd.f32 %v3565_v16, %v11468_v46  ;;  %v3349_v21 = vpop.f32.mrf.mxu1 }
 0x37e   : > { %v3569_v34 = vpop.f32.mrf.mxu0  ;;  %v12120_v41 = vsel %vm1040_vm1, %v4798_v27, %v4799_v45  ;;  %v4646_v63 = vrot.slane %v4644_v35, 1 }
 0x37f   : > { %v3825_v11 = vmax.f32 %v3717_v58, %v3771_v12  ;;  %v3718_v61 = vadd.f32 %v12011_v8, %v3657_v23  ;;  %v3570_v24 = vadd.f32 %v3569_v34, %v12043_v19  ;;  %8615 = vmatmul.mubr.bf16.gmra.mxu0 %v12120_v41  ;;  %v12125_v48 = vpop.f32.mrf.mxu1 }
 0x380   : > { %v8556_v1 = vpop.f32.mrf.mxu0  ;;  %v12128_v46 = vsel %vm739_vm2, %v4642_v9, %v4646_v63 }
 0x381   : > { %v12130_v16 = vpack.c.bf16 %v3825_v11, %v3824_v4  ;;  %v3772_v27 = vmul.f32 0.2, %v3718_v61  ;;  %v3658_v0 = vadd.f32 %v3570_v24, %v11479_v3  ;;  %5195 = vmatprep.mubr.bf16.mxu1 %v12128_v46  ;;  %v3354_v28 = vpop.f32.mrf.mxu1 }
 0x382   : > { %v3572_v5 = vpop.f32.mrf.mxu0  ;;  %7489 = vmatmul.mubr.msk.bf16.gmra.mxu1 %vm11643_vm11, %v12097_v13 }
 0x383   : > { %13848 = vst [vmem:[#allocation31_spill] sm:$0xff] %v12130_v16  ;;  %v3826_v19 = vmax.f32 %v3718_v61, %v3772_v27  ;;  %v3719_v58 = vadd.f32 %v12011_v8, %v3658_v0  ;;  %v3573_v45 = vadd.f32 %v3572_v5, %v12050_v55  ;;  %v4482_v49 = vsel %vm11643_vm11, %v12130_v16, 0  ;;  %v12142_v35 = vpop.f32.mrf.mxu1 }
 0x384   : > { %v8557_v3 = vpop.f32.mrf.mxu0  ;;  %v4651_v12 = vshll.u32 %v4482_v49, 16  ;;  %v4801_v27 = vrot.slane %v4482_v49, 1  ;;  %v4649_v28 = vshrl.u32 %v4482_v49, 16 }
 0x385   : > { %v3866_v23 = vpack.c.bf16 %v3826_v19, %v3826_v19  ;;  %v3659_v21 = vadd.f32 %v3573_v45, %v11491_v36  ;;  %v3357_v34 = vpop.f32.mrf.mxu1  ;;  %v3773_v4 = vmul.f32 0.2, %v3719_v58 }
 0x386   : > { %v3577_v9 = vpop.f32.mrf.mxu0  ;;  %v4653_v63 = vrot.slane %v4651_v12, 1 }
 0x387   : > { %v3720_v11 = vadd.f32 %v12011_v8, %v3659_v21  ;;  %v3578_v61 = vadd.f32 %v3577_v9, %v12059_v32  ;;  %v4483_v55 = vsel %vm11660_vm12, %v3866_v23, 0  ;;  %v12149_v24 = vpop.f32.mrf.mxu1  ;;  %v3827_v34 = vmax.f32 %v3719_v58, %v3773_v4 }
 0x388   : > { %v8560_v1 = vpop.f32.mrf.mxu0  ;;  %v4802_v0 = vrot.slane %v4483_v55, 1  ;;  %v4656_v5 = vshll.u32 %v4483_v55, 16  ;;  %v4654_v21 = vor.u32 %v4653_v63, %v4649_v28 }
 0x389   : > { %v3774_v19 = vmul.f32 0.2, %v3720_v11  ;;  %v3660_v36 = vadd.f32 %v3578_v61, %v11498_v62  ;;  %v3362_v45 = vpop.f32.mrf.mxu1 }
 0x38a   : > { %v3580_v3 = vpop.f32.mrf.mxu0  ;;  %v12153_v12 = vsel %vm1040_vm1, %v4801_v27, %v4802_v0  ;;  %v4658_v32 = vrot.slane %v4656_v5, 1 }
 0x38b   : > { %v3828_v9 = vmax.f32 %v3720_v11, %v3774_v19  ;;  %v3721_v23 = vadd.f32 %v12011_v8, %v3660_v36  ;;  %v3581_v1 = vadd.f32 %v3580_v3, %v12076_v42  ;;  %8618 = vmatprep.mubr.bf16.mxu0 %v12153_v12  ;;  %v12158_v49 = vpop.f32.mrf.mxu1  ;;  %v13849_v36 = vld [vmem:[#allocation17_spill] sm:$0xff] }
 0x38c   : > { %v8561_v55 = vpop.f32.mrf.mxu0  ;;  %v12161_v62 = vsel %vm739_vm2, %v4654_v21, %v4658_v32 }
 0x38d   : > { %v12163_v61 = vpack.c.bf16 %v3828_v9, %v3827_v34  ;;  %v3775_v27 = vmul.f32 0.2, %v3721_v23  ;;  %v3661_v63 = vadd.f32 %v3581_v1, %v11508_v15  ;;  %5203 = vmatprep.mubr.bf16.mxu1 %v12161_v62  ;;  %v3365_v58 = vpop.f32.mrf.mxu1 }
 0x38e   : > { %v3585_v4 = vpop.f32.mrf.mxu0  ;;  %7490 = vmatmul.mubr.msk.bf16.gmra.mxu1 %vm11643_vm11, %v12130_v16 }
 0x38f   : > { %v3829_v42 = vmax.f32 %v3721_v23, %v3775_v27  ;;  %v3722_v11 = vadd.f32 %v12011_v8, %v3661_v63  ;;  %v3586_v0 = vadd.f32 %v3585_v4, %v12083_v60  ;;  %v4484_v28 = vsel %vm11643_vm11, %v12163_v61, 0  ;;  %v13850_v4 = vld [vmem:[#allocation12_spill] sm:$0xff] }
 0x390   : > { %v8564_v5 = vpop.f32.mrf.mxu0  ;;  %v4663_v19 = vshll.u32 %v4484_v28, 16  ;;  %v4804_v1 = vrot.slane %v4484_v28, 1  ;;  %v4661_v27 = vshrl.u32 %v4484_v28, 16 }
 0x391   : > { %v3868_v15 = vpack.c.bf16 %v3829_v42, %v3829_v42  ;;  %v3662_v45 = vadd.f32 %v3586_v0, %v13849_v36  ;;  %v3776_v32 = vmul.f32 0.2, %v3722_v11 }
 0x392   : > { %v3588_v3 = vpop.f32.mrf.mxu0  ;;  %v4665_v21 = vrot.slane %v4663_v19, 1 }
 0x393   : > { %v3723_v34 = vadd.f32 %v12011_v8, %v3662_v45  ;;  %v3589_v9 = vadd.f32 %v3588_v3, %v12092_v22  ;;  %v4485_v23 = vsel %vm11660_vm12, %v3868_v15, 0  ;;  %v3830_v45 = vmax.f32 %v3722_v11, %v3776_v32 }
 0x394   : > { %v8565_v60 = vpop.f32.mrf.mxu0  ;;  %v4805_v55 = vrot.slane %v4485_v23, 1  ;;  %v4668_v63 = vshll.u32 %v4485_v23, 16  ;;  %v4666_v19 = vor.u32 %v4665_v21, %v4661_v27 }
 0x395   : > { %v3777_v58 = vmul.f32 0.2, %v3723_v34  ;;  %v3663_v42 = vadd.f32 %v3589_v9, %v13850_v4  ;;  %v13851_v60 = vld [vmem:[#allocation16_spill] sm:$0xff] }
 0x396   : > { %v3593_v5 = vpop.f32.mrf.mxu0  ;;  %v12182_v0 = vsel %vm1040_vm1, %v4804_v1, %v4805_v55  ;;  %v4670_v36 = vrot.slane %v4668_v63, 1  ;;  %v13852_v63 = vld [vmem:[#allocation41_spill] sm:$0xff] }
 0x397   : > { %v3831_v16 = vmax.f32 %v3723_v34, %v3777_v58  ;;  %v3724_v22 = vadd.f32 %v12011_v8, %v3663_v42  ;;  %v3594_v15 = vadd.f32 %v3593_v5, %v12109_v29  ;;  %8619 = vmatmul.mubr.bf16.gmra.mxu0 %v12182_v0 }
 0x398   : > { %v8568_v3 = vpop.f32.mrf.mxu0  ;;  %v12188_v28 = vsel %vm739_vm2, %v4666_v19, %v4670_v36 }
 0x399   : > { %v12190_v23 = vpack.c.bf16 %v3831_v16, %v3830_v45  ;;  %v3778_v9 = vmul.f32 0.2, %v3724_v22  ;;  %v3664_v1 = vadd.f32 %v3594_v15, %v13851_v60  ;;  %5211 = vmatprep.mubr.bf16.mxu1 %v12188_v28 }
 0x39a   : > { %v3596_v21 = vpop.f32.mrf.mxu0  ;;  %7491 = vmatmul.mubr.msk.bf16.gmra.mxu1 %vm11643_vm11, %v12163_v61 }
 0x39b   : > { %v3832_v11 = vmax.f32 %v3724_v22, %v3778_v9  ;;  %v3725_v29 = vadd.f32 %v12011_v8, %v3664_v1  ;;  %v3597_v32 = vadd.f32 %v3596_v21, %v12116_v56  ;;  %v4486_v16 = vsel %vm11643_vm11, %v12190_v23, 0  ;;  %v13853_v1 = vld [vmem:[#allocation15_spill] sm:$0xff] }
 0x39c   : > { %v8569_v34 = vpop.f32.mrf.mxu0  ;;  %v4675_v55 = vshll.u32 %v4486_v16, 16  ;;  %v4807_v22 = vrot.slane %v4486_v16, 1  ;;  %v4673_v3 = vshrl.u32 %v4486_v16, 16 }
 0x39d   : > { %v3870_v27 = vpack.c.bf16 %v3832_v11, %v3832_v11  ;;  %v3665_v58 = vadd.f32 %v3597_v32, %v13852_v63  ;;  %v3779_v5 = vmul.f32 0.2, %v3725_v29 }
 0x39e   : > { %v3601_v4 = vpop.f32.mrf.mxu0  ;;  %v4677_v42 = vrot.slane %v4675_v55, 1 }
 0x39f   : > { %v3726_v19 = vadd.f32 %v12011_v8, %v3665_v58  ;;  %v3602_v36 = vadd.f32 %v3601_v4, %v12125_v48  ;;  %v4487_v45 = vsel %vm11660_vm12, %v3870_v27, 0  ;;  %v3833_v63 = vmax.f32 %v3725_v29, %v3779_v5 }
 0x3a0   : > { %v8572_v56 = vpop.f32.mrf.mxu0  ;;  %v4808_v15 = vrot.slane %v4487_v45, 1  ;;  %v4680_v9 = vshll.u32 %v4487_v45, 16  ;;  %v4678_v34 = vor.u32 %v4677_v42, %v4673_v3 }
 0x3a1   : > { %v3780_v60 = vmul.f32 0.2, %v3726_v19  ;;  %v3666_v21 = vadd.f32 %v3602_v36, %v13853_v1  ;;  %v13854_v56 = vld [vmem:[#allocation18_spill] sm:$0xff] }
 0x3a2   : > { %v3604_v11 = vpop.f32.mrf.mxu0  ;;  %v12209_v32 = vsel %vm1040_vm1, %v4807_v22, %v4808_v15  ;;  %v4682_v55 = vrot.slane %v4680_v9, 1 }
 0x3a3   : > { %v3834_v58 = vmax.f32 %v3726_v19, %v3780_v60  ;;  %v3727_v48 = vadd.f32 %v12011_v8, %v3666_v21  ;;  %v3605_v27 = vadd.f32 %v3604_v11, %v12142_v35  ;;  %8622 = vmatprep.mubr.bf16.mxu0 %v12209_v32  ;;  %v13855_v60 = vld [vmem:[#allocation11_spill] sm:$0xff] }
 0x3a4   : > { %v8573_v4 = vpop.f32.mrf.mxu0  ;;  %v12215_v16 = vsel %vm739_vm2, %v4678_v34, %v4682_v55 }
 0x3a5   : > { %v12217_v45 = vpack.c.bf16 %v3834_v58, %v3833_v63  ;;  %v3781_v36 = vmul.f32 0.2, %v3727_v48  ;;  %v3667_v22 = vadd.f32 %v3605_v27, %v13854_v56  ;;  %5219 = vmatprep.mubr.bf16.mxu1 %v12215_v16 }
 0x3a6   : > { %v3609_v42 = vpop.f32.mrf.mxu0  ;;  %7492 = vmatmul.mubr.msk.bf16.gmra.mxu1 %vm11643_vm11, %v12190_v23 }
 0x3a7   : > { %v3835_v29 = vmax.f32 %v3727_v48, %v3781_v36  ;;  %v3728_v35 = vadd.f32 %v12011_v8, %v3667_v22  ;;  %v3610_v5 = vadd.f32 %v3609_v42, %v12149_v24  ;;  %v4488_v19 = vsel %vm11643_vm11, %v12217_v45, 0  ;;  %v13856_v22 = vld [vmem:[#allocation13_spill] sm:$0xff] }
 0x3a8   : > { %v8576_v15 = vpop.f32.mrf.mxu0  ;;  %v4687_v3 = vshll.u32 %v4488_v19, 16  ;;  %v4810_v24 = vrot.slane %v4488_v19, 1  ;;  %v4685_v27 = vshrl.u32 %v4488_v19, 16 }
 0x3a9   : > { %v3872_v9 = vpack.c.bf16 %v3835_v29, %v3835_v29  ;;  %v3668_v1 = vadd.f32 %v3610_v5, %v13855_v60  ;;  %v3782_v34 = vmul.f32 0.2, %v3728_v35 }
 0x3aa   : > { %v3612_v21 = vpop.f32.mrf.mxu0  ;;  %v4689_v11 = vrot.slane %v4687_v3, 1 }
 0x3ab   : > { %v3729_v55 = vadd.f32 %v12011_v8, %v3668_v1  ;;  %v3613_v63 = vadd.f32 %v3612_v21, %v12158_v49  ;;  %v4489_v58 = vsel %vm11660_vm12, %v3872_v9, 0  ;;  %v3836_v3 = vmax.f32 %v3728_v35, %v3782_v34 }
 0x3ac   : > { %v4811_v48 = vrot.slane %v4489_v58, 1  ;;  %v4692_v4 = vshll.u32 %v4489_v58, 16  ;;  %v8577_v36 = vpop.f32.mrf.mxu0  ;;  %v4690_v5 = vor.u32 %v4689_v11, %v4685_v27  ;;  %v12257_v11 = vld [vmem:[%s13316_s3 + $0x230] sm:$0xff]  }
 0x3ad   : > { %v3783_v56 = vmul.f32 0.2, %v3729_v55  ;;  %v3669_v42 = vadd.f32 %v3613_v63, %v13856_v22  ;;  %v8985_v58 = vld [vmem:[%s13316_s3 + $0x1f0] sm:$0xff]   ;;  %v12276_v36 = vld [vmem:[%s13316_s3 + $0x228] sm:$0xff]  }
 0x3ae   : > { %v12236_v29 = vsel %vm1040_vm1, %v4810_v24, %v4811_v48  ;;  %v4694_v15 = vrot.slane %v4692_v4, 1  ;;  %v8987_v22 = vld [vmem:[%s13316_s3 + $0x1b0] sm:$0xff]  }
 0x3af   : > { %13857 = vst [vmem:[#allocation64_spill] sm:$0xff] %v12236_v29  ;;  %v3837_v60 = vmax.f32 %v3729_v55, %v3783_v56  ;;  %v3730_v49 = vadd.f32 %v12011_v8, %v3669_v42  ;;  %8623 = vmatmul.mubr.bf16.gmra.mxu0 %v12236_v29  ;;  %v13860_v55 = vld [vmem:[#allocation19_spill] sm:$0xff] }
 0x3b0   : > { %5573 = vmatprep.mubr.bf16.mxu0 %v11648_v20  ;;  %v12242_v6 = vsel %vm739_vm2, %v4690_v5, %v4694_v15  ;;  %v12297_v5 = vld [vmem:[%s13316_s3 + $0x220] sm:$0xff]   ;;  %v9017_v29 = vld [vmem:[%s9331_s12 + $0x38] sm:$0xf] }
 0x3b1   : > { %v12244_v19 = vpack.c.bf16 %v3837_v60, %v3836_v3  ;;  %v3784_v9 = vmul.f32 0.2, %v3730_v49  ;;  %5227 = vmatprep.mubr.bf16.mxu1 %v12242_v6  ;;  %v13862_v3 = vld [vmem:[#allocation36_spill] sm:$0xff]  ;;  %v8989_v60 = vld [vmem:[%s13316_s3 + $0x1a8] sm:$0xff]  }
 0x3b2   : > { %7493 = vmatmul.mubr.msk.bf16.gmra.mxu1 %vm11643_vm11, %v12217_v45 }
 0x3b3   : > { %13858 = vst [vmem:[#allocation26_spill] sm:$0xff] %v12244_v19  ;;  %v3838_v35 = vmax.f32 %v3730_v49, %v3784_v9  ;;  %8642 = vmatprep.mubr.bf16.mxu1 %v11637_v26  ;;  %v4490_v1 = vsel %vm11609_vm8, %v12244_v19, 0  ;;  %v8984_v26 = vld [vmem:[%s13316_s3 + $0x1b8] sm:$0xff]   ;;  %v13863_v9 = vld [vmem:[#allocation44_spill] sm:$0xff] }
 0x3b4   : > { %v4699_v20 = vshll.u32 %v4490_v1, 16  ;;  %v4697_v24 = vshrl.u32 %v4490_v1, 16  ;;  %v4813_v27 = vrot.slane %v4490_v1, 1 }
 0x3b5   : > { %v3874_v21 = vpack.c.bf16 %v3838_v35, %v3838_v35  ;;  %v8990_v35 = vld [vmem:[%s13316_s3 + $0x1e0] sm:$0xff]  }
 0x3b6   : > { %v4701_v34 = vrot.slane %v4699_v20, 1  ;;  %v12314_v20 = vld [vmem:[%s13316_s3 + $0x218] sm:$0xff]  }
 0x3b7   : > { %7518 = vmatmul.mubr.msk.bf16.vlgmr.msra.gmra.mxu0 %vm11609_vm8, %v13860_v55  ;;  %v4491_v63 = vsel %vm11609_vm8, %v3874_v21, 0  ;;  %v13864_v21 = vld [vmem:[#allocation27_spill] sm:$0xff] }
 0x3b8   : > { %5581 = vmatprep.mubr.bf16.mxu0 %v11681_v31  ;;  %8675 = vmatpush3.bf16.msra.mxu0 %v11918_v14  ;;  %v4704_v48 = vshll.u32 %v4491_v63, 16  ;;  %v4814_v4 = vrot.slane %v4491_v63, 1  ;;  %v4702_v31 = vor.u32 %v4701_v34, %v4697_v24  ;;  %v8991_v34 = vld [vmem:[%s13316_s3 + $0x1a0] sm:$0xff]   ;;  %v12331_v63 = vld [vmem:[%s13316_s3 + $0x210] sm:$0xff]  }
 0x3b9   : > { %8676 = vmatprep.subr.bf16.mxu0 %v12257_v11  ;;  %v13866_v24 = vld [vmem:[#allocation20_spill] sm:$0xff] }
 0x3ba   : > { %8643 = vmatmul.mubr.bf16.vlgmr.msra.gmra.mxu1 %v11673_v18  ;;  %v4706_v56 = vrot.slane %v4704_v48, 1  ;;  %v12280_v14 = vsel %vm1040_vm1, %v4813_v27, %v4814_v4  ;;  %v8988_v18 = vld [vmem:[%s13316_s3 + $0x1e8] sm:$0xff]   ;;  %v8994_v48 = vld [vmem:[%s13316_s3 + $0x198] sm:$0xff]   ;;  %v13868_v4 = vld [vmem:[#allocation52_spill] sm:$0xff] }
 0x3bb   : > { %13861 = vst [vmem:[#allocation49_spill] sm:$0xff] %v12280_v14  ;;  %8646 = vmatprep.mubr.bf16.mxu1 %v11719_v44  ;;  %8047 = vmatpush3.bf16.msra.mxu1 %v8984_v26  ;;  %v8993_v26 = vld [vmem:[%s13316_s3 + $0x1d8] sm:$0xff]  }
 0x3bc   : > { %8677 = vmatpush3.bf16.msra.mxu0 %v12257_v11  ;;  %8048 = vmatprep.subr.bf16.mxu1 %v8985_v58  ;;  %v12288_v42 = vsel %vm739_vm2, %v4702_v31, %v4706_v56  ;;  %v8995_v31 = vld [vmem:[%s13316_s3 + $0x1d0] sm:$0xff]  }
 0x3bd   : > { %8678 = vmatprep.subr.bf16.mxu0 %v12276_v36 }
 0x3be   : > { %v7790_v15 = vpop.f32.mrf.mxu1 }
 0x3bf   : > { %7519 = vmatmul.mubr.msk.bf16.gmra.mxu0 %vm11643_vm11, %v13862_v3  ;;  %8049 = vmatpush3.bf16.msra.mxu1 %v8987_v22  ;;  %v8996_v3 = vld [vmem:[%s13316_s3 + $0x190] sm:$0xff]  }
 0x3c0   : > { %v7791_v49 = vpop.f32.mrf.mxu1  ;;  %5589 = vmatprep.mubr.bf16.mxu0 %v13863_v9  ;;  %8679 = vmatpush3.bf16.msra.mxu0 %v12276_v36 }
 0x3c1   : > { %v7792_v1 = vadd.f32 %v7791_v49, %v7790_v15  ;;  %8050 = vmatprep.subr.bf16.mxu1 %v8988_v18  ;;  %8680 = vmatprep.subr.bf16.mxu0 %v12297_v5  ;;  %v12353_v15 = vld [vmem:[%s13316_s3 + $0x208] sm:$0xff]  }
 0x3c2   : > { %8647 = vmatmul.mubr.bf16.gmra.mxu1 %v13864_v21  ;;  %v12321_v55 = vpop.f32.mrf.mxu1  ;;  %v8997_v49 = vld [vmem:[%s13316_s3 + $0x1c8] sm:$0xff]  }
 0x3c3   : > { %8650 = vmatprep.mubr.bf16.mxu1 %v11809_v51  ;;  %8051 = vmatpush3.bf16.msra.mxu1 %v8989_v60  ;;  %13865 = vst [vmem:[#allocation63_spill] sm:$0xff] %v12321_v55 }
 0x3c4   : > { %8052 = vmatprep.subr.bf16.mxu1 %v8990_v35  ;;  %8681 = vmatpush3.bf16.msra.mxu0 %v12297_v5  ;;  %v12339_v27 = vpop.f32.mrf.mxu1 }
 0x3c5   : > { %8682 = vmatprep.subr.bf16.mxu0 %v12314_v20  ;;  %13867 = vst [vmem:[#allocation32_spill] sm:$0xff] %v12339_v27  ;;  %v6512_v27 = vrot.slane %v9017_v29, 5 }
 0x3c7   : > { %v8596_v58 = vpop.f32.mrf.mxu0  ;;  %7520 = vmatmul.mubr.msk.bf16.gmra.mxu0 %vm11643_vm11, %v13866_v24  ;;  %8053 = vmatpush3.bf16.msra.mxu1 %v8991_v34  ;;  %v12367_v34 = vld [vmem:[%s13316_s3 + $0x200] sm:$0xff]  }
 0x3c8   : > { %5597 = vmatprep.mubr.bf16.mxu0 %v13868_v4  ;;  %8054 = vmatprep.subr.bf16.mxu1 %v8993_v26 }
 0x3c9   : > { %v5270_v56 = vpop.f32.mrf.mxu0  ;;  %8683 = vmatpush3.bf16.msra.mxu0 %v12314_v20 }
 0x3ca   : > { %v12346_v22 = vadd.f32 %v7792_v1, %v5270_v56  ;;  %v7796_v18 = vpop.f32.mrf.mxu1  ;;  %8651 = vmatmul.mubr.bf16.gmra.mxu1 %v11857_v17  ;;  %8684 = vmatprep.subr.bf16.mxu0 %v12331_v63 }
 0x3cb   : > { %8654 = vmatprep.mubr.bf16.mxu1 %v11908_v37  ;;  %8055 = vmatpush3.bf16.msra.mxu1 %v8994_v48  ;;  %v13871_v48 = vld [vmem:[#allocation24_spill] sm:$0xff] }
 0x3cc   : > { %13869 = vst [vmem:[#allocation30_spill] sm:$0xff] %v12346_v22  ;;  %v7797_v60 = vpop.f32.mrf.mxu1  ;;  %8056 = vmatprep.subr.bf16.mxu1 %v8995_v31  ;;  %v8998_v31 = vld [vmem:[%s13316_s3 + $0x188] sm:$0xff]  }
 0x3cd   : > { %v7798_v35 = vadd.f32 %v7797_v60, %v7796_v18  ;;  %8685 = vmatpush3.bf16.msra.mxu0 %v12331_v63  ;;  %v8999_v18 = vld [vmem:[%s13316_s3 + $0x1c0] sm:$0xff]  }
 0x3ce   : > { %v7799_v1 = vpop.f32.mrf.mxu1  ;;  %8686 = vmatprep.subr.bf16.mxu0 %v12353_v15 }
 0x3cf   : > { %v12369_v26 = vadd.f32 %v8596_v58, %v7798_v35  ;;  %7521 = vmatmul.mubr.msk.bf16.gmra.mxu0 %vm11643_vm11, %v13871_v48  ;;  %8057 = vmatpush3.bf16.msra.mxu1 %v8996_v3  ;;  %v8597_v58 = vpop.f32.mrf.mxu0  ;;  %v12384_v3 = vld [vmem:[#allocation2 + $0x38] sm:$0xff]  }
 0x3d0   : > { %v7800_v56 = vpop.f32.mrf.mxu1  ;;  %5605 = vmatprep.mubr.bf16.mxu0 %v11823_v47  ;;  %8058 = vmatprep.subr.bf16.mxu1 %v8997_v49  ;;  %v9000_v49 = vld [vmem:[%s13316_s3 + $0x180] sm:$0xff]  }
 0x3d1   : > { %13870 = vst [vmem:[#allocation68_spill] sm:$0xff] %v12369_v26  ;;  %v7801_v60 = vadd.f32 %v7800_v56, %v7799_v1  ;;  %8687 = vmatpush3.bf16.msra.mxu0 %v12353_v15 }
 0x3d2   : > { %8655 = vmatmul.mubr.bf16.gmra.mxu1 %v11947_v38  ;;  %8688 = vmatprep.subr.bf16.mxu0 %v12367_v34 }
 0x3d3   : > { %v12386_v35 = vadd.f32 %v8597_v58, %v7801_v60  ;;  %8658 = vmatprep.mubr.bf16.mxu1 %v11980_v7  ;;  %8059 = vmatpush3.bf16.msra.mxu1 %v8998_v31  ;;  %v9014_v31 = vld [vmem:[%s13316_s3 + $0x238] sm:$0xff]   ;;  %v9015_v58 = vld [vmem:[%s9331_s12 + $0x34] sm:$0xf] }
 0x3d4   : > { %8060 = vmatprep.subr.bf16.mxu1 %v8999_v18 }
 0x3d5   : > { %13872 = vst [vmem:[#allocation34_spill] sm:$0xff] %v12386_v35  ;;  %8689 = vmatpush3.bf16.msra.mxu0 %v12367_v34  ;;  %v6509_v35 = vrot.slane %v9015_v58, 5 }
 0x3d6   : > { %v7802_v1 = vpop.f32.mrf.mxu1  ;;  %8722 = vmatprep.subr.bf16.mxu0 %v12384_v3 }
 0x3d7   : > { %7522 = vmatmul.mubr.msk.bf16.gmra.mxu0 %vm11643_vm11, %v11777_v10  ;;  %8061 = vmatpush3.bf16.msra.mxu1 %v9000_v49  ;;  %v12406_v49 = vpop.f32.mrf.mxu0  ;;  %v6511_v22 = vrot.slane %v6509_v35, 4 }
 0x3d8   : > { %v7803_v56 = vpop.f32.mrf.mxu1  ;;  %5613 = vmatprep.mubr.bf16.mxu0 %v11865_v2  ;;  %8770 = vmatprep.subr.bf16.mxu1 %v9014_v31  ;;  %13874 = vst [vmem:[#allocation65_spill] sm:$0xff] %v12406_v49 }
 0x3d9   : > { %v7804_v18 = vadd.f32 %v7803_v56, %v7802_v1  ;;  %v9016_v1 = vld [vmem:[%s9331_s12 + $0x30] sm:$0xf]  ;;  %v12430_v29 = vsel %vm12420_vm15, %v6511_v22, %v6512_v27 }
 0x3da   : > { %8659 = vmatmul.mubr.bf16.gmra.mxu1 %v12021_v40  ;;  %v12403_v60 = vpop.f32.mrf.mxu1  ;;  %v7624_v56 = vrot.slane %v9016_v1, 9 }
 0x3db   : > { %8662 = vmatprep.mubr.bf16.mxu1 %v12054_v53  ;;  %13873 = vst [vmem:[#allocation33_spill] sm:$0xff] %v12403_v60 }
 0x3dc   : > { %v12411_v14 = vpop.f32.mrf.mxu1  ;;  %v12426_v1 = vsel %vm12420_vm15, %v7624_v56, %v6509_v35 }
 0x3dd   : > { %13875 = vst [vmem:[#allocation74_spill] sm:$0xff] %v12411_v14 }
 0x3df   : > { %v8600_v26 = vpop.f32.mrf.mxu0  ;;  %7523 = vmatmul.mubr.msk.bf16.gmra.mxu0 %vm11643_vm11, %v11825_v43 }
 0x3e0   : > { %5621 = vmatprep.mubr.bf16.mxu0 %v11921_v39 }
 0x3e1   : > { %v5286_v55 = vpop.f32.mrf.mxu0 }
 0x3e2   : > { %v12416_v60 = vadd.f32 %v7804_v18, %v5286_v55  ;;  %v7808_v58 = vpop.f32.mrf.mxu1  ;;  %8663 = vmatmul.mubr.bf16.gmra.mxu1 %v12087_v25 }
 0x3e3   : > { %8666 = vmatprep.mubr.bf16.mxu1 %v12120_v41  ;;  %v8601_v35 = vpop.f32.mrf.mxu0 }
 0x3e4   : > { %13876 = vst [vmem:[#allocation35_spill] sm:$0xff] %v12416_v60  ;;  %v7809_v14 = vpop.f32.mrf.mxu1 }
 0x3e5   : > { %v7810_v8 = vadd.f32 %v7809_v14, %v7808_v58 }
 0x3e6   : > { %v7811_v55 = vpop.f32.mrf.mxu1 }
 0x3e7   : > { %v12434_v60 = vadd.f32 %v8600_v26, %v7810_v8  ;;  %7524 = vmatmul.mubr.msk.bf16.gmra.mxu0 %vm11643_vm11, %v11867_v30  ;;  %v12452_v26 = vpop.f32.mrf.mxu0 }
 0x3e8   : > { %v7812_v19 = vpop.f32.mrf.mxu1  ;;  %5629 = vmatprep.mubr.bf16.mxu0 %v11955_v57 }
 0x3e9   : > { %13879 = vst [vmem:[#allocation60_spill] sm:$0xff] %v12434_v60  ;;  %v7813_v14 = vadd.f32 %v7812_v19, %v7811_v55  ;;  %v13882_v55 = vld [vmem:[#allocation61_spill] sm:$0xff] }
 0x3ea   : > { %8667 = vmatmul.mubr.bf16.gmra.mxu1 %v12153_v12 }
 0x3eb   : > { %v12441_v56 = vadd.f32 %v8601_v35, %v7813_v14  ;;  %8670 = vmatprep.mubr.bf16.mxu1 %v12182_v0  ;;  %v13884_v35 = vld [vmem:[#allocation57_spill] sm:$0xff] }
 0x3ed   : > { %13880 = vst [vmem:[#allocation54_spill] sm:$0xff] %v12441_v56 }
 0x3ee   : > { %v7814_v27 = vpop.f32.mrf.mxu1 }
 0x3ef   : > { %7525 = vmatmul.mubr.msk.bf16.gmra.mxu0 %vm11643_vm11, %v11923_v54 }
 0x3f0   : > { %v7815_v8 = vpop.f32.mrf.mxu1  ;;  %5637 = vmatprep.mubr.bf16.mxu0 %v11991_v52 }
 0x3f1   : > { %v7816_v22 = vadd.f32 %v7815_v8, %v7814_v27 }
 0x3f2   : > { %8671 = vmatmul.mubr.bf16.gmra.mxu1 %v12209_v32  ;;  %v12450_v19 = vpop.f32.mrf.mxu1 }
 0x3f3   : > { %6088 = vmatprep.mubr.bf16.mxu1 %v13863_v9  ;;  %13881 = vst [vmem:[#allocation69_spill] sm:$0xff] %v12450_v19 }
 0x3f4   : > { %v12457_v14 = vpop.f32.mrf.mxu1 }
 0x3f5   : > { %13883 = vst [vmem:[#allocation37_spill] sm:$0xff] %v12457_v14  ;;  %v13885_v14 = vld [vmem:[#allocation21_spill] sm:$0xff] }
 0x3f7   : > { %v8604_v58 = vpop.f32.mrf.mxu0  ;;  %7526 = vmatmul.mubr.msk.bf16.gmra.mxu0 %vm11643_vm11, %v13882_v55 }
 0x3f8   : > { %5645 = vmatprep.mubr.bf16.mxu0 %v13884_v35 }
 0x3f9   : > { %v5302_v18 = vpop.f32.mrf.mxu0 }
 0x3fa   : > { %v12460_v56 = vadd.f32 %v7816_v22, %v5302_v18  ;;  %v7820_v27 = vpop.f32.mrf.mxu1  ;;  %7606 = vmatmul.mubr.msk.bf16.vlgmr.msra.gmra.mxu1 %vm11643_vm11, %v13866_v24  ;;  %v13886_v22 = vld [vmem:[#allocation22_spill] sm:$0xff] }
 0x3fb   : > { %6096 = vmatprep.mubr.bf16.mxu1 %v13868_v4  ;;  %8778 = vmatpush3.bf16.msra.mxu1 %v9014_v31  ;;  %v8605_v4 = vpop.f32.mrf.mxu0 }
 0x3fc   : > { %v7821_v9 = vpop.f32.mrf.mxu1  ;;  %8771 = vmatprep.subr.bf16.mxu1 %v12257_v11 }
 0x3fd   : > { %v7822_v8 = vadd.f32 %v7821_v9, %v7820_v27 }
 0x3fe   : > { %v7823_v19 = vpop.f32.mrf.mxu1 }
 0x3ff   : > { %v12467_v60 = vadd.f32 %v8604_v58, %v7822_v8  ;;  %7527 = vmatmul.mubr.msk.bf16.gmra.mxu0 %vm11643_vm11, %v13885_v14  ;;  %8779 = vmatpush3.bf16.msra.mxu1 %v12257_v11  ;;  %v13887_v58 = vld [vmem:[#allocation25_spill] sm:$0xff] }
 0x400   : > { %v7824_v18 = vpop.f32.mrf.mxu1  ;;  %5653 = vmatprep.mubr.bf16.mxu0 %v13886_v22  ;;  %8772 = vmatprep.subr.bf16.mxu1 %v12276_v36 }
 0x401   : > { %v7825_v24 = vadd.f32 %v7824_v18, %v7823_v19 }
 0x402   : > { %7607 = vmatmul.mubr.msk.bf16.gmra.mxu1 %vm11643_vm11, %v13871_v48 }
 0x403   : > { %v12478_v31 = vadd.f32 %v8605_v4, %v7825_v24  ;;  %6104 = vmatprep.mubr.bf16.mxu1 %v11823_v47  ;;  %8780 = vmatpush3.bf16.msra.mxu1 %v12276_v36  ;;  %v12495_v36 = vpop.f32.mrf.mxu0 }
 0x404   : > { %8773 = vmatprep.subr.bf16.mxu1 %v12297_v5 }
 0x406   : > { %v7826_v11 = vpop.f32.mrf.mxu1 }
 0x407   : > { %7528 = vmatmul.mubr.msk.bf16.gmra.mxu0 %vm11643_vm11, %v13887_v58  ;;  %8781 = vmatpush3.bf16.msra.mxu1 %v12297_v5 }
 0x408   : > { %v7827_v19 = vpop.f32.mrf.mxu1  ;;  %5661 = vmatprep.mubr.bf16.mxu0 %v12095_v59  ;;  %8774 = vmatprep.subr.bf16.mxu1 %v12314_v20 }
 0x409   : > { %v7828_v48 = vadd.f32 %v7827_v19, %v7826_v11  ;;  %v13888_v19 = vld [vmem:[#allocation31_spill] sm:$0xff] }
 0x40a   : > { %v7829_v27 = vpop.f32.mrf.mxu1  ;;  %7608 = vmatmul.mubr.msk.bf16.gmra.mxu1 %vm11643_vm11, %v11777_v10 }
 0x40b   : > { %6112 = vmatprep.mubr.bf16.mxu1 %v11865_v2  ;;  %8782 = vmatpush3.bf16.msra.mxu1 %v12314_v20 }
 0x40c   : > { %v7830_v47 = vpop.f32.mrf.mxu1  ;;  %8775 = vmatprep.subr.bf16.mxu1 %v12331_v63 }
 0x40d   : > { %v12497_v5 = vadd.f32 %v7830_v47, %v7829_v27 }
 0x40f   : > { %v8608_v9 = vpop.f32.mrf.mxu0  ;;  %7529 = vmatmul.mubr.msk.bf16.gmra.mxu0 %vm11643_vm11, %v12064_v50  ;;  %8783 = vmatpush3.bf16.msra.mxu1 %v12331_v63 }
 0x410   : > { %5669 = vmatprep.mubr.bf16.mxu0 %v12128_v46  ;;  %8776 = vmatprep.subr.bf16.mxu1 %v12353_v15 }
 0x411   : > { %v5318_v10 = vpop.f32.mrf.mxu0 }
 0x412   : > { %v12505_v2 = vadd.f32 %v7828_v48, %v5318_v10  ;;  %v7832_v20 = vpop.f32.mrf.mxu1  ;;  %7609 = vmatmul.mubr.msk.bf16.gmra.mxu1 %vm11643_vm11, %v11825_v43 }
 0x413   : > { %6120 = vmatprep.mubr.bf16.mxu1 %v11921_v39  ;;  %8784 = vmatpush3.bf16.msra.mxu1 %v12353_v15  ;;  %v8609_v39 = vpop.f32.mrf.mxu0 }
 0x414   : > { %v7833_v8 = vpop.f32.mrf.mxu1  ;;  %8777 = vmatprep.subr.bf16.mxu1 %v12367_v34 }
 0x415   : > { %v7834_v63 = vadd.f32 %v7833_v8, %v7832_v20  ;;  %v12534_v47 = vpop.f32.mrf.mxu0 }
 0x416   : > { %v7835_v18 = vpop.f32.mrf.mxu1 }
 0x417   : > { %v12513_v24 = vadd.f32 %v8608_v9, %v7834_v63  ;;  %7530 = vmatmul.mubr.msk.bf16.gmra.mxu0 %vm11643_vm11, %v12097_v13  ;;  %8785 = vmatpush3.bf16.msra.mxu1 %v12367_v34 }
 0x418   : > { %v7836_v4 = vpop.f32.mrf.mxu1  ;;  %5677 = vmatprep.mubr.bf16.mxu0 %v12161_v62 }
 0x419   : > { %v7837_v43 = vadd.f32 %v7836_v4, %v7835_v18 }
 0x41a   : > { %7610 = vmatmul.mubr.msk.bf16.gmra.mxu1 %vm11643_vm11, %v11867_v30 }
 0x41b   : > { %v12523_v15 = vadd.f32 %v8609_v39, %v7837_v43  ;;  %6128 = vmatprep.mubr.bf16.mxu1 %v11955_v57 }
 0x41e   : > { %v7838_v11 = vpop.f32.mrf.mxu1 }
 0x41f   : > { %7531 = vmatmul.mubr.msk.bf16.gmra.mxu0 %vm11643_vm11, %v13888_v19 }
 0x420   : > { %v7839_v48 = vpop.f32.mrf.mxu1  ;;  %5685 = vmatprep.mubr.bf16.mxu0 %v12188_v28 }
 0x421   : > { %v7840_v34 = vadd.f32 %v7839_v48, %v7838_v11 }
 0x422   : > { %v7841_v27 = vpop.f32.mrf.mxu1  ;;  %7611 = vmatmul.mubr.msk.bf16.gmra.mxu1 %vm11643_vm11, %v11923_v54 }
 0x423   : > { %6136 = vmatprep.mubr.bf16.mxu1 %v11991_v52 }
 0x424   : > { %v7842_v30 = vpop.f32.mrf.mxu1 }
 0x425   : > { %v12536_v57 = vadd.f32 %v7842_v30, %v7841_v27  ;;  %v9008_v30 = vld [vmem:[#allocation2 + $0x20] sm:$0xff]  }
 0x427   : > { %v8612_v9 = vpop.f32.mrf.mxu0  ;;  %7532 = vmatmul.mubr.msk.bf16.gmra.mxu0 %vm11643_vm11, %v12163_v61 }
 0x428   : > { %5693 = vmatprep.mubr.bf16.mxu0 %v12215_v16 }
 0x429   : > { %v5334_v10 = vpop.f32.mrf.mxu0 }
 0x42a   : > { %v12542_v20 = vadd.f32 %v7840_v34, %v5334_v10  ;;  %v7844_v8 = vpop.f32.mrf.mxu1  ;;  %7612 = vmatmul.mubr.msk.bf16.gmra.mxu1 %vm11643_vm11, %v13882_v55  ;;  %v9007_v34 = vld [vmem:[#allocation2 + $0x28] sm:$0xff]  }
 0x42b   : > { %6144 = vmatprep.mubr.bf16.mxu1 %v13884_v35  ;;  %v8613_v39 = vpop.f32.mrf.mxu0  ;;  %v9006_v35 = vld [vmem:[#allocation2 + $0x30] sm:$0xff]  }
 0x42c   : > { %v7845_v54 = vpop.f32.mrf.mxu1 }
 0x42d   : > { %v7846_v52 = vadd.f32 %v7845_v54, %v7844_v8 }
 0x42e   : > { %v7847_v63 = vpop.f32.mrf.mxu1 }
 0x42f   : > { %v12548_v18 = vadd.f32 %v8612_v9, %v7846_v52  ;;  %7533 = vmatmul.mubr.msk.bf16.gmra.mxu0 %vm11643_vm11, %v12190_v23  ;;  %v9009_v9 = vld [vmem:[#allocation2 + $0x18] sm:$0xff]  }
 0x430   : > { %v7848_v4 = vpop.f32.mrf.mxu1  ;;  %8690 = vmatprep.mubr.bf16.mxu0 %v11719_v44 }
 0x431   : > { %v7849_v43 = vadd.f32 %v7848_v4, %v7847_v63 }
 0x432   : > { %7613 = vmatmul.mubr.msk.bf16.gmra.mxu1 %vm11643_vm11, %v13885_v14 }
 0x433   : > { %v12557_v55 = vadd.f32 %v8613_v39, %v7849_v43  ;;  %6152 = vmatprep.mubr.bf16.mxu1 %v13886_v22  ;;  %v12567_v22 = vpop.f32.mrf.mxu0 }
 0x436   : > { %v7850_v11 = vpop.f32.mrf.mxu1 }
 0x437   : > { %8691 = vmatmul.mubr.bf16.vlgmr.msra.gmra.mxu0 %v13864_v21 }
 0x438   : > { %v7851_v48 = vpop.f32.mrf.mxu1  ;;  %8694 = vmatprep.mubr.bf16.mxu0 %v11809_v51  ;;  %8723 = vmatpush3.bf16.msra.mxu0 %v12384_v3 }
 0x439   : > { %v7852_v44 = vadd.f32 %v7851_v48, %v7850_v11  ;;  %8724 = vmatprep.subr.bf16.mxu0 %v9006_v35  ;;  %v9018_v48 = vld [vmem:[%s9331_s12 + $0x24] sm:$0xf] }
 0x43a   : > { %v7853_v27 = vpop.f32.mrf.mxu1  ;;  %7614 = vmatmul.mubr.msk.bf16.gmra.mxu1 %vm11643_vm11, %v13887_v58 }
 0x43b   : > { %6160 = vmatprep.mubr.bf16.mxu1 %v12095_v59 }
 0x43c   : > { %v7854_v14 = vpop.f32.mrf.mxu1  ;;  %8725 = vmatpush3.bf16.msra.mxu0 %v9006_v35  ;;  %v9012_v35 = vld [vmem:[#allocation2] sm:$0xff]  }
 0x43d   : > { %v7855_v21 = vadd.f32 %v7854_v14, %v7853_v27  ;;  %8726 = vmatprep.subr.bf16.mxu0 %v9007_v34 }
 0x43f   : > { %v8616_v51 = vpop.f32.mrf.mxu0  ;;  %8695 = vmatmul.mubr.bf16.gmra.mxu0 %v11857_v17 }
 0x440   : > { %8698 = vmatprep.mubr.bf16.mxu0 %v11908_v37  ;;  %8727 = vmatpush3.bf16.msra.mxu0 %v9007_v34  ;;  %v9010_v37 = vld [vmem:[#allocation2 + $0x10] sm:$0xff]   ;;  %v9019_v34 = vld [vmem:[%s9331_s12 + $0x20] sm:$0xf] }
 0x441   : > { %v5350_v3 = vpop.f32.mrf.mxu0  ;;  %8728 = vmatprep.subr.bf16.mxu0 %v9008_v30  ;;  %v7623_v27 = vrot.slane %v9019_v34, 9 }
 0x442   : > { %v12571_v10 = vadd.f32 %v7852_v44, %v5350_v3  ;;  %v7856_v58 = vpop.f32.mrf.mxu1  ;;  %7615 = vmatmul.mubr.msk.bf16.gmra.mxu1 %vm11643_vm11, %v12064_v50  ;;  %v9021_v3 = vld [vmem:[%s9331_s12 + $0x44] sm:$0xf] }
 0x443   : > { %v8617_v59 = vpop.f32.mrf.mxu0  ;;  %6168 = vmatprep.mubr.bf16.mxu1 %v12128_v46  ;;  %v9011_v46 = vld [vmem:[#allocation2 + $0x8] sm:$0xff]  }
 0x444   : > { %v7857_v8 = vpop.f32.mrf.mxu1  ;;  %8729 = vmatpush3.bf16.msra.mxu0 %v9008_v30 }
 0x445   : > { %v7858_v54 = vadd.f32 %v7857_v8, %v7856_v58  ;;  %v5353_v17 = vpop.f32.mrf.mxu0  ;;  %8730 = vmatprep.subr.bf16.mxu0 %v9009_v9 }
 0x446   : > { %v12577_v52 = vadd.f32 %v7855_v21, %v5353_v17  ;;  %v7859_v63 = vpop.f32.mrf.mxu1 }
 0x447   : > { %v12579_v4 = vadd.f32 %v8616_v51, %v7858_v54  ;;  %8699 = vmatmul.mubr.bf16.gmra.mxu0 %v11947_v38 }
 0x448   : > { %v7860_v43 = vpop.f32.mrf.mxu1  ;;  %8702 = vmatprep.mubr.bf16.mxu0 %v11980_v7  ;;  %8731 = vmatpush3.bf16.msra.mxu0 %v9009_v9  ;;  %v6516_v9 = vrot.slane %v9021_v3, 5  ;;  %v9029_v3 = vld [vmem:[%s9331_s12 + $0x68] sm:$0xf] }
 0x449   : > { %v7861_v50 = vadd.f32 %v7860_v43, %v7859_v63  ;;  %8732 = vmatprep.subr.bf16.mxu0 %v9010_v37 }
 0x44a   : > { %7616 = vmatmul.mubr.msk.bf16.gmra.mxu1 %vm11643_vm11, %v12097_v13  ;;  %v6502_v13 = vrot.slane %v9018_v48, 5  ;;  %v6518_v43 = vrot.slane %v6516_v9, 4 }
 0x44b   : > { %v12586_v39 = vadd.f32 %v8617_v59, %v7861_v50  ;;  %6176 = vmatprep.mubr.bf16.mxu1 %v12161_v62  ;;  %v9023_v50 = vld [vmem:[%s9331_s12 + $0x48] sm:$0xf] }
 0x44c   : > { %8733 = vmatpush3.bf16.msra.mxu0 %v9010_v37  ;;  %v6504_v14 = vrot.slane %v6502_v13, 4  ;;  %v9022_v37 = vld [vmem:[%s9331_s12 + $0x40] sm:$0xf] }
 0x44d   : > { %8734 = vmatprep.subr.bf16.mxu0 %v9011_v46  ;;  %v7625_v63 = vrot.slane %v9022_v37, 9 }
 0x44e   : > { %v7862_v38 = vpop.f32.mrf.mxu1 }
 0x44f   : > { %8703 = vmatmul.mubr.bf16.gmra.mxu0 %v12021_v40 }
 0x450   : > { %v7863_v7 = vpop.f32.mrf.mxu1  ;;  %8706 = vmatprep.mubr.bf16.mxu0 %v12054_v53  ;;  %8735 = vmatpush3.bf16.msra.mxu0 %v9011_v46  ;;  %v9020_v53 = vld [vmem:[%s9331_s12 + $0x28] sm:$0xf]  ;;  %v6519_v46 = vrot.slane %v9023_v50, 5 }
 0x451   : > { %v7864_v11 = vadd.f32 %v7863_v7, %v7862_v38  ;;  %8736 = vmatprep.subr.bf16.mxu0 %v9012_v35  ;;  %v6505_v21 = vrot.slane %v9020_v53, 5 }
 0x452   : > { %v7865_v44 = vpop.f32.mrf.mxu1  ;;  %7617 = vmatmul.mubr.msk.bf16.gmra.mxu1 %vm11643_vm11, %v13888_v19  ;;  %v6503_v19 = vsel %vm12420_vm15, %v7623_v27, %v6502_v13  ;;  %v6517_v13 = vsel %vm12420_vm15, %v7625_v63, %v6516_v9  ;;  %v9026_v27 = vld [vmem:[%s9331_s12 + $0x50] sm:$0xf]  ;;  %v6533_v9 = vrot.slane %v9029_v3, 5 }
 0x453   : > { %6184 = vmatprep.mubr.bf16.mxu1 %v12188_v28  ;;  %v6506_v28 = vsel %vm12420_vm15, %v6504_v14, %v6505_v21  ;;  %v7626_v14 = vrot.slane %v9026_v27, 9  ;;  %v9027_v21 = vld [vmem:[%s9331_s12 + $0x58] sm:$0xf]  ;;  %v9035_v27 = vld [vmem:[%s9331_s12 + $0x88] sm:$0xf] }
 0x454   : > { %v7866_v62 = vpop.f32.mrf.mxu1  ;;  %8737 = vmatpush3.bf16.msra.mxu0 %v9012_v35  ;;  %v7639_v8 = vcombine.low %v6503_v19, %v6506_v28 }
 0x455   : > { %v7867_v40 = vadd.f32 %v7866_v62, %v7865_v44  ;;  %v6520_v44 = vsel %vm12420_vm15, %v6518_v43, %v6519_v46  ;;  %v9025_v62 = vld [vmem:[%s9331_s12 + $0x64] sm:$0xf] }
 0x456   : > { %v7641_v34 = vcombine.low %v6517_v13, %v6520_v44 }
 0x457   : > { %v8620_v30 = vpop.f32.mrf.mxu0  ;;  %8707 = vmatmul.mubr.bf16.gmra.mxu0 %v12087_v25 }
 0x458   : > { %8710 = vmatprep.mubr.bf16.mxu0 %v12120_v41 }
 0x459   : > { %v5366_v51 = vpop.f32.mrf.mxu0 }
 0x45a   : > { %v12605_v58 = vadd.f32 %v7864_v11, %v5366_v51  ;;  %v7868_v59 = vpop.f32.mrf.mxu1  ;;  %7618 = vmatmul.mubr.msk.bf16.gmra.mxu1 %vm11643_vm11, %v12163_v61  ;;  %v9028_v51 = vld [vmem:[%s9331_s12 + $0x60] sm:$0xf] }
 0x45b   : > { %v8621_v25 = vpop.f32.mrf.mxu0  ;;  %6192 = vmatprep.mubr.bf16.mxu1 %v12215_v16  ;;  %v9024_v16 = vld [vmem:[%s9331_s12 + $0x54] sm:$0xf]  ;;  %v7627_v19 = vrot.slane %v9028_v51, 9 }
 0x45c   : > { %v7869_v41 = vpop.f32.mrf.mxu1  ;;  %v6523_v11 = vrot.slane %v9024_v16, 5 }
 0x45d   : > { %v7870_v54 = vadd.f32 %v7869_v41, %v7868_v59  ;;  %v5369_v17 = vpop.f32.mrf.mxu0 }
 0x45e   : > { %v12613_v35 = vadd.f32 %v7867_v40, %v5369_v17  ;;  %v7871_v38 = vpop.f32.mrf.mxu1  ;;  %v6530_v40 = vrot.slane %v9025_v62, 5  ;;  %v6525_v53 = vrot.slane %v6523_v11, 4  ;;  %v9034_v62 = vld [vmem:[%s9331_s12 + $0x80] sm:$0xf] }
 0x45f   : > { %v12615_v7 = vadd.f32 %v8620_v30, %v7870_v54  ;;  %8711 = vmatmul.mubr.bf16.gmra.mxu0 %v12153_v12  ;;  %v6526_v30 = vrot.slane %v9027_v21, 5 }
 0x460   : > { %v7872_v61 = vpop.f32.mrf.mxu1  ;;  %8738 = vmatprep.mubr.bf16.mxu0 %v7639_v8  ;;  %v6532_v28 = vrot.slane %v6530_v40, 4  ;;  %v9030_v8 = vld [vmem:[%s9331_s12 + $0x74] sm:$0xf]  ;;  %v6531_v37 = vsel %vm12420_vm15, %v7627_v19, %v6530_v40  ;;  %v7629_v40 = vrot.slane %v9034_v62, 9 }
 0x461   : > { %v7873_v48 = vadd.f32 %v7872_v61, %v7871_v38  ;;  %v6527_v41 = vsel %vm12420_vm15, %v6525_v53, %v6526_v30  ;;  %v6537_v54 = vrot.slane %v9030_v8, 5  ;;  %v9032_v61 = vld [vmem:[%s9331_s12 + $0x70] sm:$0xf]  ;;  %v9036_v53 = vld [vmem:[%s9331_s12 + $0x94] sm:$0xf] }
 0x462   : > { %7619 = vmatmul.mubr.msk.bf16.gmra.mxu1 %vm11643_vm11, %v12190_v23  ;;  %v13889_v23 = vcombine.low %v12426_v1, %v12430_v29  ;;  %v6534_v1 = vsel %vm12420_vm15, %v6532_v28, %v6533_v9  ;;  %v9031_v29 = vld [vmem:[%s9331_s12 + $0x84] sm:$0xf]  ;;  %v7628_v16 = vrot.slane %v9032_v61, 9  ;;  %v6551_v21 = vrot.slane %v9036_v53, 5 }
 0x463   : > { %v12627_v12 = vadd.f32 %v8621_v25, %v7873_v48  ;;  %6200 = vmatprep.mubr.bf16.mxu1 %v12242_v6  ;;  %v6524_v6 = vsel %vm12420_vm15, %v7626_v14, %v6523_v11  ;;  %v6544_v63 = vrot.slane %v9031_v29, 5  ;;  %v7643_v38 = vcombine.low %v6531_v37, %v6534_v1  ;;  %v9033_v48 = vld [vmem:[%s9331_s12 + $0x78] sm:$0xf]  ;;  %v9037_v28 = vld [vmem:[%s9331_s12 + $0xa4] sm:$0xf] }
 0x464   : > { %v7642_v50 = vcombine.low %v6524_v6, %v6527_v41  ;;  %v6539_v11 = vrot.slane %v6537_v54, 4  ;;  %v6540_v13 = vrot.slane %v9033_v48, 5  ;;  %v6547_v14 = vrot.slane %v9035_v27, 5  ;;  %v9038_v37 = vld [vmem:[%s9331_s12 + $0x90] sm:$0xf] }
 0x465   : > { %v6545_v51 = vsel %vm12420_vm15, %v7629_v40, %v6544_v63  ;;  %v6558_v3 = vrot.slane %v9037_v28, 5  ;;  %v7630_v1 = vrot.slane %v9038_v37, 9  ;;  %v6553_v29 = vrot.slane %v6551_v21, 4 }
 0x466   : > { %v7874_v59 = vpop.f32.mrf.mxu1 }
 0x467   : > { %8739 = vmatmul.mubr.bf16.vlgmr.msra.gmra.mxu0 %v13889_v23  ;;  %v13890_v23 = vld [vmem:[#allocation26_spill] sm:$0xff]  ;;  %v6560_v61 = vrot.slane %v6558_v3, 4 }
 0x468   : > { %v7875_v25 = vpop.f32.mrf.mxu1  ;;  %8742 = vmatprep.mubr.bf16.mxu0 %v7641_v34  ;;  %v6546_v34 = vrot.slane %v6544_v63, 4  ;;  %v9039_v63 = vld [vmem:[%s9331_s12 + $0x98] sm:$0xf] }
 0x469   : > { %v7876_v17 = vadd.f32 %v7875_v25, %v7874_v59 }
 0x46a   : > { %v7877_v43 = vpop.f32.mrf.mxu1  ;;  %7620 = vmatmul.mubr.msk.bf16.gmra.mxu1 %vm11643_vm11, %v12217_v45  ;;  %v6538_v45 = vsel %vm12420_vm15, %v7628_v16, %v6537_v54  ;;  %v6548_v19 = vsel %vm12420_vm15, %v6546_v34, %v6547_v14  ;;  %v9041_v16 = vld [vmem:[%s9331_s12 + $0xa8] sm:$0xf]  ;;  %v6552_v34 = vsel %vm12420_vm15, %v7630_v1, %v6551_v21  ;;  %v9042_v14 = vld [vmem:[%s9331_s12 + $0xb4] sm:$0xf]  ;;  %v13892_v21 = vld [vmem:[#allocation63_spill] sm:$0xff] }
 0x46b   : > { %6208 = vmatprep.mubr.bf16.mxu1 %v12288_v42  ;;  %v6541_v42 = vsel %vm12420_vm15, %v6539_v11, %v6540_v13  ;;  %v7645_v54 = vcombine.low %v6545_v51, %v6548_v19  ;;  %v6561_v11 = vrot.slane %v9041_v16, 5  ;;  %v13895_v1 = vld [vmem:[#allocation30_spill] sm:$0xff]  ;;  %v9047_v16 = vld [vmem:[%s9331_s12 + $0xc8] sm:$0xf] }
 0x46c   : > { %v7878_v46 = vpop.f32.mrf.mxu1  ;;  %v7644_v41 = vcombine.low %v6538_v45, %v6541_v42  ;;  %v6565_v45 = vrot.slane %v9042_v14, 5 }
 0x46d   : > { %v7879_v44 = vadd.f32 %v7878_v46, %v7877_v43  ;;  %v6554_v43 = vrot.slane %v9039_v63, 5  ;;  %v9040_v46 = vld [vmem:[%s9331_s12 + $0xa0] sm:$0xf] }
 0x46f   : > { %v8624_v33 = vpop.f32.mrf.mxu0  ;;  %8743 = vmatmul.mubr.bf16.gmra.mxu0 %v7642_v50  ;;  %v6555_v27 = vsel %vm12420_vm15, %v6553_v29, %v6554_v43 }
 0x470   : > { %8746 = vmatprep.mubr.bf16.mxu0 %v7643_v38  ;;  %v7631_v38 = vrot.slane %v9040_v46, 9 }
 0x471   : > { %v5382_v30 = vpop.f32.mrf.mxu0 }
 0x472   : > { %v12665_v9 = vadd.f32 %v7876_v17, %v5382_v30  ;;  %v7880_v59 = vpop.f32.mrf.mxu1  ;;  %7621 = vmatmul.mubr.msk.bf16.gmra.mxu1 %vm11609_vm8, %v13890_v23  ;;  %v9043_v30 = vld [vmem:[%s9331_s12 + $0xc4] sm:$0xf] }
 0x473   : > { %v8625_v6 = vpop.f32.mrf.mxu0  ;;  %8714 = vmatprep.mubr.bf16.mxu1 %v12182_v0  ;;  %v6572_v51 = vrot.slane %v9043_v30, 5  ;;  %v9048_v30 = vld [vmem:[%s9331_s12 + $0xd4] sm:$0xf] }
 0x474   : > { %v7881_v8 = vpop.f32.mrf.mxu1 }
 0x475   : > { %v7882_v50 = vadd.f32 %v7881_v8, %v7880_v59  ;;  %v5385_v17 = vpop.f32.mrf.mxu0  ;;  %v13893_v59 = vld [vmem:[#allocation32_spill] sm:$0xff] }
 0x476   : > { %v12675_v48 = vadd.f32 %v7879_v44, %v5385_v17  ;;  %v7883_v0 = vpop.f32.mrf.mxu1  ;;  %v6559_v44 = vsel %vm12420_vm15, %v7631_v38, %v6558_v3  ;;  %v7795_v23 = vadd.f32 %v13893_v59, %v13892_v21  ;;  %v13894_v8 = vld [vmem:[#allocation64_spill] sm:$0xff]  ;;  %v7646_v3 = vcombine.low %v6552_v34, %v6555_v27  ;;  %v9045_v17 = vld [vmem:[%s9331_s12 + $0xb8] sm:$0xf] }
 0x477   : > { %v12677_v13 = vadd.f32 %v8624_v33, %v7882_v50  ;;  %v7926_v62 = vpop.f32.mrf.mxu0  ;;  %8747 = vmatmul.mubr.bf16.gmra.mxu0 %v7644_v41  ;;  %v6562_v33 = vsel %vm12420_vm15, %v6560_v61, %v6561_v11  ;;  %v6567_v50 = vrot.slane %v6565_v45, 4  ;;  %v6568_v46 = vrot.slane %v9045_v17, 5  ;;  %v9046_v38 = vld [vmem:[%s9331_s12 + $0xc0] sm:$0xf] }
 0x478   : > { %v7884_v40 = vpop.f32.mrf.mxu1  ;;  %8750 = vmatprep.mubr.bf16.mxu0 %v7645_v54  ;;  %v9044_v54 = vld [vmem:[%s9331_s12 + $0xb0] sm:$0xf]  ;;  %v7647_v43 = vcombine.low %v6559_v44, %v6562_v33  ;;  %v7633_v61 = vrot.slane %v9046_v38, 9  ;;  %v6575_v11 = vrot.slane %v9047_v16, 5  ;;  %v9051_v38 = vld [vmem:[%s9331_s12 + $0xd8] sm:$0xf] }
 0x479   : > { %v7885_v42 = vadd.f32 %v7884_v40, %v7883_v0  ;;  %v7927_v53 = vpop.f32.mrf.mxu0  ;;  %v7632_v37 = vrot.slane %v9044_v54, 9  ;;  %v13896_v0 = vld [vmem:[#allocation65_spill] sm:$0xff]  ;;  %v6569_v33 = vsel %vm12420_vm15, %v6567_v50, %v6568_v46  ;;  %v9052_v16 = vld [vmem:[%s9331_s12 + $0xe0] sm:$0xf] }
 0x47a   : > { %v7928_v19 = vadd.f32 %v7927_v53, %v7926_v62  ;;  %v8644_v28 = vpop.f32.mrf.mxu1  ;;  %8715 = vmatmul.mubr.bf16.vlgmr.msra.gmra.mxu1 %v12209_v32  ;;  %v5274_v62 = vadd.f32 %v7795_v23, %v13896_v0  ;;  %v6573_v59 = vsel %vm12420_vm15, %v7633_v61, %v6572_v51  ;;  %v6582_v61 = vrot.slane %v9051_v38, 5 }
 0x47b   : > { %v12692_v25 = vadd.f32 %v8625_v6, %v7885_v42  ;;  %v7929_v41 = vpop.f32.mrf.mxu0  ;;  %8718 = vmatprep.mubr.bf16.mxu1 %v13894_v8  ;;  %v6574_v6 = vrot.slane %v6572_v51, 4  ;;  %v6566_v44 = vsel %vm12420_vm15, %v7632_v37, %v6565_v45  ;;  %v13898_v37 = vld [vmem:[#allocation49_spill] sm:$0xff]  ;;  %v13899_v51 = vld [vmem:[#allocation68_spill] sm:$0xff] }
 0x47c   : > { %v5576_v29 = vadd.f32 %v7928_v19, %v13895_v1  ;;  %v5736_v63 = vpop.f32.mrf.mxu1  ;;  %v6579_v19 = vrot.slane %v9048_v30, 5 }
 0x47d   : > { %v7930_v32 = vpop.f32.mrf.mxu0  ;;  %v6576_v23 = vsel %vm12420_vm15, %v6574_v6, %v6575_v11  ;;  %v7635_v11 = vrot.slane %v9052_v16, 9  ;;  %v13903_v16 = vld [vmem:[#allocation35_spill] sm:$0xff] }
 0x47e   : > { %v12701_v40 = vadd.f32 %v5736_v63, %v5576_v29  ;;  %v7931_v34 = vadd.f32 %v7930_v32, %v7929_v41  ;;  %v8645_v27 = vpop.f32.mrf.mxu1  ;;  %v9049_v41 = vld [vmem:[%s9331_s12 + $0xe4] sm:$0xf]  ;;  %v7648_v29 = vcombine.low %v6566_v44, %v6569_v33  ;;  %v9050_v63 = vld [vmem:[%s9331_s12 + $0xd0] sm:$0xf]  ;;  %v7649_v46 = vcombine.low %v6573_v59, %v6576_v23 }
 0x47f   : > { %v7932_v14 = vpop.f32.mrf.mxu0  ;;  %8751 = vmatmul.mubr.bf16.gmra.mxu0 %v7646_v3  ;;  %v6586_v8 = vrot.slane %v9049_v41, 5  ;;  %v6581_v32 = vrot.slane %v6579_v19, 4  ;;  %v13900_v33 = vld [vmem:[#allocation34_spill] sm:$0xff] }
 0x480   : > { %v5579_v42 = vadd.f32 %v7931_v34, %v5274_v62  ;;  %v5739_v53 = vpop.f32.mrf.mxu1  ;;  %8754 = vmatprep.mubr.bf16.mxu0 %v7647_v43  ;;  %v7634_v43 = vrot.slane %v9050_v63, 9  ;;  %v9053_v62 = vld [vmem:[%s9331_s12 + $0xe8] sm:$0xf]  ;;  %v9054_v41 = vld [vmem:[%s9331_s12 + $0xf4] sm:$0xf] }
 0x481   : > { %v7933_v21 = vpop.f32.mrf.mxu0  ;;  %v6588_v0 = vrot.slane %v6586_v8, 4  ;;  %v6589_v34 = vrot.slane %v9053_v62, 5  ;;  %v6583_v23 = vsel %vm12420_vm15, %v6581_v32, %v6582_v61 }
 0x482   : > { %v12713_v3 = vadd.f32 %v5739_v53, %v5579_v42  ;;  %v7934_v54 = vadd.f32 %v7933_v21, %v7932_v14  ;;  %v12715_v45 = vpop.f32.mrf.mxu1  ;;  %8719 = vmatmul.mubr.bf16.gmra.mxu1 %v13898_v37  ;;  %v6580_v59 = vsel %vm12420_vm15, %v7634_v43, %v6579_v19  ;;  %v13901_v43 = vld [vmem:[#allocation33_spill] sm:$0xff] }
 0x483   : > { %v7935_v1 = vpop.f32.mrf.mxu0  ;;  %v7650_v61 = vcombine.low %v6580_v59, %v6583_v23 }
 0x484   : > { %13897 = vst [vmem:[#allocation45_spill] sm:$0xff] %v12713_v3  ;;  %v5584_v50 = vadd.f32 %v7934_v54, %v13899_v51  ;;  %v5752_v17 = vpop.f32.mrf.mxu1  ;;  %v6593_v54 = vrot.slane %v9054_v41, 5  ;;  %v9058_v41 = vld [vmem:[%s9331_s12 + $0x100] sm:$0xf] }
 0x485   : > { %v7936_v6 = vpop.f32.mrf.mxu0 }
 0x486   : > { %v7937_v14 = vadd.f32 %v7936_v6, %v7935_v1  ;;  %v12723_v42 = vpop.f32.mrf.mxu1  ;;  %v12725_v53 = vadd.f32 %v8644_v28, %v5584_v50  ;;  %v6587_v28 = vsel %vm12420_vm15, %v7635_v11, %v6586_v8  ;;  %v6590_v1 = vsel %vm12420_vm15, %v6588_v0, %v6589_v34  ;;  %v9056_v6 = vld [vmem:[%s9331_s12 + $0xf0] sm:$0xf] }
 0x487   : > { %v7938_v44 = vpop.f32.mrf.mxu0  ;;  %8755 = vmatmul.mubr.bf16.gmra.mxu0 %v7648_v29  ;;  %v9055_v29 = vld [vmem:[%s9331_s12 + $0x104] sm:$0xf]  ;;  %v7636_v8 = vrot.slane %v9056_v6, 9  ;;  %v7651_v0 = vcombine.low %v6587_v28, %v6590_v1  ;;  %v6595_v34 = vrot.slane %v6593_v54, 4 }
 0x488   : > { %v5587_v30 = vadd.f32 %v7937_v14, %v13900_v33  ;;  %v5755_v21 = vpop.f32.mrf.mxu1  ;;  %8758 = vmatprep.mubr.bf16.mxu0 %v7649_v46  ;;  %v6600_v63 = vrot.slane %v9055_v29, 5  ;;  %v13902_v46 = vld [vmem:[#allocation74_spill] sm:$0xff]  ;;  %v9057_v14 = vld [vmem:[%s9331_s12 + $0xf8] sm:$0xf] }
 0x489   : > { %v7939_v37 = vpop.f32.mrf.mxu0  ;;  %v7807_v32 = vadd.f32 %v13902_v46, %v13901_v43  ;;  %v6594_v6 = vsel %vm12420_vm15, %v7636_v8, %v6593_v54  ;;  %v9061_v8 = vld [vmem:[%s9331_s12 + $0x110] sm:$0xf] }
 0x48a   : > { %v7940_v51 = vadd.f32 %v7939_v37, %v7938_v44  ;;  %v12738_v50 = vpop.f32.mrf.mxu1  ;;  %v12740_v19 = vadd.f32 %v8645_v27, %v5587_v30  ;;  %v6596_v44 = vrot.slane %v9057_v14, 5  ;;  %v7637_v27 = vrot.slane %v9058_v41, 9  ;;  %v9059_v37 = vld [vmem:[%s9331_s12 + $0x108] sm:$0xf]  ;;  %v9060_v14 = vld [vmem:[%s9331_s12 + $0x114] sm:$0xf] }
 0x48b   : > { %v7941_v38 = vpop.f32.mrf.mxu0  ;;  %v6602_v30 = vrot.slane %v6600_v63, 4  ;;  %v6603_v29 = vrot.slane %v9059_v37, 5  ;;  %v5290_v43 = vadd.f32 %v7807_v32, %v12452_v26  ;;  %v6607_v26 = vrot.slane %v9060_v14, 5  ;;  %v9062_v14 = vld [vmem:[%s9331_s12 + $0x118] sm:$0xf] }
 0x48c   : > { %v5592_v11 = vadd.f32 %v7940_v51, %v13903_v16  ;;  %v12746_v62 = vpop.f32.mrf.mxu1  ;;  %v6597_v16 = vsel %vm12420_vm15, %v6595_v34, %v6596_v44  ;;  %v7638_v41 = vrot.slane %v9061_v8, 9  ;;  %v13905_v34 = vld [vmem:[#allocation60_spill] sm:$0xff]  ;;  %v13908_v8 = vld [vmem:[#allocation37_spill] sm:$0xff] }
 0x48d   : > { %v7942_v33 = vpop.f32.mrf.mxu0  ;;  %v7652_v54 = vcombine.low %v6594_v6, %v6597_v16 }
 0x48e   : > { %v7943_v59 = vadd.f32 %v7942_v33, %v7941_v38  ;;  %v12752_v23 = vpop.f32.mrf.mxu1  ;;  %v12754_v46 = vadd.f32 %v5752_v17, %v5592_v11  ;;  %v6601_v17 = vsel %vm12420_vm15, %v7637_v27, %v6600_v63  ;;  %v6604_v38 = vsel %vm12420_vm15, %v6602_v30, %v6603_v29  ;;  %v13906_v29 = vld [vmem:[#allocation54_spill] sm:$0xff] }
 0x48f   : > { %v7944_v51 = vpop.f32.mrf.mxu0  ;;  %8759 = vmatmul.mubr.bf16.gmra.mxu0 %v7650_v61  ;;  %v6608_v6 = vsel %vm12420_vm15, %v7638_v41, %v6607_v26 }
 0x490   : > { %13904 = vst [vmem:[#allocation38_spill] sm:$0xff] %v12754_v46  ;;  %v5595_v28 = vadd.f32 %v7943_v59, %v5290_v43  ;;  %v5771_v1 = vpop.f32.mrf.mxu1  ;;  %8762 = vmatprep.mubr.bf16.mxu0 %v7651_v0  ;;  %v7653_v43 = vcombine.low %v6601_v17, %v6604_v38  ;;  %v6609_v59 = vrot.slane %v6607_v26, 4  ;;  %v6610_v46 = vrot.slane %v9062_v14, 5 }
 0x491   : > { %v7945_v32 = vpop.f32.mrf.mxu0 }
 0x492   : > { %v7946_v61 = vadd.f32 %v7945_v32, %v7944_v51  ;;  %v12765_v11 = vpop.f32.mrf.mxu1  ;;  %v12767_v0 = vadd.f32 %v5755_v21, %v5595_v28  ;;  %v6611_v16 = vsel %vm12420_vm15, %v6609_v59, %v6610_v46 }
 0x493   : > { %v7947_v33 = vpop.f32.mrf.mxu0 }
 0x494   : > { %v5600_v44 = vadd.f32 %v7946_v61, %v13905_v34  ;;  %v5784_v37 = vpop.f32.mrf.mxu1 }
 0x495   : > { %v7948_v63 = vpop.f32.mrf.mxu0 }
 0x496   : > { %v7949_v27 = vadd.f32 %v7948_v63, %v7947_v33  ;;  %v12772_v3 = vpop.f32.mrf.mxu1  ;;  %v12775_v30 = vadd.f32 %v12715_v45, %v5600_v44  ;;  %v7654_v33 = vcombine.low %v6608_v6, %v6611_v16 }
 0x497   : > { %v7950_v21 = vpop.f32.mrf.mxu0  ;;  %8763 = vmatmul.mubr.bf16.gmra.mxu0 %v7652_v54  ;;  %v13907_v54 = vld [vmem:[#allocation69_spill] sm:$0xff] }
 0x498   : > { %v5603_v51 = vadd.f32 %v7949_v27, %v13906_v29  ;;  %v5787_v28 = vpop.f32.mrf.mxu1  ;;  %8766 = vmatprep.mubr.bf16.mxu0 %v7653_v43  ;;  %v7819_v34 = vadd.f32 %v13908_v8, %v13907_v54 }
 0x499   : > { %v7951_v32 = vpop.f32.mrf.mxu0 }
 0x49a   : > { %v7952_v17 = vadd.f32 %v7951_v32, %v7950_v21  ;;  %v12782_v38 = vpop.f32.mrf.mxu1  ;;  %v12785_v61 = vadd.f32 %v12723_v42, %v5603_v51  ;;  %v5306_v49 = vadd.f32 %v7819_v34, %v12495_v36 }
 0x49b   : > { %v7953_v45 = vpop.f32.mrf.mxu0 }
 0x49c   : > { %v5608_v44 = vadd.f32 %v7952_v17, %v12460_v56  ;;  %v12790_v43 = vpop.f32.mrf.mxu1 }
 0x49d   : > { %v7954_v26 = vpop.f32.mrf.mxu0 }
 0x49e   : > { %v7955_v46 = vadd.f32 %v7954_v26, %v7953_v45  ;;  %v12793_v41 = vpop.f32.mrf.mxu1  ;;  %v12796_v59 = vadd.f32 %v12746_v62, %v5608_v44 }
 0x49f   : > { %v7956_v42 = vpop.f32.mrf.mxu0  ;;  %8767 = vmatmul.mubr.bf16.gmra.mxu0 %v7654_v33 }
 0x4a0   : > { %v5611_v14 = vadd.f32 %v7955_v46, %v5306_v49  ;;  %v12798_v63 = vpop.f32.mrf.mxu1 }
 0x4a1   : > { %v7957_v27 = vpop.f32.mrf.mxu0 }
 0x4a2   : > { %v7958_v21 = vadd.f32 %v7957_v27, %v7956_v42  ;;  %v12800_v29 = vpop.f32.mrf.mxu1  ;;  %v12802_v56 = vadd.f32 %v5771_v1, %v5611_v14 }
 0x4a3   : > { %v7959_v51 = vpop.f32.mrf.mxu0 }
 0x4a4   : > { %v5616_v36 = vadd.f32 %v7958_v21, %v12467_v60  ;;  %v12805_v6 = vpop.f32.mrf.mxu1 }
 0x4a5   : > { %v7960_v16 = vpop.f32.mrf.mxu0 }
 0x4a6   : > { %v7961_v32 = vadd.f32 %v7960_v16, %v7959_v51  ;;  %v12807_v62 = vpop.f32.mrf.mxu1  ;;  %v12810_v17 = vadd.f32 %v12738_v50, %v5616_v36  ;;  %v5322_v50 = vadd.f32 %v12497_v5, %v12534_v47 }
 0x4a7   : > { %v7962_v45 = vpop.f32.mrf.mxu0 }
 0x4a8   : > { %v5619_v33 = vadd.f32 %v7961_v32, %v12478_v31  ;;  %v12813_v54 = vpop.f32.mrf.mxu1 }
 0x4a9   : > { %v7963_v8 = vpop.f32.mrf.mxu0 }
 0x4aa   : > { %v7964_v1 = vadd.f32 %v7963_v8, %v7962_v45  ;;  %v12815_v34 = vpop.f32.mrf.mxu1  ;;  %v12818_v60 = vadd.f32 %v12752_v23, %v5619_v33 }
 0x4ab   : > { %v7965_v44 = vpop.f32.mrf.mxu0 }
 0x4ac   : > { %v5624_v26 = vadd.f32 %v7964_v1, %v12505_v2  ;;  %v12821_v49 = vpop.f32.mrf.mxu1 }
 0x4ad   : > { %v7966_v46 = vpop.f32.mrf.mxu0 }
 0x4ae   : > { %v7967_v42 = vadd.f32 %v7966_v46, %v7965_v44  ;;  %v12825_v31 = vpop.f32.mrf.mxu1  ;;  %v12827_v14 = vadd.f32 %v5784_v37, %v5624_v26 }
 0x4af   : > { %v7968_v27 = vpop.f32.mrf.mxu0 }
 0x4b0   : > { %v5627_v21 = vadd.f32 %v7967_v42, %v5322_v50  ;;  %v12829_v51 = vpop.f32.mrf.mxu1 }
 0x4b1   : > { %v7969_v23 = vpop.f32.mrf.mxu0 }
 0x4b2   : > { %v7970_v36 = vadd.f32 %v7969_v23, %v7968_v27  ;;  %v12831_v16 = vpop.f32.mrf.mxu1  ;;  %v12833_v2 = vadd.f32 %v5787_v28, %v5627_v21 }
 0x4b3   : > { %13909 = vst [vmem:[#allocation42_spill] sm:$0xff] %v12831_v16  ;;  %v7971_v32 = vpop.f32.mrf.mxu0 }
 0x4b4   : > { %v5632_v45 = vadd.f32 %v7970_v36, %v12513_v24  ;;  %v12836_v33 = vpop.f32.mrf.mxu1 }
 0x4b5   : > { %v7972_v5 = vpop.f32.mrf.mxu0 }
 0x4b6   : > { %v7973_v47 = vadd.f32 %v7972_v5, %v7971_v32  ;;  %v12838_v8 = vpop.f32.mrf.mxu1  ;;  %v12841_v37 = vadd.f32 %v12765_v11, %v5632_v45  ;;  %v5338_v11 = vadd.f32 %v12536_v57, %v12567_v22 }
 0x4b7   : > { %13910 = vst [vmem:[#allocation77_spill] sm:$0xff] %v12838_v8  ;;  %v7974_v1 = vpop.f32.mrf.mxu0 }
 0x4b8   : > { %v5635_v44 = vadd.f32 %v7973_v47, %v12523_v15  ;;  %v12844_v26 = vpop.f32.mrf.mxu1 }
 0x4b9   : > { %v7975_v46 = vpop.f32.mrf.mxu0 }
 0x4ba   : > { %v7976_v28 = vadd.f32 %v7975_v46, %v7974_v1  ;;  %v8062_v50 = vpop.f32.mrf.mxu1  ;;  %v12847_v42 = vadd.f32 %v12772_v3, %v5635_v44 }
 0x4bb   : > { %v7977_v24 = vpop.f32.mrf.mxu0 }
 0x4bc   : > { %v5640_v27 = vadd.f32 %v7976_v28, %v12542_v20  ;;  %v8063_v21 = vpop.f32.mrf.mxu1 }
 0x4bd   : > { %v12850_v23 = vadd.f32 %v8063_v21, %v8062_v50  ;;  %v7978_v36 = vpop.f32.mrf.mxu0 }
 0x4be   : > { %v7979_v32 = vadd.f32 %v7978_v36, %v7977_v24  ;;  %v8065_v15 = vpop.f32.mrf.mxu1  ;;  %v12855_v45 = vadd.f32 %v12790_v43, %v5640_v27 }
 0x4bf   : > { %v7980_v5 = vpop.f32.mrf.mxu0 }
 0x4c0   : > { %13911 = vst [vmem:[#allocation46_spill] sm:$0xff] %v12855_v45  ;;  %v5643_v47 = vadd.f32 %v7979_v32, %v5338_v11  ;;  %v8066_v1 = vpop.f32.mrf.mxu1 }
 0x4c1   : > { %v12857_v3 = vadd.f32 %v8066_v1, %v8065_v15  ;;  %v7981_v44 = vpop.f32.mrf.mxu0 }
 0x4c2   : > { %v7982_v46 = vadd.f32 %v7981_v44, %v7980_v5  ;;  %v8068_v20 = vpop.f32.mrf.mxu1  ;;  %v12860_v28 = vadd.f32 %v12798_v63, %v5643_v47 }
 0x4c3   : > { %v7983_v50 = vpop.f32.mrf.mxu0 }
 0x4c4   : > { %13912 = vst [vmem:[#allocation66_spill] sm:$0xff] %v12860_v28  ;;  %v5648_v21 = vadd.f32 %v7982_v46, %v12548_v18  ;;  %v8069_v57 = vpop.f32.mrf.mxu1 }
 0x4c5   : > { %v12863_v22 = vadd.f32 %v8069_v57, %v8068_v20  ;;  %v7984_v24 = vpop.f32.mrf.mxu0 }
 0x4c6   : > { %v7985_v43 = vadd.f32 %v7984_v24, %v7983_v50  ;;  %v8071_v27 = vpop.f32.mrf.mxu1  ;;  %v12866_v36 = vadd.f32 %v12782_v38, %v5648_v21 }
 0x4c7   : > { %v7986_v11 = vpop.f32.mrf.mxu0 }
 0x4c8   : > { %v5651_v32 = vadd.f32 %v7985_v43, %v12557_v55  ;;  %v8072_v15 = vpop.f32.mrf.mxu1 }
 0x4c9   : > { %v12869_v5 = vadd.f32 %v8072_v15, %v8071_v27  ;;  %v7987_v63 = vpop.f32.mrf.mxu0 }
 0x4ca   : > { %v7988_v47 = vadd.f32 %v7987_v63, %v7986_v11  ;;  %v8074_v1 = vpop.f32.mrf.mxu1  ;;  %v12872_v18 = vadd.f32 %v12793_v41, %v5651_v32 }
 0x4cb   : > { %v7989_v44 = vpop.f32.mrf.mxu0 }
 0x4cc   : > { %13913 = vst [vmem:[#allocation62_spill] sm:$0xff] %v12872_v18  ;;  %v5656_v46 = vadd.f32 %v7988_v47, %v12571_v10  ;;  %v8075_v20 = vpop.f32.mrf.mxu1 }
 0x4cd   : > { %v12875_v50 = vadd.f32 %v8075_v20, %v8074_v1  ;;  %v7990_v38 = vpop.f32.mrf.mxu0 }
 0x4ce   : > { %v7991_v21 = vadd.f32 %v7990_v38, %v7989_v44  ;;  %v8077_v57 = vpop.f32.mrf.mxu1  ;;  %v12878_v55 = vadd.f32 %v12805_v6, %v5656_v46 }
 0x4cf   : > { %v7992_v24 = vpop.f32.mrf.mxu0 }
 0x4d0   : > { %13914 = vst [vmem:[#allocation40_spill] sm:$0xff] %v12878_v55  ;;  %v5659_v43 = vadd.f32 %v7991_v21, %v12577_v52  ;;  %v8078_v27 = vpop.f32.mrf.mxu1 }
 0x4d1   : > { %v12881_v11 = vadd.f32 %v8078_v27, %v8077_v57  ;;  %v7993_v41 = vpop.f32.mrf.mxu0 }
 0x4d2   : > { %v7994_v32 = vadd.f32 %v7993_v41, %v7992_v24  ;;  %v12883_v15 = vpop.f32.mrf.mxu1  ;;  %v12886_v10 = vadd.f32 %v12813_v54, %v5659_v43 }
 0x4d3   : > { %v7995_v63 = vpop.f32.mrf.mxu0 }
 0x4d4   : > { %13915 = vst [vmem:[#allocation50_spill] sm:$0xff] %v12886_v10  ;;  %v5664_v47 = vadd.f32 %v7994_v32, %v12579_v4  ;;  %v12889_v1 = vpop.f32.mrf.mxu1 }
 0x4d5   : > { %v7996_v6 = vpop.f32.mrf.mxu0 }
 0x4d6   : > { %v7997_v44 = vadd.f32 %v7996_v6, %v7995_v63  ;;  %v12891_v46 = vpop.f32.mrf.mxu1  ;;  %v12894_v52 = vadd.f32 %v12800_v29, %v5664_v47 }
 0x4d7   : > { %v7998_v20 = vpop.f32.mrf.mxu0 }
 0x4d8   : > { %13916 = vst [vmem:[#allocation75_spill] sm:$0xff] %v12894_v52  ;;  %v5667_v38 = vadd.f32 %v7997_v44, %v12586_v39  ;;  %v12897_v21 = vpop.f32.mrf.mxu1 }
 0x4d9   : > { %v7999_v57 = vpop.f32.mrf.mxu0 }
 0x4da   : > { %v8000_v54 = vadd.f32 %v7999_v57, %v7998_v20  ;;  %v12899_v24 = vpop.f32.mrf.mxu1  ;;  %v12902_v4 = vadd.f32 %v12807_v62, %v5667_v38 }
 0x4db   : > { %v8001_v43 = vpop.f32.mrf.mxu0 }
 0x4dc   : > { %13917 = vst [vmem:[#allocation47_spill] sm:$0xff] %v12902_v4  ;;  %v5672_v27 = vadd.f32 %v8000_v54, %v12605_v58  ;;  %v12905_v41 = vpop.f32.mrf.mxu1 }
 0x4dd   : > { %v8002_v32 = vpop.f32.mrf.mxu0 }
 0x4de   : > { %v8003_v29 = vadd.f32 %v8002_v32, %v8001_v43  ;;  %v12907_v63 = vpop.f32.mrf.mxu1  ;;  %v12910_v39 = vadd.f32 %v12821_v49, %v5672_v27 }
 0x4df   : > { %v8004_v47 = vpop.f32.mrf.mxu0 }
 0x4e0   : > { %13918 = vst [vmem:[#allocation83_spill] sm:$0xff] %v12910_v39  ;;  %v5675_v6 = vadd.f32 %v8003_v29, %v12613_v35  ;;  %v12913_v44 = vpop.f32.mrf.mxu1 }
 0x4e1   : > { %v8005_v20 = vpop.f32.mrf.mxu0 }
 0x4e2   : > { %v8006_v62 = vadd.f32 %v8005_v20, %v8004_v47  ;;  %v12915_v38 = vpop.f32.mrf.mxu1  ;;  %v12918_v58 = vadd.f32 %v12829_v51, %v5675_v6 }
 0x4e3   : > { %v8007_v57 = vpop.f32.mrf.mxu0 }
 0x4e4   : > { %13919 = vst [vmem:[#allocation51_spill] sm:$0xff] %v12918_v58  ;;  %v5680_v54 = vadd.f32 %v8006_v62, %v12615_v7  ;;  %v12921_v43 = vpop.f32.mrf.mxu1 }
 0x4e5   : > { %v8008_v32 = vpop.f32.mrf.mxu0 }
 0x4e6   : > { %v8009_v49 = vadd.f32 %v8008_v32, %v8007_v57  ;;  %v12923_v27 = vpop.f32.mrf.mxu1  ;;  %v12926_v35 = vadd.f32 %v12815_v34, %v5680_v54 }
 0x4e7   : > { %v8010_v29 = vpop.f32.mrf.mxu0 }
 0x4e8   : > { %13920 = vst [vmem:[#allocation67_spill] sm:$0xff] %v12926_v35  ;;  %v5683_v47 = vadd.f32 %v8009_v49, %v12627_v12  ;;  %v12929_v20 = vpop.f32.mrf.mxu1 }
 0x4e9   : > { %v8011_v8 = vpop.f32.mrf.mxu0 }
 0x4ea   : > { %v8012_v51 = vadd.f32 %v8011_v8, %v8010_v29  ;;  %v12931_v6 = vpop.f32.mrf.mxu1  ;;  %v12934_v7 = vadd.f32 %v12825_v31, %v5683_v47 }
 0x4eb   : > { %v8013_v62 = vpop.f32.mrf.mxu0 }
 0x4ec   : > { %13921 = vst [vmem:[#allocation73_spill] sm:$0xff] %v12934_v7  ;;  %v5688_v57 = vadd.f32 %v8012_v51, %v12665_v9  ;;  %v12937_v32 = vpop.f32.mrf.mxu1 }
 0x4ed   : > { %v8014_v58 = vpop.f32.mrf.mxu0 }
 0x4ee   : > { %v8015_v34 = vadd.f32 %v8014_v58, %v8013_v62  ;;  %v12939_v54 = vpop.f32.mrf.mxu1  ;;  %v12942_v12 = vadd.f32 %v12836_v33, %v5688_v57 }
 0x4ef   : > { %v8016_v49 = vpop.f32.mrf.mxu0 }
 0x4f0   : > { %13922 = vst [vmem:[#allocation48_spill] sm:$0xff] %v12942_v12  ;;  %v5691_v8 = vadd.f32 %v8015_v34, %v12675_v48  ;;  %v12945_v29 = vpop.f32.mrf.mxu1 }
 0x4f1   : > { %v8017_v16 = vpop.f32.mrf.mxu0 }
 0x4f2   : > { %v8018_v31 = vadd.f32 %v8017_v16, %v8016_v49  ;;  %v12947_v47 = vpop.f32.mrf.mxu1  ;;  %v12950_v9 = vadd.f32 %v12844_v26, %v5691_v8 }
 0x4f3   : > { %v8019_v51 = vpop.f32.mrf.mxu0 }
 0x4f4   : > { %13923 = vst [vmem:[#allocation70_spill] sm:$0xff] %v12950_v9  ;;  %v12953_v58 = vadd.f32 %v8018_v31, %v12677_v13  ;;  %v12955_v62 = vpop.f32.mrf.mxu1 }
 0x4f5   : > { %v8020_v33 = vpop.f32.mrf.mxu0 }
 0x4f6   : > { %13924 = vst [vmem:[#allocation53_spill] sm:$0xff] %v12953_v58  ;;  %v8021_v57 = vadd.f32 %v8020_v33, %v8019_v51  ;;  %v12957_v12 = vpop.f32.mrf.mxu1 }
 0x4f7   : > { %v8692_v48 = vpop.f32.mrf.mxu0 }
 0x4f8   : > { %v12960_v34 = vadd.f32 %v8021_v57, %v12692_v25  ;;  %v6260_v16 = vadd.f32 %v8692_v48, %v12863_v22  ;;  %v12963_v49 = vpop.f32.mrf.mxu1 }
 0x4f9   : > { %v6251_v26 = vpop.f32.mrf.mxu0 }
 0x4fa   : > { %13925 = vst [vmem:[#allocation58_spill] sm:$0xff] %v12960_v34  ;;  %v6380_v8 = vadd.f32 %v6260_v16, %v12725_v53  ;;  %v6252_v13 = vadd.f32 %v12850_v23, %v6251_v26  ;;  %v12967_v31 = vpop.f32.mrf.mxu1  ;;  %v13926_v23 = vld [vmem:[#allocation45_spill] sm:$0xff]  ;;  %v13927_v34 = vld [vmem:[#allocation38_spill] sm:$0xff] }
 0x4fb   : > { %v8693_v9 = vpop.f32.mrf.mxu0 }
 0x4fc   : > { %v12970_v51 = vadd.f32 %v6252_v13, %v12701_v40  ;;  %v6263_v33 = vadd.f32 %v8693_v9, %v12869_v5  ;;  %v12973_v58 = vpop.f32.mrf.mxu1 }
 0x4fd   : > { %v6254_v25 = vpop.f32.mrf.mxu0 }
 0x4fe   : > { %v12976_v22 = vadd.f32 %v6263_v33, %v12740_v19  ;;  %v6255_v57 = vadd.f32 %v12857_v3, %v6254_v25  ;;  %v12979_v48 = vpop.f32.mrf.mxu1 }
 0x4ff   : > { %v8696_v53 = vpop.f32.mrf.mxu0 }
 0x500   : > { %v12982_v16 = vadd.f32 %v6255_v57, %v13926_v23  ;;  %v12984_v26 = vpop.f32.mrf.mxu1  ;;  %v8088_v23 = vadd.f32 %v12905_v41, %v12899_v24 }
 0x501   : > { %v6267_v40 = vpop.f32.mrf.mxu0 }
 0x502   : > { %v6268_v13 = vadd.f32 %v12875_v50, %v6267_v40  ;;  %v12987_v5 = vpop.f32.mrf.mxu1 }
 0x503   : > { %v8697_v9 = vpop.f32.mrf.mxu0 }
 0x504   : > { %v12990_v7 = vadd.f32 %v6268_v13, %v13927_v34  ;;  %v12992_v19 = vpop.f32.mrf.mxu1 }
 0x505   : > { %v6270_v3 = vpop.f32.mrf.mxu0 }
 0x506   : > { %v6271_v33 = vadd.f32 %v12881_v11, %v6270_v3  ;;  %v12995_v25 = vpop.f32.mrf.mxu1  ;;  %v8091_v11 = vadd.f32 %v12913_v44, %v12907_v63 }
 0x507   : > { %v8700_v57 = vpop.f32.mrf.mxu0 }
 0x508   : > { %v13000_v39 = vadd.f32 %v6271_v33, %v12767_v0  ;;  %v13002_v50 = vpop.f32.mrf.mxu1 }
 0x509   : > { %v6283_v40 = vpop.f32.mrf.mxu0 }
 0x50a   : > { %v6284_v35 = vadd.f32 %v8088_v23, %v6283_v40  ;;  %v13004_v34 = vpop.f32.mrf.mxu1 }
 0x50b   : > { %13928 = vst [vmem:[#allocation55_spill] sm:$0xff] %v13004_v34  ;;  %v13006_v13 = vpop.f32.mrf.mxu0 }
 0x50c   : > { %v13011_v3 = vadd.f32 %v6284_v35, %v12796_v59  ;;  %v13013_v10 = vpop.f32.mrf.mxu1 }
 0x50d   : > { %13929 = vst [vmem:[#allocation92_spill] sm:$0xff] %v13013_v10  ;;  %v6286_v24 = vpop.f32.mrf.mxu0 }
 0x50e   : > { %v6287_v41 = vadd.f32 %v8091_v11, %v6286_v24  ;;  %v13015_v0 = vpop.f32.mrf.mxu1 }
 0x50f   : > { %13930 = vst [vmem:[#allocation59_spill] sm:$0xff] %v13015_v0  ;;  %v13017_v33 = vpop.f32.mrf.mxu0 }
 0x510   : > { %v13020_v23 = vadd.f32 %v6287_v41, %v12802_v56  ;;  %v13022_v40 = vpop.f32.mrf.mxu1 }
 0x511   : > { %13931 = vst [vmem:[#allocation79_spill] sm:$0xff] %v13022_v40  ;;  %v13024_v4 = vpop.f32.mrf.mxu0 }
 0x512   : > { %v13026_v55 = vpop.f32.mrf.mxu1 }
 0x513   : > { %v13028_v63 = vpop.f32.mrf.mxu0 }
 0x514   : > { %v13030_v59 = vpop.f32.mrf.mxu1 }
 0x515   : > { %v13032_v44 = vpop.f32.mrf.mxu0 }
 0x516   : > { %v13034_v35 = vpop.f32.mrf.mxu1 }
 0x517   : > { %13932 = vst [vmem:[#allocation71_spill] sm:$0xff] %v13034_v35  ;;  %v13036_v11 = vpop.f32.mrf.mxu0  ;;  %v13057_v35 = vld [vmem:[%s13317_s4] ss:$0 sm:$0xff] }
 0x518   : > { %v13038_v24 = vpop.f32.mrf.mxu1 }
 0x519   : > { %13933 = vst [vmem:[#allocation93_spill] sm:$0xff] %v13038_v24  ;;  %v13040_v56 = vpop.f32.mrf.mxu0  ;;  %v8082_v24 = vadd.f32 %v12889_v1, %v12883_v15  ;;  %v6417_v15 = vadd.f32 %v13057_v35, %v12970_v51 }
 0x51a   : > { %v13042_v41 = vpop.f32.mrf.mxu1 }
 0x51b   : > { %13934 = vst [vmem:[#allocation84_spill] sm:$0xff] %v13042_v41  ;;  %v13044_v52 = vpop.f32.mrf.mxu0 }
 0x51c   : > { %v13046_v40 = vpop.f32.mrf.mxu1 }
 0x51d   : > { %13935 = vst [vmem:[#allocation94_spill] sm:$0xff] %v13046_v40  ;;  %v13048_v0 = vpop.f32.mrf.mxu0  ;;  %v6276_v40 = vadd.f32 %v8696_v53, %v8082_v24 }
 0x51e   : > { %13936 = vst [vmem:[#allocation95_spill] sm:$0xff] %v13048_v0  ;;  %v13050_v28 = vpop.f32.mrf.mxu1 }
 0x51f   : > { %13937 = vst [vmem:[#allocation88_spill] sm:$0xff] %v13050_v28  ;;  %v13052_v18 = vpop.f32.mrf.mxu0  ;;  %v6419_v28 = vadd.f32 %v13057_v35, %v6380_v8  ;;  %v6384_v53 = vadd.f32 %v6276_v40, %v12775_v30 }
 0x520   : > { %13938 = vst [vmem:[#allocation86_spill] sm:$0xff] %v13052_v18  ;;  %v13061_v41 = vpop.f32.mrf.mxu1  ;;  %v8085_v18 = vadd.f32 %v12897_v21, %v12891_v46  ;;  %v6420_v46 = vadd.f32 %v13057_v35, %v12976_v22 }
 0x521   : > { %13939 = vst [vmem:[#allocation91_spill] sm:$0xff] %v13061_v41  ;;  %v13063_v10 = vpop.f32.mrf.mxu0  ;;  %v6630_v8 = vmul.f32 0.1, %v6419_v28 }
 0x522   : > { %13940 = vst [vmem:[#allocation90_spill] sm:$0xff] %v13063_v10  ;;  %v13066_v34 = vpop.f32.mrf.mxu1  ;;  %v6279_v1 = vadd.f32 %v8697_v9, %v8085_v18  ;;  %v6628_v10 = vmul.f32 0.1, %v6417_v15  ;;  %v6418_v18 = vadd.f32 %v13057_v35, %v12982_v16  ;;  %v8097_v16 = vadd.f32 %v12929_v20, %v12923_v27 }
 0x523   : > { %13941 = vst [vmem:[#allocation76_spill] sm:$0xff] %v13066_v34  ;;  %v13071_v0 = vpop.f32.mrf.mxu0 }
 0x524   : > { %13942 = vst [vmem:[#allocation80_spill] sm:$0xff] %v13071_v0  ;;  %v13073_v45 = vpop.f32.mrf.mxu1  ;;  %v6385_v51 = vadd.f32 %v6279_v1, %v12785_v61 }
 0x525   : > { %13943 = vst [vmem:[#allocation72_spill] sm:$0xff] %v13073_v45  ;;  %v13079_v41 = vpop.f32.mrf.mxu0  ;;  %v8094_v45 = vadd.f32 %v12921_v43, %v12915_v38  ;;  %v6631_v38 = vmul.f32 0.1, %v6420_v46  ;;  %v6423_v43 = vadd.f32 %v13057_v35, %v6384_v53  ;;  %v6295_v53 = vadd.f32 %v13006_v13, %v8097_v16 }
 0x526   : > { %v13082_v24 = vpop.f32.mrf.mxu1  ;;  %v8100_v13 = vadd.f32 %v12937_v32, %v12931_v6 }
 0x527   : > { %v8740_v21 = vpop.f32.mrf.mxu0  ;;  %v6292_v9 = vadd.f32 %v8700_v57, %v8094_v45  ;;  %v6629_v57 = vmul.f32 0.1, %v6418_v18  ;;  %v6634_v20 = vmul.f32 0.1, %v6423_v43 }
 0x528   : > { %v6815_v34 = vadd.f32 %v8740_v21, %v6630_v8  ;;  %v13088_v0 = vpop.f32.mrf.mxu1  ;;  %v8106_v21 = vadd.f32 %v12955_v62, %v12947_v47  ;;  %v6300_v16 = vadd.f32 %v8100_v13, %v13024_v4  ;;  %v8115_v13 = vadd.f32 %v12984_v26, %v12979_v48  ;;  %v13945_v26 = vld [vmem:[#allocation95_spill] sm:$0xff] }
 0x529   : > { %v6806_v30 = vpop.f32.mrf.mxu0  ;;  %v6388_v1 = vadd.f32 %v6292_v9, %v12810_v17  ;;  %v6422_v17 = vadd.f32 %v13057_v35, %v13000_v39 }
 0x52a   : > { %6935 = vst [vmem:[%s13093_s27 + $0x10] sm:$0xff] %v6815_v34  ;;  %v6807_v28 = vadd.f32 %v6806_v30, %v6628_v10  ;;  %v13096_v22 = vpop.f32.mrf.mxu1  ;;  %v6421_v34 = vadd.f32 %v13057_v35, %v12990_v7  ;;  %v6424_v10 = vadd.f32 %v13057_v35, %v6385_v51 }
 0x52b   : > { %v8741_v40 = vpop.f32.mrf.mxu0  ;;  %v6427_v43 = vadd.f32 %v13057_v35, %v6388_v1  ;;  %v8118_v1 = vadd.f32 %v12992_v19, %v12987_v5 }
 0x52c   : > { %6933 = vst [vmem:[%s13093_s27] sm:$0xff] %v6807_v28  ;;  %v6818_v61 = vadd.f32 %v8741_v40, %v6631_v38  ;;  %v13102_v45 = vpop.f32.mrf.mxu1  ;;  %v6632_v51 = vmul.f32 0.1, %v6421_v34  ;;  %v6635_v9 = vmul.f32 0.1, %v6424_v10  ;;  %v6389_v28 = vadd.f32 %v6295_v53, %v12818_v60 }
 0x52d   : > { %v6809_v15 = vpop.f32.mrf.mxu0  ;;  %v6308_v38 = vadd.f32 %v13017_v33, %v8106_v21  ;;  %v8109_v40 = vadd.f32 %v12963_v49, %v12957_v12  ;;  %v6633_v60 = vmul.f32 0.1, %v6422_v17  ;;  %v6425_v33 = vadd.f32 %v13057_v35, %v13011_v3 }
 0x52e   : > { %6936 = vst [vmem:[%s13093_s27 + $0x18] sm:$0xff] %v6818_v61  ;;  %v6810_v8 = vadd.f32 %v6809_v15, %v6629_v57  ;;  %v13110_v27 = vpop.f32.mrf.mxu1  ;;  %v8103_v61 = vadd.f32 %v12945_v29, %v12939_v54  ;;  %v6638_v15 = vmul.f32 0.1, %v6427_v43  ;;  %v6428_v10 = vadd.f32 %v13057_v35, %v6389_v28 }
 0x52f   : > { %v8744_v46 = vpop.f32.mrf.mxu0  ;;  %v6311_v57 = vadd.f32 %v13028_v63, %v8109_v40  ;;  %v6392_v12 = vadd.f32 %v6308_v38, %v12841_v37  ;;  %v6390_v54 = vadd.f32 %v6300_v16, %v12827_v14  ;;  %v6636_v37 = vmul.f32 0.1, %v6425_v33  ;;  %v13944_v40 = vld [vmem:[#allocation46_spill] sm:$0xff] }
 0x530   : > { %6934 = vst [vmem:[%s13093_s27 + $0x8] sm:$0xff] %v6810_v8  ;;  %v6831_v18 = vadd.f32 %v8744_v46, %v6634_v20  ;;  %v13115_v7 = vpop.f32.mrf.mxu1  ;;  %v6303_v3 = vadd.f32 %v8103_v61, %v13032_v44  ;;  %v6426_v8 = vadd.f32 %v13057_v35, %v13020_v23  ;;  %v8112_v20 = vadd.f32 %v12973_v58, %v12967_v31 }
 0x531   : > { %v6822_v30 = vpop.f32.mrf.mxu0  ;;  %v6393_v46 = vadd.f32 %v6311_v57, %v12847_v42  ;;  %v6324_v19 = vadd.f32 %v13036_v11, %v8118_v1  ;;  %v6639_v21 = vmul.f32 0.1, %v6428_v10  ;;  %v6429_v11 = vadd.f32 %v13057_v35, %v6390_v54  ;;  %v13950_v10 = vld [vmem:[#allocation71_spill] sm:$0xff]  ;;  %v13951_v1 = vld [vmem:[#allocation93_spill] sm:$0xff] }
 0x532   : > { %6939 = vst [vmem:[%s13093_s27 + $0x30] sm:$0xff] %v6831_v18  ;;  %v6823_v47 = vadd.f32 %v6822_v30, %v6632_v51  ;;  %v13124_v62 = vpop.f32.mrf.mxu1  ;;  %v6431_v18 = vadd.f32 %v13057_v35, %v6392_v12  ;;  %v8121_v51 = vadd.f32 %v13002_v50, %v12995_v25  ;;  %v6391_v23 = vadd.f32 %v6303_v3, %v12833_v2 }
 0x533   : > { %v8745_v39 = vpop.f32.mrf.mxu0  ;;  %v6316_v58 = vadd.f32 %v8112_v20, %v13040_v56  ;;  %v6637_v31 = vmul.f32 0.1, %v6426_v8  ;;  %v6432_v28 = vadd.f32 %v13057_v35, %v6393_v46  ;;  %v6396_v25 = vadd.f32 %v6324_v19, %v12866_v36  ;;  %v13953_v8 = vld [vmem:[#allocation90_spill] sm:$0xff]  ;;  %v13954_v19 = vld [vmem:[#allocation59_spill] sm:$0xff] }
 0x534   : > { %6937 = vst [vmem:[%s13093_s27 + $0x20] sm:$0xff] %v6823_v47  ;;  %v6834_v6 = vadd.f32 %v8745_v39, %v6635_v9  ;;  %v13131_v32 = vpop.f32.mrf.mxu1  ;;  %v6327_v2 = vadd.f32 %v13044_v52, %v8121_v51  ;;  %v6642_v56 = vmul.f32 0.1, %v6431_v18  ;;  %v8130_v38 = vadd.f32 %v13030_v59, %v13026_v55  ;;  %v13947_v52 = vld [vmem:[#allocation92_spill] sm:$0xff]  ;;  %v13949_v55 = vld [vmem:[#allocation86_spill] sm:$0xff] }
 0x535   : > { %v6825_v34 = vpop.f32.mrf.mxu0  ;;  %v6430_v43 = vadd.f32 %v13057_v35, %v6391_v23  ;;  %v6394_v48 = vadd.f32 %v6316_v58, %v13944_v40  ;;  %v6319_v39 = vadd.f32 %v8115_v13, %v13945_v26  ;;  %v6640_v36 = vmul.f32 0.1, %v6429_v11  ;;  %v13956_v18 = vld [vmem:[#allocation80_spill] sm:$0xff]  ;;  %v13957_v58 = vld [vmem:[#allocation75_spill] sm:$0xff]  ;;  %v13962_v26 = vld [vmem:[#allocation94_spill] sm:$0xff] }
 0x536   : > { %6940 = vst [vmem:[%s13093_s27 + $0x38] sm:$0xff] %v6834_v6  ;;  %v6826_v49 = vadd.f32 %v6825_v34, %v6633_v60  ;;  %v13140_v4 = vpop.f32.mrf.mxu1  ;;  %v13946_v6 = vld [vmem:[#allocation55_spill] sm:$0xff]  ;;  %v6643_v57 = vmul.f32 0.1, %v6432_v28  ;;  %v13948_v34 = vld [vmem:[#allocation62_spill] sm:$0xff]  ;;  %v6340_v59 = vadd.f32 %v13949_v55, %v8130_v38  ;;  %v8133_v3 = vadd.f32 %v13951_v1, %v13950_v10  ;;  %v13959_v28 = vld [vmem:[#allocation72_spill] sm:$0xff] }
 0x537   : > { %v8748_v53 = vpop.f32.mrf.mxu0  ;;  %v8124_v60 = vadd.f32 %v13947_v52, %v13946_v6  ;;  %v6397_v12 = vadd.f32 %v6327_v2, %v13948_v34  ;;  %v6641_v54 = vmul.f32 0.1, %v6430_v43  ;;  %v13964_v34 = vld [vmem:[#allocation50_spill] sm:$0xff]  ;;  %v13965_v1 = vld [vmem:[#allocation67_spill] sm:$0xff] }
 0x538   : > { %6938 = vst [vmem:[%s13093_s27 + $0x28] sm:$0xff] %v6826_v49  ;;  %v6847_v29 = vadd.f32 %v8748_v53, %v6638_v15  ;;  %v13148_v63 = vpop.f32.mrf.mxu1  ;;  %v6435_v15 = vadd.f32 %v13057_v35, %v6396_v25  ;;  %v6343_v51 = vadd.f32 %v13956_v18, %v8133_v3 }
 0x539   : > { %v6838_v5 = vpop.f32.mrf.mxu0  ;;  %v6332_v20 = vadd.f32 %v8124_v60, %v13953_v8  ;;  %v6436_v13 = vadd.f32 %v13057_v35, %v6397_v12  ;;  %v13967_v8 = vld [vmem:[#allocation91_spill] sm:$0xff] }
 0x53a   : > { %6943 = vst [vmem:[%s13093_s27 + $0x50] sm:$0xff] %v6847_v29  ;;  %v6839_v44 = vadd.f32 %v6838_v5, %v6636_v37  ;;  %v13157_v14 = vpop.f32.mrf.mxu1  ;;  %v13952_v29 = vld [vmem:[#allocation66_spill] sm:$0xff]  ;;  %v6433_v5 = vadd.f32 %v13057_v35, %v6394_v48  ;;  %v6646_v11 = vmul.f32 0.1, %v6435_v15  ;;  %v13961_v48 = vld [vmem:[#allocation84_spill] sm:$0xff] }
 0x53b   : > { %v8749_v17 = vpop.f32.mrf.mxu0  ;;  %v6395_v37 = vadd.f32 %v6319_v39, %v13952_v29  ;;  %v8136_v39 = vadd.f32 %v13962_v26, %v13961_v48 }
 0x53c   : > { %6941 = vst [vmem:[%s13093_s27 + $0x40] sm:$0xff] %v6839_v44  ;;  %v6850_v42 = vadd.f32 %v8749_v17, %v6639_v21  ;;  %v6347_v30 = vpop.f32.mrf.mxu1  ;;  %v13955_v44 = vld [vmem:[#allocation79_spill] sm:$0xff]  ;;  %v6644_v43 = vmul.f32 0.1, %v6433_v5 }
 0x53d   : > { %v6841_v9 = vpop.f32.mrf.mxu0  ;;  %v8127_v21 = vadd.f32 %v13955_v44, %v13954_v19  ;;  %v6434_v40 = vadd.f32 %v13057_v35, %v6395_v37  ;;  %v6348_v55 = vadd.f32 %v8136_v39, %v6347_v30  ;;  %v13966_v37 = vld [vmem:[#allocation88_spill] sm:$0xff] }
 0x53e   : > { %6944 = vst [vmem:[%s13093_s27 + $0x58] sm:$0xff] %v6850_v42  ;;  %v6842_v50 = vadd.f32 %v6841_v9, %v6637_v31  ;;  %v8717_v33 = vpop.f32.mrf.mxu1  ;;  %v6400_v42 = vadd.f32 %v6340_v59, %v13957_v58  ;;  %v13958_v9 = vld [vmem:[#allocation76_spill] sm:$0xff] }
 0x53f   : > { %v8752_v47 = vpop.f32.mrf.mxu0  ;;  %v8142_v25 = vadd.f32 %v13959_v28, %v13958_v9  ;;  %v6335_v2 = vadd.f32 %v8127_v21, %v13079_v41  ;;  %v6645_v10 = vmul.f32 0.1, %v6434_v40  ;;  %v8154_v21 = vadd.f32 %v13131_v32, %v13124_v62  ;;  %v13971_v62 = vld [vmem:[#allocation42_spill] sm:$0xff] }
 0x540   : > { %6942 = vst [vmem:[%s13093_s27 + $0x48] sm:$0xff] %v6842_v50  ;;  %v6863_v16 = vadd.f32 %v8752_v47, %v6642_v56  ;;  %v6350_v23 = vpop.f32.mrf.mxu1  ;;  %v13960_v56 = vld [vmem:[#allocation40_spill] sm:$0xff] }
 0x541   : > { %v6854_v61 = vpop.f32.mrf.mxu0  ;;  %v6398_v38 = vadd.f32 %v6332_v20, %v13960_v56  ;;  %v6356_v6 = vadd.f32 %v13157_v14, %v8142_v25  ;;  %v6399_v12 = vadd.f32 %v6335_v2, %v13964_v34  ;;  %v8139_v20 = vadd.f32 %v13967_v8, %v13966_v37  ;;  %v13970_v2 = vld [vmem:[#allocation53_spill] sm:$0xff] }
 0x542   : > { %6947 = vst [vmem:[%s13093_s27 + $0x70] sm:$0xff] %v6863_v16  ;;  %v6855_v49 = vadd.f32 %v6854_v61, %v6640_v36  ;;  %v13963_v16 = vld [vmem:[#allocation47_spill] sm:$0xff]  ;;  %v8720_v52 = vpop.f32.mrf.mxu1  ;;  %v6647_v61 = vmul.f32 0.1, %v6436_v13  ;;  %v13969_v13 = vld [vmem:[#allocation73_spill] sm:$0xff]  ;;  %v5857_v32 = vadd.f32 %v13971_v62, %v13970_v2 }
 0x543   : > { %v8753_v53 = vpop.f32.mrf.mxu0  ;;  %v6401_v36 = vadd.f32 %v6343_v51, %v13963_v16  ;;  %v6437_v14 = vadd.f32 %v13057_v35, %v6398_v38  ;;  %v6404_v3 = vadd.f32 %v6356_v6, %v13965_v1  ;;  %v6438_v44 = vadd.f32 %v13057_v35, %v6399_v12  ;;  %v13976_v1 = vld [vmem:[#allocation70_spill] sm:$0xff] }
 0x544   : > { %6945 = vst [vmem:[%s13093_s27 + $0x60] sm:$0xff] %v6855_v49  ;;  %v6866_v46 = vadd.f32 %v8753_v53, %v6643_v57  ;;  %v6439_v57 = vadd.f32 %v13057_v35, %v6400_v42  ;;  %v8145_v49 = vadd.f32 %v13088_v0, %v13082_v24  ;;  %v6363_v53 = vpop.f32.mrf.mxu1  ;;  %v13968_v0 = vld [vmem:[#allocation83_spill] sm:$0xff]  ;;  %v6351_v18 = vadd.f32 %v8139_v20, %v6350_v23 }
 0x545   : > { %v6857_v17 = vpop.f32.mrf.mxu0  ;;  %v6440_v29 = vadd.f32 %v13057_v35, %v6401_v36  ;;  %v6402_v24 = vadd.f32 %v6348_v55, %v13968_v0  ;;  %v6372_v28 = vadd.f32 %v8720_v52, %v8154_v21  ;;  %v8157_v38 = vadd.f32 %v13148_v63, %v13140_v4  ;;  %v13973_v4 = vld [vmem:[#allocation58_spill] sm:$0xff]  ;;  %v13974_v63 = vld [vmem:[#allocation77_spill] sm:$0xff] }
 0x546   : > { %6948 = vst [vmem:[%s13093_s27 + $0x78] sm:$0xff] %v6866_v46  ;;  %v6858_v31 = vadd.f32 %v6857_v17, %v6641_v54  ;;  %v6359_v30 = vadd.f32 %v8717_v33, %v8145_v49  ;;  %v6650_v5 = vmul.f32 0.1, %v6439_v57  ;;  %v6648_v17 = vmul.f32 0.1, %v6437_v14  ;;  %v8721_v58 = vpop.f32.mrf.mxu1  ;;  %v13975_v57 = vld [vmem:[#allocation48_spill] sm:$0xff] }
 0x547   : > { %v8756_v50 = vpop.f32.mrf.mxu0  ;;  %v6651_v33 = vmul.f32 0.1, %v6440_v29  ;;  %v6441_v56 = vadd.f32 %v13057_v35, %v6402_v24  ;;  %v6408_v16 = vadd.f32 %v6372_v28, %v5857_v32  ;;  %v6375_v36 = vadd.f32 %v8721_v58, %v8157_v38 }
 0x548   : > { %6946 = vst [vmem:[%s13093_s27 + $0x68] sm:$0xff] %v6858_v31  ;;  %v6879_v47 = vadd.f32 %v8756_v50, %v6646_v11  ;;  %v6443_v31 = vadd.f32 %v13057_v35, %v6404_v3  ;;  %v8148_v11 = vadd.f32 %v13102_v45, %v13096_v22  ;;  %v6405_v9 = vadd.f32 %v6359_v30, %v13969_v13  ;;  %v6366_v48 = vpop.f32.mrf.mxu1 }
 0x549   : > { %v6870_v60 = vpop.f32.mrf.mxu0  ;;  %v6649_v50 = vmul.f32 0.1, %v6438_v44  ;;  %v8151_v45 = vadd.f32 %v13115_v7, %v13110_v27 }
 0x54a   : > { %6951 = vst [vmem:[%s13093_s27 + $0x90] sm:$0xff] %v6879_v47  ;;  %v6871_v41 = vadd.f32 %v6870_v60, %v6644_v43  ;;  %v13972_v47 = vld [vmem:[#allocation51_spill] sm:$0xff]  ;;  %v6364_v40 = vadd.f32 %v8148_v11, %v6363_v53  ;;  %v6654_v39 = vmul.f32 0.1, %v6443_v31  ;;  %v6444_v52 = vadd.f32 %v13057_v35, %v6405_v9 }
 0x54b   : > { %v8757_v59 = vpop.f32.mrf.mxu0  ;;  %v6403_v43 = vadd.f32 %v6351_v18, %v13972_v47  ;;  %v5860_v60 = vadd.f32 %v13974_v63, %v13973_v4  ;;  %v6367_v12 = vadd.f32 %v8151_v45, %v6366_v48 }
 0x54c   : > { %6949 = vst [vmem:[%s13093_s27 + $0x80] sm:$0xff] %v6871_v41  ;;  %v6882_v15 = vadd.f32 %v8757_v59, %v6647_v61  ;;  %v6652_v61 = vmul.f32 0.1, %v6441_v56  ;;  %v6406_v34 = vadd.f32 %v6364_v40, %v13975_v57 }
 0x54d   : > { %v6873_v54 = vpop.f32.mrf.mxu0  ;;  %v6442_v7 = vadd.f32 %v13057_v35, %v6403_v43  ;;  %v6409_v59 = vadd.f32 %v6375_v36, %v5860_v60  ;;  %v6407_v3 = vadd.f32 %v6367_v12, %v13976_v1 }
 0x54e   : > { %6952 = vst [vmem:[%s13093_s27 + $0x98] sm:$0xff] %v6882_v15  ;;  %v6874_v46 = vadd.f32 %v6873_v54, %v6645_v10  ;;  %v6655_v15 = vmul.f32 0.1, %v6444_v52  ;;  %v6447_v10 = vadd.f32 %v13057_v35, %v6408_v16  ;;  %v6445_v29 = vadd.f32 %v13057_v35, %v6406_v34 }
 0x54f   : > { %v8760_v19 = vpop.f32.mrf.mxu0  ;;  %v6653_v54 = vmul.f32 0.1, %v6442_v7  ;;  %v6448_v30 = vadd.f32 %v13057_v35, %v6409_v59  ;;  %v6446_v24 = vadd.f32 %v13057_v35, %v6407_v3 }
 0x550   : > { %6950 = vst [vmem:[%s13093_s27 + $0x88] sm:$0xff] %v6874_v46  ;;  %v6895_v51 = vadd.f32 %v8760_v19, %v6650_v5  ;;  %v6658_v20 = vmul.f32 0.1, %v6447_v10  ;;  %v6656_v0 = vmul.f32 0.1, %v6445_v29 }
 0x551   : > { %v6886_v42 = vpop.f32.mrf.mxu0  ;;  %v6659_v21 = vmul.f32 0.1, %v6448_v30 }
 0x552   : > { %6955 = vst [vmem:[%s13093_s27 + $0xb0] sm:$0xff] %v6895_v51  ;;  %v6887_v25 = vadd.f32 %v6886_v42, %v6648_v17  ;;  %v6657_v17 = vmul.f32 0.1, %v6446_v24 }
 0x553   : > { %v8761_v23 = vpop.f32.mrf.mxu0 }
 0x554   : > { %6953 = vst [vmem:[%s13093_s27 + $0xa0] sm:$0xff] %v6887_v25  ;;  %v6898_v22 = vadd.f32 %v8761_v23, %v6651_v33 }
 0x555   : > { %v6889_v26 = vpop.f32.mrf.mxu0 }
 0x556   : > { %6956 = vst [vmem:[%s13093_s27 + $0xb8] sm:$0xff] %v6898_v22  ;;  %v6890_v6 = vadd.f32 %v6889_v26, %v6649_v50 }
 0x557   : > { %v8764_v41 = vpop.f32.mrf.mxu0 }
 0x558   : > { %6954 = vst [vmem:[%s13093_s27 + $0xa8] sm:$0xff] %v6890_v6  ;;  %v6911_v27 = vadd.f32 %v8764_v41, %v6654_v39 }
 0x559   : > { %v6902_v55 = vpop.f32.mrf.mxu0 }
 0x55a   : > { %6959 = vst [vmem:[%s13093_s27 + $0xd0] sm:$0xff] %v6911_v27  ;;  %v6903_v49 = vadd.f32 %v6902_v55, %v6652_v61 }
 0x55b   : > { %v8765_v14 = vpop.f32.mrf.mxu0 }
 0x55c   : > { %6957 = vst [vmem:[%s13093_s27 + $0xc0] sm:$0xff] %v6903_v49  ;;  %v6914_v53 = vadd.f32 %v8765_v14, %v6655_v15 }
 0x55d   : > { %v6905_v37 = vpop.f32.mrf.mxu0 }
 0x55e   : > { %6960 = vst [vmem:[%s13093_s27 + $0xd8] sm:$0xff] %v6914_v53  ;;  %v6906_v8 = vadd.f32 %v6905_v37, %v6653_v54 }
 0x55f   : > { %v8768_v46 = vpop.f32.mrf.mxu0 }
 0x560   : > { %6958 = vst [vmem:[%s13093_s27 + $0xc8] sm:$0xff] %v6906_v8  ;;  %v6927_v5 = vadd.f32 %v8768_v46, %v6658_v20 }
 0x561   : > { %v6918_v19 = vpop.f32.mrf.mxu0 }
 0x562   : > { %6963 = vst [vmem:[%s13093_s27 + $0xf0] sm:$0xff] %v6927_v5  ;;  %v6919_v44 = vadd.f32 %v6918_v19, %v6656_v0 }
 0x563   : > { %v8769_v18 = vpop.f32.mrf.mxu0 }
 0x564   : > { %6961 = vst [vmem:[%s13093_s27 + $0xe0] sm:$0xff] %v6919_v44  ;;  %v6930_v51 = vadd.f32 %v8769_v18, %v6659_v21 }
 0x565   : > { %v6921_v58 = vpop.f32.mrf.mxu0 }
 0x566   : > { %6964 = vst [vmem:[%s13093_s27 + $0xf8] sm:$0xff] %v6930_v51  ;;  %v6922_v35 = vadd.f32 %v6921_v58, %v6657_v17 }
 0x568   : > { %6962 = vst [vmem:[%s13093_s27 + $0xe8] sm:$0xff] %v6922_v35 }
 0x569   : > { %9102 = shalt.err (!%p9099_p3)
}
 0x56a   : > { %s9103_s12 = scalar_lea.hbm %s13260_s13, 4096  ;;  %s9107_s20 = scalar_lea.hbm %s13319_s6, 8192 }
 0x56b   : > { %p9104_p5 = scmp.ne.s32.totalorder %s13260_s13, %s9103_s12  ;;  %p9108_p9 = scmp.lt.s32.totalorder %s13260_s13, %s13319_s6 }
 0x56c   : > { %p9109_p10 = scmp.lt.s32.totalorder %s9107_s20, %s9103_s12 }
 0x56d   : > { %p9105_p6 = pnand %p9104_p5, %p9256_p4 }
 0x56e   : > { %p9110_p11 = por %p9109_p10, %p9108_p9 }
 0x56f   : > { %p9106_p7 = pneg %p9105_p6 }
 0x571   : > { %p9111_p12 = pnand %p9110_p11, %p9106_p7 }
 0x573   : > { %9114 = shalt.err (!%p9111_p12)
}
 0x574   : > { %s9179_s8 = smov 128   ;;  %s9180_s11 = smov 8  }
 0x575   : > { %8791 = dma.vmem_to_hbm [thread:$0]  (%p9256_p4), %s13262_s30, 4096, %s13260_s13, %s13268_s24, %s9179_s8, %s9179_s8, %s9180_s11  }
 0x576 PF: > { %p8803_p13 = scmp.ge.s32.totalorder %s9169_s26, 2  ;;  %s6997_s14 = sand.u32 1, %s9149_s21  }
 0x577   : > { %s6998_s15 = scalar_lea.sflag [#allocation4], %s6997_s14 }
 0x578   : > { %p8798_p0 = pnand %p8803_p13, %p9263_p8 }
 0x57a   : > { %p8799_p1 = pneg %p8798_p0 }
 0x57c   : > { %9144 = dma.done.wait (%p8799_p1), %s6998_s15, 4096  }
 0x57d   : > { %9146 = vsyncadd (%p8799_p1), %s6998_s15, 4294963200  ;;  %s20_s26 = sadd.s32 1, %s9169_s26   ;;  %s13977_s21 = smov %s9153_s22 }
 0x57e   : > { %p17_p2 = scmp.ge.s32.totalorder %s20_s26, 4   ;;  %s13978_s22 = smov %s9157_s23 }
 0x57f   : > { %s13979_s23 = smov %s9269_s10  ;;  %s13980_s24 = smov %s9165_s25 }
 0x580   : > { %s13981_s25 = smov %s13983_s29  ;;  %19 = sbr.rel (!%p17_p2) target bundleno = 5 (0x5), region = 88 }
 0x585   :  { %7003 = vsyncpa [#allocation3], 1 }
 0x586   :  { %7005 = vsyncpa [#allocation3 + $0x1], 1 }
 0x587   :  { %7006 = vsyncpa [#allocation4], 1 }
 0x588   :  { %7008 = vsyncpa [#allocation4 + $0x1], 1 }

</bundles_post_ra>
